<compile_context>
chip_gen: v7x
topology: tpu7x:2x2x1
jax: 0.10.0
libtpu: 0.0.40
codegen_flags: <defaults>
</compile_context>

<pallas_src>
import functools

import jax
import jax.numpy as jnp
from jax.experimental import pallas as pl
from jax.experimental.pallas import tpu as pltpu

EPS = 1e-5
LANES = 128  # TPU vreg lane width


# ---------------------------------------------------------------------------
# In-kernel helpers (traced inside the Pallas body).
# ---------------------------------------------------------------------------
def _conv3x3_rows(pad_ref, w_ref, H, W):
    """3x3 stride-1 conv from a pre-padded haloed VMEM ref.

    pad_ref: (N, H+2, W+2, Cp) VMEM ref in the MXU dtype.
    w_ref:   (3, 3*Cp, Cp) VMEM ref in the MXU dtype (row-major im2col pack).
    Accumulates over the 3 kernel rows -> peak temp is (M, 3*Cp), not (M, 9*Cp).
    Returns (N*H*W, Cp) float32.
    """
    N = pad_ref.shape[0]
    Cp = pad_ref.shape[-1]
    M = N * H * W
    acc = jnp.zeros((M, Cp), jnp.float32)
    for dh in range(3):
        taps = [pad_ref[:, pl.ds(dh, H), pl.ds(dw, W), :].reshape(M, Cp)
                for dw in range(3)]
        row_patches = jnp.concatenate(taps, axis=-1)          # (M, 3*Cp), mxu dtype
        acc = acc + jnp.dot(row_patches, w_ref[dh],
                            preferred_element_type=jnp.float32)
    return acc


def _bn_scale_bias(x2d, gamma, beta):
    """Training-mode BN (biased var over M) folded into scale/bias.

    Returns (scale, bias) so that bn(x) == x * scale + bias.
    Uses the centered E[(x-mean)^2] form (numerically stable)."""
    mean = jnp.mean(x2d, axis=0, keepdims=True)
    ctr = x2d - mean
    var = jnp.mean(ctr * ctr, axis=0, keepdims=True)
    scale = gamma * jax.lax.rsqrt(var + EPS)
    bias = beta - mean * scale
    return scale, bias


# ---------------------------------------------------------------------------
# Fused BasicBlock kernel: out = relu(bn2(conv2(relu(bn1(conv1(x))))) + x)
# ---------------------------------------------------------------------------
def basic_block_kernel(x_ref, w1_ref, g1_ref, b1_ref, w2_ref, g2_ref, b2_ref,
                       out_ref, pad_sc):
    N, H, W, Cp = x_ref.shape
    M = N * H * W
    sdt = pad_sc.dtype

    # ---- zero ONLY the halo ring, once (interior is fully overwritten) -----
    zrow = jnp.zeros((N, 1, W + 2, Cp), sdt)
    zcol = jnp.zeros((N, H + 2, 1, Cp), sdt)
    pad_sc[:, pl.ds(0, 1), :, :] = zrow
    pad_sc[:, pl.ds(H + 1, 1), :, :] = zrow
    pad_sc[:, :, pl.ds(0, 1), :] = zcol
    pad_sc[:, :, pl.ds(W + 1, 1), :] = zcol

    # ---- conv1 + bn1 + relu (x cast once into the MXU-dtype scratch) -------
    pad_sc[:, pl.ds(1, H), pl.ds(1, W), :] = x_ref[...].astype(sdt)
    h1 = _conv3x3_rows(pad_sc, w1_ref, H, W)                   # (M, Cp) f32
    s1, c1 = _bn_scale_bias(h1, g1_ref[...], b1_ref[...])
    h1 = jnp.maximum(h1 * s1 + c1, 0.0)

    # ---- conv2 + bn2 + identity shortcut + relu (scratch reused for h1) ----
    pad_sc[:, pl.ds(1, H), pl.ds(1, W), :] = h1.reshape(N, H, W, Cp).astype(sdt)
    h2 = _conv3x3_rows(pad_sc, w2_ref, H, W)                   # (M, Cp) f32
    s2, c2 = _bn_scale_bias(h2, g2_ref[...], b2_ref[...])
    out = h2 * s2 + c2 + x_ref[...].reshape(M, Cp)             # f32 residual
    out_ref[...] = jnp.maximum(out, 0.0).astype(out_ref.dtype)  # lane-dense 2-D


# ---------------------------------------------------------------------------
# Wrapper-side layout plumbing (im2col weight pack, channel pad, transpose).
# ---------------------------------------------------------------------------
def _round_up(n, m):
    return ((n + m - 1) // m) * m


def _vmem_specs(n):
    return [pl.BlockSpec(memory_space=pltpu.MemorySpace.VMEM) for _ in range(n)]


def _im2col_weights(w_hwio, cp, mxu_dtype):
    """(3,3,Cin,Cout) HWIO -> (3, 3*cp, cp) row-major im2col pack, MXU dtype."""
    kh, kw, cin, cout = w_hwio.shape
    w9 = w_hwio.astype(mxu_dtype).reshape(kh * kw, cin, cout)
    w9p = jnp.zeros((kh * kw, cp, cp), mxu_dtype).at[:, :cin, :cout].set(w9)
    return w9p.reshape(kh, kw * cp, cp)


def _pad_c(v, cp, fill):
    return jnp.pad(v, ((0, 0), (0, cp - v.shape[-1])), constant_values=fill)


def pack_params(params, cp, mxu_dtype):
    """One-time HBM-side packing (cast weights to MXU dtype, pad BN params)."""
    return dict(
        w1=_im2col_weights(params["w1"], cp, mxu_dtype),
        w2=_im2col_weights(params["w2"], cp, mxu_dtype),
        g1=_pad_c(params["g1"], cp, 1.0), b1=_pad_c(params["b1"], cp, 0.0),
        g2=_pad_c(params["g2"], cp, 1.0), b2=_pad_c(params["b2"], cp, 0.0),
    )


def _vmem_limit_bytes(N, H, W, Cp, mxu_itemsize):
    M = N * H * W
    slab_f32 = M * Cp * 4
    scratch = N * (H + 2) * (W + 2) * Cp * mxu_itemsize
    weights = 2 * 9 * Cp * Cp * mxu_itemsize
    temps = M * 3 * Cp * mxu_itemsize + 4 * M * Cp * 4
    est = 2 * slab_f32 + scratch + weights + temps
    return int(min(64 << 20, max(16 << 20, 2 * est)))


def basic_block_forward_slab(x_slab, packed, mxu_dtype=jnp.bfloat16,
                             out_dtype=jnp.float32):
    """x_slab: (N, H, W, Cp) f32 padded-NHWC slab (Cp a multiple of 128).
    Returns (N*H*W, Cp) `out_dtype` slab.  Chained BasicBlocks should stay in
    this layout (no pad / transpose HBM round-trips between blocks)."""
    N, H, W, Cp = x_slab.shape
    return pl.pallas_call(
        basic_block_kernel,
        out_shape=jax.ShapeDtypeStruct((N * H * W, Cp), out_dtype),
        in_specs=_vmem_specs(7),
        out_specs=pl.BlockSpec(memory_space=pltpu.MemorySpace.VMEM),
        scratch_shapes=[
            pltpu.VMEM((N, H + 2, W + 2, Cp), mxu_dtype),  # haloed x / h1
        ],
        compiler_params=pltpu.CompilerParams(
            vmem_limit_bytes=_vmem_limit_bytes(
                N, H, W, Cp, jnp.dtype(mxu_dtype).itemsize)),
    )(x_slab, packed["w1"], packed["g1"], packed["b1"],
      packed["w2"], packed["g2"], packed["b2"])


def basic_block_forward(x_nchw, params, mxu_dtype=jnp.bfloat16,
                        out_dtype=jnp.float32):
    """x_nchw: (N, Cin, H, W) float32.  stride=1, in_planes == planes
    (identity shortcut, the empty nn.Sequential() branch).

    mxu_dtype: jnp.bfloat16 (default; MXU-native on v5e/v6e/v7x, f32
    accumulation, f32 BN/ReLU/residual math) or jnp.float32 (exact)."""
    N, Cin, H, W = x_nchw.shape
    P = params["w1"].shape[-1]
    assert Cin == P, "identity-shortcut config requires in_planes == planes"
    Cp = _round_up(max(Cin, P), LANES)           # lane-dense channel width

    # NCHW -> NHWC; zero-pad channels so every last dim is a full 128 lanes.
    x = jnp.transpose(x_nchw, (0, 2, 3, 1))
    x = jnp.pad(x, ((0, 0), (0, 0), (0, 0), (0, Cp - Cin)))

    packed = pack_params(params, Cp, mxu_dtype)
    out2d = basic_block_forward_slab(x, packed, mxu_dtype=mxu_dtype,
                                     out_dtype=out_dtype)

    # Boundary-only layout plumbing (chained blocks skip this entirely).
    out = out2d.astype(jnp.float32).reshape(N, H, W, Cp)[..., :P]
    return jnp.transpose(out, (0, 3, 1, 2))      # NHWC -> NCHW


# ---------------------------------------------------------------------------
# Deterministic parameter init (shapes from BasicBlock.__init__).
# Conv weights stored HWIO; BN gamma=1 / beta=0 like nn.BatchNorm2d init.
# ---------------------------------------------------------------------------
def init_params(key, in_planes, planes):
    k1, k2 = jax.random.split(key)
    w1 = jax.random.normal(k1, (3, 3, in_planes, planes), jnp.float32)
    w1 = w1 * (2.0 / (in_planes * 9)) ** 0.5
    w2 = jax.random.normal(k2, (3, 3, planes, planes), jnp.float32)
    w2 = w2 * (2.0 / (planes * 9)) ** 0.5
    return dict(
        w1=w1, w2=w2,
        g1=jnp.ones((1, planes), jnp.float32), b1=jnp.zeros((1, planes), jnp.float32),
        g2=jnp.ones((1, planes), jnp.float32), b2=jnp.zeros((1, planes), jnp.float32),
    )


# ---------------------------------------------------------------------------
# Pure-JAX reference (same semantics) for a correctness check.
# ---------------------------------------------------------------------------
def reference(x_nchw, params):
    x = jnp.transpose(x_nchw, (0, 2, 3, 1))

    def conv(inp, w):
        return jax.lax.conv_general_dilated(
            inp, w, (1, 1), "SAME",
            dimension_numbers=("NHWC", "HWIO", "NHWC"))

    def bn(inp, g, b):
        mean = jnp.mean(inp, axis=(0, 1, 2), keepdims=True)
        var = jnp.mean(jnp.square(inp - mean), axis=(0, 1, 2), keepdims=True)
        return ((inp - mean) * jax.lax.rsqrt(var + EPS)
                * g.reshape(1, 1, 1, -1) + b.reshape(1, 1, 1, -1))

    h = jax.nn.relu(bn(conv(x, params["w1"]), params["g1"], params["b1"]))
    h = bn(conv(h, params["w2"]), params["g2"], params["b2"]) + x
    h = jax.nn.relu(h)
    return jnp.transpose(h, (0, 3, 1, 2))


if __name__ == "__main__":
    key = jax.random.PRNGKey(0)
    kx, kp = jax.random.split(key)

    N, C, H, W = 2, 4, 16, 16          # in_planes = planes = 4, stride = 1
    x = jax.random.normal(kx, (N, C, H, W), jnp.float32)
    params = init_params(kp, C, C)

    ref = reference(x, params)

    # Exact f32 path (matches PyTorch f32 semantics).
    out_f32 = basic_block_forward(x, params, mxu_dtype=jnp.float32)
    jax.block_until_ready(out_f32)
    assert out_f32.shape == (N, C, H, W)
    err = float(jnp.max(jnp.abs(out_f32 - ref)))
    assert jnp.allclose(out_f32, ref, atol=1e-4, rtol=1e-4), f"f32 max abs err {err}"

    # Default perf path: bf16 MXU operands (f32 accumulation / BN / residual).
    out_bf16 = basic_block_forward(x, params)
    jax.block_until_ready(out_bf16)
    err_bf16 = float(jnp.max(jnp.abs(out_bf16 - ref)))
    assert err_bf16 < 0.1, f"bf16 max abs err {err_bf16}"

    print("KERNEL_OK")
</pallas_src>

<mosaic_0001>
module attributes {stable_mosaic.version = 11 : i64} {
  func.func @basic_block_kernel(%arg0: memref<2x16x16x128xf32, #tpu.memory_space<vmem>>, %arg1: memref<3x384x128xf32, #tpu.memory_space<vmem>>, %arg2: memref<1x128xf32, #tpu.memory_space<vmem>>, %arg3: memref<1x128xf32, #tpu.memory_space<vmem>>, %arg4: memref<3x384x128xf32, #tpu.memory_space<vmem>>, %arg5: memref<1x128xf32, #tpu.memory_space<vmem>>, %arg6: memref<1x128xf32, #tpu.memory_space<vmem>>, %arg7: memref<512x128xf32, #tpu.memory_space<vmem>>, %arg8: memref<2x18x18x128xf32, #tpu.memory_space<vmem>>) attributes {dimension_semantics = [], scalar_prefetch = 0 : i64, scratch_operands = 1 : i64, tpu.core_type = #tpu.core_type<tc>} {
    %cst = arith.constant 0.000000e+00 : f32
    %0 = vector.broadcast %cst : f32 to vector<2x1x18x128xf32>
    %cst_0 = arith.constant 0.000000e+00 : f32
    %1 = vector.broadcast %cst_0 : f32 to vector<2x18x1x128xf32>
    %c0 = arith.constant 0 : index
    %c0_1 = arith.constant 0 : index
    %c0_2 = arith.constant 0 : index
    %c0_3 = arith.constant 0 : index
    %2 = vector.load %arg8[%c0, %c0_1, %c0_2, %c0_3] : memref<2x18x18x128xf32, #tpu.memory_space<vmem>>, vector<2x1x18x128xf32>
    tpu.vector_store %arg8[%c0, %c0_1, %c0_2, %c0_3], %0 {strides = array<i32>} : memref<2x18x18x128xf32, #tpu.memory_space<vmem>>, vector<2x1x18x128xf32>,
    %c0_4 = arith.constant 0 : index
    %c17 = arith.constant 17 : index
    %c0_5 = arith.constant 0 : index
    %c0_6 = arith.constant 0 : index
    %3 = vector.load %arg8[%c0_4, %c17, %c0_5, %c0_6] : memref<2x18x18x128xf32, #tpu.memory_space<vmem>>, vector<2x1x18x128xf32>
    tpu.vector_store %arg8[%c0_4, %c17, %c0_5, %c0_6], %0 {strides = array<i32>} : memref<2x18x18x128xf32, #tpu.memory_space<vmem>>, vector<2x1x18x128xf32>,
    %c0_7 = arith.constant 0 : index
    %c0_8 = arith.constant 0 : index
    %c0_9 = arith.constant 0 : index
    %c0_10 = arith.constant 0 : index
    %4 = vector.load %arg8[%c0_7, %c0_8, %c0_9, %c0_10] : memref<2x18x18x128xf32, #tpu.memory_space<vmem>>, vector<2x18x1x128xf32>
    tpu.vector_store %arg8[%c0_7, %c0_8, %c0_9, %c0_10], %1 {strides = array<i32>} : memref<2x18x18x128xf32, #tpu.memory_space<vmem>>, vector<2x18x1x128xf32>,
    %c0_11 = arith.constant 0 : index
    %c0_12 = arith.constant 0 : index
    %c17_13 = arith.constant 17 : index
    %c0_14 = arith.constant 0 : index
    %5 = vector.load %arg8[%c0_11, %c0_12, %c17_13, %c0_14] : memref<2x18x18x128xf32, #tpu.memory_space<vmem>>, vector<2x18x1x128xf32>
    tpu.vector_store %arg8[%c0_11, %c0_12, %c17_13, %c0_14], %1 {strides = array<i32>} : memref<2x18x18x128xf32, #tpu.memory_space<vmem>>, vector<2x18x1x128xf32>,
    %c0_15 = arith.constant 0 : index
    %c0_16 = arith.constant 0 : index
    %c0_17 = arith.constant 0 : index
    %c0_18 = arith.constant 0 : index
    %6 = vector.load %arg0[%c0_15, %c0_16, %c0_17, %c0_18] : memref<2x16x16x128xf32, #tpu.memory_space<vmem>>, vector<2x16x16x128xf32>
    %c0_19 = arith.constant 0 : index
    %c1 = arith.constant 1 : index
    %c1_20 = arith.constant 1 : index
    %c0_21 = arith.constant 0 : index
    %7 = vector.load %arg8[%c0_19, %c1, %c1_20, %c0_21] : memref<2x18x18x128xf32, #tpu.memory_space<vmem>>, vector<2x16x16x128xf32>
    tpu.vector_store %arg8[%c0_19, %c1, %c1_20, %c0_21], %6 {strides = array<i32>} : memref<2x18x18x128xf32, #tpu.memory_space<vmem>>, vector<2x16x16x128xf32>,
    %cst_22 = arith.constant 0.000000e+00 : f32
    %8 = vector.broadcast %cst_22 : f32 to vector<512x128xf32>
    %c0_23 = arith.constant 0 : index
    %c0_24 = arith.constant 0 : index
    %c0_25 = arith.constant 0 : index
    %c0_26 = arith.constant 0 : index
    %9 = vector.load %arg8[%c0_23, %c0_24, %c0_25, %c0_26] : memref<2x18x18x128xf32, #tpu.memory_space<vmem>>, vector<2x16x16x128xf32>
    %10 = vector.shape_cast %9 : vector<2x16x16x128xf32> to vector<512x128xf32>
    %c0_27 = arith.constant 0 : index
    %c0_28 = arith.constant 0 : index
    %c1_29 = arith.constant 1 : index
    %c0_30 = arith.constant 0 : index
    %11 = vector.load %arg8[%c0_27, %c0_28, %c1_29, %c0_30] : memref<2x18x18x128xf32, #tpu.memory_space<vmem>>, vector<2x16x16x128xf32>
    %12 = vector.shape_cast %11 : vector<2x16x16x128xf32> to vector<512x128xf32>
    %c0_31 = arith.constant 0 : index
    %c0_32 = arith.constant 0 : index
    %c2 = arith.constant 2 : index
    %c0_33 = arith.constant 0 : index
    %13 = vector.load %arg8[%c0_31, %c0_32, %c2, %c0_33] : memref<2x18x18x128xf32, #tpu.memory_space<vmem>>, vector<2x16x16x128xf32>
    %14 = vector.shape_cast %13 : vector<2x16x16x128xf32> to vector<512x128xf32>
    %15 = tpu.concatenate %10, %12, %14 in 1 : vector<512x128xf32>, vector<512x128xf32>, vector<512x128xf32> -> vector<512x384xf32>
    %c0_34 = arith.constant 0 : index
    %c0_35 = arith.constant 0 : index
    %c0_36 = arith.constant 0 : index
    %16 = vector.load %arg1[%c0_34, %c0_35, %c0_36] : memref<3x384x128xf32, #tpu.memory_space<vmem>>, vector<1x384x128xf32>
    %17 = vector.shape_cast %16 : vector<1x384x128xf32> to vector<384x128xf32>
    %cst_37 = arith.constant dense<0.000000e+00> : vector<512x128xf32>
    %18 = tpu.matmul %15, %17, %cst_37 {dimension_numbers = #tpu.dot_dimension_numbers<[1], [0], [0], [1], [0, 0, 1, 1], [], []>} : vector<512x384xf32>, vector<384x128xf32>, vector<512x128xf32> -> vector<512x128xf32>
    %19 = arith.addf %8, %18 : vector<512x128xf32>
    %c0_38 = arith.constant 0 : index
    %c1_39 = arith.constant 1 : index
    %c0_40 = arith.constant 0 : index
    %c0_41 = arith.constant 0 : index
    %20 = vector.load %arg8[%c0_38, %c1_39, %c0_40, %c0_41] : memref<2x18x18x128xf32, #tpu.memory_space<vmem>>, vector<2x16x16x128xf32>
    %21 = vector.shape_cast %20 : vector<2x16x16x128xf32> to vector<512x128xf32>
    %c0_42 = arith.constant 0 : index
    %c1_43 = arith.constant 1 : index
    %c1_44 = arith.constant 1 : index
    %c0_45 = arith.constant 0 : index
    %22 = vector.load %arg8[%c0_42, %c1_43, %c1_44, %c0_45] : memref<2x18x18x128xf32, #tpu.memory_space<vmem>>, vector<2x16x16x128xf32>
    %23 = vector.shape_cast %22 : vector<2x16x16x128xf32> to vector<512x128xf32>
    %c0_46 = arith.constant 0 : index
    %c1_47 = arith.constant 1 : index
    %c2_48 = arith.constant 2 : index
    %c0_49 = arith.constant 0 : index
    %24 = vector.load %arg8[%c0_46, %c1_47, %c2_48, %c0_49] : memref<2x18x18x128xf32, #tpu.memory_space<vmem>>, vector<2x16x16x128xf32>
    %25 = vector.shape_cast %24 : vector<2x16x16x128xf32> to vector<512x128xf32>
    %26 = tpu.concatenate %21, %23, %25 in 1 : vector<512x128xf32>, vector<512x128xf32>, vector<512x128xf32> -> vector<512x384xf32>
    %c1_50 = arith.constant 1 : index
    %c0_51 = arith.constant 0 : index
    %c0_52 = arith.constant 0 : index
    %27 = vector.load %arg1[%c1_50, %c0_51, %c0_52] : memref<3x384x128xf32, #tpu.memory_space<vmem>>, vector<1x384x128xf32>
    %28 = vector.shape_cast %27 : vector<1x384x128xf32> to vector<384x128xf32>
    %cst_53 = arith.constant dense<0.000000e+00> : vector<512x128xf32>
    %29 = tpu.matmul %26, %28, %cst_53 {dimension_numbers = #tpu.dot_dimension_numbers<[1], [0], [0], [1], [0, 0, 1, 1], [], []>} : vector<512x384xf32>, vector<384x128xf32>, vector<512x128xf32> -> vector<512x128xf32>
    %30 = arith.addf %19, %29 : vector<512x128xf32>
    %c0_54 = arith.constant 0 : index
    %c2_55 = arith.constant 2 : index
    %c0_56 = arith.constant 0 : index
    %c0_57 = arith.constant 0 : index
    %31 = vector.load %arg8[%c0_54, %c2_55, %c0_56, %c0_57] : memref<2x18x18x128xf32, #tpu.memory_space<vmem>>, vector<2x16x16x128xf32>
    %32 = vector.shape_cast %31 : vector<2x16x16x128xf32> to vector<512x128xf32>
    %c0_58 = arith.constant 0 : index
    %c2_59 = arith.constant 2 : index
    %c1_60 = arith.constant 1 : index
    %c0_61 = arith.constant 0 : index
    %33 = vector.load %arg8[%c0_58, %c2_59, %c1_60, %c0_61] : memref<2x18x18x128xf32, #tpu.memory_space<vmem>>, vector<2x16x16x128xf32>
    %34 = vector.shape_cast %33 : vector<2x16x16x128xf32> to vector<512x128xf32>
    %c0_62 = arith.constant 0 : index
    %c2_63 = arith.constant 2 : index
    %c2_64 = arith.constant 2 : index
    %c0_65 = arith.constant 0 : index
    %35 = vector.load %arg8[%c0_62, %c2_63, %c2_64, %c0_65] : memref<2x18x18x128xf32, #tpu.memory_space<vmem>>, vector<2x16x16x128xf32>
    %36 = vector.shape_cast %35 : vector<2x16x16x128xf32> to vector<512x128xf32>
    %37 = tpu.concatenate %32, %34, %36 in 1 : vector<512x128xf32>, vector<512x128xf32>, vector<512x128xf32> -> vector<512x384xf32>
    %c2_66 = arith.constant 2 : index
    %c0_67 = arith.constant 0 : index
    %c0_68 = arith.constant 0 : index
    %38 = vector.load %arg1[%c2_66, %c0_67, %c0_68] : memref<3x384x128xf32, #tpu.memory_space<vmem>>, vector<1x384x128xf32>
    %39 = vector.shape_cast %38 : vector<1x384x128xf32> to vector<384x128xf32>
    %cst_69 = arith.constant dense<0.000000e+00> : vector<512x128xf32>
    %40 = tpu.matmul %37, %39, %cst_69 {dimension_numbers = #tpu.dot_dimension_numbers<[1], [0], [0], [1], [0, 0, 1, 1], [], []>} : vector<512x384xf32>, vector<384x128xf32>, vector<512x128xf32> -> vector<512x128xf32>
    %41 = arith.addf %30, %40 : vector<512x128xf32>
    %c0_70 = arith.constant 0 : index
    %c0_71 = arith.constant 0 : index
    %42 = vector.load %arg2[%c0_70, %c0_71] : memref<1x128xf32, #tpu.memory_space<vmem>>, vector<1x128xf32>
    %c0_72 = arith.constant 0 : index
    %c0_73 = arith.constant 0 : index
    %43 = vector.load %arg3[%c0_72, %c0_73] : memref<1x128xf32, #tpu.memory_space<vmem>>, vector<1x128xf32>
    %cst_74 = arith.constant dense<0.000000e+00> : vector<128xf32>
    %44 = vector.multi_reduction <add>, %41, %cst_74 [0] : vector<512x128xf32> to vector<128xf32>
    %45 = vector.shape_cast %44 : vector<128xf32> to vector<1x128xf32>
    %cst_75 = arith.constant 5.120000e+02 : f32
    %46 = vector.broadcast %cst_75 : f32 to vector<1x128xf32>
    %47 = arith.divf %45, %46 : vector<1x128xf32>
    %48 = vector.broadcast %47 : vector<1x128xf32> to vector<512x128xf32>
    %49 = arith.subf %41, %48 : vector<512x128xf32>
    %50 = arith.mulf %49, %49 : vector<512x128xf32>
    %cst_76 = arith.constant dense<0.000000e+00> : vector<128xf32>
    %51 = vector.multi_reduction <add>, %50, %cst_76 [0] : vector<512x128xf32> to vector<128xf32>
    %52 = vector.shape_cast %51 : vector<128xf32> to vector<1x128xf32>
    %cst_77 = arith.constant 5.120000e+02 : f32
    %53 = vector.broadcast %cst_77 : f32 to vector<1x128xf32>
    %54 = arith.divf %52, %53 : vector<1x128xf32>
    %cst_78 = arith.constant 9.99999974E-6 : f32
    %55 = vector.broadcast %cst_78 : f32 to vector<1x128xf32>
    %56 = arith.addf %54, %55 : vector<1x128xf32>
    %57 = math.rsqrt %56 : vector<1x128xf32>
    %58 = arith.mulf %42, %57 : vector<1x128xf32>
    %59 = arith.mulf %47, %58 : vector<1x128xf32>
    %60 = arith.subf %43, %59 : vector<1x128xf32>
    %61 = vector.broadcast %58 : vector<1x128xf32> to vector<512x128xf32>
    %62 = arith.mulf %41, %61 : vector<512x128xf32>
    %63 = vector.broadcast %60 : vector<1x128xf32> to vector<512x128xf32>
    %64 = arith.addf %62, %63 : vector<512x128xf32>
    %cst_79 = arith.constant 0.000000e+00 : f32
    %65 = vector.broadcast %cst_79 : f32 to vector<512x128xf32>
    %66 = arith.maximumf %64, %65 : vector<512x128xf32>
    %67 = vector.shape_cast %66 : vector<512x128xf32> to vector<2x16x16x128xf32>
    %c0_80 = arith.constant 0 : index
    %c1_81 = arith.constant 1 : index
    %c1_82 = arith.constant 1 : index
    %c0_83 = arith.constant 0 : index
    %68 = vector.load %arg8[%c0_80, %c1_81, %c1_82, %c0_83] : memref<2x18x18x128xf32, #tpu.memory_space<vmem>>, vector<2x16x16x128xf32>
    tpu.vector_store %arg8[%c0_80, %c1_81, %c1_82, %c0_83], %67 {strides = array<i32>} : memref<2x18x18x128xf32, #tpu.memory_space<vmem>>, vector<2x16x16x128xf32>,
    %cst_84 = arith.constant 0.000000e+00 : f32
    %69 = vector.broadcast %cst_84 : f32 to vector<512x128xf32>
    %c0_85 = arith.constant 0 : index
    %c0_86 = arith.constant 0 : index
    %c0_87 = arith.constant 0 : index
    %c0_88 = arith.constant 0 : index
    %70 = vector.load %arg8[%c0_85, %c0_86, %c0_87, %c0_88] : memref<2x18x18x128xf32, #tpu.memory_space<vmem>>, vector<2x16x16x128xf32>
    %71 = vector.shape_cast %70 : vector<2x16x16x128xf32> to vector<512x128xf32>
    %c0_89 = arith.constant 0 : index
    %c0_90 = arith.constant 0 : index
    %c1_91 = arith.constant 1 : index
    %c0_92 = arith.constant 0 : index
    %72 = vector.load %arg8[%c0_89, %c0_90, %c1_91, %c0_92] : memref<2x18x18x128xf32, #tpu.memory_space<vmem>>, vector<2x16x16x128xf32>
    %73 = vector.shape_cast %72 : vector<2x16x16x128xf32> to vector<512x128xf32>
    %c0_93 = arith.constant 0 : index
    %c0_94 = arith.constant 0 : index
    %c2_95 = arith.constant 2 : index
    %c0_96 = arith.constant 0 : index
    %74 = vector.load %arg8[%c0_93, %c0_94, %c2_95, %c0_96] : memref<2x18x18x128xf32, #tpu.memory_space<vmem>>, vector<2x16x16x128xf32>
    %75 = vector.shape_cast %74 : vector<2x16x16x128xf32> to vector<512x128xf32>
    %76 = tpu.concatenate %71, %73, %75 in 1 : vector<512x128xf32>, vector<512x128xf32>, vector<512x128xf32> -> vector<512x384xf32>
    %c0_97 = arith.constant 0 : index
    %c0_98 = arith.constant 0 : index
    %c0_99 = arith.constant 0 : index
    %77 = vector.load %arg4[%c0_97, %c0_98, %c0_99] : memref<3x384x128xf32, #tpu.memory_space<vmem>>, vector<1x384x128xf32>
    %78 = vector.shape_cast %77 : vector<1x384x128xf32> to vector<384x128xf32>
    %cst_100 = arith.constant dense<0.000000e+00> : vector<512x128xf32>
    %79 = tpu.matmul %76, %78, %cst_100 {dimension_numbers = #tpu.dot_dimension_numbers<[1], [0], [0], [1], [0, 0, 1, 1], [], []>} : vector<512x384xf32>, vector<384x128xf32>, vector<512x128xf32> -> vector<512x128xf32>
    %80 = arith.addf %69, %79 : vector<512x128xf32>
    %c0_101 = arith.constant 0 : index
    %c1_102 = arith.constant 1 : index
    %c0_103 = arith.constant 0 : index
    %c0_104 = arith.constant 0 : index
    %81 = vector.load %arg8[%c0_101, %c1_102, %c0_103, %c0_104] : memref<2x18x18x128xf32, #tpu.memory_space<vmem>>, vector<2x16x16x128xf32>
    %82 = vector.shape_cast %81 : vector<2x16x16x128xf32> to vector<512x128xf32>
    %c0_105 = arith.constant 0 : index
    %c1_106 = arith.constant 1 : index
    %c1_107 = arith.constant 1 : index
    %c0_108 = arith.constant 0 : index
    %83 = vector.load %arg8[%c0_105, %c1_106, %c1_107, %c0_108] : memref<2x18x18x128xf32, #tpu.memory_space<vmem>>, vector<2x16x16x128xf32>
    %84 = vector.shape_cast %83 : vector<2x16x16x128xf32> to vector<512x128xf32>
    %c0_109 = arith.constant 0 : index
    %c1_110 = arith.constant 1 : index
    %c2_111 = arith.constant 2 : index
    %c0_112 = arith.constant 0 : index
    %85 = vector.load %arg8[%c0_109, %c1_110, %c2_111, %c0_112] : memref<2x18x18x128xf32, #tpu.memory_space<vmem>>, vector<2x16x16x128xf32>
    %86 = vector.shape_cast %85 : vector<2x16x16x128xf32> to vector<512x128xf32>
    %87 = tpu.concatenate %82, %84, %86 in 1 : vector<512x128xf32>, vector<512x128xf32>, vector<512x128xf32> -> vector<512x384xf32>
    %c1_113 = arith.constant 1 : index
    %c0_114 = arith.constant 0 : index
    %c0_115 = arith.constant 0 : index
    %88 = vector.load %arg4[%c1_113, %c0_114, %c0_115] : memref<3x384x128xf32, #tpu.memory_space<vmem>>, vector<1x384x128xf32>
    %89 = vector.shape_cast %88 : vector<1x384x128xf32> to vector<384x128xf32>
    %cst_116 = arith.constant dense<0.000000e+00> : vector<512x128xf32>
    %90 = tpu.matmul %87, %89, %cst_116 {dimension_numbers = #tpu.dot_dimension_numbers<[1], [0], [0], [1], [0, 0, 1, 1], [], []>} : vector<512x384xf32>, vector<384x128xf32>, vector<512x128xf32> -> vector<512x128xf32>
    %91 = arith.addf %80, %90 : vector<512x128xf32>
    %c0_117 = arith.constant 0 : index
    %c2_118 = arith.constant 2 : index
    %c0_119 = arith.constant 0 : index
    %c0_120 = arith.constant 0 : index
    %92 = vector.load %arg8[%c0_117, %c2_118, %c0_119, %c0_120] : memref<2x18x18x128xf32, #tpu.memory_space<vmem>>, vector<2x16x16x128xf32>
    %93 = vector.shape_cast %92 : vector<2x16x16x128xf32> to vector<512x128xf32>
    %c0_121 = arith.constant 0 : index
    %c2_122 = arith.constant 2 : index
    %c1_123 = arith.constant 1 : index
    %c0_124 = arith.constant 0 : index
    %94 = vector.load %arg8[%c0_121, %c2_122, %c1_123, %c0_124] : memref<2x18x18x128xf32, #tpu.memory_space<vmem>>, vector<2x16x16x128xf32>
    %95 = vector.shape_cast %94 : vector<2x16x16x128xf32> to vector<512x128xf32>
    %c0_125 = arith.constant 0 : index
    %c2_126 = arith.constant 2 : index
    %c2_127 = arith.constant 2 : index
    %c0_128 = arith.constant 0 : index
    %96 = vector.load %arg8[%c0_125, %c2_126, %c2_127, %c0_128] : memref<2x18x18x128xf32, #tpu.memory_space<vmem>>, vector<2x16x16x128xf32>
    %97 = vector.shape_cast %96 : vector<2x16x16x128xf32> to vector<512x128xf32>
    %98 = tpu.concatenate %93, %95, %97 in 1 : vector<512x128xf32>, vector<512x128xf32>, vector<512x128xf32> -> vector<512x384xf32>
    %c2_129 = arith.constant 2 : index
    %c0_130 = arith.constant 0 : index
    %c0_131 = arith.constant 0 : index
    %99 = vector.load %arg4[%c2_129, %c0_130, %c0_131] : memref<3x384x128xf32, #tpu.memory_space<vmem>>, vector<1x384x128xf32>
    %100 = vector.shape_cast %99 : vector<1x384x128xf32> to vector<384x128xf32>
    %cst_132 = arith.constant dense<0.000000e+00> : vector<512x128xf32>
    %101 = tpu.matmul %98, %100, %cst_132 {dimension_numbers = #tpu.dot_dimension_numbers<[1], [0], [0], [1], [0, 0, 1, 1], [], []>} : vector<512x384xf32>, vector<384x128xf32>, vector<512x128xf32> -> vector<512x128xf32>
    %102 = arith.addf %91, %101 : vector<512x128xf32>
    %c0_133 = arith.constant 0 : index
    %c0_134 = arith.constant 0 : index
    %103 = vector.load %arg5[%c0_133, %c0_134] : memref<1x128xf32, #tpu.memory_space<vmem>>, vector<1x128xf32>
    %c0_135 = arith.constant 0 : index
    %c0_136 = arith.constant 0 : index
    %104 = vector.load %arg6[%c0_135, %c0_136] : memref<1x128xf32, #tpu.memory_space<vmem>>, vector<1x128xf32>
    %cst_137 = arith.constant dense<0.000000e+00> : vector<128xf32>
    %105 = vector.multi_reduction <add>, %102, %cst_137 [0] : vector<512x128xf32> to vector<128xf32>
    %106 = vector.shape_cast %105 : vector<128xf32> to vector<1x128xf32>
    %cst_138 = arith.constant 5.120000e+02 : f32
    %107 = vector.broadcast %cst_138 : f32 to vector<1x128xf32>
    %108 = arith.divf %106, %107 : vector<1x128xf32>
    %109 = vector.broadcast %108 : vector<1x128xf32> to vector<512x128xf32>
    %110 = arith.subf %102, %109 : vector<512x128xf32>
    %111 = arith.mulf %110, %110 : vector<512x128xf32>
    %cst_139 = arith.constant dense<0.000000e+00> : vector<128xf32>
    %112 = vector.multi_reduction <add>, %111, %cst_139 [0] : vector<512x128xf32> to vector<128xf32>
    %113 = vector.shape_cast %112 : vector<128xf32> to vector<1x128xf32>
    %cst_140 = arith.constant 5.120000e+02 : f32
    %114 = vector.broadcast %cst_140 : f32 to vector<1x128xf32>
    %115 = arith.divf %113, %114 : vector<1x128xf32>
    %cst_141 = arith.constant 9.99999974E-6 : f32
    %116 = vector.broadcast %cst_141 : f32 to vector<1x128xf32>
    %117 = arith.addf %115, %116 : vector<1x128xf32>
    %118 = math.rsqrt %117 : vector<1x128xf32>
    %119 = arith.mulf %103, %118 : vector<1x128xf32>
    %120 = arith.mulf %108, %119 : vector<1x128xf32>
    %121 = arith.subf %104, %120 : vector<1x128xf32>
    %122 = vector.broadcast %119 : vector<1x128xf32> to vector<512x128xf32>
    %123 = arith.mulf %102, %122 : vector<512x128xf32>
    %124 = vector.broadcast %121 : vector<1x128xf32> to vector<512x128xf32>
    %125 = arith.addf %123, %124 : vector<512x128xf32>
    %c0_142 = arith.constant 0 : index
    %c0_143 = arith.constant 0 : index
    %c0_144 = arith.constant 0 : index
    %c0_145 = arith.constant 0 : index
    %126 = vector.load %arg0[%c0_142, %c0_143, %c0_144, %c0_145] : memref<2x16x16x128xf32, #tpu.memory_space<vmem>>, vector<2x16x16x128xf32>
    %127 = vector.shape_cast %126 : vector<2x16x16x128xf32> to vector<512x128xf32>
    %128 = arith.addf %125, %127 : vector<512x128xf32>
    %cst_146 = arith.constant 0.000000e+00 : f32
    %129 = vector.broadcast %cst_146 : f32 to vector<512x128xf32>
    %130 = arith.maximumf %128, %129 : vector<512x128xf32>
    %c0_147 = arith.constant 0 : index
    %c0_148 = arith.constant 0 : index
    %131 = vector.load %arg7[%c0_147, %c0_148] : memref<512x128xf32, #tpu.memory_space<vmem>>, vector<512x128xf32>
    tpu.vector_store %arg7[%c0_147, %c0_148], %130 {strides = array<i32>} : memref<512x128xf32, #tpu.memory_space<vmem>>, vector<512x128xf32>,
    return
  }
}

</mosaic_0001>

<bundles_post_ra>
// kernel: tpu_custom_call.1
= control target key start
LH: loop header
LB: loop body
LE: loop exit
PB: predicated region body
PF: predicated region fallthrough
CT: control target
= control target key end

     0   :  { %12 = vsyncpa [#allocation4], 0  ;;  %s14819_s0 = inlined_call_operand.hbm [shape: f32[2,16,16,128], index: 0, kind: input, shape index: {}]   ;;  %s14820_s1 = inlined_call_operand.hbm [shape: f32[3,384,128], index: 1, kind: input, shape index: {}]   ;;  %s14821_s2 = inlined_call_operand.vmem [shape: f32[1,128], index: 2, kind: input, shape index: {}]   ;;  %s14822_s3 = inlined_call_operand.vmem [shape: f32[1,128], index: 3, kind: input, shape index: {}]   ;;  %s14823_s4 = inlined_call_operand.hbm [shape: f32[3,384,128], index: 4, kind: input, shape index: {}]   ;;  %s14824_s5 = inlined_call_operand.vmem [shape: f32[1,128], index: 5, kind: input, shape index: {}]   ;;  %s14825_s6 = inlined_call_operand.vmem [shape: f32[1,128], index: 6, kind: input, shape index: {}]   ;;  %s14826_s7 = inlined_call_operand.hbm [shape: f32[512,128], index: 7, kind: output, shape index: {}]  }
   0x1   :  { %13 = vsyncpa [#allocation7], 0 }
   0x2   :  { %14 = vsyncpa [#allocation5], 0  ;;  %s9564_s24 = smov [#allocation6]   ;;  %s9565_s26 = smov [#allocation3]  }
   0x3   :  { %s32_s25 = sshll.u32 %s9564_s24, 4  ;;  %s20_s27 = sshll.u32 %s9565_s26, 4  ;;  %s33_s25 = int_to_ptr.vmem [resolvable:$true] %s32_s25  ;;  %s9612_s27 = int_to_ptr.vmem [resolvable:$true] %s20_s27 }
   0x4   :  { %s9470_s30 = scalar_lea.hbm %s14820_s1, 18432 }
   0x5   :  { %p9471_p0 = scmp.ne.s32.totalorder %s14820_s1, %s9470_s30  ;;  %p9474_p1 = scmp.lt.u32.totalorder %s9470_s30, %s14820_s1 }
   0x7   :  { %p9476_p2 = pnand %p9474_p1, %p9471_p0 }
   0x9   :  { %9479 = shalt.err (!%p9476_p2)
}
   0xa   :  { %s9480_s12 = scalar_lea.vmem %s33_s25, 18432  ;;  %p9485_p4 = scmp.lt.s32.totalorder %s33_s25, %s33_s25 }
   0xb   :  { %p9481_p3 = scmp.ne.s32.totalorder %s33_s25, %s9480_s12  ;;  %p9486_p5 = scmp.lt.s32.totalorder %s9480_s12, %s9480_s12 }
   0xd   :  { %p9487_p6 = por %p9486_p5, %p9485_p4 }
   0xf   :  { %p9488_p7 = pnand %p9487_p6, %p9481_p3 }
  0x11   :  { %9491 = shalt.err (!%p9488_p7)
}
  0x12   :  { %s9566_s13 = smov 128   ;;  %s9567_s14 = smov 8  }
  0x13   :  { %38 = dma.hbm_to_vmem [thread:$0]  %s14820_s1, 18432, %s33_s25, [#allocation7], %s9566_s13, %s9566_s13, %s9567_s14  }
  0x14   :  { %s9492_s19 = scalar_lea.hbm %s14819_s0, 8192 }
  0x15   :  { %p9493_p8 = scmp.ne.s32.totalorder %s14819_s0, %s9492_s19  ;;  %p9496_p9 = scmp.lt.u32.totalorder %s9492_s19, %s14819_s0 }
  0x17   :  { %p9498_p10 = pnand %p9496_p9, %p9493_p8 }
  0x19   :  { %9501 = shalt.err (!%p9498_p10)
}
  0x1a   :  { %s9502_s24 = scalar_lea.vmem %s9612_s27, 8192  ;;  %p9507_p12 = scmp.lt.s32.totalorder %s9612_s27, %s9612_s27 }
  0x1b   :  { %p9503_p11 = scmp.ne.s32.totalorder %s9612_s27, %s9502_s24  ;;  %p9508_p13 = scmp.lt.s32.totalorder %s9502_s24, %s9502_s24 }
  0x1d   :  { %p9509_p0 = por %p9508_p13, %p9507_p12 }
  0x1f   :  { %p9510_p1 = pnand %p9509_p0, %p9503_p11 }
  0x21   :  { %9513 = shalt.err (!%p9510_p1)
}
  0x22   :  { %26 = dma.hbm_to_vmem [thread:$0]  %s14819_s0, 8192, %s9612_s27, [#allocation4], %s9566_s13, %s9566_s13, %s9567_s14  }
  0x23   :  { %s9568_s26 = smov [#allocation8]   ;;  %s9514_s8 = scalar_lea.hbm %s14823_s4, 18432 }
  0x24   :  { %s48_s28 = sshll.u32 %s9568_s26, 4  ;;  %p9515_p2 = scmp.ne.s32.totalorder %s14823_s4, %s9514_s8  ;;  %s49_s28 = int_to_ptr.vmem [resolvable:$true] %s48_s28 }
  0x25   :  { %p9518_p3 = scmp.lt.u32.totalorder %s9514_s8, %s14823_s4 }
  0x27   :  { %p9520_p4 = pnand %p9518_p3, %p9515_p2 }
  0x29   :  { %9523 = shalt.err (!%p9520_p4)
}
  0x2a   :  { %s9524_s15 = scalar_lea.vmem %s49_s28, 18432  ;;  %p9529_p6 = scmp.lt.s32.totalorder %s49_s28, %s49_s28 }
  0x2b   :  { %p9525_p5 = scmp.ne.s32.totalorder %s49_s28, %s9524_s15  ;;  %p9530_p7 = scmp.lt.s32.totalorder %s9524_s15, %s9524_s15 }
  0x2d   :  { %p9531_p8 = por %p9530_p7, %p9529_p6 }
  0x2f   :  { %p9532_p9 = pnand %p9531_p8, %p9525_p5 }
  0x31   :  { %9535 = shalt.err (!%p9532_p9)
}
  0x32   :  { %54 = dma.hbm_to_vmem [thread:$0]  %s14823_s4, 18432, %s49_s28, [#allocation7], %s9566_s13, %s9566_s13, %s9567_s14  }
  0x33   :  { %9558 = dma.done.wait [#allocation4], 8192  }
  0x34   :  { %9559 = vsyncadd [#allocation4], 4294959104 }
  0x35   :  { %9560 = dma.done.wait [#allocation7], 36864  }
  0x36   :  { %9561 = vsyncadd [#allocation7], 4294930432  ;;  %v14827_v0 = vmov 0.0|0.0   ;;  %v9570_v1 = vmov 0.0   ;;  %v715_v2 = vld [vmem:[#allocation6 + $0x180] sm:$0xff]  ;;  %v716_v3 = vld [vmem:[#allocation6 + $0x188] sm:$0xff] }
  0x37   :  { %8956 = vmatprep.subr.bf16.mxu0 %v14827_v0  ;;  %118 = vst [vmem:[#allocation2 + $0x29] sm:$0x1] %v9570_v1  ;;  %68 = vst [vmem:[#allocation2] sm:$0xff] %v9570_v1  ;;  %v747_v4 = vld [vmem:[#allocation6 + $0x280] sm:$0xff]  ;;  %v8957_v5 = vpack.c.bf16 %v716_v3, %v715_v2  ;;  %v748_v6 = vld [vmem:[#allocation6 + $0x288] sm:$0xff] }
  0x38   :  { %69 = vst [vmem:[#allocation2 + $0x8] sm:$0xff] %v9570_v1  ;;  %70 = vst [vmem:[#allocation2 + $0x10] sm:$0x3] %v9570_v1  ;;  %v717_v7 = vld [vmem:[#allocation6 + $0x190] sm:$0xff]  ;;  %v718_v8 = vld [vmem:[#allocation6 + $0x198] sm:$0xff]  ;;  %v9004_v9 = vpack.c.bf16 %v748_v6, %v747_v4 }
  0x39   :  { %71 = vst [vmem:[#allocation2 + $0x1b0] sm:$0xff] %v9570_v1  ;;  %72 = vst [vmem:[#allocation2 + $0x1b8] sm:$0xff] %v9570_v1  ;;  %v749_v10 = vld [vmem:[#allocation6 + $0x290] sm:$0xff]  ;;  %v750_v11 = vld [vmem:[#allocation6 + $0x298] sm:$0xff]  ;;  %8958 = vmatpush1.bf16.msra.mxu0 %v8957_v5  ;;  %v8960_v12 = vpack.c.bf16 %v718_v8, %v717_v7 }
  0x3a   :  { %73 = vst [vmem:[#allocation2 + $0x1c0] sm:$0x3] %v9570_v1  ;;  %75 = vst [vmem:[#allocation2 + $0x198] sm:$0xff] %v9570_v1  ;;  %v9008_v13 = vpack.c.bf16 %v750_v11, %v749_v10  ;;  %v751_v14 = vld [vmem:[#allocation6 + $0x2a0] sm:$0xff]  ;;  %v752_v15 = vld [vmem:[#allocation6 + $0x2a8] sm:$0xff]  ;;  %9005 = vmatprep.subr.bf16.mxu1 %v9004_v9  ;;  %8959 = vmatprep.subr.bf16.mxu0 %v14827_v0 }
  0x3b   :  { %76 = vst [vmem:[#allocation2 + $0x1a0] sm:$0xff] %v9570_v1  ;;  %77 = vst [vmem:[#allocation2 + $0x1a8] sm:$0x3] %v9570_v1  ;;  %v719_v16 = vld [vmem:[#allocation6 + $0x1a0] sm:$0xff]  ;;  %v720_v17 = vld [vmem:[#allocation6 + $0x1a8] sm:$0xff]  ;;  %9007 = vmatpush3.bf16.msra.mxu1 %v9004_v9  ;;  %v9012_v18 = vpack.c.bf16 %v752_v15, %v751_v14 }
  0x3c   :  { %78 = vst [vmem:[#allocation2 + $0x348] sm:$0xff] %v9570_v1  ;;  %79 = vst [vmem:[#allocation2 + $0x350] sm:$0xff] %v9570_v1  ;;  %9009 = vmatprep.subr.bf16.mxu1 %v9008_v13  ;;  %v8963_v19 = vpack.c.bf16 %v720_v17, %v719_v16  ;;  %v753_v20 = vld [vmem:[#allocation6 + $0x2b0] sm:$0xff]  ;;  %v754_v21 = vld [vmem:[#allocation6 + $0x2b8] sm:$0xff] }
  0x3d   :  { %80 = vst [vmem:[#allocation2 + $0x358] sm:$0x3] %v9570_v1  ;;  %82 = vst [vmem:[#allocation2 + $0x18] sm:$0x1] %v9570_v1  ;;  %8961 = vmatpush1.bf16.msra.mxu0 %v8960_v12  ;;  %v721_v22 = vld [vmem:[#allocation6 + $0x1b0] sm:$0xff]  ;;  %v722_v23 = vld [vmem:[#allocation6 + $0x1b8] sm:$0xff]  ;;  %v9016_v24 = vpack.c.bf16 %v754_v21, %v753_v20 }
  0x3e   :  { %83 = vst [vmem:[#allocation2 + $0x30] sm:$0x1] %v9570_v1  ;;  %84 = vst [vmem:[#allocation2 + $0x48] sm:$0x1] %v9570_v1  ;;  %8962 = vmatprep.subr.bf16.mxu0 %v14827_v0  ;;  %v153_v25 = vld [vmem:[#allocation3] sm:$0xff]  ;;  %v8966_v26 = vpack.c.bf16 %v722_v23, %v721_v22  ;;  %v756_v28 = vld [vmem:[#allocation6 + $0x2c8] sm:$0xff] }
  0x3f   :  { %85 = vst [vmem:[#allocation2 + $0x60] sm:$0x1] %v9570_v1  ;;  %86 = vst [vmem:[#allocation2 + $0x78] sm:$0x1] %v9570_v1  ;;  %9011 = vmatpush3.bf16.msra.mxu1 %v9008_v13  ;;  %v755_v27 = vld [vmem:[#allocation6 + $0x2c0] sm:$0xff]  ;;  %v9751_v29 = vld [vmem:[#allocation3 + $0x8] sm:$0xff]  ;;  %827 = vmatprep.mubr.f32.mxu0 %v153_v25 }
  0x40   :  { %87 = vst [vmem:[#allocation2 + $0x90] sm:$0x1] %v9570_v1  ;;  %88 = vst [vmem:[#allocation2 + $0xa8] sm:$0x1] %v9570_v1  ;;  %9013 = vmatprep.subr.bf16.mxu1 %v9012_v18  ;;  %v723_v30 = vld [vmem:[#allocation6 + $0x1c0] sm:$0xff]  ;;  %v724_v31 = vld [vmem:[#allocation6 + $0x1c8] sm:$0xff]  ;;  %v9020_v34 = vpack.c.bf16 %v756_v28, %v755_v27 }
  0x41   :  { %89 = vst [vmem:[#allocation2 + $0xc0] sm:$0x1] %v9570_v1  ;;  %90 = vst [vmem:[#allocation2 + $0xd8] sm:$0x1] %v9570_v1  ;;  %8964 = vmatpush1.bf16.msra.mxu0 %v8963_v19  ;;  %v9755_v32 = vld [vmem:[#allocation3 + $0x10] sm:$0xff]  ;;  %v9757_v33 = vld [vmem:[#allocation3 + $0x18] sm:$0xff]  ;;  %v8969_v37 = vpack.c.bf16 %v724_v31, %v723_v30 }
  0x42   :  { %91 = vst [vmem:[#allocation2 + $0xf0] sm:$0x1] %v9570_v1  ;;  %92 = vst [vmem:[#allocation2 + $0x108] sm:$0x1] %v9570_v1  ;;  %8965 = vmatprep.subr.bf16.mxu0 %v14827_v0  ;;  %v9761_v35 = vld [vmem:[#allocation3 + $0x20] sm:$0xff]  ;;  %v9763_v36 = vld [vmem:[#allocation3 + $0x28] sm:$0xff] }
  0x43   :  { %93 = vst [vmem:[#allocation2 + $0x120] sm:$0x1] %v9570_v1  ;;  %94 = vst [vmem:[#allocation2 + $0x138] sm:$0x1] %v9570_v1  ;;  %9015 = vmatpush3.bf16.msra.mxu1 %v9012_v18  ;;  %v725_v38 = vld [vmem:[#allocation6 + $0x1d0] sm:$0xff]  ;;  %v758_v40 = vld [vmem:[#allocation6 + $0x2d8] sm:$0xff] }
  0x44   :  { %95 = vst [vmem:[#allocation2 + $0x150] sm:$0x1] %v9570_v1  ;;  %96 = vst [vmem:[#allocation2 + $0x168] sm:$0x1] %v9570_v1  ;;  %9017 = vmatprep.subr.bf16.mxu1 %v9016_v24  ;;  %v757_v39 = vld [vmem:[#allocation6 + $0x2d0] sm:$0xff]  ;;  %v726_v41 = vld [vmem:[#allocation6 + $0x1d8] sm:$0xff] }
  0x45   :  { %97 = vst [vmem:[#allocation2 + $0x180] sm:$0x1] %v9570_v1  ;;  %100 = vst [vmem:[#allocation2 + $0x1c8] sm:$0x1] %v9570_v1  ;;  %8967 = vmatpush1.bf16.msra.mxu0 %v8966_v26  ;;  %v9768_v42 = vld [vmem:[#allocation3 + $0x30] sm:$0xff]  ;;  %v9770_v43 = vld [vmem:[#allocation3 + $0x38] sm:$0xff]  ;;  %v9024_v46 = vpack.c.bf16 %v758_v40, %v757_v39  ;;  %v8972_v48 = vpack.c.bf16 %v726_v41, %v725_v38 }
  0x46   :  { %101 = vst [vmem:[#allocation2 + $0x1e0] sm:$0x1] %v9570_v1  ;;  %102 = vst [vmem:[#allocation2 + $0x1f8] sm:$0x1] %v9570_v1  ;;  %8968 = vmatprep.subr.bf16.mxu0 %v14827_v0  ;;  %v9774_v44 = vld [vmem:[#allocation3 + $0x40] sm:$0xff]  ;;  %v9776_v45 = vld [vmem:[#allocation3 + $0x48] sm:$0xff] }
  0x47   :  { %103 = vst [vmem:[#allocation2 + $0x210] sm:$0x1] %v9570_v1  ;;  %104 = vst [vmem:[#allocation2 + $0x228] sm:$0x1] %v9570_v1  ;;  %9019 = vmatpush3.bf16.msra.mxu1 %v9016_v24  ;;  %v727_v47 = vld [vmem:[#allocation6 + $0x1e0] sm:$0xff]  ;;  %v760_v50 = vld [vmem:[#allocation6 + $0x2e8] sm:$0xff] }
  0x48   :  { %105 = vst [vmem:[#allocation2 + $0x240] sm:$0x1] %v9570_v1  ;;  %106 = vst [vmem:[#allocation2 + $0x258] sm:$0x1] %v9570_v1  ;;  %9021 = vmatprep.subr.bf16.mxu1 %v9020_v34  ;;  %v759_v49 = vld [vmem:[#allocation6 + $0x2e0] sm:$0xff]  ;;  %v728_v52 = vld [vmem:[#allocation6 + $0x1e8] sm:$0xff] }
  0x49   :  { %107 = vst [vmem:[#allocation2 + $0x270] sm:$0x1] %v9570_v1  ;;  %108 = vst [vmem:[#allocation2 + $0x288] sm:$0x1] %v9570_v1  ;;  %8970 = vmatpush1.bf16.msra.mxu0 %v8969_v37  ;;  %v9781_v53 = vld [vmem:[#allocation3 + $0x50] sm:$0xff]  ;;  %v9783_v54 = vld [vmem:[#allocation3 + $0x58] sm:$0xff]  ;;  %v9028_v55 = vpack.c.bf16 %v760_v50, %v759_v49  ;;  %v8975_v57 = vpack.c.bf16 %v728_v52, %v727_v47 }
  0x4a   :  { %109 = vst [vmem:[#allocation2 + $0x2a0] sm:$0x1] %v9570_v1  ;;  %110 = vst [vmem:[#allocation2 + $0x2b8] sm:$0x1] %v9570_v1  ;;  %8971 = vmatprep.subr.bf16.mxu0 %v14827_v0  ;;  %v9787_v56 = vld [vmem:[#allocation3 + $0x60] sm:$0xff]  ;;  %v761_v58 = vld [vmem:[#allocation6 + $0x2f0] sm:$0xff] }
  0x4b   :  { %111 = vst [vmem:[#allocation2 + $0x2d0] sm:$0x1] %v9570_v1  ;;  %112 = vst [vmem:[#allocation2 + $0x2e8] sm:$0x1] %v9570_v1  ;;  %9023 = vmatpush3.bf16.msra.mxu1 %v9020_v34  ;;  %v762_v59 = vld [vmem:[#allocation6 + $0x2f8] sm:$0xff]  ;;  %v9789_v60 = vld [vmem:[#allocation3 + $0x68] sm:$0xff] }
  0x4c   :  { %113 = vst [vmem:[#allocation2 + $0x300] sm:$0x1] %v9570_v1  ;;  %114 = vst [vmem:[#allocation2 + $0x318] sm:$0x1] %v9570_v1  ;;  %9025 = vmatprep.subr.bf16.mxu1 %v9024_v46  ;;  %v729_v61 = vld [vmem:[#allocation6 + $0x1f0] sm:$0xff]  ;;  %v730_v62 = vld [vmem:[#allocation6 + $0x1f8] sm:$0xff]  ;;  %v9032_v63 = vpack.c.bf16 %v762_v59, %v761_v58 }
  0x4d   :  { %115 = vst [vmem:[#allocation2 + $0x330] sm:$0x1] %v9570_v1  ;;  %119 = vst [vmem:[#allocation2 + $0x41] sm:$0x1] %v9570_v1  ;;  %8973 = vmatpush1.bf16.msra.mxu0 %v8972_v48  ;;  %v9796_v2 = vld [vmem:[#allocation3 + $0x78] sm:$0xff]  ;;  %v8978_v3 = vpack.c.bf16 %v730_v62, %v729_v61  ;;  %v9800_v4 = vld [vmem:[#allocation3 + $0x80] sm:$0xff] }
  0x4e   :  { %120 = vst [vmem:[#allocation2 + $0x59] sm:$0x1] %v9570_v1  ;;  %121 = vst [vmem:[#allocation2 + $0x71] sm:$0x1] %v9570_v1  ;;  %8974 = vmatprep.subr.bf16.mxu0 %v14827_v0  ;;  %v731_v5 = vld [vmem:[#allocation6 + $0x200] sm:$0xff]  ;;  %v732_v6 = vld [vmem:[#allocation6 + $0x208] sm:$0xff] }
  0x4f   :  { %122 = vst [vmem:[#allocation2 + $0x89] sm:$0x1] %v9570_v1  ;;  %123 = vst [vmem:[#allocation2 + $0xa1] sm:$0x1] %v9570_v1  ;;  %9027 = vmatpush3.bf16.msra.mxu1 %v9024_v46  ;;  %v9803_v7 = vld [vmem:[#allocation3 + $0x88] sm:$0xff]  ;;  %v474_v8 = vld [vmem:[#allocation6] sm:$0xff]  ;;  %v8981_v12 = vpack.c.bf16 %v732_v6, %v731_v5 }
  0x50   :  { %124 = vst [vmem:[#allocation2 + $0xb9] sm:$0x1] %v9570_v1  ;;  %125 = vst [vmem:[#allocation2 + $0xd1] sm:$0x1] %v9570_v1  ;;  %9029 = vmatprep.subr.bf16.mxu1 %v9028_v55  ;;  %v475_v9 = vld [vmem:[#allocation6 + $0x8] sm:$0xff]  ;;  %v9807_v10 = vld [vmem:[#allocation3 + $0x90] sm:$0xff] }
  0x51   :  { %126 = vst [vmem:[#allocation2 + $0xe9] sm:$0x1] %v9570_v1  ;;  %127 = vst [vmem:[#allocation2 + $0x101] sm:$0x1] %v9570_v1  ;;  %8976 = vmatpush1.bf16.msra.mxu0 %v8975_v57  ;;  %v9809_v11 = vld [vmem:[#allocation3 + $0x98] sm:$0xff]  ;;  %v9813_v13 = vld [vmem:[#allocation3 + $0xa0] sm:$0xff]  ;;  %v9037_v18 = vpack.c.bf16 %v475_v9, %v474_v8 }
  0x52   :  { %128 = vst [vmem:[#allocation2 + $0x119] sm:$0x1] %v9570_v1  ;;  %129 = vst [vmem:[#allocation2 + $0x131] sm:$0x1] %v9570_v1  ;;  %8977 = vmatprep.subr.bf16.mxu0 %v14827_v0  ;;  %v733_v14 = vld [vmem:[#allocation6 + $0x210] sm:$0xff]  ;;  %v734_v15 = vld [vmem:[#allocation6 + $0x218] sm:$0xff] }
  0x53   :  { %130 = vst [vmem:[#allocation2 + $0x149] sm:$0x1] %v9570_v1  ;;  %131 = vst [vmem:[#allocation2 + $0x161] sm:$0x1] %v9570_v1  ;;  %9031 = vmatpush3.bf16.msra.mxu1 %v9028_v55  ;;  %v9816_v16 = vld [vmem:[#allocation3 + $0xa8] sm:$0xff]  ;;  %v9820_v19 = vld [vmem:[#allocation3 + $0xb0] sm:$0xff]  ;;  %v8984_v24 = vpack.c.bf16 %v734_v15, %v733_v14 }
  0x54   :  { %132 = vst [vmem:[#allocation2 + $0x179] sm:$0x1] %v9570_v1  ;;  %133 = vst [vmem:[#allocation2 + $0x191] sm:$0x1] %v9570_v1  ;;  %9033 = vmatprep.subr.bf16.mxu1 %v9032_v63  ;;  %v9822_v20 = vld [vmem:[#allocation3 + $0xb8] sm:$0xff]  ;;  %v476_v22 = vld [vmem:[#allocation6 + $0x10] sm:$0xff] }
  0x55   :  { %136 = vst [vmem:[#allocation2 + $0x1d9] sm:$0x1] %v9570_v1  ;;  %137 = vst [vmem:[#allocation2 + $0x1f1] sm:$0x1] %v9570_v1  ;;  %8979 = vmatpush1.bf16.msra.mxu0 %v8978_v3  ;;  %v477_v23 = vld [vmem:[#allocation6 + $0x18] sm:$0xff]  ;;  %v9829_v26 = vld [vmem:[#allocation3 + $0xc8] sm:$0xff] }
  0x56   :  { %138 = vst [vmem:[#allocation2 + $0x209] sm:$0x1] %v9570_v1  ;;  %139 = vst [vmem:[#allocation2 + $0x221] sm:$0x1] %v9570_v1  ;;  %8980 = vmatprep.subr.bf16.mxu0 %v14827_v0  ;;  %v735_v27 = vld [vmem:[#allocation6 + $0x220] sm:$0xff]  ;;  %v736_v28 = vld [vmem:[#allocation6 + $0x228] sm:$0xff]  ;;  %v9040_v31 = vpack.c.bf16 %v477_v23, %v476_v22 }
  0x57   :  { %140 = vst [vmem:[#allocation2 + $0x239] sm:$0x1] %v9570_v1  ;;  %141 = vst [vmem:[#allocation2 + $0x251] sm:$0x1] %v9570_v1  ;;  %9035 = vmatpush3.bf16.msra.mxu1 %v9032_v63  ;;  %v9834_v34 = vld [vmem:[#allocation3 + $0xd0] sm:$0xff]  ;;  %v9836_v37 = vld [vmem:[#allocation3 + $0xd8] sm:$0xff]  ;;  %v8987_v41 = vpack.c.bf16 %v736_v28, %v735_v27 }
  0x58   :  { %142 = vst [vmem:[#allocation2 + $0x269] sm:$0x1] %v9570_v1  ;;  %143 = vst [vmem:[#allocation2 + $0x281] sm:$0x1] %v9570_v1  ;;  %9036 = vmatprep.subr.bf16.mxu1 %v14827_v0  ;;  %v478_v39 = vld [vmem:[#allocation6 + $0x20] sm:$0xff]  ;;  %v479_v40 = vld [vmem:[#allocation6 + $0x28] sm:$0xff] }
  0x59   :  { %144 = vst [vmem:[#allocation2 + $0x299] sm:$0x1] %v9570_v1  ;;  %145 = vst [vmem:[#allocation2 + $0x2b1] sm:$0x1] %v9570_v1  ;;  %8982 = vmatpush1.bf16.msra.mxu0 %v8981_v12  ;;  %v9841_v46 = vld [vmem:[#allocation3 + $0xe0] sm:$0xff]  ;;  %v9843_v47 = vld [vmem:[#allocation3 + $0xe8] sm:$0xff]  ;;  %v9043_v52 = vpack.c.bf16 %v479_v40, %v478_v39 }
  0x5a   :  { %146 = vst [vmem:[#allocation2 + $0x2c9] sm:$0x1] %v9570_v1  ;;  %147 = vst [vmem:[#allocation2 + $0x2e1] sm:$0x1] %v9570_v1  ;;  %8983 = vmatprep.subr.bf16.mxu0 %v14827_v0  ;;  %v737_v48 = vld [vmem:[#allocation6 + $0x230] sm:$0xff]  ;;  %v738_v49 = vld [vmem:[#allocation6 + $0x238] sm:$0xff] }
  0x5b   :  { %148 = vst [vmem:[#allocation2 + $0x2f9] sm:$0x1] %v9570_v1  ;;  %149 = vst [vmem:[#allocation2 + $0x311] sm:$0x1] %v9570_v1  ;;  %v480_v55 = vld [vmem:[#allocation6 + $0x30] sm:$0xff]  ;;  %v481_v57 = vld [vmem:[#allocation6 + $0x38] sm:$0xff]  ;;  %v8990_v61 = vpack.c.bf16 %v738_v49, %v737_v48 }
  0x5c   :  { %150 = vst [vmem:[#allocation2 + $0x329] sm:$0x1] %v9570_v1  ;;  %151 = vst [vmem:[#allocation2 + $0x341] sm:$0x1] %v9570_v1  ;;  %v9849_v58 = vld [vmem:[#allocation3 + $0xf0] sm:$0xff]  ;;  %v9851_v59 = vld [vmem:[#allocation3 + $0xf8] sm:$0xff]  ;;  %v9046_v9 = vpack.c.bf16 %v481_v57, %v480_v55 }
  0x5d   :  { %81 = vst [vmem:[#allocation2] sm:$0x1] %v9570_v1  ;;  %98 = vst [vmem:[#allocation2 + $0x198] sm:$0x1] %v9570_v1  ;;  %8985 = vmatpush1.bf16.msra.mxu0 %v8984_v24  ;;  %v9855_v62 = vld [vmem:[#allocation3 + $0x100] sm:$0xff]  ;;  %v740_v3 = vld [vmem:[#allocation6 + $0x248] sm:$0xff] }
  0x5e   :  { %99 = vst [vmem:[#allocation2 + $0x1b0] sm:$0x1] %v9570_v1  ;;  %116 = vst [vmem:[#allocation2 + $0x348] sm:$0x1] %v9570_v1  ;;  %8986 = vmatprep.subr.bf16.mxu0 %v14827_v0  ;;  %v739_v63 = vld [vmem:[#allocation6 + $0x240] sm:$0xff]  ;;  %v9858_v5 = vld [vmem:[#allocation3 + $0x108] sm:$0xff] }
  0x5f   :  { %117 = vst [vmem:[#allocation2 + $0x11] sm:$0x1] %v9570_v1  ;;  %134 = vst [vmem:[#allocation2 + $0x1a9] sm:$0x1] %v9570_v1  ;;  %v482_v12 = vld [vmem:[#allocation6 + $0x40] sm:$0xff]  ;;  %v483_v14 = vld [vmem:[#allocation6 + $0x48] sm:$0xff] }
  0x60   :  { %135 = vst [vmem:[#allocation2 + $0x1c1] sm:$0x1] %v9570_v1  ;;  %152 = vst [vmem:[#allocation2 + $0x359] sm:$0x1] %v9570_v1  ;;  %v9794_v1 = vld [vmem:[#allocation3 + $0x70] sm:$0xff]  ;;  %v742_v23 = vld [vmem:[#allocation6 + $0x258] sm:$0xff]  ;;  %v9049_v28 = vpack.c.bf16 %v483_v14, %v482_v12 }
  0x61   :  { %218 = vst [vmem:[#allocation2 + $0x19] sm:$0xff] %v153_v25  ;;  %219 = vst [vmem:[#allocation2 + $0x21] sm:$0xff] %v9751_v29  ;;  %v9827_v25 = vld [vmem:[#allocation3 + $0xc0] sm:$0xff]  ;;  %8988 = vmatpush1.bf16.msra.mxu0 %v8987_v41  ;;  %v9863_v15 = vld [vmem:[#allocation3 + $0x110] sm:$0xff] }
  0x62   :  { %220 = vst [vmem:[#allocation2 + $0x31] sm:$0xff] %v9755_v32  ;;  %221 = vst [vmem:[#allocation2 + $0x39] sm:$0xff] %v9757_v33  ;;  %8989 = vmatprep.subr.bf16.mxu0 %v14827_v0  ;;  %v741_v22 = vld [vmem:[#allocation6 + $0x250] sm:$0xff]  ;;  %v9872_v24 = vld [vmem:[#allocation3 + $0x128] sm:$0xff] }
  0x63   :  { %222 = vst [vmem:[#allocation2 + $0x49] sm:$0xff] %v9761_v35  ;;  %223 = vst [vmem:[#allocation2 + $0x51] sm:$0xff] %v9763_v36  ;;  %v484_v39 = vld [vmem:[#allocation6 + $0x50] sm:$0xff]  ;;  %v485_v40 = vld [vmem:[#allocation6 + $0x58] sm:$0xff]  ;;  %v8996_v41 = vpack.c.bf16 %v742_v23, %v741_v22 }
  0x64   :  { %224 = vst [vmem:[#allocation2 + $0x61] sm:$0xff] %v9768_v42  ;;  %225 = vst [vmem:[#allocation2 + $0x69] sm:$0xff] %v9770_v43  ;;  %v9883_v48 = vld [vmem:[#allocation3 + $0x140] sm:$0xff]  ;;  %v9885_v49 = vld [vmem:[#allocation3 + $0x148] sm:$0xff]  ;;  %v9052_v55 = vpack.c.bf16 %v485_v40, %v484_v39 }
  0x65   :  { %226 = vst [vmem:[#allocation2 + $0x79] sm:$0xff] %v9774_v44  ;;  %227 = vst [vmem:[#allocation2 + $0x81] sm:$0xff] %v9776_v45  ;;  %8991 = vmatpush1.bf16.msra.mxu0 %v8990_v61  ;;  %v9890_v57 = vld [vmem:[#allocation3 + $0x150] sm:$0xff]  ;;  %v9892_v61 = vld [vmem:[#allocation3 + $0x158] sm:$0xff] }
  0x66   :  { %228 = vst [vmem:[#allocation2 + $0x91] sm:$0xff] %v9781_v53  ;;  %229 = vst [vmem:[#allocation2 + $0x99] sm:$0xff] %v9783_v54  ;;  %8992 = vmatprep.subr.bf16.mxu0 %v14827_v0  ;;  %v9899_v12 = vld [vmem:[#allocation3 + $0x168] sm:$0xff]  ;;  %v745_v14 = vld [vmem:[#allocation6 + $0x270] sm:$0xff] }
  0x67   :  { %230 = vst [vmem:[#allocation2 + $0xa9] sm:$0xff] %v9787_v56  ;;  %231 = vst [vmem:[#allocation2 + $0xb1] sm:$0xff] %v9789_v60  ;;  %v9905_v39 = vld [vmem:[#allocation3 + $0x170] sm:$0xff]  ;;  %v9907_v40 = vld [vmem:[#allocation3 + $0x178] sm:$0xff] }
  0x68   :  { %v650_v51 = vld [vmem:[#allocation2 + $0x1a] sm:$0xff]  ;;  %232 = vst [vmem:[#allocation2 + $0xc1] sm:$0xff] %v9794_v1  ;;  %233 = vst [vmem:[#allocation2 + $0xc9] sm:$0xff] %v9796_v2  ;;  %v651_v17 = vld [vmem:[#allocation2 + $0x22] sm:$0xff] }
  0x69   :  { %8220 = vmatprep.mubr.f32.mxu1 %v650_v51  ;;  %234 = vst [vmem:[#allocation2 + $0xd9] sm:$0xff] %v9800_v4  ;;  %235 = vst [vmem:[#allocation2 + $0xe1] sm:$0xff] %v9803_v7  ;;  %v652_v21 = vld [vmem:[#allocation2 + $0x32] sm:$0xff]  ;;  %v653_v30 = vld [vmem:[#allocation2 + $0x3a] sm:$0xff] }
  0x6a   :  { %236 = vst [vmem:[#allocation2 + $0xf1] sm:$0xff] %v9807_v10  ;;  %237 = vst [vmem:[#allocation2 + $0xf9] sm:$0xff] %v9809_v11  ;;  %8221 = vmatmul.mubr.f32.vlgmr.msra.gmra.mrb[0].mxu1 %v651_v17  ;;  %v654_v38 = vld [vmem:[#allocation2 + $0x4a] sm:$0xff]  ;;  %v655_v50 = vld [vmem:[#allocation2 + $0x52] sm:$0xff] }
  0x6b   :  { %238 = vst [vmem:[#allocation2 + $0x109] sm:$0xff] %v9813_v13  ;;  %239 = vst [vmem:[#allocation2 + $0x111] sm:$0xff] %v9816_v16  ;;  %9038 = vmatpush1.bf16.msra.mxu1 %v9037_v18  ;;  %8223 = vmatprep.mubr.f32.mxu1 %v652_v21  ;;  %v656_v51 = vld [vmem:[#allocation2 + $0x62] sm:$0xff]  ;;  %v657_v6 = vld [vmem:[#allocation2 + $0x6a] sm:$0xff]  ;;  %v8993_v18 = vpack.c.bf16 %v740_v3, %v739_v63 }
  0x6c   :  { %240 = vst [vmem:[#allocation2 + $0x121] sm:$0xff] %v9820_v19  ;;  %241 = vst [vmem:[#allocation2 + $0x129] sm:$0xff] %v9822_v20  ;;  %9039 = vmatprep.subr.bf16.mxu1 %v14827_v0  ;;  %v658_v8 = vld [vmem:[#allocation2 + $0x7a] sm:$0xff]  ;;  %v659_v27 = vld [vmem:[#allocation2 + $0x82] sm:$0xff] }
  0x6d   :  { %242 = vst [vmem:[#allocation2 + $0x139] sm:$0xff] %v9827_v25  ;;  %243 = vst [vmem:[#allocation2 + $0x141] sm:$0xff] %v9829_v26  ;;  %v9865_v17 = vld [vmem:[#allocation3 + $0x118] sm:$0xff]  ;;  %v9869_v21 = vld [vmem:[#allocation3 + $0x120] sm:$0xff]  ;;  %8994 = vmatpush1.bf16.msra.mxu0 %v8993_v18 }
  0x6e   :  { %244 = vst [vmem:[#allocation2 + $0x151] sm:$0xff] %v9834_v34  ;;  %245 = vst [vmem:[#allocation2 + $0x159] sm:$0xff] %v9836_v37  ;;  %8224 = vmatmul.mubr.f32.gmra.mrb[2].mxu1 %v653_v30  ;;  %v9876_v30 = vld [vmem:[#allocation3 + $0x130] sm:$0xff]  ;;  %8995 = vmatprep.subr.bf16.mxu0 %v14827_v0  ;;  %v486_v3 = vld [vmem:[#allocation6 + $0x60] sm:$0xff] }
  0x6f   :  { %246 = vst [vmem:[#allocation2 + $0x169] sm:$0xff] %v9841_v46  ;;  %247 = vst [vmem:[#allocation2 + $0x171] sm:$0xff] %v9843_v47  ;;  %8226 = vmatprep.mubr.f32.mxu1 %v654_v38  ;;  %9041 = vmatpush1.bf16.msra.mxu1 %v9040_v31  ;;  %v9878_v31 = vld [vmem:[#allocation3 + $0x138] sm:$0xff]  ;;  %v662_v63 = vld [vmem:[#allocation2 + $0xaa] sm:$0xff] }
  0x70   :  { %9042 = vmatprep.subr.bf16.mxu1 %v14827_v0  ;;  %248 = vst [vmem:[#allocation2 + $0x181] sm:$0xff] %v9849_v58  ;;  %249 = vst [vmem:[#allocation2 + $0x189] sm:$0xff] %v9851_v59  ;;  %v660_v38 = vld [vmem:[#allocation2 + $0x92] sm:$0xff]  ;;  %v664_v23 = vld [vmem:[#allocation2 + $0xc2] sm:$0xff] }
  0x71   :  { %250 = vst [vmem:[#allocation2 + $0x1c9] sm:$0xff] %v9855_v62  ;;  %251 = vst [vmem:[#allocation2 + $0x1d1] sm:$0xff] %v9858_v5  ;;  %8997 = vmatpush1.bf16.msra.mxu0 %v8996_v41  ;;  %v746_v18 = vld [vmem:[#allocation6 + $0x278] sm:$0xff] }
  0x72   :  { %8227 = vmatmul.mubr.f32.gmra.mrb[4].mxu1 %v655_v50  ;;  %252 = vst [vmem:[#allocation2 + $0x1e1] sm:$0xff] %v9863_v15  ;;  %253 = vst [vmem:[#allocation2 + $0x1e9] sm:$0xff] %v9865_v17  ;;  %v743_v50 = vld [vmem:[#allocation6 + $0x260] sm:$0xff]  ;;  %8998 = vmatprep.subr.bf16.mxu0 %v14827_v0  ;;  %v663_v22 = vld [vmem:[#allocation2 + $0xb2] sm:$0xff]  ;;  %v9002_v41 = vpack.c.bf16 %v746_v18, %v745_v14 }
  0x73   :  { %8229 = vmatprep.mubr.f32.mxu1 %v656_v51  ;;  %9044 = vmatpush1.bf16.msra.mxu1 %v9043_v52  ;;  %254 = vst [vmem:[#allocation2 + $0x1f9] sm:$0xff] %v9869_v21  ;;  %255 = vst [vmem:[#allocation2 + $0x201] sm:$0xff] %v9872_v24  ;;  %v744_v51 = vld [vmem:[#allocation6 + $0x268] sm:$0xff]  ;;  %v661_v52 = vld [vmem:[#allocation2 + $0x9a] sm:$0xff] }
  0x74   :  { %9045 = vmatprep.subr.bf16.mxu1 %v14827_v0  ;;  %256 = vst [vmem:[#allocation2 + $0x211] sm:$0xff] %v9876_v30  ;;  %257 = vst [vmem:[#allocation2 + $0x219] sm:$0xff] %v9878_v31  ;;  %v204_v14 = vld [vmem:[#allocation3 + $0x198] sm:$0xff] }
  0x75   :  { %258 = vst [vmem:[#allocation2 + $0x229] sm:$0xff] %v9883_v48  ;;  %259 = vst [vmem:[#allocation2 + $0x231] sm:$0xff] %v9885_v49  ;;  %v9921_v18 = vld [vmem:[#allocation2 + $0x18] sm:$0xff] }
  0x76   :  { %8230 = vmatmul.mubr.f32.gmra.mrb[6].mxu1 %v657_v6  ;;  %v487_v6 = vld [vmem:[#allocation6 + $0x68] sm:$0xff]  ;;  %260 = vst [vmem:[#allocation2 + $0x241] sm:$0xff] %v9890_v57  ;;  %261 = vst [vmem:[#allocation2 + $0x249] sm:$0xff] %v9892_v61 }
  0x77   :  { %8232 = vmatprep.mubr.f32.mxu1 %v658_v8  ;;  %9047 = vmatpush1.bf16.msra.mxu1 %v9046_v9  ;;  %v8999_v8 = vpack.c.bf16 %v744_v51, %v743_v50  ;;  %v9897_v9 = vld [vmem:[#allocation3 + $0x160] sm:$0xff]  ;;  %263 = vst [vmem:[#allocation2 + $0x261] sm:$0xff] %v9899_v12  ;;  %15031 = vst [vmem:[#allocation13_spill] sm:$0xff] %v9907_v40  ;;  %v9914_v51 = vld [vmem:[#allocation3 + $0x188] sm:$0xff] }
  0x78   :  { %9048 = vmatprep.subr.bf16.mxu1 %v14827_v0  ;;  %262 = vst [vmem:[#allocation2 + $0x259] sm:$0xff] %v9897_v9  ;;  %264 = vst [vmem:[#allocation2 + $0x271] sm:$0xff] %v9905_v39  ;;  %v9911_v50 = vld [vmem:[#allocation3 + $0x180] sm:$0xff] }
  0x79   :  { %9000 = vmatpush1.bf16.msra.mxu0 %v8999_v8  ;;  %265 = vst [vmem:[#allocation2 + $0x279] sm:$0xff] %v9907_v40  ;;  %15032 = vst [vmem:[#allocation14_spill] sm:$0xff] %v9911_v50  ;;  %v9919_v8 = vld [vmem:[#allocation3 + $0x190] sm:$0xff]  ;;  %v493_v40 = vld [vmem:[#allocation6 + $0x98] sm:$0xff] }
  0x7a   :  { %8233 = vmatmul.mubr.f32.gmra.mrb[8].mxu1 %v659_v27  ;;  %v9055_v27 = vpack.c.bf16 %v487_v6, %v486_v3  ;;  %9001 = vmatprep.subr.bf16.mxu0 %v14827_v0  ;;  %15033 = vst [vmem:[#allocation15_spill] sm:$0xff] %v9914_v51  ;;  %266 = vst [vmem:[#allocation2 + $0x289] sm:$0xff] %v9911_v50  ;;  %v490_v3 = vld [vmem:[#allocation6 + $0x80] sm:$0xff]  ;;  %v491_v6 = vld [vmem:[#allocation6 + $0x88] sm:$0xff] }
  0x7b   :  { %8235 = vmatprep.mubr.f32.mxu1 %v660_v38  ;;  %9050 = vmatpush1.bf16.msra.mxu1 %v9049_v28  ;;  %v488_v28 = vld [vmem:[#allocation6 + $0x70] sm:$0xff]  ;;  %v489_v38 = vld [vmem:[#allocation6 + $0x78] sm:$0xff]  ;;  %267 = vst [vmem:[#allocation2 + $0x291] sm:$0xff] %v9914_v51  ;;  %15034 = vst [vmem:[#allocation16_spill] sm:$0xff] %v9919_v8 }
  0x7c   :  { %9051 = vmatprep.subr.bf16.mxu1 %v14827_v0  ;;  %268 = vst [vmem:[#allocation2 + $0x2a1] sm:$0xff] %v9919_v8  ;;  %269 = vst [vmem:[#allocation2 + $0x2a9] sm:$0xff] %v204_v14  ;;  %v668_v51 = vld [vmem:[#allocation2 + $0xf2] sm:$0xff]  ;;  %v210_v14 = vld [vmem:[#allocation3 + $0x1c8] sm:$0xff] }
  0x7d   :  { %9003 = vmatpush1.bf16.msra.mxu0 %v9002_v41  ;;  %v15035_v41 = vmov 0.0|0.0   ;;  %v492_v50 = vld [vmem:[#allocation6 + $0x90] sm:$0xff]  ;;  %275 = vst [vmem:[#allocation2 + $0x2f1] sm:$0xff] %v210_v14  ;;  %v497_v14 = vld [vmem:[#allocation6 + $0xb8] sm:$0xff] }
  0x7e   :  { %8236 = vmatmul.mubr.f32.gmra.mrb[10].mxu1 %v661_v52  ;;  %v665_v52 = vld [vmem:[#allocation2 + $0xca] sm:$0xff]  ;;  %v9937_v8 = vld [vmem:[#allocation2 + $0x38] sm:$0xff] }
  0x7f   :  { %8238 = vmatprep.mubr.f32.mxu1 %v662_v63  ;;  %9053 = vmatpush1.bf16.msra.mxu1 %v9052_v55  ;;  %v666_v55 = vld [vmem:[#allocation2 + $0xda] sm:$0xff]  ;;  %v9058_v63 = vpack.c.bf16 %v489_v38, %v488_v28  ;;  %v9061_v28 = vpack.c.bf16 %v491_v6, %v490_v3  ;;  %v207_v38 = vld [vmem:[#allocation3 + $0x1b0] sm:$0xff]  ;;  %v9064_v3 = vpack.c.bf16 %v493_v40, %v492_v50  ;;  %v672_v40 = vld [vmem:[#allocation2 + $0x122] sm:$0xff] }
  0x80   :  { %9054 = vmatprep.subr.bf16.mxu1 %v14827_v0  ;;  %828 = vmatmul.mubr.f32.vlgmr.msra.gmra.mrb[0].mxu0 %v9921_v18  ;;  %272 = vst [vmem:[#allocation2 + $0x2d1] sm:$0xff] %v207_v38  ;;  %v211_v6 = vld [vmem:[#allocation3 + $0x1d0] sm:$0xff]  ;;  %v213_v38 = vld [vmem:[#allocation3 + $0x1e0] sm:$0xff] }
  0x81   :  { %832 = vmatprep.mubr.f32.mxu0 %v9751_v29  ;;  %v495_v29 = vld [vmem:[#allocation6 + $0xa8] sm:$0xff]  ;;  %276 = vst [vmem:[#allocation2 + $0x301] sm:$0xff] %v211_v6  ;;  %278 = vst [vmem:[#allocation2 + $0x319] sm:$0xff] %v213_v38  ;;  %v215_v6 = vld [vmem:[#allocation3 + $0x1f0] sm:$0xff] }
  0x82   :  { %8239 = vmatmul.mubr.f32.gmra.mrb[12].mxu1 %v663_v22  ;;  %v205_v22 = vld [vmem:[#allocation3 + $0x1a0] sm:$0xff]  ;;  %280 = vst [vmem:[#allocation2 + $0x331] sm:$0xff] %v215_v6  ;;  %v9947_v6 = vld [vmem:[#allocation2 + $0x50] sm:$0xff] }
  0x83   :  { %8241 = vmatprep.mubr.f32.mxu1 %v664_v23  ;;  %9056 = vmatpush1.bf16.msra.mxu1 %v9055_v27  ;;  %v206_v23 = vld [vmem:[#allocation3 + $0x1a8] sm:$0xff]  ;;  %270 = vst [vmem:[#allocation2 + $0x2b9] sm:$0xff] %v205_v22  ;;  %v212_v22 = vld [vmem:[#allocation3 + $0x1d8] sm:$0xff]  ;;  %v498_v38 = vld [vmem:[#allocation6 + $0xc0] sm:$0xff] }
  0x84   :  { %9057 = vmatprep.subr.bf16.mxu1 %v14827_v0  ;;  %v667_v27 = vld [vmem:[#allocation2 + $0xe2] sm:$0xff]  ;;  %271 = vst [vmem:[#allocation2 + $0x2c1] sm:$0xff] %v206_v23  ;;  %v208_v0 = vld [vmem:[#allocation3 + $0x1b8] sm:$0xff]  ;;  %v670_v23 = vld [vmem:[#allocation2 + $0x10a] sm:$0xff] }
  0x85   :  { %273 = vst [vmem:[#allocation2 + $0x2d9] sm:$0xff] %v208_v0  ;;  %v494_v0 = vld [vmem:[#allocation6 + $0xa0] sm:$0xff]  ;;  %277 = vst [vmem:[#allocation2 + $0x309] sm:$0xff] %v212_v22 }
  0x86   :  { %8242 = vmatmul.mubr.f32.gmra.mrb[14].mxu1 %v665_v52  ;;  %v9927_v52 = vld [vmem:[#allocation2 + $0x20] sm:$0xff]  ;;  %v9067_v50 = vpack.c.bf16 %v495_v29, %v494_v0 }
  0x87   :  { %8244 = vmatprep.mubr.f32.mxu1 %v666_v55  ;;  %9059 = vmatpush1.bf16.msra.mxu1 %v9058_v63  ;;  %v209_v55 = vld [vmem:[#allocation3 + $0x1c0] sm:$0xff] }
  0x88   :  { %9060 = vmatprep.subr.bf16.mxu1 %v15035_v41  ;;  %274 = vst [vmem:[#allocation2 + $0x2e9] sm:$0xff] %v209_v55  ;;  %v669_v63 = vld [vmem:[#allocation2 + $0xfa] sm:$0xff]  ;;  %833 = vmatmul.mubr.f32.gmra.mrb[2].mxu0 %v9927_v52  ;;  %v496_v55 = vld [vmem:[#allocation6 + $0xb0] sm:$0xff] }
  0x89   :  { %837 = vmatprep.mubr.f32.mxu0 %v9755_v32  ;;  %v216_v32 = vld [vmem:[#allocation3 + $0x1f8] sm:$0xff]  ;;  %v506_v22 = vld [vmem:[#allocation6 + $0x100] sm:$0xff]  ;;  %v9070_v0 = vpack.c.bf16 %v497_v14, %v496_v55  ;;  %v500_v55 = vld [vmem:[#allocation6 + $0xd0] sm:$0xff] }
  0x8a   :  { %8245 = vmatmul.mubr.f32.gmra.mrb[16].mxu1 %v667_v27  ;;  %v9932_v27 = vld [vmem:[#allocation2 + $0x30] sm:$0xff]  ;;  %281 = vst [vmem:[#allocation2 + $0x339] sm:$0xff] %v216_v32  ;;  %v674_v29 = vld [vmem:[#allocation2 + $0x13a] sm:$0xff] }
  0x8b   :  { %8247 = vmatprep.mubr.f32.mxu1 %v668_v51  ;;  %9062 = vmatpush1.bf16.msra.mxu1 %v9061_v28  ;;  %v214_v51 = vld [vmem:[#allocation3 + $0x1e8] sm:$0xff]  ;;  %v671_v28 = vld [vmem:[#allocation2 + $0x112] sm:$0xff] }
  0x8c   :  { %9063 = vmatprep.subr.bf16.mxu1 %v15035_v41  ;;  %279 = vst [vmem:[#allocation2 + $0x321] sm:$0xff] %v214_v51  ;;  %838 = vmatmul.mubr.f32.gmra.mrb[4].mxu0 %v9932_v27  ;;  %v499_v51 = vld [vmem:[#allocation6 + $0xc8] sm:$0xff]  ;;  %v501_v14 = vld [vmem:[#allocation6 + $0xd8] sm:$0xff] }
  0x8d   :  { %842 = vmatprep.mubr.f32.mxu0 %v9757_v33  ;;  %v9942_v33 = vld [vmem:[#allocation2 + $0x48] sm:$0xff]  ;;  %v509_v32 = vld [vmem:[#allocation6 + $0x118] sm:$0xff] }
  0x8e   :  { %8248 = vmatmul.mubr.f32.gmra.mrb[18].mxu1 %v669_v63  ;;  %v507_v63 = vld [vmem:[#allocation6 + $0x108] sm:$0xff] }
  0x8f   :  { %8250 = vmatprep.mubr.f32.mxu1 %v670_v23  ;;  %9065 = vmatpush1.bf16.msra.mxu1 %v9064_v3  ;;  %v9084_v23 = vpack.c.bf16 %v507_v63, %v506_v22  ;;  %v673_v3 = vld [vmem:[#allocation2 + $0x12a] sm:$0xff]  ;;  %v677_v22 = vld [vmem:[#allocation2 + $0x15a] sm:$0xff]  ;;  %v9076_v63 = vpack.c.bf16 %v501_v14, %v500_v55 }
  0x90   :  { %9066 = vmatprep.subr.bf16.mxu1 %v15035_v41  ;;  %843 = vmatmul.mubr.f32.gmra.mrb[6].mxu0 %v9937_v8  ;;  %v9957_v55 = vld [vmem:[#allocation2 + $0x68] sm:$0xff] }
  0x91   :  { %847 = vmatprep.mubr.f32.mxu0 %v9761_v35  ;;  %9085 = vmatprep.subr.bf16.mxu0 %v9084_v23  ;;  %v508_v35 = vld [vmem:[#allocation6 + $0x110] sm:$0xff] }
  0x92   :  { %8251 = vmatmul.mubr.f32.gmra.mrb[20].mxu1 %v671_v28  ;;  %9087 = vmatpush3.bf16.msra.mxu0 %v9084_v23  ;;  %v675_v28 = vld [vmem:[#allocation2 + $0x142] sm:$0xff]  ;;  %v9088_v23 = vpack.c.bf16 %v509_v32, %v508_v35  ;;  %v682_v35 = vld [vmem:[#allocation2 + $0x1ca] sm:$0xff]  ;;  %v9962_v32 = vld [vmem:[#allocation2 + $0x78] sm:$0xff] }
  0x93   :  { %8253 = vmatprep.mubr.f32.mxu1 %v672_v40  ;;  %9068 = vmatpush1.bf16.msra.mxu1 %v9067_v50  ;;  %v9073_v40 = vpack.c.bf16 %v499_v51, %v498_v38  ;;  %v676_v50 = vld [vmem:[#allocation2 + $0x152] sm:$0xff] }
  0x94   :  { %9069 = vmatprep.subr.bf16.mxu1 %v15035_v41  ;;  %848 = vmatmul.mubr.f32.gmra.mrb[8].mxu0 %v9942_v33  ;;  %v679_v38 = vld [vmem:[#allocation2 + $0x172] sm:$0xff] }
  0x95   :  { %852 = vmatprep.mubr.f32.mxu0 %v9763_v36  ;;  %v9952_v36 = vld [vmem:[#allocation2 + $0x60] sm:$0xff]  ;;  %9089 = vmatprep.subr.bf16.mxu0 %v9088_v23 }
  0x96   :  { %8254 = vmatmul.mubr.f32.gmra.mrb[22].mxu1 %v673_v3  ;;  %v678_v3 = vld [vmem:[#allocation2 + $0x16a] sm:$0xff]  ;;  %9091 = vmatpush3.bf16.msra.mxu0 %v9088_v23 }
  0x97   :  { %8256 = vmatprep.mubr.f32.mxu1 %v674_v29  ;;  %9071 = vmatpush1.bf16.msra.mxu1 %v9070_v0  ;;  %v502_v0 = vld [vmem:[#allocation6 + $0xe0] sm:$0xff]  ;;  %v503_v29 = vld [vmem:[#allocation6 + $0xe8] sm:$0xff] }
  0x98   :  { %9072 = vmatprep.subr.bf16.mxu1 %v15035_v41  ;;  %853 = vmatmul.mubr.f32.gmra.mrb[10].mxu0 %v9947_v6  ;;  %v9079_v51 = vpack.c.bf16 %v503_v29, %v502_v0  ;;  %v9967_v0 = vld [vmem:[#allocation2 + $0x80] sm:$0xff] }
  0x99   :  { %857 = vmatprep.mubr.f32.mxu0 %v9768_v42  ;;  %v681_v42 = vld [vmem:[#allocation2 + $0x18a] sm:$0xff]  ;;  %v686_v29 = vld [vmem:[#allocation2 + $0x1fa] sm:$0xff] }
  0x9a   :  { %8257 = vmatmul.mubr.f32.gmra.mrb[24].mxu1 %v675_v28  ;;  %v680_v28 = vld [vmem:[#allocation2 + $0x182] sm:$0xff] }
  0x9b   :  { %8259 = vmatprep.mubr.f32.mxu1 %v676_v50  ;;  %9074 = vmatpush1.bf16.msra.mxu1 %v9073_v40  ;;  %v504_v40 = vld [vmem:[#allocation6 + $0xf0] sm:$0xff]  ;;  %v505_v50 = vld [vmem:[#allocation6 + $0xf8] sm:$0xff] }
  0x9c   :  { %9075 = vmatprep.subr.bf16.mxu1 %v15035_v41  ;;  %858 = vmatmul.mubr.f32.gmra.mrb[12].mxu0 %v9952_v36  ;;  %v9082_v14 = vpack.c.bf16 %v505_v50, %v504_v40  ;;  %v689_v40 = vld [vmem:[#allocation2 + $0x21a] sm:$0xff]  ;;  %v690_v50 = vld [vmem:[#allocation2 + $0x22a] sm:$0xff] }
  0x9d   :  { %862 = vmatprep.mubr.f32.mxu0 %v9770_v43  ;;  %v683_v43 = vld [vmem:[#allocation2 + $0x1d2] sm:$0xff] }
  0x9e   :  { %8260 = vmatmul.mubr.f32.gmra.mrb[26].mxu1 %v677_v22  ;;  %v510_v22 = vld [vmem:[#allocation6 + $0x120] sm:$0xff] }
  0x9f   :  { %8262 = vmatprep.mubr.f32.mxu1 %v678_v3  ;;  %9077 = vmatpush1.bf16.msra.mxu1 %v9076_v63  ;;  %v511_v63 = vld [vmem:[#allocation6 + $0x128] sm:$0xff] }
  0xa0   :  { %9078 = vmatprep.subr.bf16.mxu1 %v15035_v41  ;;  %863 = vmatmul.mubr.f32.gmra.mrb[14].mxu0 %v9957_v55  ;;  %v9092_v23 = vpack.c.bf16 %v511_v63, %v510_v22  ;;  %v684_v3 = vld [vmem:[#allocation2 + $0x1e2] sm:$0xff]  ;;  %v694_v22 = vld [vmem:[#allocation2 + $0x25a] sm:$0xff] }
  0xa1   :  { %867 = vmatprep.mubr.f32.mxu0 %v9774_v44  ;;  %v685_v44 = vld [vmem:[#allocation2 + $0x1ea] sm:$0xff]  ;;  %v695_v63 = vld [vmem:[#allocation2 + $0x262] sm:$0xff] }
  0xa2   :  { %8263 = vmatmul.mubr.f32.gmra.mrb[28].mxu1 %v679_v38  ;;  %9093 = vmatprep.subr.bf16.mxu0 %v9092_v23  ;;  %v9971_v38 = vld [vmem:[#allocation2 + $0x90] sm:$0xff] }
  0xa3   :  { %8265 = vmatprep.mubr.f32.mxu1 %v680_v28  ;;  %9080 = vmatpush1.bf16.msra.mxu1 %v9079_v51  ;;  %v687_v51 = vld [vmem:[#allocation2 + $0x202] sm:$0xff]  ;;  %v9975_v28 = vld [vmem:[#allocation2 + $0x98] sm:$0xff] }
  0xa4   :  { %9081 = vmatprep.subr.bf16.mxu1 %v15035_v41  ;;  %868 = vmatmul.mubr.f32.gmra.mrb[16].mxu0 %v9962_v32 }
  0xa5   :  { %872 = vmatprep.mubr.f32.mxu0 %v9776_v45  ;;  %9095 = vmatpush3.bf16.msra.mxu0 %v9092_v23  ;;  %v688_v45 = vld [vmem:[#allocation2 + $0x212] sm:$0xff]  ;;  %v697_v23 = vld [vmem:[#allocation2 + $0x27a] sm:$0xff] }
  0xa6   :  { %8266 = vmatmul.mubr.f32.gmra.mrb[30].mxu1 %v681_v42  ;;  %v691_v42 = vld [vmem:[#allocation2 + $0x232] sm:$0xff] }
  0xa7   :  { %8268 = vmatprep.mubr.f32.mxu1 %v682_v35  ;;  %9083 = vmatpush1.bf16.msra.mxu1 %v9082_v14  ;;  %v692_v14 = vld [vmem:[#allocation2 + $0x242] sm:$0xff]  ;;  %v693_v35 = vld [vmem:[#allocation2 + $0x24a] sm:$0xff] }
  0xa8   :  { %9116 = vmatprep.subr.bf16.mxu1 %v15035_v41  ;;  %873 = vmatmul.mubr.f32.gmra.mrb[18].mxu0 %v9967_v0 }
  0xa9   :  { %877 = vmatprep.mubr.f32.mxu0 %v9781_v53  ;;  %v9979_v53 = vld [vmem:[#allocation2 + $0xa8] sm:$0xff] }
  0xaa   :  { %8269 = vmatmul.mubr.f32.gmra.mrb[32].mxu1 %v683_v43  ;;  %v696_v43 = vld [vmem:[#allocation2 + $0x272] sm:$0xff] }
  0xab   :  { %8271 = vmatprep.mubr.f32.mxu1 %v684_v3  ;;  %v698_v3 = vld [vmem:[#allocation2 + $0x28a] sm:$0xff] }
  0xac   :  { %878 = vmatmul.mubr.f32.gmra.mrb[20].mxu0 %v9971_v38 }
  0xad   :  { %882 = vmatprep.mubr.f32.mxu0 %v9783_v54  ;;  %v9983_v54 = vld [vmem:[#allocation2 + $0xb0] sm:$0xff] }
  0xae   :  { %8272 = vmatmul.mubr.f32.gmra.mrb[34].mxu1 %v685_v44  ;;  %v512_v44 = vld [vmem:[#allocation6 + $0x130] sm:$0xff] }
  0xaf   :  { %8274 = vmatprep.mubr.f32.mxu1 %v686_v29  ;;  %v513_v29 = vld [vmem:[#allocation6 + $0x138] sm:$0xff] }
  0xb0   :  { %883 = vmatmul.mubr.f32.gmra.mrb[22].mxu0 %v9975_v28 }
  0xb1   :  { %887 = vmatprep.mubr.f32.mxu0 %v9787_v56  ;;  %v9987_v56 = vld [vmem:[#allocation2 + $0xc0] sm:$0xff] }
  0xb2   :  { %8275 = vmatmul.mubr.f32.gmra.mrb[36].mxu1 %v687_v51  ;;  %v699_v51 = vld [vmem:[#allocation2 + $0x292] sm:$0xff] }
  0xb3   :  { %8277 = vmatprep.mubr.f32.mxu1 %v688_v45  ;;  %v9096_v45 = vpack.c.bf16 %v513_v29, %v512_v44  ;;  %v710_v44 = vld [vmem:[#allocation2 + $0x31a] sm:$0xff]  ;;  %v711_v29 = vld [vmem:[#allocation2 + $0x322] sm:$0xff] }
  0xb4   :  { %888 = vmatmul.mubr.f32.gmra.mrb[24].mxu0 %v9979_v53 }
  0xb5   :  { %892 = vmatprep.mubr.f32.mxu0 %v9789_v60  ;;  %v9991_v60 = vld [vmem:[#allocation2 + $0xc8] sm:$0xff]  ;;  %9097 = vmatprep.subr.bf16.mxu0 %v9096_v45 }
  0xb6   :  { %8278 = vmatmul.mubr.f32.gmra.mrb[38].mxu1 %v689_v40  ;;  %v9999_v40 = vld [vmem:[#allocation2 + $0xe0] sm:$0xff]  ;;  %9099 = vmatpush3.bf16.msra.mxu0 %v9096_v45 }
  0xb7   :  { %8280 = vmatprep.mubr.f32.mxu1 %v690_v50  ;;  %v702_v50 = vld [vmem:[#allocation2 + $0x2ba] sm:$0xff] }
  0xb8   :  { %893 = vmatmul.mubr.f32.gmra.mrb[26].mxu0 %v9983_v54  ;;  %v713_v45 = vld [vmem:[#allocation2 + $0x33a] sm:$0xff] }
  0xb9   :  { %897 = vmatprep.mubr.f32.mxu0 %v9794_v1  ;;  %v9995_v1 = vld [vmem:[#allocation2 + $0xd8] sm:$0xff] }
  0xba   :  { %8281 = vmatmul.mubr.f32.gmra.mrb[40].mxu1 %v691_v42  ;;  %v10003_v42 = vld [vmem:[#allocation2 + $0xf0] sm:$0xff] }
  0xbb   :  { %8283 = vmatprep.mubr.f32.mxu1 %v692_v14  ;;  %v703_v14 = vld [vmem:[#allocation2 + $0x2c2] sm:$0xff] }
  0xbc   :  { %898 = vmatmul.mubr.f32.gmra.mrb[28].mxu0 %v9987_v56 }
  0xbd   :  { %902 = vmatprep.mubr.f32.mxu0 %v9796_v2  ;;  %v700_v2 = vld [vmem:[#allocation2 + $0x2a2] sm:$0xff] }
  0xbe   :  { %8284 = vmatmul.mubr.f32.gmra.mrb[42].mxu1 %v693_v35  ;;  %v10007_v35 = vld [vmem:[#allocation2 + $0xf8] sm:$0xff] }
  0xbf   :  { %8286 = vmatprep.mubr.f32.mxu1 %v694_v22  ;;  %v705_v22 = vld [vmem:[#allocation2 + $0x2da] sm:$0xff] }
  0xc0   :  { %903 = vmatmul.mubr.f32.gmra.mrb[30].mxu0 %v9991_v60 }
  0xc1   :  { %907 = vmatprep.mubr.f32.mxu0 %v9800_v4  ;;  %v701_v4 = vld [vmem:[#allocation2 + $0x2aa] sm:$0xff] }
  0xc2   :  { %8287 = vmatmul.mubr.f32.gmra.mrb[44].mxu1 %v695_v63  ;;  %v706_v63 = vld [vmem:[#allocation2 + $0x2ea] sm:$0xff] }
  0xc3   :  { %8289 = vmatprep.mubr.f32.mxu1 %v696_v43  ;;  %v707_v43 = vld [vmem:[#allocation2 + $0x2f2] sm:$0xff] }
  0xc4   :  { %908 = vmatmul.mubr.f32.gmra.mrb[32].mxu0 %v9995_v1 }
  0xc5   :  { %912 = vmatprep.mubr.f32.mxu0 %v9803_v7  ;;  %v704_v7 = vld [vmem:[#allocation2 + $0x2d2] sm:$0xff] }
  0xc6   :  { %8290 = vmatmul.mubr.f32.gmra.mrb[46].mxu1 %v697_v23  ;;  %v708_v23 = vld [vmem:[#allocation2 + $0x302] sm:$0xff] }
  0xc7   :  { %8292 = vmatprep.mubr.f32.mxu1 %v698_v3  ;;  %v709_v3 = vld [vmem:[#allocation2 + $0x30a] sm:$0xff] }
  0xc8   :  { %913 = vmatmul.mubr.f32.gmra.mrb[34].mxu0 %v9999_v40 }
  0xc9   :  { %917 = vmatprep.mubr.f32.mxu0 %v9807_v10  ;;  %v10011_v10 = vld [vmem:[#allocation2 + $0x108] sm:$0xff] }
  0xca   :  { %8293 = vmatmul.mubr.f32.gmra.mrb[48].mxu1 %v699_v51  ;;  %v712_v51 = vld [vmem:[#allocation2 + $0x332] sm:$0xff] }
  0xcb   :  { %8295 = vmatprep.mubr.f32.mxu1 %v700_v2  ;;  %v346_v2 = vld [vmem:[#allocation2 + $0x1] sm:$0xff] }
  0xcc   :  { %918 = vmatmul.mubr.f32.gmra.mrb[36].mxu0 %v10003_v42 }
  0xcd   :  { %922 = vmatprep.mubr.f32.mxu0 %v9809_v11  ;;  %v10015_v11 = vld [vmem:[#allocation2 + $0x110] sm:$0xff] }
  0xce   :  { %8296 = vmatmul.mubr.f32.gmra.mrb[50].mxu1 %v701_v4  ;;  %v2497_v4 = vld [vmem:[#allocation6 + $0x300] sm:$0xff] }
  0xcf   :  { %8298 = vmatprep.mubr.f32.mxu1 %v702_v50  ;;  %v10027_v50 = vld [vmem:[#allocation2 + $0x138] sm:$0xff] }
  0xd0   :  { %923 = vmatmul.mubr.f32.gmra.mrb[38].mxu0 %v10007_v35 }
  0xd1   :  { %927 = vmatprep.mubr.f32.mxu0 %v9813_v13  ;;  %v10019_v13 = vld [vmem:[#allocation2 + $0x120] sm:$0xff] }
  0xd2   :  { %8299 = vmatmul.mubr.f32.gmra.mrb[52].mxu1 %v703_v14  ;;  %v514_v14 = vld [vmem:[#allocation6 + $0x140] sm:$0xff] }
  0xd3   :  { %8301 = vmatprep.mubr.f32.mxu1 %v704_v7  ;;  %v515_v7 = vld [vmem:[#allocation6 + $0x148] sm:$0xff] }
  0xd4   :  { %928 = vmatmul.mubr.f32.gmra.mrb[40].mxu0 %v10011_v10 }
  0xd5   :  { %932 = vmatprep.mubr.f32.mxu0 %v9816_v16  ;;  %v10023_v16 = vld [vmem:[#allocation2 + $0x128] sm:$0xff] }
  0xd6   :  { %8302 = vmatmul.mubr.f32.gmra.mrb[54].mxu1 %v705_v22  ;;  %v282_v22 = vld [vmem:[#allocation2] sm:$0xff] }
  0xd7   :  { %8304 = vmatprep.mubr.f32.mxu1 %v706_v63  ;;  %v9100_v63 = vpack.c.bf16 %v515_v7, %v514_v14  ;;  %v2503_v14 = vld [vmem:[#allocation6 + $0x330] sm:$0xff]  ;;  %v2504_v7 = vld [vmem:[#allocation6 + $0x338] sm:$0xff] }
  0xd8   :  { %933 = vmatmul.mubr.f32.gmra.mrb[42].mxu0 %v10015_v11 }
  0xd9   :  { %937 = vmatprep.mubr.f32.mxu0 %v9820_v19  ;;  %v2498_v19 = vld [vmem:[#allocation6 + $0x308] sm:$0xff]  ;;  %9101 = vmatprep.subr.bf16.mxu0 %v9100_v63 }
  0xda   :  { %8305 = vmatmul.mubr.f32.gmra.mrb[56].mxu1 %v707_v43  ;;  %v347_v43 = vld [vmem:[#allocation2 + $0x9] sm:$0xff]  ;;  %9103 = vmatpush3.bf16.msra.mxu0 %v9100_v63 }
  0xdb   :  { %8307 = vmatprep.mubr.f32.mxu1 %v708_v23  ;;  %v2499_v23 = vld [vmem:[#allocation6 + $0x310] sm:$0xff]  ;;  %v2506_v63 = vld [vmem:[#allocation6 + $0x348] sm:$0xff] }
  0xdc   :  { %938 = vmatmul.mubr.f32.gmra.mrb[44].mxu0 %v10019_v13 }
  0xdd   :  { %942 = vmatprep.mubr.f32.mxu0 %v9822_v20  ;;  %v9117_v20 = vpack.c.bf16 %v2498_v19, %v2497_v4  ;;  %v349_v19 = vld [vmem:[#allocation2 + $0x21] sm:$0xff] }
  0xde   :  { %8308 = vmatmul.mubr.f32.gmra.mrb[58].mxu1 %v709_v3  ;;  %v2500_v3 = vld [vmem:[#allocation6 + $0x318] sm:$0xff] }
  0xdf   :  { %8310 = vmatprep.mubr.f32.mxu1 %v710_v44  ;;  %v10031_v44 = vld [vmem:[#allocation2 + $0x140] sm:$0xff] }
  0xe0   :  { %943 = vmatmul.mubr.f32.gmra.mrb[46].mxu0 %v10023_v16 }
  0xe1   :  { %947 = vmatprep.mubr.f32.mxu0 %v9827_v25  ;;  %v9120_v25 = vpack.c.bf16 %v2500_v3, %v2499_v23  ;;  %v2508_v3 = vld [vmem:[#allocation6 + $0x358] sm:$0xff] }
  0xe2   :  { %8311 = vmatmul.mubr.f32.gmra.mrb[60].mxu1 %v711_v29  ;;  %v348_v29 = vld [vmem:[#allocation2 + $0x19] sm:$0xff] }
  0xe3   :  { %8313 = vmatprep.mubr.f32.mxu1 %v712_v51  ;;  %v2501_v51 = vld [vmem:[#allocation6 + $0x320] sm:$0xff] }
  0xe4   :  { %948 = vmatmul.mubr.f32.gmra.mrb[48].mxu0 %v10027_v50 }
  0xe5   :  { %952 = vmatprep.mubr.f32.mxu0 %v9829_v26  ;;  %v10038_v26 = vld [vmem:[#allocation2 + $0x8] sm:$0xff] }
  0xe6   :  { %8314 = vmatmul.mubr.f32.gmra.mrb[62].mxu1 %v713_v45  ;;  %v2502_v45 = vld [vmem:[#allocation6 + $0x328] sm:$0xff] }
  0xe7   :  { %1597 = vmatprep.mubr.f32.mxu1 %v346_v2  ;;  %v10036_v2 = vld [vmem:[#allocation2 + $0x150] sm:$0xff]  ;;  %v9123_v4 = vpack.c.bf16 %v2502_v45, %v2501_v51  ;;  %v517_v51 = vld [vmem:[#allocation6 + $0x158] sm:$0xff]  ;;  %v2509_v45 = vld [vmem:[#allocation6 + $0x360] sm:$0xff] }
  0xe8   :  { %953 = vmatmul.mubr.f32.gmra.mrb[50].mxu0 %v10031_v44 }
  0xe9   :  { %957 = vmatprep.mubr.f32.mxu0 %v9834_v34  ;;  %v9126_v34 = vpack.c.bf16 %v2504_v7, %v2503_v14  ;;  %v519_v14 = vld [vmem:[#allocation6 + $0x168] sm:$0xff] }
  0xea   :  { %1598 = vmatmul.mubr.f32.vlgmr.msra.gmra.mrb[64].mxu1 %v282_v22  ;;  %v10044_v22 = vld [vmem:[#allocation2 + $0x158] sm:$0xff]  ;;  %v9451_v7 = vld [vmem:[#allocation2 + $0x49] sm:$0xff] }
  0xeb   :  { %9118 = vmatpush1.bf16.msra.mxu1 %v9117_v20  ;;  %1602 = vmatprep.mubr.f32.mxu1 %v347_v43  ;;  %v2505_v20 = vld [vmem:[#allocation6 + $0x340] sm:$0xff]  ;;  %v10050_v43 = vld [vmem:[#allocation2 + $0x168] sm:$0xff] }
  0xec   :  { %9119 = vmatprep.subr.bf16.mxu1 %v15035_v41  ;;  %958 = vmatmul.mubr.f32.gmra.mrb[52].mxu0 %v10036_v2  ;;  %v9129_v23 = vpack.c.bf16 %v2506_v63, %v2505_v20  ;;  %v2511_v63 = vld [vmem:[#allocation6 + $0x370] sm:$0xff] }
  0xed   :  { %962 = vmatprep.mubr.f32.mxu0 %v9836_v37  ;;  %v9449_v37 = vld [vmem:[#allocation2 + $0x31] sm:$0xff] }
  0xee   :  { %1603 = vmatmul.mubr.f32.gmra.mrb[66].mxu1 %v10038_v26 }
  0xef   :  { %1607 = vmatprep.mubr.f32.mxu1 %v348_v29  ;;  %9121 = vmatpush1.bf16.msra.mxu1 %v9120_v25  ;;  %v10056_v25 = vld [vmem:[#allocation2 + $0x170] sm:$0xff]  ;;  %v9450_v29 = vld [vmem:[#allocation2 + $0x39] sm:$0xff] }
  0xf0   :  { %9122 = vmatprep.subr.bf16.mxu1 %v15035_v41  ;;  %963 = vmatmul.mubr.f32.gmra.mrb[54].mxu0 %v10044_v22 }
  0xf1   :  { %967 = vmatprep.mubr.f32.mxu0 %v9841_v46  ;;  %v516_v46 = vld [vmem:[#allocation6 + $0x150] sm:$0xff] }
  0xf2   :  { %1608 = vmatmul.mubr.f32.gmra.mrb[68].mxu1 %v9921_v18  ;;  %v2507_v18 = vld [vmem:[#allocation6 + $0x350] sm:$0xff] }
  0xf3   :  { %1612 = vmatprep.mubr.f32.mxu1 %v349_v19  ;;  %9124 = vmatpush1.bf16.msra.mxu1 %v9123_v4  ;;  %v2510_v4 = vld [vmem:[#allocation6 + $0x368] sm:$0xff]  ;;  %v9104_v19 = vpack.c.bf16 %v517_v51, %v516_v46 }
  0xf4   :  { %9125 = vmatprep.subr.bf16.mxu1 %v15035_v41  ;;  %968 = vmatmul.mubr.f32.gmra.mrb[56].mxu0 %v10050_v43 }
  0xf5   :  { %972 = vmatprep.mubr.f32.mxu0 %v9843_v47  ;;  %v552_v47 = vld [vmem:[#allocation2 + $0x180] sm:$0xff]  ;;  %9105 = vmatprep.subr.bf16.mxu0 %v9104_v19 }
  0xf6   :  { %1613 = vmatmul.mubr.f32.gmra.mrb[70].mxu1 %v9927_v52  ;;  %v9132_v52 = vpack.c.bf16 %v2508_v3, %v2507_v18  ;;  %9107 = vmatpush3.bf16.msra.mxu0 %v9104_v19  ;;  %v9452_v18 = vld [vmem:[#allocation2 + $0x51] sm:$0xff] }
  0xf7   :  { %1617 = vmatprep.mubr.f32.mxu1 %v9449_v37  ;;  %9127 = vmatpush1.bf16.msra.mxu1 %v9126_v34  ;;  %v9135_v34 = vpack.c.bf16 %v2510_v4, %v2509_v45  ;;  %v2512_v37 = vld [vmem:[#allocation6 + $0x378] sm:$0xff]  ;;  %v355_v45 = vld [vmem:[#allocation2 + $0x69] sm:$0xff] }
  0xf8   :  { %9128 = vmatprep.subr.bf16.mxu1 %v15035_v41  ;;  %973 = vmatmul.mubr.f32.gmra.mrb[58].mxu0 %v10056_v25  ;;  %v9138_v3 = vpack.c.bf16 %v2512_v37, %v2511_v63  ;;  %v2515_v4 = vld [vmem:[#allocation6 + $0x390] sm:$0xff]  ;;  %v2516_v19 = vld [vmem:[#allocation6 + $0x398] sm:$0xff] }
  0xf9   :  { %977 = vmatprep.mubr.f32.mxu0 %v9849_v58  ;;  %v520_v58 = vld [vmem:[#allocation6 + $0x170] sm:$0xff]  ;;  %v2520_v63 = vld [vmem:[#allocation6 + $0x3b8] sm:$0xff] }
  0xfa   :  { %1618 = vmatmul.mubr.f32.gmra.mrb[72].mxu1 %v9932_v27  ;;  %v518_v27 = vld [vmem:[#allocation6 + $0x160] sm:$0xff] }
  0xfb   :  { %1622 = vmatprep.mubr.f32.mxu1 %v9450_v29  ;;  %9130 = vmatpush1.bf16.msra.mxu1 %v9129_v23  ;;  %v9108_v20 = vpack.c.bf16 %v519_v14, %v518_v27  ;;  %v553_v23 = vld [vmem:[#allocation2 + $0x188] sm:$0xff]  ;;  %v2513_v29 = vld [vmem:[#allocation6 + $0x380] sm:$0xff] }
  0xfc   :  { %9131 = vmatprep.subr.bf16.mxu1 %v15035_v41  ;;  %978 = vmatmul.mubr.f32.gmra.mrb[60].mxu0 %v552_v47  ;;  %v356_v47 = vld [vmem:[#allocation2 + $0x79] sm:$0xff]  ;;  %v2518_v14 = vld [vmem:[#allocation6 + $0x3a8] sm:$0xff] }
  0xfd   :  { %982 = vmatprep.mubr.f32.mxu0 %v9851_v59  ;;  %9109 = vmatprep.subr.bf16.mxu0 %v9108_v20  ;;  %v10068_v59 = vld [vmem:[#allocation2 + $0x1c8] sm:$0xff]  ;;  %v2517_v27 = vld [vmem:[#allocation6 + $0x3a0] sm:$0xff] }
  0xfe   :  { %1623 = vmatmul.mubr.f32.gmra.mrb[74].mxu1 %v9937_v8  ;;  %v521_v8 = vld [vmem:[#allocation6 + $0x178] sm:$0xff]  ;;  %9111 = vmatpush3.bf16.msra.mxu0 %v9108_v20  ;;  %v2519_v20 = vld [vmem:[#allocation6 + $0x3b0] sm:$0xff] }
  0xff   :  { %1627 = vmatprep.mubr.f32.mxu1 %v9451_v7  ;;  %9133 = vmatpush1.bf16.msra.mxu1 %v9132_v52  ;;  %v9112_v46 = vpack.c.bf16 %v521_v8, %v520_v58  ;;  %v2514_v52 = vld [vmem:[#allocation6 + $0x388] sm:$0xff]  ;;  %v10080_v7 = vld [vmem:[#allocation2 + $0x1e0] sm:$0xff]  ;;  %v9150_v37 = vpack.c.bf16 %v2520_v63, %v2519_v20  ;;  %v15039_v63 = vld [vmem:[#allocation16_spill] sm:$0xff] }
 0x100   :  { %9134 = vmatprep.subr.bf16.mxu1 %v15035_v41  ;;  %983 = vmatmul.mubr.f32.gmra.mrb[62].mxu0 %v553_v23  ;;  %v9141_v51 = vpack.c.bf16 %v2514_v52, %v2513_v29  ;;  %v10113_v23 = vld [vmem:[#allocation2 + $0x228] sm:$0xff] }
 0x101   :  { %987 = vmatprep.mubr.f32.mxu0 %v9855_v62  ;;  %9113 = vmatprep.subr.bf16.mxu0 %v9112_v46  ;;  %v10074_v62 = vld [vmem:[#allocation2 + $0x1d0] sm:$0xff]  ;;  %v2522_v58 = vld [vmem:[#allocation6 + $0x3c8] sm:$0xff] }
 0x102   :  { %1628 = vmatmul.mubr.f32.gmra.mrb[76].mxu1 %v9942_v33  ;;  %v9453_v33 = vld [vmem:[#allocation2 + $0x61] sm:$0xff]  ;;  %9115 = vmatpush3.bf16.msra.mxu0 %v9112_v46 }
 0x103   :  { %1632 = vmatprep.mubr.f32.mxu1 %v9452_v18  ;;  %9136 = vmatpush1.bf16.msra.mxu1 %v9135_v34  ;;  %v10086_v34 = vld [vmem:[#allocation2 + $0x1e8] sm:$0xff]  ;;  %v10134_v18 = vld [vmem:[#allocation2 + $0x258] sm:$0xff] }
 0x104   :  { %9137 = vmatprep.subr.bf16.mxu1 %v15035_v41  ;;  %988 = vmatmul.mubr.f32.gmra.mrb[64].mxu0 %v10068_v59 }
 0x105   :  { %992 = vmatprep.mubr.f32.mxu0 %v9858_v5  ;;  %v9147_v5 = vpack.c.bf16 %v2518_v14, %v2517_v27  ;;  %v10174_v14 = vld [vmem:[#allocation2 + $0x290] sm:$0xff] }
 0x106   :  { %1633 = vmatmul.mubr.f32.gmra.mrb[78].mxu1 %v9947_v6  ;;  %v9144_v6 = vpack.c.bf16 %v2516_v19, %v2515_v4  ;;  %v15037_v4 = vld [vmem:[#allocation14_spill] sm:$0xff] }
 0x107   :  { %1637 = vmatprep.mubr.f32.mxu1 %v9453_v33  ;;  %9139 = vmatpush1.bf16.msra.mxu1 %v9138_v3  ;;  %v2524_v3 = vld [vmem:[#allocation6 + $0x3d8] sm:$0xff]  ;;  %v15036_v33 = vld [vmem:[#allocation13_spill] sm:$0xff]  ;;  %v10165_v19 = vld [vmem:[#allocation2 + $0x288] sm:$0xff] }
 0x108   :  { %9140 = vmatprep.subr.bf16.mxu1 %v15035_v41  ;;  %993 = vmatmul.mubr.f32.gmra.mrb[66].mxu0 %v10074_v62 }
 0x109   :  { %997 = vmatprep.mubr.f32.mxu0 %v9863_v15  ;;  %v358_v15 = vld [vmem:[#allocation2 + $0x91] sm:$0xff] }
 0x10a   :  { %1638 = vmatmul.mubr.f32.gmra.mrb[80].mxu1 %v9952_v36  ;;  %v357_v36 = vld [vmem:[#allocation2 + $0x81] sm:$0xff] }
 0x10b   :  { %1642 = vmatprep.mubr.f32.mxu1 %v355_v45  ;;  %9142 = vmatpush1.bf16.msra.mxu1 %v9141_v51  ;;  %v10156_v51 = vld [vmem:[#allocation2 + $0x278] sm:$0xff] }
 0x10c   :  { %9143 = vmatprep.subr.bf16.mxu1 %v15035_v41  ;;  %998 = vmatmul.mubr.f32.gmra.mrb[68].mxu0 %v10080_v7 }
 0x10d   :  { %1002 = vmatprep.mubr.f32.mxu0 %v9865_v17  ;;  %v359_v17 = vld [vmem:[#allocation2 + $0x99] sm:$0xff] }
 0x10e   :  { %1643 = vmatmul.mubr.f32.gmra.mrb[82].mxu1 %v9957_v55  ;;  %v10092_v55 = vld [vmem:[#allocation2 + $0x1f8] sm:$0xff] }
 0x10f   :  { %1647 = vmatprep.mubr.f32.mxu1 %v356_v47  ;;  %9145 = vmatpush1.bf16.msra.mxu1 %v9144_v6  ;;  %v371_v47 = vld [vmem:[#allocation2 + $0x129] sm:$0xff] }
 0x110   :  { %9146 = vmatprep.subr.bf16.mxu1 %v15035_v41  ;;  %1003 = vmatmul.mubr.f32.gmra.mrb[70].mxu0 %v10086_v34 }
 0x111   :  { %1007 = vmatprep.mubr.f32.mxu0 %v9869_v21  ;;  %v360_v21 = vld [vmem:[#allocation2 + $0xa9] sm:$0xff] }
 0x112   :  { %1648 = vmatmul.mubr.f32.gmra.mrb[84].mxu1 %v9962_v32  ;;  %v10097_v32 = vld [vmem:[#allocation2 + $0x200] sm:$0xff] }
 0x113   :  { %1652 = vmatprep.mubr.f32.mxu1 %v357_v36  ;;  %9148 = vmatpush1.bf16.msra.mxu1 %v9147_v5  ;;  %v2525_v36 = vld [vmem:[#allocation6 + $0x3e0] sm:$0xff] }
 0x114   :  { %9149 = vmatprep.subr.bf16.mxu1 %v15035_v41  ;;  %1008 = vmatmul.mubr.f32.gmra.mrb[72].mxu0 %v10092_v55 }
 0x115   :  { %1012 = vmatprep.mubr.f32.mxu0 %v9872_v24  ;;  %v361_v24 = vld [vmem:[#allocation2 + $0xb1] sm:$0xff] }
 0x116   :  { %1653 = vmatmul.mubr.f32.gmra.mrb[86].mxu1 %v9967_v0  ;;  %v10102_v0 = vld [vmem:[#allocation2 + $0x210] sm:$0xff] }
 0x117   :  { %1657 = vmatprep.mubr.f32.mxu1 %v358_v15  ;;  %9151 = vmatpush1.bf16.msra.mxu1 %v9150_v37  ;;  %v2526_v15 = vld [vmem:[#allocation6 + $0x3e8] sm:$0xff]  ;;  %v10183_v37 = vld [vmem:[#allocation2 + $0x2a0] sm:$0xff] }
 0x118   :  { %1013 = vmatmul.mubr.f32.gmra.mrb[74].mxu0 %v10097_v32  ;;  %9152 = vmatprep.subr.bf16.mxu1 %v15035_v41 }
 0x119   :  { %1017 = vmatprep.mubr.f32.mxu0 %v9876_v30  ;;  %v362_v30 = vld [vmem:[#allocation2 + $0xc1] sm:$0xff] }
 0x11a   :  { %1658 = vmatmul.mubr.f32.gmra.mrb[88].mxu1 %v9971_v38  ;;  %v10108_v38 = vld [vmem:[#allocation2 + $0x218] sm:$0xff] }
 0x11b   :  { %1662 = vmatprep.mubr.f32.mxu1 %v359_v17  ;;  %v9159_v17 = vpack.c.bf16 %v2526_v15, %v2525_v36  ;;  %v10219_v36 = vld [vmem:[#allocation2 + $0x2d0] sm:$0xff] }
 0x11c   :  { %1018 = vmatmul.mubr.f32.gmra.mrb[76].mxu0 %v10102_v0 }
 0x11d   :  { %1022 = vmatprep.mubr.f32.mxu0 %v9878_v31  ;;  %v10118_v31 = vld [vmem:[#allocation2 + $0x230] sm:$0xff] }
 0x11e   :  { %1663 = vmatmul.mubr.f32.gmra.mrb[90].mxu1 %v9975_v28  ;;  %v363_v28 = vld [vmem:[#allocation2 + $0xc9] sm:$0xff] }
 0x11f   :  { %1667 = vmatprep.mubr.f32.mxu1 %v360_v21 }
 0x120   :  { %1023 = vmatmul.mubr.f32.gmra.mrb[78].mxu0 %v10108_v38 }
 0x121   :  { %1027 = vmatprep.mubr.f32.mxu0 %v9883_v48  ;;  %v364_v48 = vld [vmem:[#allocation2 + $0xd9] sm:$0xff] }
 0x122   :  { %1668 = vmatmul.mubr.f32.gmra.mrb[92].mxu1 %v9979_v53  ;;  %v2521_v53 = vld [vmem:[#allocation6 + $0x3c0] sm:$0xff] }
 0x123   :  { %1672 = vmatprep.mubr.f32.mxu1 %v361_v24  ;;  %v9153_v8 = vpack.c.bf16 %v2522_v58, %v2521_v53 }
 0x124   :  { %1028 = vmatmul.mubr.f32.gmra.mrb[80].mxu0 %v10113_v23 }
 0x125   :  { %1032 = vmatprep.mubr.f32.mxu0 %v9885_v49  ;;  %9154 = vmatpush1.bf16.msra.mxu1 %v9153_v8  ;;  %v365_v49 = vld [vmem:[#allocation2 + $0xe1] sm:$0xff]  ;;  %v9455_v8 = vld [vmem:[#allocation2 + $0x2b9] sm:$0xff] }
 0x126   :  { %1673 = vmatmul.mubr.f32.gmra.mrb[94].mxu1 %v9983_v54  ;;  %v10123_v54 = vld [vmem:[#allocation2 + $0x240] sm:$0xff]  ;;  %9155 = vmatprep.subr.bf16.mxu1 %v15035_v41 }
 0x127   :  { %1677 = vmatprep.mubr.f32.mxu1 %v362_v30  ;;  %v9454_v30 = vld [vmem:[#allocation2 + $0x2a9] sm:$0xff] }
 0x128   :  { %1033 = vmatmul.mubr.f32.gmra.mrb[82].mxu0 %v10118_v31 }
 0x129   :  { %1037 = vmatprep.mubr.f32.mxu0 %v9890_v57  ;;  %v366_v57 = vld [vmem:[#allocation2 + $0xf1] sm:$0xff] }
 0x12a   :  { %1678 = vmatmul.mubr.f32.gmra.mrb[96].mxu1 %v9987_v56  ;;  %v10129_v56 = vld [vmem:[#allocation2 + $0x248] sm:$0xff] }
 0x12b   :  { %1682 = vmatprep.mubr.f32.mxu1 %v363_v28  ;;  %v10192_v28 = vld [vmem:[#allocation2 + $0x2a8] sm:$0xff] }
 0x12c   :  { %1038 = vmatmul.mubr.f32.gmra.mrb[84].mxu0 %v10123_v54 }
 0x12d   :  { %1042 = vmatprep.mubr.f32.mxu0 %v9892_v61  ;;  %v10139_v61 = vld [vmem:[#allocation2 + $0x260] sm:$0xff] }
 0x12e   :  { %1683 = vmatmul.mubr.f32.gmra.mrb[98].mxu1 %v9991_v60  ;;  %v367_v60 = vld [vmem:[#allocation2 + $0xf9] sm:$0xff] }
 0x12f   :  { %1687 = vmatprep.mubr.f32.mxu1 %v364_v48  ;;  %v10200_v48 = vld [vmem:[#allocation2 + $0x2b8] sm:$0xff] }
 0x130   :  { %1043 = vmatmul.mubr.f32.gmra.mrb[86].mxu0 %v10129_v56 }
 0x131   :  { %1047 = vmatprep.mubr.f32.mxu0 %v9897_v9  ;;  %v368_v9 = vld [vmem:[#allocation2 + $0x109] sm:$0xff] }
 0x132   :  { %1688 = vmatmul.mubr.f32.gmra.mrb[100].mxu1 %v9995_v1  ;;  %v2523_v1 = vld [vmem:[#allocation6 + $0x3d0] sm:$0xff] }
 0x133   :  { %1692 = vmatprep.mubr.f32.mxu1 %v365_v49  ;;  %v9156_v46 = vpack.c.bf16 %v2524_v3, %v2523_v1  ;;  %v10208_v1 = vld [vmem:[#allocation2 + $0x2c0] sm:$0xff] }
 0x134   :  { %1048 = vmatmul.mubr.f32.gmra.mrb[88].mxu0 %v10134_v18 }
 0x135   :  { %1052 = vmatprep.mubr.f32.mxu0 %v9899_v12  ;;  %9157 = vmatpush1.bf16.msra.mxu1 %v9156_v46  ;;  %v369_v12 = vld [vmem:[#allocation2 + $0x111] sm:$0xff] }
 0x136   :  { %1693 = vmatmul.mubr.f32.gmra.mrb[102].mxu1 %v9999_v40  ;;  %v10146_v40 = vld [vmem:[#allocation2 + $0x270] sm:$0xff]  ;;  %9158 = vmatprep.subr.bf16.mxu1 %v15035_v41 }
 0x137   :  { %1697 = vmatprep.mubr.f32.mxu1 %v366_v57  ;;  %v375_v57 = vld [vmem:[#allocation2 + $0x159] sm:$0xff]  ;;  %v2527_v46 = vld [vmem:[#allocation6 + $0x3f0] sm:$0xff] }
 0x138   :  { %1053 = vmatmul.mubr.f32.gmra.mrb[90].mxu0 %v10139_v61 }
 0x139   :  { %1057 = vmatprep.mubr.f32.mxu0 %v9905_v39  ;;  %9160 = vmatpush1.bf16.msra.mxu1 %v9159_v17 }
 0x13a   :  { %1698 = vmatmul.mubr.f32.gmra.mrb[104].mxu1 %v10003_v42  ;;  %9161 = vmatprep.subr.bf16.mxu1 %v15035_v41 }
 0x13b   :  { %1702 = vmatprep.mubr.f32.mxu1 %v367_v60 }
 0x13c   :  { %1058 = vmatmul.mubr.f32.gmra.mrb[92].mxu0 %v10146_v40 }
 0x13d   :  { %v10143_v29 = vpop.f32.mrb[0].mxu1  ;;  %1062 = vmatprep.mubr.f32.mxu0 %v15036_v33 }
 0x13e   :  { %v10148_v52 = vpop.f32.mrb[1].mxu1  ;;  %1703 = vmatmul.mubr.f32.gmra.mrb[106].mxu1 %v10007_v35  ;;  %v370_v35 = vld [vmem:[#allocation2 + $0x121] sm:$0xff] }
 0x13f   :  { %1707 = vmatprep.mubr.f32.mxu1 %v368_v9  ;;  %v2528_v9 = vld [vmem:[#allocation6 + $0x3f8] sm:$0xff] }
 0x140   :  { %1063 = vmatmul.mubr.f32.gmra.mrb[94].mxu0 %v10156_v51  ;;  %v9162_v33 = vpack.c.bf16 %v2528_v9, %v2527_v46  ;;  %v9459_v46 = vld [vmem:[#allocation2 + $0x2e9] sm:$0xff] }
 0x141   :  { %v10153_v42 = vpop.f32.mrb[2].mxu1  ;;  %1067 = vmatprep.mubr.f32.mxu0 %v15037_v4  ;;  %v376_v4 = vld [vmem:[#allocation2 + $0x169] sm:$0xff] }
 0x142   :  { %v10158_v39 = vpop.f32.mrb[3].mxu1  ;;  %1708 = vmatmul.mubr.f32.gmra.mrb[108].mxu1 %v10011_v10  ;;  %v15038_v10 = vld [vmem:[#allocation15_spill] sm:$0xff]  ;;  %v10241_v9 = vld [vmem:[#allocation2 + $0x2e8] sm:$0xff] }
 0x143   :  { %1712 = vmatprep.mubr.f32.mxu1 %v369_v12  ;;  %9163 = vmatpush1.bf16.msra.mxu1 %v9162_v33  ;;  %15040 = vst [vmem:[#allocation13_spill] sm:$0xff] %v10241_v9  ;;  %v2530_v33 = vld [vmem:[#allocation6 + $0x408] sm:$0xff] }
 0x144   :  { %1068 = vmatmul.mubr.f32.gmra.mrb[96].mxu0 %v10165_v19 }
 0x145   :  { %v10162_v45 = vpop.f32.mrb[4].mxu1  ;;  %1072 = vmatprep.mubr.f32.mxu0 %v15038_v10  ;;  %v9457_v10 = vld [vmem:[#allocation2 + $0x2d1] sm:$0xff] }
 0x146   :  { %v10167_v6 = vpop.f32.mrb[5].mxu1  ;;  %1713 = vmatmul.mubr.f32.gmra.mrb[110].mxu1 %v10015_v11  ;;  %v372_v11 = vld [vmem:[#allocation2 + $0x139] sm:$0xff] }
 0x147   :  { %1717 = vmatprep.mubr.f32.mxu1 %v370_v35 }
 0x148   :  { %1073 = vmatmul.mubr.f32.gmra.mrb[98].mxu0 %v10174_v14 }
 0x149   :  { %v10171_v27 = vpop.f32.mrb[6].mxu1  ;;  %1077 = vmatprep.mubr.f32.mxu0 %v15039_v63 }
 0x14a   :  { %v10176_v5 = vpop.f32.mrb[7].mxu1  ;;  %1718 = vmatmul.mubr.f32.gmra.mrb[112].mxu1 %v10019_v13  ;;  %v373_v13 = vld [vmem:[#allocation2 + $0x141] sm:$0xff] }
 0x14b   :  { %1722 = vmatprep.mubr.f32.mxu1 %v371_v47 }
 0x14c   :  { %1078 = vmatmul.mubr.f32.gmra.mrb[100].mxu0 %v10183_v37 }
 0x14d   :  { %v10180_v20 = vpop.f32.mrb[8].mxu1  ;;  %1082 = vmatprep.mubr.f32.mxu0 %v9454_v30  ;;  %v10230_v30 = vld [vmem:[#allocation2 + $0x2d8] sm:$0xff] }
 0x14e   :  { %v10185_v21 = vpop.f32.mrb[9].mxu1  ;;  %1723 = vmatmul.mubr.f32.gmra.mrb[114].mxu1 %v10023_v16  ;;  %v374_v16 = vld [vmem:[#allocation2 + $0x151] sm:$0xff] }
 0x14f   :  { %1727 = vmatprep.mubr.f32.mxu1 %v372_v11  ;;  %v377_v11 = vld [vmem:[#allocation2 + $0x171] sm:$0xff] }
 0x150   :  { %1083 = vmatmul.mubr.f32.gmra.mrb[102].mxu0 %v10192_v28 }
 0x151   :  { %v10190_v24 = vpop.f32.mrb[10].mxu1  ;;  %1087 = vmatprep.mubr.f32.mxu0 %v9455_v8 }
 0x152   :  { %v10194_v53 = vpop.f32.mrb[11].mxu1  ;;  %1728 = vmatmul.mubr.f32.gmra.mrb[116].mxu1 %v10027_v50  ;;  %v9456_v50 = vld [vmem:[#allocation2 + $0x2c1] sm:$0xff] }
 0x153   :  { %1732 = vmatprep.mubr.f32.mxu1 %v373_v13  ;;  %v829_v12 = vpop.f32.mrb[0].mxu0  ;;  %v9458_v13 = vld [vmem:[#allocation2 + $0x2d9] sm:$0xff] }
 0x154   :  { %1088 = vmatmul.mubr.f32.gmra.mrb[104].mxu0 %v10200_v48  ;;  %v831_v35 = vpop.f32.mrb[1].mxu0 }
 0x155   :  { %v10198_v58 = vpop.f32.mrb[12].mxu1  ;;  %1092 = vmatprep.mubr.f32.mxu0 %v9456_v50 }
 0x156   :  { %v10202_v49 = vpop.f32.mrb[13].mxu1  ;;  %1733 = vmatmul.mubr.f32.gmra.mrb[118].mxu1 %v10031_v44  ;;  %v10214_v44 = vadd.f32 %v10148_v52, %v829_v12 }
 0x157   :  { %1737 = vmatprep.mubr.f32.mxu1 %v374_v16 }
 0x158   :  { %1093 = vmatmul.mubr.f32.gmra.mrb[106].mxu0 %v10208_v1 }
 0x159   :  { %v10206_v60 = vpop.f32.mrb[14].mxu1  ;;  %1097 = vmatprep.mubr.f32.mxu0 %v9457_v10 }
 0x15a   :  { %v10210_v3 = vpop.f32.mrb[15].mxu1  ;;  %1738 = vmatmul.mubr.f32.gmra.mrb[120].mxu1 %v10036_v2 }
 0x15b   :  { %1742 = vmatprep.mubr.f32.mxu1 %v375_v57  ;;  %v834_v15 = vpop.f32.mrb[2].mxu0  ;;  %v378_v57 = vld [vmem:[#allocation2 + $0x1b1] sm:$0xff] }
 0x15c   :  { %v10225_v52 = vadd.f32 %v10143_v29, %v834_v15  ;;  %1098 = vmatmul.mubr.f32.gmra.mrb[108].mxu0 %v10219_v36  ;;  %v836_v17 = vpop.f32.mrb[3].mxu0 }
 0x15d   :  { %v10217_v47 = vpop.f32.mrb[16].mxu1  ;;  %1102 = vmatprep.mubr.f32.mxu0 %v9458_v13  ;;  %v379_v17 = vld [vmem:[#allocation2 + $0x1b9] sm:$0xff]  ;;  %v9460_v13 = vld [vmem:[#allocation2 + $0x2f1] sm:$0xff] }
 0x15e   :  { %v10221_v2 = vpop.f32.mrb[17].mxu1  ;;  %1743 = vmatmul.mubr.f32.gmra.mrb[122].mxu1 %v10044_v22 }
 0x15f   :  { %1747 = vmatprep.mubr.f32.mxu1 %v376_v4  ;;  %v839_v22 = vpop.f32.mrb[4].mxu0 }
 0x160   :  { %v10236_v8 = vadd.f32 %v10158_v39, %v839_v22  ;;  %1103 = vmatmul.mubr.f32.gmra.mrb[110].mxu0 %v10230_v30  ;;  %v841_v29 = vpop.f32.mrb[5].mxu0  ;;  %v314_v39 = vld [vmem:[#allocation2 + $0x1b0] sm:$0xff] }
 0x161   :  { %v10228_v63 = vpop.f32.mrb[18].mxu1  ;;  %1107 = vmatprep.mubr.f32.mxu0 %v9459_v46  ;;  %v10254_v22 = vld [vmem:[#allocation2 + $0x2f0] sm:$0xff] }
 0x162   :  { %v10232_v16 = vpop.f32.mrb[19].mxu1  ;;  %1748 = vmatmul.mubr.f32.gmra.mrb[124].mxu1 %v10050_v43  ;;  %v2529_v43 = vld [vmem:[#allocation6 + $0x400] sm:$0xff]  ;;  %15041 = vst [vmem:[#allocation14_spill] sm:$0xff] %v10254_v22  ;;  %v380_v46 = vld [vmem:[#allocation2 + $0x1c9] sm:$0xff] }
 0x163   :  { %1752 = vmatprep.mubr.f32.mxu1 %v377_v11  ;;  %v844_v35 = vpop.f32.mrb[6].mxu0  ;;  %v10246_v4 = vpack.c.bf16 %v2530_v33, %v2529_v43  ;;  %v9461_v33 = vld [vmem:[#allocation2 + $0x301] sm:$0xff] }
 0x164   :  { %v10249_v10 = vadd.f32 %v10153_v42, %v844_v35  ;;  %1108 = vmatmul.mubr.f32.gmra.mrb[112].mxu0 %v10241_v9  ;;  %v846_v15 = vpop.f32.mrb[7].mxu0  ;;  %v10265_v35 = vld [vmem:[#allocation2 + $0x300] sm:$0xff] }
 0x165   :  { %v10239_v50 = vpop.f32.mrb[20].mxu1  ;;  %1112 = vmatprep.mubr.f32.mxu0 %v9460_v13  ;;  %9165 = vmatprep.subr.bf16.mxu0 %v10246_v4  ;;  %15042 = vst [vmem:[#allocation15_spill] sm:$0xff] %v10265_v35  ;;  %v381_v13 = vld [vmem:[#allocation2 + $0x1d1] sm:$0xff] }
 0x166   :  { %v10243_v12 = vpop.f32.mrb[21].mxu1  ;;  %1753 = vmatmul.mubr.f32.gmra.mrb[126].mxu1 %v10056_v25 }
 0x167   :  { %1757 = vmatprep.mubr.f32.mxu1 %v378_v57  ;;  %v849_v29 = vpop.f32.mrb[8].mxu0 }
 0x168   :  { %v10260_v42 = vadd.f32 %v10167_v6, %v849_v29  ;;  %1113 = vmatmul.mubr.f32.gmra.mrb[114].mxu0 %v10254_v22  ;;  %v851_v57 = vpop.f32.mrb[9].mxu0 }
 0x169   :  { %v10252_v11 = vpop.f32.mrb[22].mxu1  ;;  %1117 = vmatprep.mubr.f32.mxu0 %v9461_v33  ;;  %v9462_v57 = vld [vmem:[#allocation2 + $0x309] sm:$0xff] }
 0x16a   :  { %v10257_v25 = vpop.f32.mrb[23].mxu1  ;;  %1758 = vmatmul.mubr.f32.gmra.mrb[128].mxu1 %v314_v39  ;;  %v10276_v33 = vld [vmem:[#allocation2 + $0x308] sm:$0xff] }
 0x16b   :  { %1762 = vmatprep.mubr.f32.mxu1 %v379_v17  ;;  %v854_v39 = vpop.f32.mrb[10].mxu0  ;;  %15043 = vst [vmem:[#allocation16_spill] sm:$0xff] %v10276_v33 }
 0x16c   :  { %v10271_v17 = vadd.f32 %v10162_v45, %v854_v39  ;;  %1118 = vmatmul.mubr.f32.gmra.mrb[116].mxu0 %v10265_v35  ;;  %v856_v6 = vpop.f32.mrb[11].mxu0  ;;  %v382_v39 = vld [vmem:[#allocation2 + $0x1e1] sm:$0xff]  ;;  %v9463_v35 = vld [vmem:[#allocation2 + $0x319] sm:$0xff] }
 0x16d   :  { %v10263_v43 = vpop.f32.mrb[24].mxu1  ;;  %1122 = vmatprep.mubr.f32.mxu0 %v9462_v57  ;;  %v10287_v57 = vld [vmem:[#allocation2 + $0x318] sm:$0xff] }
 0x16e   :  { %v10267_v15 = vpop.f32.mrb[25].mxu1  ;;  %1763 = vmatmul.mubr.f32.gmra.mrb[130].mxu1 %v10038_v26  ;;  %15045 = vst [vmem:[#allocation18_spill] sm:$0xff] %v10287_v57 }
 0x16f   :  { %1767 = vmatprep.mubr.f32.mxu1 %v380_v46  ;;  %v859_v26 = vpop.f32.mrb[12].mxu0 }
 0x170   :  { %v10282_v46 = vadd.f32 %v10176_v5, %v859_v26  ;;  %1123 = vmatmul.mubr.f32.gmra.mrb[118].mxu0 %v10276_v33  ;;  %v861_v45 = vpop.f32.mrb[13].mxu0  ;;  %v383_v26 = vld [vmem:[#allocation2 + $0x1e9] sm:$0xff]  ;;  %v9464_v33 = vld [vmem:[#allocation2 + $0x321] sm:$0xff] }
 0x171   :  { %v10274_v29 = vpop.f32.mrb[26].mxu1  ;;  %1127 = vmatprep.mubr.f32.mxu0 %v9463_v35  ;;  %v10298_v35 = vld [vmem:[#allocation2 + $0x320] sm:$0xff] }
 0x172   :  { %v10278_v22 = vpop.f32.mrb[27].mxu1  ;;  %1768 = vmatmul.mubr.f32.gmra.mrb[132].mxu1 %v10068_v59  ;;  %15044 = vst [vmem:[#allocation17_spill] sm:$0xff] %v10282_v46  ;;  %15048 = vst [vmem:[#allocation21_spill] sm:$0xff] %v10298_v35 }
 0x173   :  { %1772 = vmatprep.mubr.f32.mxu1 %v381_v13  ;;  %v864_v59 = vpop.f32.mrb[14].mxu0 }
 0x174   :  { %v10293_v13 = vadd.f32 %v10171_v27, %v864_v59  ;;  %1128 = vmatmul.mubr.f32.gmra.mrb[120].mxu0 %v10287_v57  ;;  %v866_v5 = vpop.f32.mrb[15].mxu0  ;;  %v384_v59 = vld [vmem:[#allocation2 + $0x1f9] sm:$0xff]  ;;  %v9465_v57 = vld [vmem:[#allocation2 + $0x331] sm:$0xff] }
 0x175   :  { %v10285_v6 = vpop.f32.mrb[28].mxu1  ;;  %1132 = vmatprep.mubr.f32.mxu0 %v9464_v33  ;;  %v584_v33 = vld [vmem:[#allocation2 + $0x330] sm:$0xff] }
 0x176   :  { %v10289_v9 = vpop.f32.mrb[29].mxu1  ;;  %1773 = vmatmul.mubr.f32.gmra.mrb[134].mxu1 %v10074_v62  ;;  %15046 = vst [vmem:[#allocation19_spill] sm:$0xff] %v10293_v13 }
 0x177   :  { %1777 = vmatprep.mubr.f32.mxu1 %v382_v39  ;;  %v869_v62 = vpop.f32.mrb[16].mxu0 }
 0x178   :  { %v10304_v39 = vadd.f32 %v10185_v21, %v869_v62  ;;  %1133 = vmatmul.mubr.f32.gmra.mrb[122].mxu0 %v10298_v35  ;;  %v871_v27 = vpop.f32.mrb[17].mxu0  ;;  %v585_v35 = vld [vmem:[#allocation2 + $0x338] sm:$0xff] }
 0x179   :  { %v10296_v45 = vpop.f32.mrb[30].mxu1  ;;  %1137 = vmatprep.mubr.f32.mxu0 %v9465_v57  ;;  %v9466_v27 = vld [vmem:[#allocation2 + $0x339] sm:$0xff]  ;;  %v410_v57 = vld [vmem:[#allocation2 + $0x2] sm:$0xff] }
 0x17a   :  { %15047 = vst [vmem:[#allocation20_spill] sm:$0xff] %v10296_v45  ;;  %v10300_v46 = vpop.f32.mrb[31].mxu1  ;;  %1778 = vmatmul.mubr.f32.gmra.mrb[136].mxu1 %v10080_v7  ;;  %15049 = vst [vmem:[#allocation22_spill] sm:$0xff] %v10304_v39 }
 0x17b   :  { %1782 = vmatprep.mubr.f32.mxu1 %v383_v26  ;;  %v874_v45 = vpop.f32.mrb[18].mxu0  ;;  %v385_v26 = vld [vmem:[#allocation2 + $0x201] sm:$0xff] }
 0x17c   :  { %v10313_v7 = vadd.f32 %v10180_v20, %v874_v45  ;;  %1138 = vmatmul.mubr.f32.gmra.mrb[124].mxu0 %v584_v33  ;;  %v876_v21 = vpop.f32.mrb[19].mxu0  ;;  %v386_v33 = vld [vmem:[#allocation2 + $0x211] sm:$0xff] }
 0x17d   :  { %v10307_v5 = vpop.f32.mrb[32].mxu1  ;;  %1142 = vmatprep.mubr.f32.mxu0 %v9466_v27  ;;  %v411_v27 = vld [vmem:[#allocation2 + $0xa] sm:$0xff] }
 0x17e   :  { %15050 = vst [vmem:[#allocation23_spill] sm:$0xff] %v10307_v5  ;;  %v10309_v13 = vpop.f32.mrb[33].mxu1  ;;  %1783 = vmatmul.mubr.f32.gmra.mrb[138].mxu1 %v10086_v34  ;;  %15052 = vst [vmem:[#allocation25_spill] sm:$0xff] %v10313_v7  ;;  %v2531_v34 = vld [vmem:[#allocation6 + $0x410] sm:$0xff] }
 0x17f   :  { %15051 = vst [vmem:[#allocation24_spill] sm:$0xff] %v10309_v13  ;;  %1787 = vmatprep.mubr.f32.mxu1 %v384_v59  ;;  %v879_v39 = vpop.f32.mrb[20].mxu0  ;;  %v2532_v59 = vld [vmem:[#allocation6 + $0x418] sm:$0xff]  ;;  %v2534_v13 = vld [vmem:[#allocation6 + $0x428] sm:$0xff] }
 0x180   :  { %v10321_v20 = vadd.f32 %v10194_v53, %v879_v39  ;;  %1143 = vmatmul.mubr.f32.gmra.mrb[126].mxu0 %v585_v35  ;;  %v881_v45 = vpop.f32.mrb[21].mxu0  ;;  %v387_v39 = vld [vmem:[#allocation2 + $0x219] sm:$0xff] }
 0x181   :  { %v10315_v62 = vpop.f32.mrb[34].mxu1  ;;  %8348 = vmatprep.mubr.f32.mxu0 %v410_v57  ;;  %v413_v57 = vld [vmem:[#allocation2 + $0x22] sm:$0xff] }
 0x182   :  { %15053 = vst [vmem:[#allocation26_spill] sm:$0xff] %v10315_v62  ;;  %v10317_v5 = vpop.f32.mrb[35].mxu1  ;;  %1788 = vmatmul.mubr.f32.gmra.mrb[140].mxu1 %v10092_v55  ;;  %v412_v55 = vld [vmem:[#allocation2 + $0x1a] sm:$0xff] }
 0x183   :  { %15054 = vst [vmem:[#allocation27_spill] sm:$0xff] %v10317_v5  ;;  %1792 = vmatprep.mubr.f32.mxu1 %v385_v26  ;;  %v9168_v5 = vpack.c.bf16 %v2532_v59, %v2531_v34  ;;  %v884_v7 = vpop.f32.mrb[22].mxu0  ;;  %v2533_v26 = vld [vmem:[#allocation6 + $0x420] sm:$0xff] }
 0x184   :  { %v10329_v53 = vadd.f32 %v10190_v24, %v884_v7  ;;  %8349 = vmatmul.mubr.f32.vlgmr.msra.gmra.mrb[128].mxu0 %v411_v27  ;;  %v886_v35 = vpop.f32.mrb[23].mxu0  ;;  %v9172_v34 = vpack.c.bf16 %v2534_v13, %v2533_v26  ;;  %v2535_v24 = vld [vmem:[#allocation6 + $0x430] sm:$0xff]  ;;  %v2536_v7 = vld [vmem:[#allocation6 + $0x438] sm:$0xff] }
 0x185   :  { %v10323_v21 = vpop.f32.mrb[36].mxu1  ;;  %8351 = vmatprep.mubr.f32.mxu0 %v412_v55  ;;  %9167 = vmatpush3.bf16.msra.mxu0 %v10246_v4  ;;  %v388_v55 = vld [vmem:[#allocation2 + $0x229] sm:$0xff]  ;;  %v10345_v4 = vld [vmem:[#allocation2 + $0x3a] sm:$0xff]  ;;  %v9176_v26 = vpack.c.bf16 %v2536_v7, %v2535_v24 }
 0x186   :  { %15055 = vst [vmem:[#allocation28_spill] sm:$0xff] %v10323_v21  ;;  %v10325_v62 = vpop.f32.mrb[37].mxu1  ;;  %1793 = vmatmul.mubr.f32.gmra.mrb[142].mxu1 %v10097_v32  ;;  %v10337_v32 = vld [vmem:[#allocation2 + $0x32] sm:$0xff]  ;;  %9169 = vmatprep.subr.bf16.mxu0 %v9168_v5  ;;  %15058 = vst [vmem:[#allocation31_spill] sm:$0xff] %v10345_v4  ;;  %v10350_v13 = vld [vmem:[#allocation2 + $0x4a] sm:$0xff] }
 0x187   :  { %1797 = vmatprep.mubr.f32.mxu1 %v386_v33  ;;  %15056 = vst [vmem:[#allocation29_spill] sm:$0xff] %v10337_v32  ;;  %v889_v59 = vpop.f32.mrb[24].mxu0  ;;  %15059 = vst [vmem:[#allocation32_spill] sm:$0xff] %v10350_v13  ;;  %v10364_v24 = vld [vmem:[#allocation2 + $0x62] sm:$0xff] }
 0x188   :  { %v10340_v33 = vadd.f32 %v10202_v49, %v889_v59  ;;  %8352 = vmatmul.mubr.f32.gmra.mrb[130].mxu0 %v413_v57  ;;  %v891_v27 = vpop.f32.mrb[25].mxu0  ;;  %v2538_v57 = vld [vmem:[#allocation6 + $0x448] sm:$0xff]  ;;  %15062 = vst [vmem:[#allocation35_spill] sm:$0xff] %v10364_v24 }
 0x189   :  { %v10331_v45 = vpop.f32.mrb[38].mxu1  ;;  %8354 = vmatprep.mubr.f32.mxu0 %v10337_v32  ;;  %9171 = vmatpush3.bf16.msra.mxu0 %v9168_v5  ;;  %v389_v32 = vld [vmem:[#allocation2 + $0x231] sm:$0xff] }
 0x18a   :  { %v10334_v21 = vpop.f32.mrb[39].mxu1  ;;  %1798 = vmatmul.mubr.f32.gmra.mrb[144].mxu1 %v10102_v0  ;;  %9173 = vmatprep.subr.bf16.mxu0 %v9172_v34 }
 0x18b   :  { %1802 = vmatprep.mubr.f32.mxu1 %v387_v39  ;;  %v894_v49 = vpop.f32.mrb[26].mxu0  ;;  %v2537_v39 = vld [vmem:[#allocation6 + $0x440] sm:$0xff] }
 0x18c   :  { %v10353_v59 = vadd.f32 %v10198_v58, %v894_v49  ;;  %8355 = vmatmul.mubr.f32.gmra.mrb[132].mxu0 %v10345_v4  ;;  %v896_v27 = vpop.f32.mrb[27].mxu0  ;;  %v9180_v58 = vpack.c.bf16 %v2538_v57, %v2537_v39  ;;  %v2540_v49 = vld [vmem:[#allocation6 + $0x458] sm:$0xff]  ;;  %v390_v4 = vld [vmem:[#allocation2 + $0x241] sm:$0xff] }
 0x18d   :  { %v10342_v35 = vpop.f32.mrb[40].mxu1  ;;  %8357 = vmatprep.mubr.f32.mxu0 %v10350_v13  ;;  %9175 = vmatpush3.bf16.msra.mxu0 %v9172_v34  ;;  %v2541_v57 = vld [vmem:[#allocation6 + $0x460] sm:$0xff] }
 0x18e   :  { %15057 = vst [vmem:[#allocation30_spill] sm:$0xff] %v10342_v35  ;;  %v10347_v0 = vpop.f32.mrb[41].mxu1  ;;  %1803 = vmatmul.mubr.f32.gmra.mrb[146].mxu1 %v10108_v38  ;;  %v10359_v38 = vld [vmem:[#allocation2 + $0x52] sm:$0xff]  ;;  %9177 = vmatprep.subr.bf16.mxu0 %v9176_v26 }
 0x18f   :  { %1807 = vmatprep.mubr.f32.mxu1 %v388_v55  ;;  %15061 = vst [vmem:[#allocation34_spill] sm:$0xff] %v10359_v38  ;;  %v899_v7 = vpop.f32.mrb[28].mxu0  ;;  %v2539_v55 = vld [vmem:[#allocation6 + $0x450] sm:$0xff] }
 0x190   :  { %v10367_v27 = vadd.f32 %v10210_v3, %v899_v7  ;;  %8358 = vmatmul.mubr.f32.gmra.mrb[134].mxu0 %v10359_v38  ;;  %v901_v13 = vpop.f32.mrb[29].mxu0  ;;  %v9184_v3 = vpack.c.bf16 %v2540_v49, %v2539_v55  ;;  %v2543_v49 = vld [vmem:[#allocation6 + $0x470] sm:$0xff] }
 0x191   :  { %v10356_v5 = vpop.f32.mrb[42].mxu1  ;;  %8360 = vmatprep.mubr.f32.mxu0 %v10364_v24  ;;  %9179 = vmatpush3.bf16.msra.mxu0 %v9176_v26  ;;  %v2542_v13 = vld [vmem:[#allocation6 + $0x468] sm:$0xff] }
 0x192   :  { %15060 = vst [vmem:[#allocation33_spill] sm:$0xff] %v10356_v5  ;;  %v10361_v35 = vpop.f32.mrb[43].mxu1  ;;  %1808 = vmatmul.mubr.f32.gmra.mrb[148].mxu1 %v10113_v23  ;;  %v10373_v23 = vld [vmem:[#allocation2 + $0x6a] sm:$0xff]  ;;  %9181 = vmatprep.subr.bf16.mxu0 %v9180_v58 }
 0x193   :  { %1812 = vmatprep.mubr.f32.mxu1 %v389_v32  ;;  %v10378_v32 = vld [vmem:[#allocation2 + $0x7a] sm:$0xff]  ;;  %v904_v39 = vpop.f32.mrb[30].mxu0  ;;  %v391_v24 = vld [vmem:[#allocation2 + $0x249] sm:$0xff] }
 0x194   :  { %15064 = vst [vmem:[#allocation37_spill] sm:$0xff] %v10378_v32  ;;  %v10381_v7 = vadd.f32 %v10206_v60, %v904_v39  ;;  %8361 = vmatmul.mubr.f32.gmra.mrb[136].mxu0 %v10373_v23  ;;  %v9188_v60 = vpack.c.bf16 %v2542_v13, %v2541_v57 }
 0x195   :  { %v10370_v34 = vpop.f32.mrb[44].mxu1  ;;  %8363 = vmatprep.mubr.f32.mxu0 %v10378_v32  ;;  %9183 = vmatpush3.bf16.msra.mxu0 %v9180_v58  ;;  %v392_v32 = vld [vmem:[#allocation2 + $0x259] sm:$0xff] }
 0x196   :  { %15063 = vst [vmem:[#allocation36_spill] sm:$0xff] %v10370_v34  ;;  %v10375_v5 = vpop.f32.mrb[45].mxu1  ;;  %1813 = vmatmul.mubr.f32.gmra.mrb[150].mxu1 %v10118_v31  ;;  %v906_v34 = vpop.f32.mrb[31].mxu0  ;;  %v10387_v31 = vld [vmem:[#allocation2 + $0x82] sm:$0xff]  ;;  %9185 = vmatprep.subr.bf16.mxu0 %v9184_v3 }
 0x197   :  { %1817 = vmatprep.mubr.f32.mxu1 %v390_v4  ;;  %v10392_v4 = vld [vmem:[#allocation2 + $0x92] sm:$0xff]  ;;  %v909_v55 = vpop.f32.mrb[32].mxu0 }
 0x198   :  { %v2544_v34 = vld [vmem:[#allocation6 + $0x478] sm:$0xff]  ;;  %v10395_v39 = vadd.f32 %v10221_v2, %v909_v55  ;;  %8364 = vmatmul.mubr.f32.gmra.mrb[138].mxu0 %v10387_v31  ;;  %v393_v55 = vld [vmem:[#allocation2 + $0x261] sm:$0xff] }
 0x199   :  { %v10384_v26 = vpop.f32.mrb[46].mxu1  ;;  %8366 = vmatprep.mubr.f32.mxu0 %v10392_v4  ;;  %9187 = vmatpush3.bf16.msra.mxu0 %v9184_v3  ;;  %v9192_v2 = vpack.c.bf16 %v2544_v34, %v2543_v49  ;;  %v10415_v3 = vld [vmem:[#allocation2 + $0xb2] sm:$0xff]  ;;  %v10420_v49 = vld [vmem:[#allocation2 + $0xc2] sm:$0xff] }
 0x19a   :  { %15065 = vst [vmem:[#allocation38_spill] sm:$0xff] %v10384_v26  ;;  %v10389_v38 = vpop.f32.mrb[47].mxu1  ;;  %1818 = vmatmul.mubr.f32.gmra.mrb[152].mxu1 %v10123_v54  ;;  %v911_v26 = vpop.f32.mrb[33].mxu0  ;;  %v10401_v54 = vld [vmem:[#allocation2 + $0x9a] sm:$0xff]  ;;  %9189 = vmatprep.subr.bf16.mxu0 %v9188_v60 }
 0x19b   :  { %15066 = vst [vmem:[#allocation39_spill] sm:$0xff] %v10389_v38  ;;  %1822 = vmatprep.mubr.f32.mxu1 %v391_v24  ;;  %v10406_v24 = vld [vmem:[#allocation2 + $0xaa] sm:$0xff]  ;;  %v914_v57 = vpop.f32.mrb[34].mxu0 }
 0x19c   :  { %v10409_v13 = vadd.f32 %v10217_v47, %v914_v57  ;;  %8367 = vmatmul.mubr.f32.gmra.mrb[140].mxu0 %v10401_v54  ;;  %v916_v26 = vpop.f32.mrb[35].mxu0  ;;  %v394_v57 = vld [vmem:[#allocation2 + $0x271] sm:$0xff] }
 0x19d   :  { %v10398_v58 = vpop.f32.mrb[48].mxu1  ;;  %8369 = vmatprep.mubr.f32.mxu0 %v10406_v24  ;;  %9191 = vmatpush3.bf16.msra.mxu0 %v9188_v60  ;;  %v10429_v60 = vld [vmem:[#allocation2 + $0xca] sm:$0xff] }
 0x19e   :  { %15067 = vst [vmem:[#allocation40_spill] sm:$0xff] %v10398_v58  ;;  %v10403_v38 = vpop.f32.mrb[49].mxu1  ;;  %1823 = vmatmul.mubr.f32.gmra.mrb[154].mxu1 %v10129_v56  ;;  %9193 = vmatprep.subr.bf16.mxu0 %v9192_v2 }
 0x19f   :  { %1827 = vmatprep.mubr.f32.mxu1 %v392_v32  ;;  %v919_v47 = vpop.f32.mrb[36].mxu0 }
 0x1a0   :  { %v10423_v32 = vadd.f32 %v10232_v16, %v919_v47  ;;  %8370 = vmatmul.mubr.f32.gmra.mrb[142].mxu0 %v10415_v3  ;;  %v921_v34 = vpop.f32.mrb[37].mxu0 }
 0x1a1   :  { %v10412_v58 = vpop.f32.mrb[50].mxu1  ;;  %8372 = vmatprep.mubr.f32.mxu0 %v10420_v49  ;;  %9195 = vmatpush3.bf16.msra.mxu0 %v9192_v2  ;;  %v395_v34 = vld [vmem:[#allocation2 + $0x279] sm:$0xff]  ;;  %v10444_v2 = vld [vmem:[#allocation2 + $0xe2] sm:$0xff] }
 0x1a2   :  { %15068 = vst [vmem:[#allocation41_spill] sm:$0xff] %v10412_v58  ;;  %v10417_v56 = vpop.f32.mrb[51].mxu1  ;;  %1828 = vmatmul.mubr.f32.gmra.mrb[156].mxu1 %v10134_v18  ;;  %v10434_v58 = vld [vmem:[#allocation2 + $0xda] sm:$0xff]  ;;  %9196 = vmatprep.subr.bf16.mxu0 %v15035_v41  ;;  %v10449_v41 = vld [vmem:[#allocation2 + $0xf2] sm:$0xff] }
 0x1a3   :  { %1832 = vmatprep.mubr.f32.mxu1 %v393_v55  ;;  %v924_v16 = vpop.f32.mrb[38].mxu0  ;;  %15073 = vst [vmem:[#allocation46_spill] sm:$0xff] %v10449_v41 }
 0x1a4   :  { %v10438_v55 = vadd.f32 %v10228_v63, %v924_v16  ;;  %8373 = vmatmul.mubr.f32.gmra.mrb[144].mxu0 %v10429_v60  ;;  %v926_v47 = vpop.f32.mrb[39].mxu0 }
 0x1a5   :  { %v10426_v26 = vpop.f32.mrb[52].mxu1  ;;  %8375 = vmatprep.mubr.f32.mxu0 %v10434_v58  ;;  %v396_v47 = vld [vmem:[#allocation2 + $0x289] sm:$0xff] }
 0x1a6   :  { %15069 = vst [vmem:[#allocation42_spill] sm:$0xff] %v10426_v26  ;;  %v10431_v18 = vpop.f32.mrb[53].mxu1  ;;  %1833 = vmatmul.mubr.f32.gmra.mrb[158].mxu1 %v10139_v61 }
 0x1a7   :  { %15070 = vst [vmem:[#allocation43_spill] sm:$0xff] %v10431_v18  ;;  %1837 = vmatprep.mubr.f32.mxu1 %v394_v57  ;;  %v929_v57 = vpop.f32.mrb[40].mxu0  ;;  %v10458_v18 = vld [vmem:[#allocation2 + $0xfa] sm:$0xff] }
 0x1a8   :  { %v10452_v63 = vadd.f32 %v10243_v12, %v929_v57  ;;  %8376 = vmatmul.mubr.f32.gmra.mrb[146].mxu0 %v10444_v2  ;;  %v931_v16 = vpop.f32.mrb[41].mxu0 }
 0x1a9   :  { %v10441_v26 = vpop.f32.mrb[54].mxu1  ;;  %8378 = vmatprep.mubr.f32.mxu0 %v10449_v41  ;;  %v397_v16 = vld [vmem:[#allocation2 + $0x291] sm:$0xff] }
 0x1aa   :  { %15071 = vst [vmem:[#allocation44_spill] sm:$0xff] %v10441_v26  ;;  %v10446_v61 = vpop.f32.mrb[55].mxu1  ;;  %1838 = vmatmul.mubr.f32.gmra.mrb[160].mxu1 %v10146_v40  ;;  %v10463_v40 = vld [vmem:[#allocation2 + $0x10a] sm:$0xff]  ;;  %v10472_v41 = vld [vmem:[#allocation2 + $0x112] sm:$0xff] }
 0x1ab   :  { %15072 = vst [vmem:[#allocation45_spill] sm:$0xff] %v10446_v61  ;;  %1842 = vmatprep.mubr.f32.mxu1 %v395_v34  ;;  %15076 = vst [vmem:[#allocation49_spill] sm:$0xff] %v10463_v40  ;;  %v934_v34 = vpop.f32.mrb[42].mxu0 }
 0x1ac   :  { %v10466_v12 = vadd.f32 %v10239_v50, %v934_v34  ;;  %8379 = vmatmul.mubr.f32.gmra.mrb[148].mxu0 %v10458_v18  ;;  %v936_v57 = vpop.f32.mrb[43].mxu0  ;;  %15078 = vst [vmem:[#allocation51_spill] sm:$0xff] %v10472_v41 }
 0x1ad   :  { %v10455_v26 = vpop.f32.mrb[56].mxu1  ;;  %8381 = vmatprep.mubr.f32.mxu0 %v10463_v40  ;;  %v398_v57 = vld [vmem:[#allocation2 + $0x2a1] sm:$0xff]  ;;  %v10486_v40 = vld [vmem:[#allocation2 + $0x12a] sm:$0xff] }
 0x1ae   :  { %15074 = vst [vmem:[#allocation47_spill] sm:$0xff] %v10455_v26  ;;  %v10460_v61 = vpop.f32.mrb[57].mxu1  ;;  %1843 = vmatmul.mubr.f32.gmra.mrb[162].mxu1 %v10156_v51  ;;  %v10477_v51 = vld [vmem:[#allocation2 + $0x122] sm:$0xff]  ;;  %15082 = vst [vmem:[#allocation55_spill] sm:$0xff] %v10486_v40 }
 0x1af   :  { %15075 = vst [vmem:[#allocation48_spill] sm:$0xff] %v10460_v61  ;;  %1847 = vmatprep.mubr.f32.mxu1 %v396_v47  ;;  %15080 = vst [vmem:[#allocation53_spill] sm:$0xff] %v10477_v51  ;;  %v939_v47 = vpop.f32.mrb[44].mxu0 }
 0x1b0   :  { %v10480_v50 = vadd.f32 %v10257_v25, %v939_v47  ;;  %8382 = vmatmul.mubr.f32.gmra.mrb[150].mxu0 %v10472_v41  ;;  %v941_v34 = vpop.f32.mrb[45].mxu0 }
 0x1b1   :  { %v10469_v26 = vpop.f32.mrb[58].mxu1  ;;  %8384 = vmatprep.mubr.f32.mxu0 %v10477_v51  ;;  %v399_v34 = vld [vmem:[#allocation2 + $0x2a9] sm:$0xff] }
 0x1b2   :  { %15077 = vst [vmem:[#allocation50_spill] sm:$0xff] %v10469_v26  ;;  %v10474_v61 = vpop.f32.mrb[59].mxu1  ;;  %1848 = vmatmul.mubr.f32.gmra.mrb[164].mxu1 %v10165_v19  ;;  %v10491_v19 = vld [vmem:[#allocation2 + $0x13a] sm:$0xff]  ;;  %v10500_v51 = vld [vmem:[#allocation2 + $0x142] sm:$0xff] }
 0x1b3   :  { %15079 = vst [vmem:[#allocation52_spill] sm:$0xff] %v10474_v61  ;;  %1852 = vmatprep.mubr.f32.mxu1 %v397_v16  ;;  %15084 = vst [vmem:[#allocation57_spill] sm:$0xff] %v10491_v19  ;;  %v944_v16 = vpop.f32.mrb[46].mxu0 }
 0x1b4   :  { %v10494_v25 = vadd.f32 %v10252_v11, %v944_v16  ;;  %8385 = vmatmul.mubr.f32.gmra.mrb[152].mxu0 %v10486_v40  ;;  %v946_v47 = vpop.f32.mrb[47].mxu0  ;;  %15086 = vst [vmem:[#allocation59_spill] sm:$0xff] %v10500_v51  ;;  %v440_v40 = vld [vmem:[#allocation2 + $0x16a] sm:$0xff] }
 0x1b5   :  { %v10483_v26 = vpop.f32.mrb[60].mxu1  ;;  %8387 = vmatprep.mubr.f32.mxu0 %v10491_v19  ;;  %v400_v47 = vld [vmem:[#allocation2 + $0x2b9] sm:$0xff] }
 0x1b6   :  { %15081 = vst [vmem:[#allocation54_spill] sm:$0xff] %v10483_v26  ;;  %v10488_v61 = vpop.f32.mrb[61].mxu1  ;;  %1853 = vmatmul.mubr.f32.gmra.mrb[166].mxu1 %v10174_v14  ;;  %v10505_v14 = vld [vmem:[#allocation2 + $0x152] sm:$0xff]  ;;  %v10512_v19 = vld [vmem:[#allocation2 + $0x15a] sm:$0xff] }
 0x1b7   :  { %15083 = vst [vmem:[#allocation56_spill] sm:$0xff] %v10488_v61  ;;  %1857 = vmatprep.mubr.f32.mxu1 %v398_v57  ;;  %15088 = vst [vmem:[#allocation61_spill] sm:$0xff] %v10505_v14  ;;  %v949_v57 = vpop.f32.mrb[48].mxu0 }
 0x1b8   :  { %v10508_v11 = vadd.f32 %v10267_v15, %v949_v57  ;;  %8388 = vmatmul.mubr.f32.gmra.mrb[154].mxu0 %v10500_v51  ;;  %v951_v16 = vpop.f32.mrb[49].mxu0 }
 0x1b9   :  { %v10497_v26 = vpop.f32.mrb[62].mxu1  ;;  %8390 = vmatprep.mubr.f32.mxu0 %v10505_v14  ;;  %v401_v16 = vld [vmem:[#allocation2 + $0x2c1] sm:$0xff]  ;;  %v441_v14 = vld [vmem:[#allocation2 + $0x172] sm:$0xff] }
 0x1ba   :  { %15085 = vst [vmem:[#allocation58_spill] sm:$0xff] %v10497_v26  ;;  %v10502_v61 = vpop.f32.mrb[63].mxu1  ;;  %1858 = vmatmul.mubr.f32.gmra.mrb[168].mxu1 %v10183_v37 }
 0x1bb   :  { %15087 = vst [vmem:[#allocation60_spill] sm:$0xff] %v10502_v61  ;;  %1862 = vmatprep.mubr.f32.mxu1 %v399_v34  ;;  %v954_v34 = vpop.f32.mrb[50].mxu0 }
 0x1bc   :  { %v10519_v15 = vadd.f32 %v10263_v43, %v954_v34  ;;  %8391 = vmatmul.mubr.f32.gmra.mrb[156].mxu0 %v10512_v19  ;;  %v956_v57 = vpop.f32.mrb[51].mxu0 }
 0x1bd   :  { %v1599_v26 = vpop.f32.mrb[64].mxu1  ;;  %8393 = vmatprep.mubr.f32.mxu0 %v440_v40  ;;  %v443_v57 = vld [vmem:[#allocation2 + $0x1ba] sm:$0xff] }
 0x1be   :  { %v10515_v61 = vadd.f32 %v1599_v26, %v10214_v44  ;;  %v1601_v37 = vpop.f32.mrb[65].mxu1  ;;  %1863 = vmatmul.mubr.f32.gmra.mrb[170].mxu1 %v10192_v28  ;;  %v442_v28 = vld [vmem:[#allocation2 + $0x1b2] sm:$0xff] }
 0x1bf   :  { %1867 = vmatprep.mubr.f32.mxu1 %v400_v47  ;;  %v959_v26 = vpop.f32.mrb[52].mxu0  ;;  %v402_v37 = vld [vmem:[#allocation2 + $0x2d1] sm:$0xff] }
 0x1c0   :  { %v10527_v47 = vadd.f32 %v10278_v22, %v959_v26  ;;  %8394 = vmatmul.mubr.f32.gmra.mrb[158].mxu0 %v441_v14  ;;  %v961_v43 = vpop.f32.mrb[53].mxu0  ;;  %v403_v14 = vld [vmem:[#allocation2 + $0x2d9] sm:$0xff] }
 0x1c1   :  { %v1604_v51 = vpop.f32.mrb[66].mxu1  ;;  %8396 = vmatprep.mubr.f32.mxu0 %v442_v28  ;;  %v445_v26 = vld [vmem:[#allocation2 + $0x1d2] sm:$0xff]  ;;  %v446_v43 = vld [vmem:[#allocation2 + $0x1e2] sm:$0xff] }
 0x1c2   :  { %v10523_v41 = vadd.f32 %v1604_v51, %v10225_v52  ;;  %v1606_v44 = vpop.f32.mrb[67].mxu1  ;;  %1868 = vmatmul.mubr.f32.gmra.mrb[172].mxu1 %v10200_v48  ;;  %v444_v51 = vld [vmem:[#allocation2 + $0x1ca] sm:$0xff] }
 0x1c3   :  { %1872 = vmatprep.mubr.f32.mxu1 %v401_v16  ;;  %v964_v48 = vpop.f32.mrb[54].mxu0 }
 0x1c4   :  { %v10534_v16 = vadd.f32 %v10274_v29, %v964_v48  ;;  %8397 = vmatmul.mubr.f32.gmra.mrb[160].mxu0 %v443_v57  ;;  %v966_v22 = vpop.f32.mrb[55].mxu0  ;;  %v448_v48 = vld [vmem:[#allocation2 + $0x1fa] sm:$0xff] }
 0x1c5   :  { %v1609_v34 = vpop.f32.mrb[68].mxu1  ;;  %8399 = vmatprep.mubr.f32.mxu0 %v444_v51 }
 0x1c6   :  { %v10530_v40 = vadd.f32 %v1609_v34, %v10236_v8  ;;  %v1611_v52 = vpop.f32.mrb[69].mxu1  ;;  %1873 = vmatmul.mubr.f32.gmra.mrb[174].mxu1 %v10208_v1  ;;  %v404_v34 = vld [vmem:[#allocation2 + $0x2e9] sm:$0xff] }
 0x1c7   :  { %1877 = vmatprep.mubr.f32.mxu1 %v402_v37  ;;  %v969_v1 = vpop.f32.mrb[56].mxu0  ;;  %v447_v52 = vld [vmem:[#allocation2 + $0x1ea] sm:$0xff] }
 0x1c8   :  { %15089 = vst [vmem:[#allocation62_spill] sm:$0xff] %v10530_v40  ;;  %v10541_v37 = vadd.f32 %v10289_v9, %v969_v1  ;;  %8400 = vmatmul.mubr.f32.gmra.mrb[162].mxu0 %v445_v26  ;;  %v971_v29 = vpop.f32.mrb[57].mxu0  ;;  %v449_v26 = vld [vmem:[#allocation2 + $0x202] sm:$0xff]  ;;  %v450_v1 = vld [vmem:[#allocation2 + $0x212] sm:$0xff] }
 0x1c9   :  { %v1614_v44 = vpop.f32.mrb[70].mxu1  ;;  %8402 = vmatprep.mubr.f32.mxu0 %v446_v43  ;;  %v15092_v43 = vld [vmem:[#allocation13_spill] sm:$0xff] }
 0x1ca   :  { %v10537_v28 = vadd.f32 %v1614_v44, %v10249_v10  ;;  %v1616_v8 = vpop.f32.mrb[71].mxu1  ;;  %1878 = vmatmul.mubr.f32.gmra.mrb[176].mxu1 %v10219_v36 }
 0x1cb   :  { %1882 = vmatprep.mubr.f32.mxu1 %v403_v14  ;;  %v974_v36 = vpop.f32.mrb[58].mxu0  ;;  %v405_v14 = vld [vmem:[#allocation2 + $0x2f1] sm:$0xff] }
 0x1cc   :  { %v10548_v22 = vadd.f32 %v10285_v6, %v974_v36  ;;  %8403 = vmatmul.mubr.f32.gmra.mrb[164].mxu0 %v447_v52  ;;  %v976_v9 = vpop.f32.mrb[59].mxu0  ;;  %v451_v52 = vld [vmem:[#allocation2 + $0x21a] sm:$0xff]  ;;  %v15095_v36 = vld [vmem:[#allocation14_spill] sm:$0xff] }
 0x1cd   :  { %v1619_v57 = vpop.f32.mrb[72].mxu1  ;;  %8405 = vmatprep.mubr.f32.mxu0 %v448_v48  ;;  %v452_v9 = vld [vmem:[#allocation2 + $0x22a] sm:$0xff] }
 0x1ce   :  { %v10544_v51 = vadd.f32 %v1619_v57, %v10260_v42  ;;  %v1621_v10 = vpop.f32.mrb[73].mxu1  ;;  %1883 = vmatmul.mubr.f32.gmra.mrb[178].mxu1 %v10230_v30 }
 0x1cf   :  { %1887 = vmatprep.mubr.f32.mxu1 %v404_v34  ;;  %v979_v30 = vpop.f32.mrb[60].mxu0  ;;  %v406_v34 = vld [vmem:[#allocation2 + $0x301] sm:$0xff] }
 0x1d0   :  { %15090 = vst [vmem:[#allocation63_spill] sm:$0xff] %v10544_v51  ;;  %v10555_v29 = vadd.f32 %v10300_v46, %v979_v30  ;;  %8406 = vmatmul.mubr.f32.gmra.mrb[166].mxu0 %v449_v26  ;;  %v981_v6 = vpop.f32.mrb[61].mxu0  ;;  %v15093_v10 = vld [vmem:[#allocation17_spill] sm:$0xff]  ;;  %v407_v26 = vld [vmem:[#allocation2 + $0x309] sm:$0xff]  ;;  %v453_v30 = vld [vmem:[#allocation2 + $0x232] sm:$0xff] }
 0x1d1   :  { %v1624_v44 = vpop.f32.mrb[74].mxu1  ;;  %8408 = vmatprep.mubr.f32.mxu0 %v450_v1  ;;  %v15097_v1 = vld [vmem:[#allocation19_spill] sm:$0xff] }
 0x1d2   :  { %v10551_v8 = vadd.f32 %v1624_v44, %v10271_v17  ;;  %v1626_v42 = vpop.f32.mrb[75].mxu1  ;;  %1888 = vmatmul.mubr.f32.gmra.mrb[180].mxu1 %v15092_v43 }
 0x1d3   :  { %1892 = vmatprep.mubr.f32.mxu1 %v405_v14  ;;  %v984_v44 = vpop.f32.mrb[62].mxu0  ;;  %v15096_v42 = vld [vmem:[#allocation20_spill] sm:$0xff] }
 0x1d4   :  { %15091 = vst [vmem:[#allocation64_spill] sm:$0xff] %v10551_v8  ;;  %v10562_v14 = vadd.f32 %v15096_v42, %v984_v44  ;;  %8409 = vmatmul.mubr.f32.gmra.mrb[168].mxu0 %v451_v52  ;;  %v986_v46 = vpop.f32.mrb[63].mxu0  ;;  %v408_v52 = vld [vmem:[#allocation2 + $0x319] sm:$0xff] }
 0x1d5   :  { %v1629_v57 = vpop.f32.mrb[76].mxu1  ;;  %8411 = vmatprep.mubr.f32.mxu0 %v452_v9  ;;  %v455_v46 = vld [vmem:[#allocation2 + $0x24a] sm:$0xff] }
 0x1d6   :  { %v10558_v48 = vadd.f32 %v1629_v57, %v15093_v10  ;;  %v1631_v17 = vpop.f32.mrb[77].mxu1  ;;  %1893 = vmatmul.mubr.f32.gmra.mrb[182].mxu1 %v15095_v36  ;;  %v15099_v10 = vld [vmem:[#allocation15_spill] sm:$0xff]  ;;  %v15101_v9 = vld [vmem:[#allocation22_spill] sm:$0xff] }
 0x1d7   :  { %1897 = vmatprep.mubr.f32.mxu1 %v406_v34  ;;  %v454_v17 = vld [vmem:[#allocation2 + $0x242] sm:$0xff]  ;;  %v989_v36 = vpop.f32.mrb[64].mxu0 }
 0x1d8   :  { %15094 = vst [vmem:[#allocation13_spill] sm:$0xff] %v10558_v48  ;;  %v15100_v48 = vld [vmem:[#allocation24_spill] sm:$0xff]  ;;  %8412 = vmatmul.mubr.f32.gmra.mrb[170].mxu0 %v453_v30  ;;  %v991_v44 = vpop.f32.mrb[65].mxu0  ;;  %v409_v30 = vld [vmem:[#allocation2 + $0x321] sm:$0xff] }
 0x1d9   :  { %v1634_v43 = vpop.f32.mrb[78].mxu1  ;;  %v10569_v34 = vadd.f32 %v15100_v48, %v989_v36  ;;  %8414 = vmatprep.mubr.f32.mxu0 %v454_v17  ;;  %v457_v44 = vld [vmem:[#allocation2 + $0x262] sm:$0xff] }
 0x1da   :  { %v10565_v6 = vadd.f32 %v1634_v43, %v15097_v1  ;;  %v1636_v57 = vpop.f32.mrb[79].mxu1  ;;  %1898 = vmatmul.mubr.f32.gmra.mrb[184].mxu1 %v15099_v10  ;;  %v15103_v1 = vld [vmem:[#allocation16_spill] sm:$0xff]  ;;  %v15105_v17 = vld [vmem:[#allocation25_spill] sm:$0xff] }
 0x1db   :  { %1902 = vmatprep.mubr.f32.mxu1 %v407_v26  ;;  %v456_v57 = vld [vmem:[#allocation2 + $0x25a] sm:$0xff]  ;;  %v994_v10 = vpop.f32.mrb[66].mxu0 }
 0x1dc   :  { %15098 = vst [vmem:[#allocation17_spill] sm:$0xff] %v10565_v6  ;;  %v15104_v6 = vld [vmem:[#allocation23_spill] sm:$0xff]  ;;  %8415 = vmatmul.mubr.f32.gmra.mrb[172].mxu0 %v455_v46  ;;  %v996_v48 = vpop.f32.mrb[67].mxu0 }
 0x1dd   :  { %v1639_v42 = vpop.f32.mrb[80].mxu1  ;;  %v10576_v26 = vadd.f32 %v15104_v6, %v994_v10  ;;  %8417 = vmatprep.mubr.f32.mxu0 %v456_v57  ;;  %v2368_v46 = vld [vmem:[#allocation2 + $0x31] sm:$0xff]  ;;  %v459_v48 = vld [vmem:[#allocation2 + $0x27a] sm:$0xff] }
 0x1de   :  { %v10572_v51 = vadd.f32 %v1639_v42, %v15101_v9  ;;  %v1641_v43 = vpop.f32.mrb[81].mxu1  ;;  %1903 = vmatmul.mubr.f32.gmra.mrb[186].mxu1 %v15103_v1  ;;  %v15107_v9 = vld [vmem:[#allocation18_spill] sm:$0xff] }
 0x1df   :  { %1907 = vmatprep.mubr.f32.mxu1 %v408_v52  ;;  %v458_v43 = vld [vmem:[#allocation2 + $0x272] sm:$0xff]  ;;  %v999_v1 = vpop.f32.mrb[68].mxu0 }
 0x1e0   :  { %15102 = vst [vmem:[#allocation14_spill] sm:$0xff] %v10572_v51  ;;  %v15108_v51 = vld [vmem:[#allocation27_spill] sm:$0xff]  ;;  %8418 = vmatmul.mubr.f32.gmra.mrb[174].mxu0 %v457_v44  ;;  %v1001_v6 = vpop.f32.mrb[69].mxu0  ;;  %v2369_v44 = vld [vmem:[#allocation2 + $0x39] sm:$0xff] }
 0x1e1   :  { %v1644_v36 = vpop.f32.mrb[82].mxu1  ;;  %v10583_v52 = vadd.f32 %v15108_v51, %v999_v1  ;;  %8420 = vmatprep.mubr.f32.mxu0 %v458_v43  ;;  %v461_v43 = vld [vmem:[#allocation2 + $0x292] sm:$0xff] }
 0x1e2   :  { %v10579_v8 = vadd.f32 %v1644_v36, %v15105_v17  ;;  %v1646_v42 = vpop.f32.mrb[83].mxu1  ;;  %1908 = vmatmul.mubr.f32.gmra.mrb[188].mxu1 %v15107_v9  ;;  %v15110_v17 = vld [vmem:[#allocation21_spill] sm:$0xff] }
 0x1e3   :  { %1912 = vmatprep.mubr.f32.mxu1 %v409_v30  ;;  %v460_v42 = vld [vmem:[#allocation2 + $0x28a] sm:$0xff]  ;;  %v1004_v9 = vpop.f32.mrb[70].mxu0 }
 0x1e4   :  { %15106 = vst [vmem:[#allocation20_spill] sm:$0xff] %v10579_v8  ;;  %v2304_v8 = vld [vmem:[#allocation2 + $0x30] sm:$0xff]  ;;  %v15111_v30 = vld [vmem:[#allocation26_spill] sm:$0xff]  ;;  %8421 = vmatmul.mubr.f32.gmra.mrb[176].mxu0 %v459_v48  ;;  %v1006_v51 = vpop.f32.mrb[71].mxu0 }
 0x1e5   :  { %v1649_v10 = vpop.f32.mrb[84].mxu1  ;;  %v10590_v40 = vadd.f32 %v15111_v30, %v1004_v9  ;;  %8423 = vmatprep.mubr.f32.mxu0 %v460_v42  ;;  %v2370_v48 = vld [vmem:[#allocation2 + $0x49] sm:$0xff] }
 0x1e6   :  { %v10586_v57 = vadd.f32 %v1649_v10, %v10321_v20  ;;  %v1651_v36 = vpop.f32.mrb[85].mxu1  ;;  %1913 = vmatmul.mubr.f32.gmra.mrb[190].mxu1 %v15110_v17  ;;  %v462_v10 = vld [vmem:[#allocation2 + $0x2a2] sm:$0xff]  ;;  %v2305_v17 = vld [vmem:[#allocation2 + $0x38] sm:$0xff]  ;;  %v463_v51 = vld [vmem:[#allocation2 + $0x2aa] sm:$0xff] }
 0x1e7   :  { %2609 = vmatprep.mubr.f32.mxu1 %v2368_v46  ;;  %v1009_v36 = vpop.f32.mrb[72].mxu0 }
 0x1e8   :  { %15109 = vst [vmem:[#allocation19_spill] sm:$0xff] %v10586_v57  ;;  %v10596_v46 = vadd.f32 %v10325_v62, %v1009_v36  ;;  %8424 = vmatmul.mubr.f32.gmra.mrb[178].mxu0 %v461_v43  ;;  %v1011_v9 = vpop.f32.mrb[73].mxu0  ;;  %v2371_v43 = vld [vmem:[#allocation2 + $0x51] sm:$0xff] }
 0x1e9   :  { %v1654_v1 = vpop.f32.mrb[86].mxu1  ;;  %8426 = vmatprep.mubr.f32.mxu0 %v462_v10  ;;  %v465_v9 = vld [vmem:[#allocation2 + $0x2c2] sm:$0xff] }
 0x1ea   :  { %v10593_v6 = vadd.f32 %v1654_v1, %v10329_v53  ;;  %v1656_v20 = vpop.f32.mrb[87].mxu1  ;;  %2610 = vmatmul.mubr.f32.vlgmr.msra.gmra.mrb[192].mxu1 %v2304_v8  ;;  %v464_v1 = vld [vmem:[#allocation2 + $0x2ba] sm:$0xff] }
 0x1eb   :  { %2614 = vmatprep.mubr.f32.mxu1 %v2369_v44  ;;  %v1014_v8 = vpop.f32.mrb[74].mxu0  ;;  %v2306_v20 = vld [vmem:[#allocation2 + $0x48] sm:$0xff]  ;;  %v15112_v44 = vld [vmem:[#allocation28_spill] sm:$0xff] }
 0x1ec   :  { %v10602_v57 = vadd.f32 %v15112_v44, %v1014_v8  ;;  %8427 = vmatmul.mubr.f32.gmra.mrb[180].mxu0 %v463_v51  ;;  %v1016_v62 = vpop.f32.mrb[75].mxu0  ;;  %v2372_v51 = vld [vmem:[#allocation2 + $0x61] sm:$0xff] }
 0x1ed   :  { %v1659_v30 = vpop.f32.mrb[88].mxu1  ;;  %8429 = vmatprep.mubr.f32.mxu0 %v464_v1  ;;  %v467_v62 = vld [vmem:[#allocation2 + $0x2da] sm:$0xff] }
 0x1ee   :  { %v10599_v42 = vadd.f32 %v1659_v30, %v10340_v33  ;;  %v1661_v53 = vpop.f32.mrb[89].mxu1  ;;  %2615 = vmatmul.mubr.f32.gmra.mrb[194].mxu1 %v2305_v17  ;;  %v466_v30 = vld [vmem:[#allocation2 + $0x2d2] sm:$0xff] }
 0x1ef   :  { %2619 = vmatprep.mubr.f32.mxu1 %v2370_v48  ;;  %v1019_v17 = vpop.f32.mrb[76].mxu0  ;;  %v2307_v53 = vld [vmem:[#allocation2 + $0x50] sm:$0xff] }
 0x1f0   :  { %v10608_v48 = vadd.f32 %v10334_v21, %v1019_v17  ;;  %8430 = vmatmul.mubr.f32.gmra.mrb[182].mxu0 %v465_v9  ;;  %v1021_v8 = vpop.f32.mrb[77].mxu0  ;;  %v2373_v9 = vld [vmem:[#allocation2 + $0x69] sm:$0xff] }
 0x1f1   :  { %v1664_v36 = vpop.f32.mrb[90].mxu1  ;;  %8432 = vmatprep.mubr.f32.mxu0 %v466_v30  ;;  %v469_v8 = vld [vmem:[#allocation2 + $0x2f2] sm:$0xff] }
 0x1f2   :  { %v10605_v10 = vadd.f32 %v1664_v36, %v10353_v59  ;;  %v1666_v33 = vpop.f32.mrb[91].mxu1  ;;  %2620 = vmatmul.mubr.f32.gmra.mrb[196].mxu1 %v2306_v20  ;;  %v468_v36 = vld [vmem:[#allocation2 + $0x2ea] sm:$0xff] }
 0x1f3   :  { %2624 = vmatprep.mubr.f32.mxu1 %v2371_v43  ;;  %v1024_v20 = vpop.f32.mrb[78].mxu0  ;;  %v2308_v33 = vld [vmem:[#allocation2 + $0x60] sm:$0xff] }
 0x1f4   :  { %v10614_v43 = vadd.f32 %v10331_v45, %v1024_v20  ;;  %8433 = vmatmul.mubr.f32.gmra.mrb[184].mxu0 %v467_v62  ;;  %v1026_v21 = vpop.f32.mrb[79].mxu0  ;;  %v2374_v62 = vld [vmem:[#allocation2 + $0x79] sm:$0xff] }
 0x1f5   :  { %v1669_v44 = vpop.f32.mrb[92].mxu1  ;;  %8435 = vmatprep.mubr.f32.mxu0 %v468_v36  ;;  %v471_v21 = vld [vmem:[#allocation2 + $0x30a] sm:$0xff] }
 0x1f6   :  { %v10611_v1 = vadd.f32 %v1669_v44, %v10367_v27  ;;  %v1671_v59 = vpop.f32.mrb[93].mxu1  ;;  %2625 = vmatmul.mubr.f32.gmra.mrb[198].mxu1 %v2307_v53  ;;  %v470_v44 = vld [vmem:[#allocation2 + $0x302] sm:$0xff] }
 0x1f7   :  { %2629 = vmatprep.mubr.f32.mxu1 %v2372_v51  ;;  %v1029_v53 = vpop.f32.mrb[80].mxu0  ;;  %v2309_v59 = vld [vmem:[#allocation2 + $0x68] sm:$0xff] }
 0x1f8   :  { %15113 = vst [vmem:[#allocation15_spill] sm:$0xff] %v10611_v1  ;;  %v10620_v51 = vadd.f32 %v10347_v0, %v1029_v53  ;;  %8436 = vmatmul.mubr.f32.gmra.mrb[186].mxu0 %v469_v8  ;;  %v1031_v45 = vpop.f32.mrb[81].mxu0  ;;  %v2375_v8 = vld [vmem:[#allocation2 + $0x81] sm:$0xff] }
 0x1f9   :  { %v1674_v17 = vpop.f32.mrb[94].mxu1  ;;  %8438 = vmatprep.mubr.f32.mxu0 %v470_v44  ;;  %v473_v45 = vld [vmem:[#allocation2 + $0x322] sm:$0xff] }
 0x1fa   :  { %v10617_v30 = vadd.f32 %v1674_v17, %v10381_v7  ;;  %v1676_v27 = vpop.f32.mrb[95].mxu1  ;;  %2630 = vmatmul.mubr.f32.gmra.mrb[200].mxu1 %v2308_v33  ;;  %v472_v17 = vld [vmem:[#allocation2 + $0x31a] sm:$0xff] }
 0x1fb   :  { %2634 = vmatprep.mubr.f32.mxu1 %v2373_v9  ;;  %v1034_v33 = vpop.f32.mrb[82].mxu0  ;;  %v2310_v27 = vld [vmem:[#allocation2 + $0x78] sm:$0xff]  ;;  %v15114_v9 = vld [vmem:[#allocation30_spill] sm:$0xff] }
 0x1fc   :  { %v10626_v1 = vadd.f32 %v15114_v9, %v1034_v33  ;;  %8439 = vmatmul.mubr.f32.gmra.mrb[188].mxu0 %v471_v21  ;;  %v1036_v0 = vpop.f32.mrb[83].mxu0  ;;  %v2376_v33 = vld [vmem:[#allocation2 + $0x91] sm:$0xff]  ;;  %v15115_v9 = vld [vmem:[#allocation29_spill] sm:$0xff] }
 0x1fd   :  { %v1679_v20 = vpop.f32.mrb[96].mxu1  ;;  %8441 = vmatprep.mubr.f32.mxu0 %v472_v17 }
 0x1fe   :  { %v10623_v36 = vadd.f32 %v1679_v20, %v10395_v39  ;;  %v1681_v7 = vpop.f32.mrb[97].mxu1  ;;  %2635 = vmatmul.mubr.f32.gmra.mrb[202].mxu1 %v2309_v59  ;;  %v2311_v59 = vld [vmem:[#allocation2 + $0x80] sm:$0xff] }
 0x1ff   :  { %2639 = vmatprep.mubr.f32.mxu1 %v2374_v62  ;;  %v1039_v20 = vpop.f32.mrb[84].mxu0 }
 0x200   :  { %v10632_v62 = vadd.f32 %v10361_v35, %v1039_v20  ;;  %8442 = vmatmul.mubr.f32.gmra.mrb[190].mxu0 %v473_v45  ;;  %v1041_v7 = vpop.f32.mrb[85].mxu0  ;;  %v2377_v45 = vld [vmem:[#allocation2 + $0x99] sm:$0xff] }
 0x201   :  { %v1684_v53 = vpop.f32.mrb[98].mxu1  ;;  %8476 = vmatprep.mubr.f32.mxu0 %v15115_v9  ;;  %v15118_v7 = vld [vmem:[#allocation32_spill] sm:$0xff] }
 0x202   :  { %v10629_v44 = vadd.f32 %v1684_v53, %v10409_v13  ;;  %v1686_v39 = vpop.f32.mrb[99].mxu1  ;;  %2640 = vmatmul.mubr.f32.gmra.mrb[204].mxu1 %v2310_v27  ;;  %v2312_v27 = vld [vmem:[#allocation2 + $0x90] sm:$0xff]  ;;  %v15116_v53 = vld [vmem:[#allocation33_spill] sm:$0xff] }
 0x203   :  { %2644 = vmatprep.mubr.f32.mxu1 %v2375_v8  ;;  %v1044_v13 = vpop.f32.mrb[86].mxu0  ;;  %v15117_v39 = vld [vmem:[#allocation31_spill] sm:$0xff] }
 0x204   :  { %v10639_v8 = vadd.f32 %v15116_v53, %v1044_v13  ;;  %8477 = vmatmul.mubr.f32.vlgmr.msra.gmra.mrb[192].mxu0 %v15117_v39  ;;  %v1046_v35 = vpop.f32.mrb[87].mxu0  ;;  %v2378_v53 = vld [vmem:[#allocation2 + $0xa9] sm:$0xff] }
 0x205   :  { %v1689_v21 = vpop.f32.mrb[100].mxu1  ;;  %8479 = vmatprep.mubr.f32.mxu0 %v15118_v7  ;;  %v15120_v35 = vld [vmem:[#allocation35_spill] sm:$0xff] }
 0x206   :  { %v10636_v17 = vadd.f32 %v1689_v21, %v10423_v32  ;;  %v1691_v0 = vpop.f32.mrb[101].mxu1  ;;  %2645 = vmatmul.mubr.f32.gmra.mrb[206].mxu1 %v2311_v59  ;;  %v2313_v59 = vld [vmem:[#allocation2 + $0x98] sm:$0xff] }
 0x207   :  { %2649 = vmatprep.mubr.f32.mxu1 %v2376_v33  ;;  %v1049_v21 = vpop.f32.mrb[88].mxu0  ;;  %v15119_v0 = vld [vmem:[#allocation34_spill] sm:$0xff] }
 0x208   :  { %v10647_v33 = vadd.f32 %v10375_v5, %v1049_v21  ;;  %8480 = vmatmul.mubr.f32.gmra.mrb[194].mxu0 %v15119_v0  ;;  %v1051_v13 = vpop.f32.mrb[89].mxu0  ;;  %v2379_v21 = vld [vmem:[#allocation2 + $0xb1] sm:$0xff] }
 0x209   :  { %v1694_v20 = vpop.f32.mrb[102].mxu1  ;;  %8482 = vmatprep.mubr.f32.mxu0 %v15120_v35  ;;  %v15122_v13 = vld [vmem:[#allocation37_spill] sm:$0xff] }
 0x20a   :  { %v10644_v9 = vadd.f32 %v1694_v20, %v10438_v55  ;;  %v1696_v32 = vpop.f32.mrb[103].mxu1  ;;  %2650 = vmatmul.mubr.f32.gmra.mrb[208].mxu1 %v2312_v27  ;;  %v2314_v27 = vld [vmem:[#allocation2 + $0xa8] sm:$0xff] }
 0x20b   :  { %2654 = vmatprep.mubr.f32.mxu1 %v2377_v45  ;;  %v1054_v20 = vpop.f32.mrb[90].mxu0  ;;  %v15121_v45 = vld [vmem:[#allocation36_spill] sm:$0xff] }
 0x20c   :  { %v10655_v32 = vadd.f32 %v15121_v45, %v1054_v20  ;;  %8483 = vmatmul.mubr.f32.gmra.mrb[196].mxu0 %v10373_v23  ;;  %v1056_v5 = vpop.f32.mrb[91].mxu0  ;;  %v2380_v23 = vld [vmem:[#allocation2 + $0xc1] sm:$0xff] }
 0x20d   :  { %v1699_v39 = vpop.f32.mrb[104].mxu1  ;;  %8485 = vmatprep.mubr.f32.mxu0 %v15122_v13 }
 0x20e   :  { %v10652_v7 = vadd.f32 %v1699_v39, %v10452_v63  ;;  %v1701_v55 = vpop.f32.mrb[105].mxu1  ;;  %2655 = vmatmul.mubr.f32.gmra.mrb[210].mxu1 %v2313_v59  ;;  %v2315_v59 = vld [vmem:[#allocation2 + $0xb0] sm:$0xff] }
 0x20f   :  { %2659 = vmatprep.mubr.f32.mxu1 %v2378_v53  ;;  %v1059_v39 = vpop.f32.mrb[92].mxu0  ;;  %v15123_v53 = vld [vmem:[#allocation39_spill] sm:$0xff] }
 0x210   :  { %v10663_v55 = vadd.f32 %v15123_v53, %v1059_v39  ;;  %8486 = vmatmul.mubr.f32.gmra.mrb[198].mxu0 %v10387_v31  ;;  %v1061_v20 = vpop.f32.mrb[93].mxu0  ;;  %v2381_v31 = vld [vmem:[#allocation2 + $0xc9] sm:$0xff] }
 0x211   :  { %v1704_v0 = vpop.f32.mrb[106].mxu1  ;;  %8488 = vmatprep.mubr.f32.mxu0 %v10392_v4 }
 0x212   :  { %v10660_v35 = vadd.f32 %v1704_v0, %v10466_v12  ;;  %v1706_v63 = vpop.f32.mrb[107].mxu1  ;;  %2660 = vmatmul.mubr.f32.gmra.mrb[212].mxu1 %v2314_v27  ;;  %v2316_v27 = vld [vmem:[#allocation2 + $0xc0] sm:$0xff] }
 0x213   :  { %2664 = vmatprep.mubr.f32.mxu1 %v2379_v21  ;;  %v1064_v0 = vpop.f32.mrb[94].mxu0  ;;  %v15124_v21 = vld [vmem:[#allocation38_spill] sm:$0xff] }
 0x214   :  { %v10671_v13 = vadd.f32 %v15124_v21, %v1064_v0  ;;  %8489 = vmatmul.mubr.f32.gmra.mrb[200].mxu0 %v10401_v54  ;;  %v1066_v63 = vpop.f32.mrb[95].mxu0  ;;  %v2382_v54 = vld [vmem:[#allocation2 + $0xd9] sm:$0xff] }
 0x215   :  { %v1709_v45 = vpop.f32.mrb[108].mxu1  ;;  %8491 = vmatprep.mubr.f32.mxu0 %v10406_v24  ;;  %v2318_v0 = vld [vmem:[#allocation2 + $0xd8] sm:$0xff] }
 0x216   :  { %v10668_v5 = vadd.f32 %v1709_v45, %v10480_v50  ;;  %v1711_v12 = vpop.f32.mrb[109].mxu1  ;;  %2665 = vmatmul.mubr.f32.gmra.mrb[214].mxu1 %v2315_v59  ;;  %v2317_v59 = vld [vmem:[#allocation2 + $0xc8] sm:$0xff] }
 0x217   :  { %2669 = vmatprep.mubr.f32.mxu1 %v2380_v23  ;;  %v1069_v53 = vpop.f32.mrb[96].mxu0 }
 0x218   :  { %v10679_v20 = vadd.f32 %v10403_v38, %v1069_v53  ;;  %8492 = vmatmul.mubr.f32.gmra.mrb[202].mxu0 %v10415_v3  ;;  %v1071_v23 = vpop.f32.mrb[97].mxu0  ;;  %v2383_v3 = vld [vmem:[#allocation2 + $0xe1] sm:$0xff] }
 0x219   :  { %v1714_v39 = vpop.f32.mrb[110].mxu1  ;;  %8494 = vmatprep.mubr.f32.mxu0 %v10420_v49  ;;  %v15126_v23 = vld [vmem:[#allocation46_spill] sm:$0xff] }
 0x21a   :  { %v10676_v4 = vadd.f32 %v1714_v39, %v10494_v25  ;;  %v1716_v50 = vpop.f32.mrb[111].mxu1  ;;  %2670 = vmatmul.mubr.f32.gmra.mrb[216].mxu1 %v2316_v27  ;;  %v15125_v27 = vld [vmem:[#allocation40_spill] sm:$0xff]  ;;  %v2319_v39 = vld [vmem:[#allocation2 + $0xe0] sm:$0xff] }
 0x21b   :  { %2674 = vmatprep.mubr.f32.mxu1 %v2381_v31  ;;  %v1074_v12 = vpop.f32.mrb[98].mxu0 }
 0x21c   :  { %v10687_v21 = vadd.f32 %v15125_v27, %v1074_v12  ;;  %8495 = vmatmul.mubr.f32.gmra.mrb[204].mxu0 %v10429_v60  ;;  %v1076_v38 = vpop.f32.mrb[99].mxu0  ;;  %v2384_v60 = vld [vmem:[#allocation2 + $0xf1] sm:$0xff]  ;;  %v15128_v27 = vld [vmem:[#allocation49_spill] sm:$0xff] }
 0x21d   :  { %v1719_v45 = vpop.f32.mrb[112].mxu1  ;;  %8497 = vmatprep.mubr.f32.mxu0 %v10434_v58 }
 0x21e   :  { %v10684_v24 = vadd.f32 %v1719_v45, %v10508_v11  ;;  %v1721_v25 = vpop.f32.mrb[113].mxu1  ;;  %2675 = vmatmul.mubr.f32.gmra.mrb[218].mxu1 %v2317_v59  ;;  %v2320_v45 = vld [vmem:[#allocation2 + $0xf0] sm:$0xff] }
 0x21f   :  { %2679 = vmatprep.mubr.f32.mxu1 %v2382_v54  ;;  %v1079_v31 = vpop.f32.mrb[100].mxu0  ;;  %v15127_v25 = vld [vmem:[#allocation41_spill] sm:$0xff] }
 0x220   :  { %v10695_v50 = vadd.f32 %v10417_v56, %v1079_v31  ;;  %8498 = vmatmul.mubr.f32.gmra.mrb[206].mxu0 %v10444_v2  ;;  %v1081_v53 = vpop.f32.mrb[101].mxu0  ;;  %v2385_v2 = vld [vmem:[#allocation2 + $0xf9] sm:$0xff] }
 0x221   :  { %v1724_v63 = vpop.f32.mrb[114].mxu1  ;;  %8500 = vmatprep.mubr.f32.mxu0 %v15126_v23  ;;  %v2386_v53 = vld [vmem:[#allocation2 + $0x109] sm:$0xff] }
 0x222   :  { %v10692_v49 = vadd.f32 %v1724_v63, %v10519_v15  ;;  %v1726_v11 = vpop.f32.mrb[115].mxu1  ;;  %2680 = vmatmul.mubr.f32.gmra.mrb[220].mxu1 %v2318_v0  ;;  %v2321_v63 = vld [vmem:[#allocation2 + $0xf8] sm:$0xff] }
 0x223   :  { %2684 = vmatprep.mubr.f32.mxu1 %v2383_v3  ;;  %v1084_v54 = vpop.f32.mrb[102].mxu0  ;;  %v15129_v11 = vld [vmem:[#allocation43_spill] sm:$0xff] }
 0x224   :  { %v10703_v12 = vadd.f32 %v15127_v25, %v1084_v54  ;;  %8501 = vmatmul.mubr.f32.gmra.mrb[208].mxu0 %v10458_v18  ;;  %v1086_v56 = vpop.f32.mrb[103].mxu0  ;;  %v2322_v54 = vld [vmem:[#allocation2 + $0x108] sm:$0xff] }
 0x225   :  { %v1729_v59 = vpop.f32.mrb[116].mxu1  ;;  %8503 = vmatprep.mubr.f32.mxu0 %v15128_v27 }
 0x226   :  { %v10700_v58 = vadd.f32 %v1729_v59, %v10527_v47  ;;  %v1731_v15 = vpop.f32.mrb[117].mxu1  ;;  %2685 = vmatmul.mubr.f32.gmra.mrb[222].mxu1 %v2319_v39  ;;  %v15131_v59 = vld [vmem:[#allocation53_spill] sm:$0xff] }
 0x227   :  { %2689 = vmatprep.mubr.f32.mxu1 %v2384_v60  ;;  %v1089_v3 = vpop.f32.mrb[104].mxu0  ;;  %v15130_v60 = vld [vmem:[#allocation51_spill] sm:$0xff] }
 0x228   :  { %v10711_v31 = vadd.f32 %v15129_v11, %v1089_v3  ;;  %v1091_v39 = vpop.f32.mrb[105].mxu0  ;;  %8504 = vmatmul.mubr.f32.gmra.mrb[210].mxu0 %v15130_v60 }
 0x229   :  { %v1734_v0 = vpop.f32.mrb[118].mxu1  ;;  %8506 = vmatprep.mubr.f32.mxu0 %v15131_v59  ;;  %v15135_v39 = vld [vmem:[#allocation45_spill] sm:$0xff]  ;;  %v15136_v59 = vld [vmem:[#allocation59_spill] sm:$0xff] }
 0x22a   :  { %v10708_v38 = vadd.f32 %v1734_v0, %v10534_v16  ;;  %v1736_v47 = vpop.f32.mrb[119].mxu1  ;;  %2690 = vmatmul.mubr.f32.gmra.mrb[224].mxu1 %v2320_v45  ;;  %v15132_v45 = vld [vmem:[#allocation42_spill] sm:$0xff]  ;;  %v15133_v0 = vld [vmem:[#allocation55_spill] sm:$0xff] }
 0x22b   :  { %2694 = vmatprep.mubr.f32.mxu1 %v2385_v2  ;;  %v1094_v15 = vpop.f32.mrb[106].mxu0  ;;  %v2387_v2 = vld [vmem:[#allocation2 + $0x111] sm:$0xff]  ;;  %v15134_v47 = vld [vmem:[#allocation57_spill] sm:$0xff] }
 0x22c   :  { %v10719_v25 = vadd.f32 %v15132_v45, %v1094_v15  ;;  %v1096_v56 = vpop.f32.mrb[107].mxu0  ;;  %8507 = vmatmul.mubr.f32.gmra.mrb[212].mxu0 %v15133_v0  ;;  %v15137_v15 = vld [vmem:[#allocation61_spill] sm:$0xff]  ;;  %v15138_v0 = vld [vmem:[#allocation44_spill] sm:$0xff] }
 0x22d   :  { %v1739_v18 = vpop.f32.mrb[120].mxu1  ;;  %8509 = vmatprep.mubr.f32.mxu0 %v15134_v47  ;;  %v2458_v56 = vld [vmem:[#allocation2 + $0x16a] sm:$0xff] }
 0x22e   :  { %v10716_v23 = vadd.f32 %v1739_v18, %v10541_v37  ;;  %v1741_v16 = vpop.f32.mrb[121].mxu1  ;;  %2695 = vmatmul.mubr.f32.gmra.mrb[226].mxu1 %v2321_v63  ;;  %v2323_v63 = vld [vmem:[#allocation2 + $0x110] sm:$0xff]  ;;  %v2388_v18 = vld [vmem:[#allocation2 + $0x121] sm:$0xff] }
 0x22f   :  { %2699 = vmatprep.mubr.f32.mxu1 %v2386_v53  ;;  %v1099_v11 = vpop.f32.mrb[108].mxu0 }
 0x230   :  { %v10727_v53 = vadd.f32 %v15135_v39, %v1099_v11  ;;  %v1101_v60 = vpop.f32.mrb[109].mxu0  ;;  %8510 = vmatmul.mubr.f32.gmra.mrb[214].mxu0 %v15136_v59  ;;  %v2459_v39 = vld [vmem:[#allocation2 + $0x172] sm:$0xff] }
 0x231   :  { %v1744_v27 = vpop.f32.mrb[122].mxu1  ;;  %8512 = vmatprep.mubr.f32.mxu0 %v15137_v15 }
 0x232   :  { %v10724_v3 = vadd.f32 %v1744_v27, %v10548_v22  ;;  %v1746_v37 = vpop.f32.mrb[123].mxu1  ;;  %2700 = vmatmul.mubr.f32.gmra.mrb[228].mxu1 %v2322_v54 }
 0x233   :  { %2704 = vmatprep.mubr.f32.mxu1 %v2387_v2  ;;  %v1104_v54 = vpop.f32.mrb[110].mxu0  ;;  %v2324_v2 = vld [vmem:[#allocation2 + $0x120] sm:$0xff]  ;;  %v2389_v37 = vld [vmem:[#allocation2 + $0x129] sm:$0xff] }
 0x234   :  { %v10735_v27 = vadd.f32 %v15138_v0, %v1104_v54  ;;  %v1106_v47 = vpop.f32.mrb[111].mxu0  ;;  %8513 = vmatmul.mubr.f32.gmra.mrb[216].mxu0 %v10512_v19  ;;  %v2390_v54 = vld [vmem:[#allocation2 + $0x139] sm:$0xff]  ;;  %v2461_v19 = vld [vmem:[#allocation2 + $0x18a] sm:$0xff] }
 0x235   :  { %v1749_v16 = vpop.f32.mrb[124].mxu1  ;;  %8515 = vmatprep.mubr.f32.mxu0 %v2458_v56  ;;  %v2462_v47 = vld [vmem:[#allocation2 + $0x19a] sm:$0xff] }
 0x236   :  { %v10732_v45 = vadd.f32 %v1749_v16, %v10555_v29  ;;  %v1751_v22 = vpop.f32.mrb[125].mxu1  ;;  %2705 = vmatmul.mubr.f32.gmra.mrb[230].mxu1 %v2323_v63  ;;  %v2460_v63 = vld [vmem:[#allocation2 + $0x182] sm:$0xff]  ;;  %v15139_v16 = vld [vmem:[#allocation48_spill] sm:$0xff] }
 0x237   :  { %2709 = vmatprep.mubr.f32.mxu1 %v2388_v18  ;;  %v1109_v59 = vpop.f32.mrb[112].mxu0  ;;  %v2325_v18 = vld [vmem:[#allocation2 + $0x128] sm:$0xff] }
 0x238   :  { %v10742_v15 = vadd.f32 %v15139_v16, %v1109_v59  ;;  %v1111_v22 = vpop.f32.mrb[113].mxu0  ;;  %8516 = vmatmul.mubr.f32.gmra.mrb[218].mxu0 %v2459_v39  ;;  %v2391_v16 = vld [vmem:[#allocation2 + $0x141] sm:$0xff] }
 0x239   :  { %v1754_v11 = vpop.f32.mrb[126].mxu1  ;;  %8518 = vmatprep.mubr.f32.mxu0 %v2460_v63  ;;  %v2463_v39 = vld [vmem:[#allocation2 + $0x1a2] sm:$0xff] }
 0x23a   :  { %v10739_v60 = vadd.f32 %v1754_v11, %v10562_v14  ;;  %v1756_v29 = vpop.f32.mrb[127].mxu1  ;;  %2710 = vmatmul.mubr.f32.gmra.mrb[232].mxu1 %v2324_v2  ;;  %15140 = vst [vmem:[#allocation24_spill] sm:$0xff] %v10742_v15  ;;  %v2326_v11 = vld [vmem:[#allocation2 + $0x138] sm:$0xff] }
 0x23b   :  { %2714 = vmatprep.mubr.f32.mxu1 %v2389_v37  ;;  %v1114_v2 = vpop.f32.mrb[114].mxu0  ;;  %v15141_v37 = vld [vmem:[#allocation47_spill] sm:$0xff] }
 0x23c   :  { %v10748_v29 = vadd.f32 %v15141_v37, %v1114_v2  ;;  %v1116_v59 = vpop.f32.mrb[115].mxu0  ;;  %8519 = vmatmul.mubr.f32.gmra.mrb[220].mxu0 %v2461_v19  ;;  %v2392_v37 = vld [vmem:[#allocation2 + $0x151] sm:$0xff] }
 0x23d   :  { %v1759_v0 = vpop.f32.mrb[128].mxu1  ;;  %8521 = vmatprep.mubr.f32.mxu0 %v2462_v47  ;;  %v2465_v19 = vld [vmem:[#allocation2 + $0x1ea] sm:$0xff] }
 0x23e   :  { %v10745_v56 = vadd.f32 %v1759_v0, %v10569_v34  ;;  %v1761_v14 = vpop.f32.mrb[129].mxu1  ;;  %2715 = vmatmul.mubr.f32.gmra.mrb[234].mxu1 %v2325_v18  ;;  %15142 = vst [vmem:[#allocation22_spill] sm:$0xff] %v10748_v29  ;;  %v2464_v0 = vld [vmem:[#allocation2 + $0x1e2] sm:$0xff] }
 0x23f   :  { %2719 = vmatprep.mubr.f32.mxu1 %v2390_v54  ;;  %v1119_v18 = vpop.f32.mrb[116].mxu0  ;;  %v2327_v14 = vld [vmem:[#allocation2 + $0x140] sm:$0xff]  ;;  %v15143_v54 = vld [vmem:[#allocation52_spill] sm:$0xff] }
 0x240   :  { %v10754_v15 = vadd.f32 %v15143_v54, %v1119_v18  ;;  %v1121_v2 = vpop.f32.mrb[117].mxu0  ;;  %8522 = vmatmul.mubr.f32.gmra.mrb[222].mxu0 %v2463_v39  ;;  %v2393_v54 = vld [vmem:[#allocation2 + $0x159] sm:$0xff]  ;;  %v2467_v39 = vld [vmem:[#allocation2 + $0x202] sm:$0xff] }
 0x241   :  { %v1764_v22 = vpop.f32.mrb[130].mxu1  ;;  %8524 = vmatprep.mubr.f32.mxu0 %v2464_v0 }
 0x242   :  { %v10751_v63 = vadd.f32 %v1764_v22, %v10576_v26  ;;  %v1766_v34 = vpop.f32.mrb[131].mxu1  ;;  %2720 = vmatmul.mubr.f32.gmra.mrb[236].mxu1 %v2326_v11  ;;  %15144 = vst [vmem:[#allocation16_spill] sm:$0xff] %v10754_v15  ;;  %v2466_v22 = vld [vmem:[#allocation2 + $0x1fa] sm:$0xff] }
 0x243   :  { %2724 = vmatprep.mubr.f32.mxu1 %v2391_v16  ;;  %v1124_v11 = vpop.f32.mrb[118].mxu0  ;;  %v2328_v34 = vld [vmem:[#allocation2 + $0x150] sm:$0xff]  ;;  %v15145_v16 = vld [vmem:[#allocation50_spill] sm:$0xff] }
 0x244   :  { %v10760_v29 = vadd.f32 %v15145_v16, %v1124_v11  ;;  %v1126_v18 = vpop.f32.mrb[119].mxu0  ;;  %8525 = vmatmul.mubr.f32.gmra.mrb[224].mxu0 %v2465_v19  ;;  %v2394_v16 = vld [vmem:[#allocation2 + $0x169] sm:$0xff]  ;;  %v2469_v19 = vld [vmem:[#allocation2 + $0x21a] sm:$0xff] }
 0x245   :  { %v1769_v59 = vpop.f32.mrb[132].mxu1  ;;  %8527 = vmatprep.mubr.f32.mxu0 %v2466_v22 }
 0x246   :  { %v10757_v47 = vadd.f32 %v1769_v59, %v10583_v52  ;;  %v1771_v26 = vpop.f32.mrb[133].mxu1  ;;  %2725 = vmatmul.mubr.f32.gmra.mrb[238].mxu1 %v2327_v14  ;;  %15146 = vst [vmem:[#allocation23_spill] sm:$0xff] %v10760_v29  ;;  %v2468_v59 = vld [vmem:[#allocation2 + $0x212] sm:$0xff] }
 0x247   :  { %2729 = vmatprep.mubr.f32.mxu1 %v2392_v37  ;;  %v1129_v14 = vpop.f32.mrb[120].mxu0  ;;  %v2329_v26 = vld [vmem:[#allocation2 + $0x158] sm:$0xff] }
 0x248   :  { %v15147_v37 = vld [vmem:[#allocation56_spill] sm:$0xff]  ;;  %v1131_v11 = vpop.f32.mrb[121].mxu0  ;;  %8528 = vmatmul.mubr.f32.gmra.mrb[226].mxu0 %v2467_v39 }
 0x249   :  { %v1774_v2 = vpop.f32.mrb[134].mxu1  ;;  %v10766_v15 = vadd.f32 %v15147_v37, %v1129_v14  ;;  %8530 = vmatprep.mubr.f32.mxu0 %v2468_v59  ;;  %v2395_v37 = vld [vmem:[#allocation2 + $0x171] sm:$0xff] }
 0x24a   :  { %v10763_v0 = vadd.f32 %v1774_v2, %v10590_v40  ;;  %v1776_v52 = vpop.f32.mrb[135].mxu1  ;;  %2730 = vmatmul.mubr.f32.gmra.mrb[240].mxu1 %v2328_v34  ;;  %v2470_v2 = vld [vmem:[#allocation2 + $0x22a] sm:$0xff]  ;;  %v2471_v39 = vld [vmem:[#allocation2 + $0x232] sm:$0xff] }
 0x24b   :  { %2734 = vmatprep.mubr.f32.mxu1 %v2393_v54  ;;  %15148 = vst [vmem:[#allocation25_spill] sm:$0xff] %v10766_v15  ;;  %v1134_v34 = vpop.f32.mrb[122].mxu0  ;;  %v2330_v52 = vld [vmem:[#allocation2 + $0x168] sm:$0xff] }
 0x24c   :  { %v15149_v54 = vld [vmem:[#allocation54_spill] sm:$0xff]  ;;  %v1136_v14 = vpop.f32.mrb[123].mxu0  ;;  %8531 = vmatmul.mubr.f32.gmra.mrb[228].mxu0 %v2469_v19 }
 0x24d   :  { %v1779_v18 = vpop.f32.mrb[136].mxu1  ;;  %v10772_v29 = vadd.f32 %v15149_v54, %v1134_v34  ;;  %8533 = vmatprep.mubr.f32.mxu0 %v2470_v2  ;;  %v2396_v54 = vld [vmem:[#allocation2 + $0x181] sm:$0xff]  ;;  %v2473_v19 = vld [vmem:[#allocation2 + $0x24a] sm:$0xff] }
 0x24e   :  { %v10769_v22 = vadd.f32 %v1779_v18, %v10596_v46  ;;  %v1781_v40 = vpop.f32.mrb[137].mxu1  ;;  %2735 = vmatmul.mubr.f32.gmra.mrb[242].mxu1 %v2329_v26  ;;  %v2472_v18 = vld [vmem:[#allocation2 + $0x242] sm:$0xff] }
 0x24f   :  { %2739 = vmatprep.mubr.f32.mxu1 %v2394_v16  ;;  %15150 = vst [vmem:[#allocation18_spill] sm:$0xff] %v10772_v29  ;;  %v1139_v26 = vpop.f32.mrb[124].mxu0  ;;  %v2331_v40 = vld [vmem:[#allocation2 + $0x170] sm:$0xff]  ;;  %v15151_v16 = vld [vmem:[#allocation60_spill] sm:$0xff] }
 0x250   :  { %v10778_v15 = vadd.f32 %v15151_v16, %v1139_v26  ;;  %v1141_v34 = vpop.f32.mrb[125].mxu0  ;;  %8534 = vmatmul.mubr.f32.gmra.mrb[230].mxu0 %v2471_v39  ;;  %v2397_v16 = vld [vmem:[#allocation2 + $0x189] sm:$0xff] }
 0x251   :  { %v1784_v11 = vpop.f32.mrb[138].mxu1  ;;  %8536 = vmatprep.mubr.f32.mxu0 %v2472_v18  ;;  %v2475_v39 = vld [vmem:[#allocation2 + $0x262] sm:$0xff] }
 0x252   :  { %v10775_v59 = vadd.f32 %v1784_v11, %v10602_v57  ;;  %v1786_v46 = vpop.f32.mrb[139].mxu1  ;;  %2740 = vmatmul.mubr.f32.gmra.mrb[244].mxu1 %v2330_v52  ;;  %v2474_v11 = vld [vmem:[#allocation2 + $0x25a] sm:$0xff] }
 0x253   :  { %2744 = vmatprep.mubr.f32.mxu1 %v2395_v37  ;;  %v1144_v52 = vpop.f32.mrb[126].mxu0  ;;  %v2332_v46 = vld [vmem:[#allocation2 + $0x180] sm:$0xff]  ;;  %v15152_v37 = vld [vmem:[#allocation58_spill] sm:$0xff] }
 0x254   :  { %v10784_v29 = vadd.f32 %v15152_v37, %v1144_v52  ;;  %v1146_v26 = vpop.f32.mrb[127].mxu0  ;;  %8537 = vmatmul.mubr.f32.gmra.mrb[232].mxu0 %v2473_v19  ;;  %v2398_v37 = vld [vmem:[#allocation2 + $0x199] sm:$0xff] }
 0x255   :  { %v1789_v14 = vpop.f32.mrb[140].mxu1  ;;  %8539 = vmatprep.mubr.f32.mxu0 %v2474_v11  ;;  %v2477_v11 = vld [vmem:[#allocation2 + $0x27a] sm:$0xff] }
 0x256   :  { %v10781_v2 = vadd.f32 %v1789_v14, %v10608_v48  ;;  %v1791_v57 = vpop.f32.mrb[141].mxu1  ;;  %2745 = vmatmul.mubr.f32.gmra.mrb[246].mxu1 %v2331_v40  ;;  %v2476_v14 = vld [vmem:[#allocation2 + $0x272] sm:$0xff] }
 0x257   :  { %2749 = vmatprep.mubr.f32.mxu1 %v2396_v54  ;;  %v8350_v40 = vpop.f32.mrb[128].mxu0  ;;  %v2333_v57 = vld [vmem:[#allocation2 + $0x188] sm:$0xff] }
 0x258   :  { %v10790_v54 = vadd.f32 %v8350_v40, %v10523_v41  ;;  %v1984_v52 = vpop.f32.mrb[129].mxu0  ;;  %8540 = vmatmul.mubr.f32.gmra.mrb[234].mxu0 %v2475_v39  ;;  %v2399_v39 = vld [vmem:[#allocation2 + $0x1a1] sm:$0xff] }
 0x259   :  { %v1794_v34 = vpop.f32.mrb[142].mxu1  ;;  %v10793_v19 = vadd.f32 %v1984_v52, %v10515_v61  ;;  %8542 = vmatprep.mubr.f32.mxu0 %v2476_v14  ;;  %v15156_v61 = vld [vmem:[#allocation62_spill] sm:$0xff]  ;;  %v2479_v14 = vld [vmem:[#allocation2 + $0x292] sm:$0xff] }
 0x25a   :  { %v10787_v18 = vadd.f32 %v1794_v34, %v10614_v43  ;;  %v1796_v48 = vpop.f32.mrb[143].mxu1  ;;  %2750 = vmatmul.mubr.f32.gmra.mrb[248].mxu1 %v2332_v46  ;;  %15153 = vst [vmem:[#allocation27_spill] sm:$0xff] %v10790_v54  ;;  %v2478_v34 = vld [vmem:[#allocation2 + $0x28a] sm:$0xff] }
 0x25b   :  { %2754 = vmatprep.mubr.f32.mxu1 %v2397_v16  ;;  %15154 = vst [vmem:[#allocation21_spill] sm:$0xff] %v10793_v19  ;;  %v8353_v16 = vpop.f32.mrb[130].mxu0  ;;  %v2334_v48 = vld [vmem:[#allocation2 + $0x198] sm:$0xff]  ;;  %v15160_v19 = vld [vmem:[#allocation63_spill] sm:$0xff] }
 0x25c   :  { %v10799_v41 = vadd.f32 %v8353_v16, %v10537_v28  ;;  %v1994_v40 = vpop.f32.mrb[131].mxu0  ;;  %8543 = vmatmul.mubr.f32.gmra.mrb[236].mxu0 %v2477_v11 }
 0x25d   :  { %v1799_v26 = vpop.f32.mrb[144].mxu1  ;;  %v10802_v52 = vadd.f32 %v1994_v40, %v15156_v61  ;;  %8545 = vmatprep.mubr.f32.mxu0 %v2478_v34  ;;  %v2481_v34 = vld [vmem:[#allocation2 + $0x2aa] sm:$0xff] }
 0x25e   :  { %v10796_v43 = vadd.f32 %v1799_v26, %v10620_v51  ;;  %v1801_v46 = vpop.f32.mrb[145].mxu1  ;;  %2755 = vmatmul.mubr.f32.gmra.mrb[250].mxu1 %v2333_v57  ;;  %15155 = vst [vmem:[#allocation26_spill] sm:$0xff] %v10799_v41  ;;  %v2480_v26 = vld [vmem:[#allocation2 + $0x2a2] sm:$0xff] }
 0x25f   :  { %2759 = vmatprep.mubr.f32.mxu1 %v2398_v37  ;;  %15157 = vst [vmem:[#allocation28_spill] sm:$0xff] %v10802_v52  ;;  %v8356_v37 = vpop.f32.mrb[132].mxu0  ;;  %v15158_v46 = vld [vmem:[#allocation64_spill] sm:$0xff]  ;;  %v2400_v41 = vld [vmem:[#allocation2 + $0x1e1] sm:$0xff] }
 0x260   :  { %v10808_v28 = vadd.f32 %v8356_v37, %v15158_v46  ;;  %v2004_v16 = vpop.f32.mrb[133].mxu0  ;;  %8546 = vmatmul.mubr.f32.gmra.mrb[238].mxu0 %v2479_v14  ;;  %v15163_v37 = vld [vmem:[#allocation17_spill] sm:$0xff] }
 0x261   :  { %v1804_v54 = vpop.f32.mrb[146].mxu1  ;;  %v10811_v40 = vadd.f32 %v2004_v16, %v15160_v19  ;;  %8548 = vmatprep.mubr.f32.mxu0 %v2480_v26  ;;  %v2401_v19 = vld [vmem:[#allocation2 + $0x1e9] sm:$0xff]  ;;  %v15165_v16 = vld [vmem:[#allocation13_spill] sm:$0xff] }
 0x262   :  { %v10805_v51 = vadd.f32 %v1804_v54, %v10626_v1  ;;  %v1806_v57 = vpop.f32.mrb[147].mxu1  ;;  %2760 = vmatmul.mubr.f32.gmra.mrb[252].mxu1 %v2334_v48  ;;  %15159 = vst [vmem:[#allocation30_spill] sm:$0xff] %v10808_v28  ;;  %v10816_v48 = vld [vmem:[#allocation2 + $0x8] sm:$0xff] }
 0x263   :  { %2764 = vmatprep.mubr.f32.mxu1 %v2399_v39  ;;  %15161 = vst [vmem:[#allocation29_spill] sm:$0xff] %v10811_v40  ;;  %15162 = vst [vmem:[#allocation33_spill] sm:$0xff] %v10816_v48  ;;  %v2482_v39 = vld [vmem:[#allocation2 + $0x2ba] sm:$0xff]  ;;  %v8359_v61 = vpop.f32.mrb[134].mxu0  ;;  %v2337_v28 = vld [vmem:[#allocation2 + $0x1e8] sm:$0xff] }
 0x264   :  { %v2336_v57 = vld [vmem:[#allocation2 + $0x1e0] sm:$0xff]  ;;  %v10820_v14 = vadd.f32 %v8359_v61, %v15163_v37  ;;  %v2014_v46 = vpop.f32.mrb[135].mxu0  ;;  %8549 = vmatmul.mubr.f32.gmra.mrb[240].mxu0 %v2481_v34  ;;  %v15166_v61 = vld [vmem:[#allocation20_spill] sm:$0xff] }
 0x265   :  { %v1809_v11 = vpop.f32.mrb[148].mxu1  ;;  %v10823_v40 = vadd.f32 %v2014_v46, %v15165_v16  ;;  %8551 = vmatprep.mubr.f32.mxu0 %v2482_v39  ;;  %v2402_v34 = vld [vmem:[#allocation2 + $0x1f9] sm:$0xff]  ;;  %v15168_v46 = vld [vmem:[#allocation14_spill] sm:$0xff] }
 0x266   :  { %v10814_v1 = vadd.f32 %v1809_v11, %v10632_v62  ;;  %v1811_v54 = vpop.f32.mrb[149].mxu1  ;;  %2765 = vmatmul.mubr.f32.gmra.mrb[254].mxu1 %v10816_v48  ;;  %15164 = vst [vmem:[#allocation31_spill] sm:$0xff] %v10820_v14  ;;  %v2483_v62 = vld [vmem:[#allocation2 + $0x2c2] sm:$0xff]  ;;  %v2484_v48 = vld [vmem:[#allocation2 + $0x2d2] sm:$0xff]  ;;  %v2485_v39 = vld [vmem:[#allocation2 + $0x2da] sm:$0xff] }
 0x267   :  { %2769 = vmatprep.mubr.f32.mxu1 %v2400_v41  ;;  %v8362_v41 = vpop.f32.mrb[136].mxu0 }
 0x268   :  { %v10829_v37 = vadd.f32 %v8362_v41, %v15166_v61  ;;  %v2024_v14 = vpop.f32.mrb[137].mxu0  ;;  %8552 = vmatmul.mubr.f32.gmra.mrb[242].mxu0 %v2483_v62  ;;  %v2403_v62 = vld [vmem:[#allocation2 + $0x201] sm:$0xff] }
 0x269   :  { %v1814_v26 = vpop.f32.mrb[150].mxu1  ;;  %v10832_v16 = vadd.f32 %v2024_v14, %v15168_v46  ;;  %8554 = vmatprep.mubr.f32.mxu0 %v2484_v48  ;;  %v15170_v14 = vld [vmem:[#allocation19_spill] sm:$0xff] }
 0x26a   :  { %v10826_v11 = vadd.f32 %v1814_v26, %v10639_v8  ;;  %v1816_v54 = vpop.f32.mrb[151].mxu1  ;;  %2770 = vmatmul.mubr.f32.gmra.mrb[0].mxu1 %v2336_v57  ;;  %15167 = vst [vmem:[#allocation32_spill] sm:$0xff] %v10829_v37  ;;  %v2486_v26 = vld [vmem:[#allocation2 + $0x2ea] sm:$0xff]  ;;  %v2487_v48 = vld [vmem:[#allocation2 + $0x2f2] sm:$0xff] }
 0x26b   :  { %2774 = vmatprep.mubr.f32.mxu1 %v2401_v19  ;;  %v8365_v19 = vpop.f32.mrb[138].mxu0  ;;  %v2338_v54 = vld [vmem:[#allocation2 + $0x1f8] sm:$0xff] }
 0x26c   :  { %v10838_v41 = vadd.f32 %v8365_v19, %v10593_v6  ;;  %v2034_v61 = vpop.f32.mrb[139].mxu0  ;;  %8555 = vmatmul.mubr.f32.gmra.mrb[244].mxu0 %v2485_v39  ;;  %v2404_v39 = vld [vmem:[#allocation2 + $0x211] sm:$0xff] }
 0x26d   :  { %v1819_v52 = vpop.f32.mrb[152].mxu1  ;;  %v10841_v46 = vadd.f32 %v2034_v61, %v15170_v14  ;;  %8557 = vmatprep.mubr.f32.mxu0 %v2486_v26  ;;  %v2489_v26 = vld [vmem:[#allocation2 + $0x30a] sm:$0xff] }
 0x26e   :  { %v10835_v8 = vadd.f32 %v1819_v52, %v10647_v33  ;;  %v1821_v57 = vpop.f32.mrb[153].mxu1  ;;  %2775 = vmatmul.mubr.f32.gmra.mrb[2].mxu1 %v2337_v28  ;;  %15169 = vst [vmem:[#allocation34_spill] sm:$0xff] %v10838_v41  ;;  %v2488_v28 = vld [vmem:[#allocation2 + $0x302] sm:$0xff]  ;;  %v2340_v14 = vld [vmem:[#allocation2 + $0x210] sm:$0xff] }
 0x26f   :  { %2779 = vmatprep.mubr.f32.mxu1 %v2402_v34  ;;  %v8368_v34 = vpop.f32.mrb[140].mxu0  ;;  %v2339_v57 = vld [vmem:[#allocation2 + $0x200] sm:$0xff] }
 0x270   :  { %v10847_v6 = vadd.f32 %v8368_v34, %v10605_v10  ;;  %v2044_v19 = vpop.f32.mrb[141].mxu0  ;;  %8558 = vmatmul.mubr.f32.gmra.mrb[246].mxu0 %v2487_v48  ;;  %v2405_v48 = vld [vmem:[#allocation2 + $0x219] sm:$0xff] }
 0x271   :  { %v1824_v37 = vpop.f32.mrb[154].mxu1  ;;  %v10850_v61 = vadd.f32 %v2044_v19, %v10599_v42  ;;  %8560 = vmatprep.mubr.f32.mxu0 %v2488_v28  ;;  %v15172_v42 = vld [vmem:[#allocation15_spill] sm:$0xff]  ;;  %v2491_v28 = vld [vmem:[#allocation2 + $0x322] sm:$0xff] }
 0x272   :  { %v10844_v33 = vadd.f32 %v1824_v37, %v10655_v32  ;;  %v1826_v52 = vpop.f32.mrb[155].mxu1  ;;  %2780 = vmatmul.mubr.f32.gmra.mrb[4].mxu1 %v2338_v54  ;;  %v2490_v54 = vld [vmem:[#allocation2 + $0x31a] sm:$0xff] }
 0x273   :  { %2784 = vmatprep.mubr.f32.mxu1 %v2403_v62  ;;  %v8371_v62 = vpop.f32.mrb[142].mxu0 }
 0x274   :  { %v10856_v10 = vadd.f32 %v8371_v62, %v10617_v30  ;;  %v2054_v52 = vpop.f32.mrb[143].mxu0  ;;  %8561 = vmatmul.mubr.f32.gmra.mrb[248].mxu0 %v2489_v26  ;;  %v2406_v26 = vld [vmem:[#allocation2 + $0x229] sm:$0xff] }
 0x275   :  { %v1829_v41 = vpop.f32.mrb[156].mxu1  ;;  %v10859_v19 = vadd.f32 %v2054_v52, %v15172_v42  ;;  %8563 = vmatprep.mubr.f32.mxu0 %v2490_v54  ;;  %v2493_v54 = vld [vmem:[#allocation2 + $0x33a] sm:$0xff]  ;;  %v2342_v42 = vld [vmem:[#allocation2 + $0x228] sm:$0xff] }
 0x276   :  { %v10853_v32 = vadd.f32 %v1829_v41, %v10663_v55  ;;  %v1831_v37 = vpop.f32.mrb[157].mxu1  ;;  %2785 = vmatmul.mubr.f32.gmra.mrb[6].mxu1 %v2339_v57  ;;  %15171 = vst [vmem:[#allocation35_spill] sm:$0xff] %v10856_v10  ;;  %v2492_v57 = vld [vmem:[#allocation2 + $0x332] sm:$0xff] }
 0x277   :  { %2789 = vmatprep.mubr.f32.mxu1 %v2404_v39  ;;  %v8374_v39 = vpop.f32.mrb[144].mxu0  ;;  %v2341_v37 = vld [vmem:[#allocation2 + $0x218] sm:$0xff] }
 0x278   :  { %v10865_v30 = vadd.f32 %v8374_v39, %v10629_v44  ;;  %v2064_v62 = vpop.f32.mrb[145].mxu0  ;;  %8564 = vmatmul.mubr.f32.gmra.mrb[250].mxu0 %v2491_v28  ;;  %v2407_v28 = vld [vmem:[#allocation2 + $0x231] sm:$0xff] }
 0x279   :  { %v1834_v34 = vpop.f32.mrb[158].mxu1  ;;  %v10868_v52 = vadd.f32 %v2064_v62, %v10623_v36  ;;  %8566 = vmatprep.mubr.f32.mxu0 %v2492_v57  ;;  %v2495_v57 = vld [vmem:[#allocation2 + $0x352] sm:$0xff] }
 0x27a   :  { %v10862_v55 = vadd.f32 %v1834_v34, %v10671_v13  ;;  %v1836_v41 = vpop.f32.mrb[159].mxu1  ;;  %2790 = vmatmul.mubr.f32.gmra.mrb[8].mxu1 %v2340_v14  ;;  %v2494_v34 = vld [vmem:[#allocation2 + $0x34a] sm:$0xff] }
 0x27b   :  { %2794 = vmatprep.mubr.f32.mxu1 %v2405_v48  ;;  %v8377_v48 = vpop.f32.mrb[146].mxu0  ;;  %v2343_v62 = vld [vmem:[#allocation2 + $0x230] sm:$0xff] }
 0x27c   :  { %v10874_v44 = vadd.f32 %v8377_v48, %v10644_v9  ;;  %v2074_v41 = vpop.f32.mrb[147].mxu0  ;;  %8567 = vmatmul.mubr.f32.gmra.mrb[252].mxu0 %v2493_v54 }
 0x27d   :  { %v1839_v10 = vpop.f32.mrb[160].mxu1  ;;  %v10877_v36 = vadd.f32 %v2074_v41, %v10636_v17  ;;  %8569 = vmatprep.mubr.f32.mxu0 %v2494_v34 }
 0x27e   :  { %v10871_v13 = vadd.f32 %v1839_v10, %v10679_v20  ;;  %v1841_v14 = vpop.f32.mrb[161].mxu1  ;;  %2795 = vmatmul.mubr.f32.gmra.mrb[10].mxu1 %v2341_v37 }
 0x27f   :  { %2799 = vmatprep.mubr.f32.mxu1 %v2406_v26  ;;  %v8380_v37 = vpop.f32.mrb[148].mxu0  ;;  %v2408_v14 = vld [vmem:[#allocation2 + $0x241] sm:$0xff] }
 0x280   :  { %v10883_v9 = vadd.f32 %v8380_v37, %v10660_v35  ;;  %v2084_v26 = vpop.f32.mrb[149].mxu0  ;;  %8570 = vmatmul.mubr.f32.gmra.mrb[254].mxu0 %v2495_v57  ;;  %v2345_v37 = vld [vmem:[#allocation2 + $0x248] sm:$0xff] }
 0x281   :  { %v1844_v39 = vpop.f32.mrb[162].mxu1  ;;  %v10886_v17 = vadd.f32 %v2084_v26, %v10652_v7 }
 0x282   :  { %v10880_v20 = vadd.f32 %v1844_v39, %v10687_v21  ;;  %v1846_v10 = vpop.f32.mrb[163].mxu1  ;;  %2800 = vmatmul.mubr.f32.gmra.mrb[12].mxu1 %v2342_v42  ;;  %v2344_v42 = vld [vmem:[#allocation2 + $0x240] sm:$0xff] }
 0x283   :  { %2804 = vmatprep.mubr.f32.mxu1 %v2407_v28  ;;  %v8383_v48 = vpop.f32.mrb[150].mxu0  ;;  %v2409_v28 = vld [vmem:[#allocation2 + $0x249] sm:$0xff] }
 0x284   :  { %v10892_v41 = vadd.f32 %v8383_v48, %v10676_v4  ;;  %v2094_v35 = vpop.f32.mrb[151].mxu0  ;;  %v2410_v4 = vld [vmem:[#allocation2 + $0x259] sm:$0xff] }
 0x285   :  { %v1849_v54 = vpop.f32.mrb[164].mxu1  ;;  %v10895_v57 = vadd.f32 %v2094_v35, %v10668_v5  ;;  %v2346_v48 = vld [vmem:[#allocation2 + $0x258] sm:$0xff] }
 0x286   :  { %v10889_v34 = vadd.f32 %v1849_v54, %v10695_v50  ;;  %v1851_v21 = vpop.f32.mrb[165].mxu1  ;;  %2805 = vmatmul.mubr.f32.gmra.mrb[14].mxu1 %v2343_v62 }
 0x287   :  { %2809 = vmatprep.mubr.f32.mxu1 %v2408_v14  ;;  %v8386_v50 = vpop.f32.mrb[152].mxu0 }
 0x288   :  { %v10901_v62 = vadd.f32 %v8386_v50, %v10692_v49  ;;  %v2104_v26 = vpop.f32.mrb[153].mxu0  ;;  %v2411_v49 = vld [vmem:[#allocation2 + $0x261] sm:$0xff] }
 0x289   :  { %v1854_v39 = vpop.f32.mrb[166].mxu1  ;;  %v10904_v54 = vadd.f32 %v2104_v26, %v10684_v24  ;;  %v2347_v50 = vld [vmem:[#allocation2 + $0x260] sm:$0xff] }
 0x28a   :  { %v10898_v7 = vadd.f32 %v1854_v39, %v10703_v12  ;;  %v1856_v10 = vpop.f32.mrb[167].mxu1  ;;  %2810 = vmatmul.mubr.f32.gmra.mrb[16].mxu1 %v2344_v42 }
 0x28b   :  { %2814 = vmatprep.mubr.f32.mxu1 %v2409_v28  ;;  %v8389_v12 = vpop.f32.mrb[154].mxu0 }
 0x28c   :  { %v10910_v42 = vadd.f32 %v8389_v12, %v10708_v38  ;;  %v2114_v35 = vpop.f32.mrb[155].mxu0  ;;  %v2412_v38 = vld [vmem:[#allocation2 + $0x271] sm:$0xff] }
 0x28d   :  { %v1859_v14 = vpop.f32.mrb[168].mxu1  ;;  %v10913_v39 = vadd.f32 %v2114_v35, %v10700_v58  ;;  %v2348_v12 = vld [vmem:[#allocation2 + $0x270] sm:$0xff] }
 0x28e   :  { %v10907_v5 = vadd.f32 %v1859_v14, %v10711_v31  ;;  %v1861_v21 = vpop.f32.mrb[169].mxu1  ;;  %2815 = vmatmul.mubr.f32.gmra.mrb[18].mxu1 %v2345_v37 }
 0x28f   :  { %2819 = vmatprep.mubr.f32.mxu1 %v2410_v4  ;;  %v8392_v31 = vpop.f32.mrb[156].mxu0 }
 0x290   :  { %v10919_v37 = vadd.f32 %v8392_v31, %v10724_v3  ;;  %v2124_v26 = vpop.f32.mrb[157].mxu0  ;;  %v2413_v3 = vld [vmem:[#allocation2 + $0x279] sm:$0xff] }
 0x291   :  { %v1864_v28 = vpop.f32.mrb[170].mxu1  ;;  %v10922_v14 = vadd.f32 %v2124_v26, %v10716_v23  ;;  %v2349_v31 = vld [vmem:[#allocation2 + $0x278] sm:$0xff] }
 0x292   :  { %v10916_v24 = vadd.f32 %v1864_v28, %v10719_v25  ;;  %v1866_v10 = vpop.f32.mrb[171].mxu1  ;;  %2820 = vmatmul.mubr.f32.gmra.mrb[20].mxu1 %v2346_v48 }
 0x293   :  { %2824 = vmatprep.mubr.f32.mxu1 %v2411_v49  ;;  %v8395_v25 = vpop.f32.mrb[158].mxu0 }
 0x294   :  { %v10928_v48 = vadd.f32 %v8395_v25, %v10739_v60  ;;  %v2134_v35 = vpop.f32.mrb[159].mxu0  ;;  %v2414_v60 = vld [vmem:[#allocation2 + $0x289] sm:$0xff] }
 0x295   :  { %v1869_v4 = vpop.f32.mrb[172].mxu1  ;;  %v10931_v28 = vadd.f32 %v2134_v35, %v10732_v45 }
 0x296   :  { %v10925_v58 = vadd.f32 %v1869_v4, %v10727_v53  ;;  %v1871_v21 = vpop.f32.mrb[173].mxu1  ;;  %2825 = vmatmul.mubr.f32.gmra.mrb[22].mxu1 %v2347_v50 }
 0x297   :  { %2829 = vmatprep.mubr.f32.mxu1 %v2412_v38  ;;  %v8398_v53 = vpop.f32.mrb[160].mxu0  ;;  %v15173_v21 = vld [vmem:[#allocation24_spill] sm:$0xff] }
 0x298   :  { %v10937_v50 = vadd.f32 %v8398_v53, %v10751_v63  ;;  %v2144_v26 = vpop.f32.mrb[161].mxu0  ;;  %v2415_v63 = vld [vmem:[#allocation2 + $0x291] sm:$0xff]  ;;  %v15175_v53 = vld [vmem:[#allocation22_spill] sm:$0xff] }
 0x299   :  { %v1874_v49 = vpop.f32.mrb[174].mxu1  ;;  %v10940_v4 = vadd.f32 %v2144_v26, %v10745_v56 }
 0x29a   :  { %v10934_v23 = vadd.f32 %v1874_v49, %v10735_v27  ;;  %v1876_v10 = vpop.f32.mrb[175].mxu1  ;;  %2830 = vmatmul.mubr.f32.gmra.mrb[24].mxu1 %v2348_v12  ;;  %v2350_v12 = vld [vmem:[#allocation2 + $0x288] sm:$0xff] }
 0x29b   :  { %2834 = vmatprep.mubr.f32.mxu1 %v2413_v3  ;;  %v8401_v27 = vpop.f32.mrb[162].mxu0 }
 0x29c   :  { %v10946_v35 = vadd.f32 %v8401_v27, %v10763_v0  ;;  %v2154_v3 = vpop.f32.mrb[163].mxu0  ;;  %v2416_v0 = vld [vmem:[#allocation2 + $0x2a1] sm:$0xff] }
 0x29d   :  { %v1879_v38 = vpop.f32.mrb[176].mxu1  ;;  %v10949_v10 = vadd.f32 %v2154_v3, %v10757_v47 }
 0x29e   :  { %v10943_v45 = vadd.f32 %v1879_v38, %v15173_v21  ;;  %v1881_v25 = vpop.f32.mrb[177].mxu1  ;;  %2835 = vmatmul.mubr.f32.gmra.mrb[26].mxu1 %v2349_v31  ;;  %15174 = vst [vmem:[#allocation36_spill] sm:$0xff] %v10946_v35  ;;  %v2351_v31 = vld [vmem:[#allocation2 + $0x290] sm:$0xff]  ;;  %v15177_v35 = vld [vmem:[#allocation16_spill] sm:$0xff] }
 0x29f   :  { %2839 = vmatprep.mubr.f32.mxu1 %v2414_v60  ;;  %v8404_v38 = vpop.f32.mrb[164].mxu0 }
 0x2a0   :  { %v10955_v60 = vadd.f32 %v8404_v38, %v10775_v59  ;;  %v2164_v21 = vpop.f32.mrb[165].mxu0  ;;  %v2417_v59 = vld [vmem:[#allocation2 + $0x2a9] sm:$0xff] }
 0x2a1   :  { %v1884_v49 = vpop.f32.mrb[178].mxu1  ;;  %v10958_v27 = vadd.f32 %v2164_v21, %v10769_v22 }
 0x2a2   :  { %v10952_v56 = vadd.f32 %v1884_v49, %v15175_v53  ;;  %v1886_v26 = vpop.f32.mrb[179].mxu1  ;;  %2840 = vmatmul.mubr.f32.gmra.mrb[28].mxu1 %v2350_v12  ;;  %15176 = vst [vmem:[#allocation37_spill] sm:$0xff] %v10955_v60  ;;  %v2352_v12 = vld [vmem:[#allocation2 + $0x2a0] sm:$0xff]  ;;  %v15179_v60 = vld [vmem:[#allocation23_spill] sm:$0xff] }
 0x2a3   :  { %2844 = vmatprep.mubr.f32.mxu1 %v2415_v63  ;;  %v8407_v49 = vpop.f32.mrb[166].mxu0 }
 0x2a4   :  { %v10964_v63 = vadd.f32 %v8407_v49, %v10787_v18  ;;  %v2174_v53 = vpop.f32.mrb[167].mxu0  ;;  %v2418_v18 = vld [vmem:[#allocation2 + $0x2b9] sm:$0xff] }
 0x2a5   :  { %v1889_v25 = vpop.f32.mrb[180].mxu1  ;;  %v10967_v38 = vadd.f32 %v2174_v53, %v10781_v2 }
 0x2a6   :  { %v10961_v47 = vadd.f32 %v1889_v25, %v15177_v35  ;;  %v1891_v3 = vpop.f32.mrb[181].mxu1  ;;  %2845 = vmatmul.mubr.f32.gmra.mrb[30].mxu1 %v2351_v31  ;;  %15178 = vst [vmem:[#allocation39_spill] sm:$0xff] %v10964_v63  ;;  %v2353_v31 = vld [vmem:[#allocation2 + $0x2a8] sm:$0xff]  ;;  %v15181_v63 = vld [vmem:[#allocation25_spill] sm:$0xff] }
 0x2a7   :  { %2849 = vmatprep.mubr.f32.mxu1 %v2416_v0  ;;  %v8410_v35 = vpop.f32.mrb[168].mxu0 }
 0x2a8   :  { %v10973_v0 = vadd.f32 %v8410_v35, %v10805_v51  ;;  %v2184_v25 = vpop.f32.mrb[169].mxu0  ;;  %v2419_v51 = vld [vmem:[#allocation2 + $0x2c1] sm:$0xff] }
 0x2a9   :  { %v1894_v26 = vpop.f32.mrb[182].mxu1  ;;  %v10976_v49 = vadd.f32 %v2184_v25, %v10796_v43 }
 0x2aa   :  { %v10970_v22 = vadd.f32 %v1894_v26, %v15179_v60  ;;  %v1896_v21 = vpop.f32.mrb[183].mxu1  ;;  %2850 = vmatmul.mubr.f32.gmra.mrb[32].mxu1 %v2352_v12  ;;  %15180 = vst [vmem:[#allocation38_spill] sm:$0xff] %v10973_v0  ;;  %v2354_v12 = vld [vmem:[#allocation2 + $0x2b8] sm:$0xff]  ;;  %v15182_v0 = vld [vmem:[#allocation18_spill] sm:$0xff] }
 0x2ab   :  { %2854 = vmatprep.mubr.f32.mxu1 %v2417_v59  ;;  %v8413_v60 = vpop.f32.mrb[170].mxu0 }
 0x2ac   :  { %v10982_v59 = vadd.f32 %v8413_v60, %v10826_v11  ;;  %v2194_v26 = vpop.f32.mrb[171].mxu0  ;;  %v2420_v11 = vld [vmem:[#allocation2 + $0x2d1] sm:$0xff] }
 0x2ad   :  { %v1899_v3 = vpop.f32.mrb[184].mxu1  ;;  %v10985_v35 = vadd.f32 %v2194_v26, %v10814_v1 }
 0x2ae   :  { %v10979_v2 = vadd.f32 %v1899_v3, %v15181_v63  ;;  %v1901_v53 = vpop.f32.mrb[185].mxu1  ;;  %2855 = vmatmul.mubr.f32.gmra.mrb[34].mxu1 %v2353_v31  ;;  %v2355_v31 = vld [vmem:[#allocation2 + $0x2c0] sm:$0xff] }
 0x2af   :  { %2859 = vmatprep.mubr.f32.mxu1 %v2418_v18  ;;  %v8416_v63 = vpop.f32.mrb[172].mxu0 }
 0x2b0   :  { %v10991_v18 = vadd.f32 %v8416_v63, %v10844_v33  ;;  %v2204_v3 = vpop.f32.mrb[173].mxu0  ;;  %v2421_v33 = vld [vmem:[#allocation2 + $0x2d9] sm:$0xff] }
 0x2b1   :  { %v1904_v21 = vpop.f32.mrb[186].mxu1  ;;  %v10994_v60 = vadd.f32 %v2204_v3, %v10835_v8 }
 0x2b2   :  { %v10988_v43 = vadd.f32 %v1904_v21, %v15182_v0  ;;  %v1906_v25 = vpop.f32.mrb[187].mxu1  ;;  %2860 = vmatmul.mubr.f32.gmra.mrb[36].mxu1 %v2354_v12  ;;  %15183 = vst [vmem:[#allocation40_spill] sm:$0xff] %v10991_v18  ;;  %v2356_v12 = vld [vmem:[#allocation2 + $0x2d0] sm:$0xff] }
 0x2b3   :  { %2864 = vmatprep.mubr.f32.mxu1 %v2419_v51  ;;  %v8419_v0 = vpop.f32.mrb[174].mxu0 }
 0x2b4   :  { %v11000_v51 = vadd.f32 %v8419_v0, %v10862_v55  ;;  %v2214_v21 = vpop.f32.mrb[175].mxu0  ;;  %v2422_v55 = vld [vmem:[#allocation2 + $0x2e9] sm:$0xff] }
 0x2b5   :  { %v1909_v53 = vpop.f32.mrb[188].mxu1  ;;  %v11003_v63 = vadd.f32 %v2214_v21, %v10853_v32 }
 0x2b6   :  { %v10997_v1 = vadd.f32 %v1909_v53, %v10778_v15  ;;  %v1911_v26 = vpop.f32.mrb[189].mxu1  ;;  %2865 = vmatmul.mubr.f32.gmra.mrb[38].mxu1 %v2355_v31  ;;  %15184 = vst [vmem:[#allocation46_spill] sm:$0xff] %v11000_v51  ;;  %v2357_v31 = vld [vmem:[#allocation2 + $0x2d8] sm:$0xff] }
 0x2b7   :  { %2869 = vmatprep.mubr.f32.mxu1 %v2420_v11  ;;  %15185 = vst [vmem:[#allocation41_spill] sm:$0xff] %v11003_v63  ;;  %v8422_v15 = vpop.f32.mrb[176].mxu0 }
 0x2b8   :  { %v11009_v11 = vadd.f32 %v8422_v15, %v10880_v20  ;;  %v2224_v53 = vpop.f32.mrb[177].mxu0 }
 0x2b9   :  { %v1914_v25 = vpop.f32.mrb[190].mxu1  ;;  %v11012_v26 = vadd.f32 %v2224_v53, %v10871_v13  ;;  %v2359_v53 = vld [vmem:[#allocation2 + $0x2f0] sm:$0xff] }
 0x2ba   :  { %v11006_v8 = vadd.f32 %v1914_v25, %v10784_v29  ;;  %v1916_v3 = vpop.f32.mrb[191].mxu1  ;;  %2870 = vmatmul.mubr.f32.gmra.mrb[40].mxu1 %v2356_v12  ;;  %15186 = vst [vmem:[#allocation49_spill] sm:$0xff] %v11009_v11  ;;  %v2358_v29 = vld [vmem:[#allocation2 + $0x2e8] sm:$0xff]  ;;  %v2423_v25 = vld [vmem:[#allocation2 + $0x2f1] sm:$0xff] }
 0x2bb   :  { %2874 = vmatprep.mubr.f32.mxu1 %v2421_v33  ;;  %15187 = vst [vmem:[#allocation43_spill] sm:$0xff] %v11012_v26  ;;  %v8425_v21 = vpop.f32.mrb[178].mxu0 }
 0x2bc   :  { %v11017_v12 = vadd.f32 %v8425_v21, %v10898_v7  ;;  %v2234_v33 = vpop.f32.mrb[179].mxu0 }
 0x2bd   :  { %v11014_v0 = vpop.f32.mrb[192].mxu1  ;;  %v11020_v20 = vadd.f32 %v2234_v33, %v10889_v34  ;;  %v2360_v33 = vld [vmem:[#allocation2 + $0x300] sm:$0xff] }
 0x2be   :  { %v2613_v32 = vpop.f32.mrb[193].mxu1  ;;  %2875 = vmatmul.mubr.f32.gmra.mrb[42].mxu1 %v2357_v31  ;;  %15188 = vst [vmem:[#allocation51_spill] sm:$0xff] %v11017_v12 }
 0x2bf   :  { %2879 = vmatprep.mubr.f32.mxu1 %v2422_v55  ;;  %15189 = vst [vmem:[#allocation53_spill] sm:$0xff] %v11020_v20  ;;  %v8428_v13 = vpop.f32.mrb[180].mxu0  ;;  %v2424_v32 = vld [vmem:[#allocation2 + $0x301] sm:$0xff] }
 0x2c0   :  { %v11025_v31 = vadd.f32 %v8428_v13, %v10916_v24  ;;  %v2244_v55 = vpop.f32.mrb[181].mxu0  ;;  %v15212_v20 = vld [vmem:[#allocation33_spill] sm:$0xff] }
 0x2c1   :  { %v11022_v3 = vpop.f32.mrb[194].mxu1  ;;  %v11028_v7 = vadd.f32 %v2244_v55, %v10907_v5  ;;  %v2361_v55 = vld [vmem:[#allocation2 + $0x308] sm:$0xff] }
 0x2c2   :  { %v2618_v15 = vpop.f32.mrb[195].mxu1  ;;  %2880 = vmatmul.mubr.f32.gmra.mrb[44].mxu1 %v2358_v29  ;;  %15190 = vst [vmem:[#allocation42_spill] sm:$0xff] %v11025_v31 }
 0x2c3   :  { %2884 = vmatprep.mubr.f32.mxu1 %v2423_v25  ;;  %15191 = vst [vmem:[#allocation55_spill] sm:$0xff] %v11028_v7  ;;  %v8431_v34 = vpop.f32.mrb[182].mxu0  ;;  %v2425_v15 = vld [vmem:[#allocation2 + $0x309] sm:$0xff] }
 0x2c4   :  { %v11033_v29 = vadd.f32 %v8431_v34, %v10934_v23  ;;  %v2254_v25 = vpop.f32.mrb[183].mxu0 }
 0x2c5   :  { %v11030_v21 = vpop.f32.mrb[196].mxu1  ;;  %v11036_v24 = vadd.f32 %v2254_v25, %v10925_v58  ;;  %v2362_v58 = vld [vmem:[#allocation2 + $0x318] sm:$0xff]  ;;  %v2427_v25 = vld [vmem:[#allocation2 + $0x321] sm:$0xff] }
 0x2c6   :  { %v2623_v12 = vpop.f32.mrb[197].mxu1  ;;  %2885 = vmatmul.mubr.f32.gmra.mrb[46].mxu1 %v2359_v53  ;;  %15192 = vst [vmem:[#allocation57_spill] sm:$0xff] %v11033_v29 }
 0x2c7   :  { %2889 = vmatprep.mubr.f32.mxu1 %v2424_v32  ;;  %15193 = vst [vmem:[#allocation45_spill] sm:$0xff] %v11036_v24  ;;  %v8434_v5 = vpop.f32.mrb[184].mxu0  ;;  %v2426_v32 = vld [vmem:[#allocation2 + $0x319] sm:$0xff] }
 0x2c8   :  { %v11039_v12 = vadd.f32 %v8434_v5, %v10952_v56  ;;  %v2264_v53 = vpop.f32.mrb[185].mxu0 }
 0x2c9   :  { %v2626_v13 = vpop.f32.mrb[198].mxu1  ;;  %v11042_v7 = vadd.f32 %v2264_v53, %v10943_v45  ;;  %v2363_v45 = vld [vmem:[#allocation2 + $0x320] sm:$0xff] }
 0x2ca   :  { %v2628_v31 = vpop.f32.mrb[199].mxu1  ;;  %2890 = vmatmul.mubr.f32.gmra.mrb[48].mxu1 %v2360_v33  ;;  %15194 = vst [vmem:[#allocation59_spill] sm:$0xff] %v11039_v12 }
 0x2cb   :  { %2894 = vmatprep.mubr.f32.mxu1 %v2425_v15  ;;  %15195 = vst [vmem:[#allocation61_spill] sm:$0xff] %v11042_v7  ;;  %v8437_v29 = vpop.f32.mrb[186].mxu0  ;;  %v15206_v7 = vld [vmem:[#allocation26_spill] sm:$0xff] }
 0x2cc   :  { %v11045_v31 = vadd.f32 %v8437_v29, %v10970_v22  ;;  %v2274_v33 = vpop.f32.mrb[187].mxu0 }
 0x2cd   :  { %v2631_v23 = vpop.f32.mrb[200].mxu1  ;;  %v11048_v15 = vadd.f32 %v2274_v33, %v10961_v47  ;;  %v2364_v47 = vld [vmem:[#allocation2 + $0x330] sm:$0xff] }
 0x2ce   :  { %v2633_v34 = vpop.f32.mrb[201].mxu1  ;;  %2895 = vmatmul.mubr.f32.gmra.mrb[50].mxu1 %v2361_v55  ;;  %15196 = vst [vmem:[#allocation44_spill] sm:$0xff] %v11045_v31 }
 0x2cf   :  { %2899 = vmatprep.mubr.f32.mxu1 %v2426_v32  ;;  %15197 = vst [vmem:[#allocation48_spill] sm:$0xff] %v11048_v15  ;;  %v8440_v12 = vpop.f32.mrb[188].mxu0  ;;  %v2428_v32 = vld [vmem:[#allocation2 + $0x331] sm:$0xff] }
 0x2d0   :  { %v11051_v53 = vadd.f32 %v8440_v12, %v10988_v43  ;;  %v2284_v55 = vpop.f32.mrb[189].mxu0  ;;  %v2431_v15 = vld [vmem:[#allocation2 + $0x351] sm:$0xff] }
 0x2d1   :  { %v2636_v56 = vpop.f32.mrb[202].mxu1  ;;  %v11054_v34 = vadd.f32 %v2284_v55, %v10979_v2  ;;  %v2365_v2 = vld [vmem:[#allocation2 + $0x338] sm:$0xff] }
 0x2d2   :  { %v2638_v5 = vpop.f32.mrb[203].mxu1  ;;  %2900 = vmatmul.mubr.f32.gmra.mrb[52].mxu1 %v2362_v58  ;;  %15198 = vst [vmem:[#allocation47_spill] sm:$0xff] %v11051_v53 }
 0x2d3   :  { %2904 = vmatprep.mubr.f32.mxu1 %v2427_v25  ;;  %15199 = vst [vmem:[#allocation52_spill] sm:$0xff] %v11054_v34  ;;  %v8443_v31 = vpop.f32.mrb[190].mxu0  ;;  %v2429_v25 = vld [vmem:[#allocation2 + $0x339] sm:$0xff] }
 0x2d4   :  { %v11057_v33 = vadd.f32 %v8443_v31, %v11006_v8  ;;  %v2294_v58 = vpop.f32.mrb[191].mxu0  ;;  %v15202_v8 = vld [vmem:[#allocation27_spill] sm:$0xff] }
 0x2d5   :  { %v2641_v22 = vpop.f32.mrb[204].mxu1  ;;  %v11060_v5 = vadd.f32 %v2294_v58, %v10997_v1  ;;  %v15204_v1 = vld [vmem:[#allocation21_spill] sm:$0xff] }
 0x2d6   :  { %v2643_v29 = vpop.f32.mrb[205].mxu1  ;;  %2905 = vmatmul.mubr.f32.gmra.mrb[54].mxu1 %v2363_v45  ;;  %15200 = vst [vmem:[#allocation50_spill] sm:$0xff] %v11057_v33 }
 0x2d7   :  { %2909 = vmatprep.mubr.f32.mxu1 %v2428_v32  ;;  %15201 = vst [vmem:[#allocation56_spill] sm:$0xff] %v11060_v5  ;;  %v8478_v53 = vpop.f32.mrb[192].mxu0  ;;  %v2430_v29 = vld [vmem:[#allocation2 + $0x349] sm:$0xff] }
 0x2d8   :  { %v3002_v55 = vadd.f32 %v8478_v53, %v11022_v3  ;;  %v2996_v45 = vpop.f32.mrb[193].mxu0 }
 0x2d9   :  { %v2646_v43 = vpop.f32.mrb[206].mxu1  ;;  %v2997_v34 = vadd.f32 %v2996_v45, %v11014_v0 }
 0x2da   :  { %v2648_v12 = vpop.f32.mrb[207].mxu1  ;;  %2910 = vmatmul.mubr.f32.gmra.mrb[56].mxu1 %v2364_v47  ;;  %v11065_v31 = vadd.f32 %v3002_v55, %v15202_v8  ;;  %v2366_v47 = vld [vmem:[#allocation2 + $0x348] sm:$0xff]  ;;  %v15208_v55 = vld [vmem:[#allocation28_spill] sm:$0xff] }
 0x2db   :  { %2914 = vmatprep.mubr.f32.mxu1 %v2429_v25  ;;  %v11068_v58 = vadd.f32 %v2997_v34, %v15204_v1  ;;  %v8481_v12 = vpop.f32.mrb[194].mxu0 }
 0x2dc   :  { %15203 = vst [vmem:[#allocation54_spill] sm:$0xff] %v11065_v31  ;;  %v3012_v25 = vadd.f32 %v8481_v12, %v2626_v13  ;;  %v3006_v5 = vpop.f32.mrb[195].mxu0  ;;  %v15210_v13 = vld [vmem:[#allocation30_spill] sm:$0xff] }
 0x2dd   :  { %v2651_v32 = vpop.f32.mrb[208].mxu1  ;;  %15205 = vst [vmem:[#allocation60_spill] sm:$0xff] %v11068_v58  ;;  %v3007_v53 = vadd.f32 %v3006_v5, %v11030_v21  ;;  %v15213_v21 = vld [vmem:[#allocation29_spill] sm:$0xff] }
 0x2de   :  { %v2653_v33 = vpop.f32.mrb[209].mxu1  ;;  %2915 = vmatmul.mubr.f32.gmra.mrb[58].mxu1 %v2365_v2  ;;  %v11072_v24 = vadd.f32 %v3012_v25, %v15206_v7 }
 0x2df   :  { %2919 = vmatprep.mubr.f32.mxu1 %v2430_v29  ;;  %v11075_v33 = vadd.f32 %v3007_v53, %v15208_v55  ;;  %v8484_v2 = vpop.f32.mrb[196].mxu0  ;;  %v15215_v55 = vld [vmem:[#allocation31_spill] sm:$0xff] }
 0x2e0   :  { %15207 = vst [vmem:[#allocation58_spill] sm:$0xff] %v11072_v24  ;;  %v3022_v34 = vadd.f32 %v8484_v2, %v2636_v56  ;;  %v3016_v45 = vpop.f32.mrb[197].mxu0 }
 0x2e1   :  { %v2656_v3 = vpop.f32.mrb[210].mxu1  ;;  %15209 = vst [vmem:[#allocation62_spill] sm:$0xff] %v11075_v33  ;;  %v3017_v8 = vadd.f32 %v3016_v45, %v2631_v23 }
 0x2e2   :  { %v2658_v0 = vpop.f32.mrb[211].mxu1  ;;  %2920 = vmatmul.mubr.f32.gmra.mrb[60].mxu1 %v2366_v47  ;;  %v11078_v1 = vadd.f32 %v3022_v34, %v15210_v13 }
 0x2e3   :  { %2924 = vmatprep.mubr.f32.mxu1 %v2431_v15  ;;  %v11082_v7 = vadd.f32 %v3017_v8, %v15213_v21  ;;  %v8487_v5 = vpop.f32.mrb[198].mxu0 }
 0x2e4   :  { %15211 = vst [vmem:[#allocation64_spill] sm:$0xff] %v11078_v1  ;;  %v3032_v47 = vadd.f32 %v8487_v5, %v2646_v43  ;;  %v3026_v25 = vpop.f32.mrb[199].mxu0 }
 0x2e5   :  { %v2661_v29 = vpop.f32.mrb[212].mxu1  ;;  %15214 = vst [vmem:[#allocation63_spill] sm:$0xff] %v11082_v7  ;;  %v3027_v0 = vadd.f32 %v3026_v25, %v2641_v22 }
 0x2e6   :  { %v2663_v12 = vpop.f32.mrb[213].mxu1  ;;  %2925 = vmatmul.mubr.f32.gmra.mrb[62].mxu1 %v15212_v20  ;;  %v11085_v15 = vadd.f32 %v3032_v47, %v15215_v55 }
 0x2e7   :  { %v11088_v23 = vadd.f32 %v3027_v0, %v10823_v40  ;;  %v8490_v2 = vpop.f32.mrb[200].mxu0  ;;  %v15218_v12 = vld [vmem:[#allocation32_spill] sm:$0xff] }
 0x2e8   :  { %15216 = vst [vmem:[#allocation17_spill] sm:$0xff] %v11085_v15  ;;  %v3042_v34 = vadd.f32 %v8490_v2, %v2656_v3  ;;  %v3036_v45 = vpop.f32.mrb[201].mxu0 }
 0x2e9   :  { %v2666_v53 = vpop.f32.mrb[214].mxu1  ;;  %15217 = vst [vmem:[#allocation13_spill] sm:$0xff] %v11088_v23  ;;  %v3037_v20 = vadd.f32 %v3036_v45, %v2651_v32 }
 0x2ea   :  { %v2668_v56 = vpop.f32.mrb[215].mxu1  ;;  %v11091_v8 = vadd.f32 %v3042_v34, %v15218_v12 }
 0x2eb   :  { %v11094_v43 = vadd.f32 %v3037_v20, %v10832_v16  ;;  %v8493_v22 = vpop.f32.mrb[202].mxu0  ;;  %v15221_v56 = vld [vmem:[#allocation34_spill] sm:$0xff] }
 0x2ec   :  { %15219 = vst [vmem:[#allocation20_spill] sm:$0xff] %v11091_v8  ;;  %v3052_v5 = vadd.f32 %v8493_v22, %v2666_v53  ;;  %v3046_v47 = vpop.f32.mrb[203].mxu0 }
 0x2ed   :  { %v2671_v13 = vpop.f32.mrb[216].mxu1  ;;  %15220 = vst [vmem:[#allocation14_spill] sm:$0xff] %v11094_v43  ;;  %v3047_v55 = vadd.f32 %v3046_v47, %v2661_v29 }
 0x2ee   :  { %v2673_v21 = vpop.f32.mrb[217].mxu1  ;;  %v11097_v40 = vadd.f32 %v3052_v5, %v15221_v56 }
 0x2ef   :  { %v11100_v3 = vadd.f32 %v3047_v55, %v10841_v46  ;;  %v8496_v32 = vpop.f32.mrb[204].mxu0  ;;  %v15226_v55 = vld [vmem:[#allocation35_spill] sm:$0xff] }
 0x2f0   :  { %15222 = vst [vmem:[#allocation19_spill] sm:$0xff] %v11097_v40  ;;  %v3056_v34 = vpop.f32.mrb[205].mxu0 }
 0x2f1   :  { %v2676_v25 = vpop.f32.mrb[218].mxu1  ;;  %15223 = vst [vmem:[#allocation15_spill] sm:$0xff] %v11100_v3  ;;  %v3057_v12 = vadd.f32 %v3056_v34, %v2671_v13 }
 0x2f2   :  { %v2678_v0 = vpop.f32.mrb[219].mxu1  ;;  %v3062_v2 = vadd.f32 %v8496_v32, %v2676_v25 }
 0x2f3   :  { %v11106_v53 = vadd.f32 %v3057_v12, %v10850_v61  ;;  %v8499_v29 = vpop.f32.mrb[206].mxu0 }
 0x2f4   :  { %v11103_v16 = vadd.f32 %v3062_v2, %v10847_v6  ;;  %v3066_v21 = vpop.f32.mrb[207].mxu0 }
 0x2f5   :  { %v2681_v45 = vpop.f32.mrb[220].mxu1  ;;  %15224 = vst [vmem:[#allocation24_spill] sm:$0xff] %v11106_v53 }
 0x2f6   :  { %v2683_v20 = vpop.f32.mrb[221].mxu1  ;;  %v3067_v5 = vadd.f32 %v3066_v21, %v2681_v45 }
 0x2f7   :  { %v8502_v25 = vpop.f32.mrb[208].mxu0 }
 0x2f8   :  { %v11109_v46 = vadd.f32 %v3067_v5, %v10859_v19  ;;  %v3076_v13 = vpop.f32.mrb[209].mxu0 }
 0x2f9   :  { %v2686_v22 = vpop.f32.mrb[222].mxu1 }
 0x2fa   :  { %v3072_v47 = vadd.f32 %v8499_v29, %v2686_v22  ;;  %v2688_v56 = vpop.f32.mrb[223].mxu1  ;;  %15225 = vst [vmem:[#allocation22_spill] sm:$0xff] %v11109_v46 }
 0x2fb   :  { %v8505_v34 = vpop.f32.mrb[210].mxu0 }
 0x2fc   :  { %v11112_v0 = vadd.f32 %v3072_v47, %v15226_v55  ;;  %v3086_v12 = vpop.f32.mrb[211].mxu0 }
 0x2fd   :  { %v2691_v6 = vpop.f32.mrb[224].mxu1 }
 0x2fe   :  { %v3077_v32 = vadd.f32 %v3076_v13, %v2691_v6  ;;  %v2693_v2 = vpop.f32.mrb[225].mxu1 }
 0x2ff   :  { %v8508_v21 = vpop.f32.mrb[212].mxu0 }
 0x300   :  { %v11115_v61 = vadd.f32 %v3077_v32, %v10868_v52  ;;  %v3096_v22 = vpop.f32.mrb[213].mxu0 }
 0x301   :  { %v2696_v20 = vpop.f32.mrb[226].mxu1 }
 0x302   :  { %v3082_v45 = vadd.f32 %v8502_v25, %v2696_v20  ;;  %v2698_v29 = vpop.f32.mrb[227].mxu1 }
 0x303   :  { %v8511_v55 = vpop.f32.mrb[214].mxu0 }
 0x304   :  { %v11118_v19 = vadd.f32 %v3082_v45, %v10865_v30  ;;  %v3106_v6 = vpop.f32.mrb[215].mxu0 }
 0x305   :  { %v2701_v5 = vpop.f32.mrb[228].mxu1 }
 0x306   :  { %v3087_v47 = vadd.f32 %v3086_v12, %v2701_v5  ;;  %v2703_v56 = vpop.f32.mrb[229].mxu1 }
 0x307   :  { %v8514_v11 = vpop.f32.mrb[216].mxu0 }
 0x308   :  { %v11121_v13 = vadd.f32 %v3087_v47, %v10877_v36  ;;  %v3116_v20 = vpop.f32.mrb[217].mxu0 }
 0x309   :  { %v2706_v2 = vpop.f32.mrb[230].mxu1 }
 0x30a   :  { %v3092_v52 = vadd.f32 %v8505_v34, %v2706_v2  ;;  %v2708_v32 = vpop.f32.mrb[231].mxu1 }
 0x30b   :  { %v8517_v26 = vpop.f32.mrb[218].mxu0 }
 0x30c   :  { %v11124_v25 = vadd.f32 %v3092_v52, %v10874_v44  ;;  %v3126_v5 = vpop.f32.mrb[219].mxu0 }
 0x30d   :  { %v2711_v29 = vpop.f32.mrb[232].mxu1 }
 0x30e   :  { %v3097_v30 = vadd.f32 %v3096_v22, %v2711_v29  ;;  %v2713_v45 = vpop.f32.mrb[233].mxu1 }
 0x30f   :  { %v8520_v51 = vpop.f32.mrb[220].mxu0 }
 0x310   :  { %v11127_v12 = vadd.f32 %v3097_v30, %v10886_v17  ;;  %v3136_v2 = vpop.f32.mrb[221].mxu0 }
 0x311   :  { %v2716_v56 = vpop.f32.mrb[234].mxu1 }
 0x312   :  { %v3102_v36 = vadd.f32 %v8508_v21, %v2716_v56  ;;  %v2718_v47 = vpop.f32.mrb[235].mxu1 }
 0x313   :  { %v8523_v63 = vpop.f32.mrb[222].mxu0 }
 0x314   :  { %v11130_v34 = vadd.f32 %v3102_v36, %v10883_v9  ;;  %v3146_v29 = vpop.f32.mrb[223].mxu0 }
 0x315   :  { %v2721_v32 = vpop.f32.mrb[236].mxu1 }
 0x316   :  { %15227 = vst [vmem:[#allocation16_spill] sm:$0xff] %v11130_v34  ;;  %v3107_v44 = vadd.f32 %v3106_v6, %v2721_v32  ;;  %v2723_v52 = vpop.f32.mrb[237].mxu1 }
 0x317   :  { %v11135_v18 = vpop.f32.mrb[224].mxu0 }
 0x318   :  { %v11133_v22 = vadd.f32 %v3107_v44, %v10895_v57  ;;  %v3156_v56 = vpop.f32.mrb[225].mxu0 }
 0x319   :  { %v2726_v45 = vpop.f32.mrb[238].mxu1 }
 0x31a   :  { %v3112_v17 = vadd.f32 %v8511_v55, %v2726_v45  ;;  %v2728_v30 = vpop.f32.mrb[239].mxu1 }
 0x31b   :  { %v11140_v34 = vpop.f32.mrb[226].mxu0 }
 0x31c   :  { %v11138_v21 = vadd.f32 %v3112_v17, %v10892_v41  ;;  %v11145_v57 = vpop.f32.mrb[227].mxu0 }
 0x31d   :  { %v2731_v9 = vpop.f32.mrb[240].mxu1 }
 0x31e   :  { %v3117_v36 = vadd.f32 %v3116_v20, %v2731_v9  ;;  %v2733_v47 = vpop.f32.mrb[241].mxu1 }
 0x31f   :  { %v11147_v52 = vpop.f32.mrb[228].mxu0 }
 0x320   :  { %v11143_v6 = vadd.f32 %v3117_v36, %v10904_v54  ;;  %v11152_v41 = vpop.f32.mrb[229].mxu0 }
 0x321   :  { %v2736_v32 = vpop.f32.mrb[242].mxu1 }
 0x322   :  { %v3122_v44 = vadd.f32 %v8514_v11, %v2736_v32  ;;  %v2738_v55 = vpop.f32.mrb[243].mxu1 }
 0x323   :  { %v11154_v9 = vpop.f32.mrb[230].mxu0 }
 0x324   :  { %v11150_v45 = vadd.f32 %v3122_v44, %v10901_v62  ;;  %v11159_v36 = vpop.f32.mrb[231].mxu0 }
 0x325   :  { %v2741_v17 = vpop.f32.mrb[244].mxu1 }
 0x326   :  { %15228 = vst [vmem:[#allocation23_spill] sm:$0xff] %v11150_v45  ;;  %v3127_v20 = vadd.f32 %v3126_v5, %v2741_v17  ;;  %v2743_v30 = vpop.f32.mrb[245].mxu1  ;;  %v3381_v5 = vadd.f32 %v11065_v31, %v11068_v58  ;;  %v15234_v58 = vld [vmem:[#allocation37_spill] sm:$0xff] }
 0x327   :  { %v11161_v55 = vpop.f32.mrb[232].mxu0 }
 0x328   :  { %v11157_v54 = vadd.f32 %v3127_v20, %v10913_v39  ;;  %v11166_v44 = vpop.f32.mrb[233].mxu0  ;;  %v3382_v20 = vadd.f32 %v3381_v5, %v11075_v33 }
 0x329   :  { %v2746_v47 = vpop.f32.mrb[246].mxu1 }
 0x32a   :  { %15229 = vst [vmem:[#allocation25_spill] sm:$0xff] %v11157_v54  ;;  %v3132_v11 = vadd.f32 %v8517_v26, %v2746_v47  ;;  %v2748_v32 = vpop.f32.mrb[247].mxu1  ;;  %v3383_v54 = vadd.f32 %v3382_v20, %v11072_v24 }
 0x32b   :  { %v11170_v39 = vpop.f32.mrb[234].mxu0 }
 0x32c   :  { %v11164_v62 = vadd.f32 %v3132_v11, %v10910_v42  ;;  %v11176_v47 = vpop.f32.mrb[235].mxu0 }
 0x32d   :  { %v2751_v45 = vpop.f32.mrb[248].mxu1 }
 0x32e   :  { %15230 = vst [vmem:[#allocation18_spill] sm:$0xff] %v11164_v62  ;;  %v3137_v17 = vadd.f32 %v3136_v2, %v2751_v45  ;;  %v2753_v30 = vpop.f32.mrb[249].mxu1 }
 0x32f   :  { %v11178_v62 = vpop.f32.mrb[236].mxu0 }
 0x330   :  { %v11174_v26 = vadd.f32 %v3137_v17, %v10922_v14  ;;  %v11184_v2 = vpop.f32.mrb[237].mxu0  ;;  %v3384_v14 = vadd.f32 %v3383_v54, %v11082_v7 }
 0x331   :  { %v2756_v32 = vpop.f32.mrb[250].mxu1 }
 0x332   :  { %v3142_v42 = vadd.f32 %v8520_v51, %v2756_v32  ;;  %v2758_v11 = vpop.f32.mrb[251].mxu1 }
 0x333   :  { %v11186_v33 = vpop.f32.mrb[238].mxu0 }
 0x334   :  { %v11182_v31 = vadd.f32 %v3142_v42, %v10919_v37  ;;  %v11192_v51 = vpop.f32.mrb[239].mxu0  ;;  %v3385_v37 = vadd.f32 %v3384_v14, %v11078_v1  ;;  %v15232_v1 = vld [vmem:[#allocation36_spill] sm:$0xff] }
 0x335   :  { %v2761_v45 = vpop.f32.mrb[252].mxu1 }
 0x336   :  { %v3147_v30 = vadd.f32 %v3146_v29, %v2761_v45  ;;  %v2763_v5 = vpop.f32.mrb[253].mxu1 }
 0x337   :  { %v11194_v24 = vpop.f32.mrb[240].mxu0 }
 0x338   :  { %v11190_v17 = vadd.f32 %v3147_v30, %v10931_v28  ;;  %v11200_v29 = vpop.f32.mrb[241].mxu0  ;;  %v3386_v28 = vadd.f32 %v3385_v37, %v11088_v23 }
 0x339   :  { %v2766_v32 = vpop.f32.mrb[254].mxu1 }
 0x33a   :  { %v3152_v11 = vadd.f32 %v8523_v63, %v2766_v32  ;;  %v2768_v20 = vpop.f32.mrb[255].mxu1 }
 0x33b   :  { %v11202_v7 = vpop.f32.mrb[242].mxu0 }
 0x33c   :  { %v11198_v42 = vadd.f32 %v3152_v11, %v10928_v48  ;;  %v11208_v63 = vpop.f32.mrb[243].mxu0  ;;  %v3387_v11 = vadd.f32 %v3386_v28, %v11085_v15 }
 0x33d   :  { %v2771_v45 = vpop.f32.mrb[0].mxu1 }
 0x33e   :  { %v3157_v5 = vadd.f32 %v3156_v56, %v2771_v45  ;;  %v2773_v54 = vpop.f32.mrb[1].mxu1  ;;  %v3388_v23 = vadd.f32 %v3387_v11, %v11094_v43 }
 0x33f   :  { %v11211_v48 = vpop.f32.mrb[244].mxu0 }
 0x340   :  { %v11206_v30 = vadd.f32 %v3157_v5, %v10940_v4  ;;  %v11217_v45 = vpop.f32.mrb[245].mxu0  ;;  %v3389_v15 = vadd.f32 %v3388_v23, %v11091_v8 }
 0x341   :  { %v2776_v32 = vpop.f32.mrb[2].mxu1 }
 0x342   :  { %v3162_v14 = vadd.f32 %v11135_v18, %v2776_v32  ;;  %v2778_v20 = vpop.f32.mrb[3].mxu1  ;;  %v3390_v43 = vadd.f32 %v3389_v15, %v11100_v3 }
 0x343   :  { %v11220_v5 = vpop.f32.mrb[246].mxu0 }
 0x344   :  { %v11215_v56 = vadd.f32 %v3162_v14, %v10937_v50  ;;  %v11226_v32 = vpop.f32.mrb[247].mxu0  ;;  %v3391_v8 = vadd.f32 %v3390_v43, %v11097_v40  ;;  %v15236_v40 = vld [vmem:[#allocation39_spill] sm:$0xff] }
 0x345   :  { %v2781_v54 = vpop.f32.mrb[4].mxu1 }
 0x346   :  { %15231 = vst [vmem:[#allocation27_spill] sm:$0xff] %v11215_v56  ;;  %v3167_v37 = vadd.f32 %v11145_v57, %v2781_v54  ;;  %v2783_v4 = vpop.f32.mrb[5].mxu1  ;;  %v3392_v3 = vadd.f32 %v3391_v8, %v11106_v53 }
 0x347   :  { %v11229_v14 = vpop.f32.mrb[248].mxu0 }
 0x348   :  { %v11224_v18 = vadd.f32 %v3167_v37, %v10949_v10  ;;  %v11235_v54 = vpop.f32.mrb[249].mxu0 }
 0x349   :  { %v2786_v20 = vpop.f32.mrb[6].mxu1 }
 0x34a   :  { %v3172_v28 = vadd.f32 %v11140_v34, %v2786_v20  ;;  %v2788_v50 = vpop.f32.mrb[7].mxu1 }
 0x34b   :  { %v11238_v37 = vpop.f32.mrb[250].mxu0 }
 0x34c   :  { %v11233_v57 = vadd.f32 %v3172_v28, %v15232_v1  ;;  %v11244_v20 = vpop.f32.mrb[251].mxu0 }
 0x34d   :  { %v2791_v4 = vpop.f32.mrb[8].mxu1 }
 0x34e   :  { %v3177_v11 = vadd.f32 %v11152_v41, %v2791_v4  ;;  %v2793_v10 = vpop.f32.mrb[9].mxu1 }
 0x34f   :  { %v11247_v28 = vpop.f32.mrb[252].mxu0 }
 0x350   :  { %v11242_v34 = vadd.f32 %v3177_v11, %v10958_v27  ;;  %15233 = vst [vmem:[#allocation21_spill] sm:$0xff] %v11247_v28  ;;  %v11253_v4 = vpop.f32.mrb[253].mxu0 }
 0x351   :  { %v2796_v50 = vpop.f32.mrb[10].mxu1 }
 0x352   :  { %v3182_v23 = vadd.f32 %v11147_v52, %v2796_v50  ;;  %v2798_v1 = vpop.f32.mrb[11].mxu1 }
 0x353   :  { %v11256_v11 = vpop.f32.mrb[254].mxu0 }
 0x354   :  { %v11251_v41 = vadd.f32 %v3182_v23, %v15234_v58  ;;  %15235 = vst [vmem:[#allocation26_spill] sm:$0xff] %v11256_v11  ;;  %v11262_v50 = vpop.f32.mrb[255].mxu0  ;;  %v3393_v23 = vadd.f32 %v3392_v3, %v11103_v16 }
 0x355   :  { %v2801_v10 = vpop.f32.mrb[12].mxu1 }
 0x356   :  { %v3187_v15 = vadd.f32 %v11159_v36, %v2801_v10  ;;  %v2803_v27 = vpop.f32.mrb[13].mxu1  ;;  %v3394_v8 = vadd.f32 %v3393_v23, %v11109_v46 }
 0x358   :  { %v11260_v52 = vadd.f32 %v3187_v15, %v10967_v38 }
 0x359   :  { %v2806_v1 = vpop.f32.mrb[14].mxu1 }
 0x35a   :  { %v3192_v43 = vadd.f32 %v11154_v9, %v2806_v1  ;;  %v2808_v58 = vpop.f32.mrb[15].mxu1  ;;  %v3395_v9 = vadd.f32 %v3394_v8, %v11112_v0  ;;  %v15237_v1 = vld [vmem:[#allocation38_spill] sm:$0xff] }
 0x35c   :  { %v11267_v28 = vadd.f32 %v3192_v43, %v15236_v40 }
 0x35d   :  { %v2811_v36 = vpop.f32.mrb[16].mxu1 }
 0x35e   :  { %v3197_v10 = vadd.f32 %v11166_v44, %v2811_v36  ;;  %v2813_v27 = vpop.f32.mrb[17].mxu1  ;;  %v3396_v44 = vadd.f32 %v3395_v9, %v11115_v61 }
 0x360   :  { %v11272_v38 = vadd.f32 %v3197_v10, %v10976_v49  ;;  %v3397_v36 = vadd.f32 %v3396_v44, %v11118_v19  ;;  %v15241_v44 = vld [vmem:[#allocation40_spill] sm:$0xff] }
 0x361   :  { %v2816_v15 = vpop.f32.mrb[18].mxu1 }
 0x362   :  { %v3202_v53 = vadd.f32 %v11161_v55, %v2816_v15  ;;  %v2818_v11 = vpop.f32.mrb[19].mxu1  ;;  %v3398_v10 = vadd.f32 %v3397_v36, %v11121_v13 }
 0x364   :  { %v11277_v3 = vadd.f32 %v3202_v53, %v15237_v1 }
 0x365   :  { %v2821_v40 = vpop.f32.mrb[20].mxu1 }
 0x366   :  { %v3207_v43 = vadd.f32 %v11176_v47, %v2821_v40  ;;  %v2823_v58 = vpop.f32.mrb[21].mxu1  ;;  %v3399_v47 = vadd.f32 %v3398_v10, %v11124_v25  ;;  %v15240_v40 = vld [vmem:[#allocation16_spill] sm:$0xff]  ;;  %v15242_v10 = vld [vmem:[#allocation41_spill] sm:$0xff] }
 0x368   :  { %v11282_v23 = vadd.f32 %v3207_v43, %v10985_v35  ;;  %v3400_v35 = vadd.f32 %v3399_v47, %v11127_v12 }
 0x369   :  { %v2826_v49 = vpop.f32.mrb[22].mxu1 }
 0x36a   :  { %15238 = vst [vmem:[#allocation28_spill] sm:$0xff] %v11282_v23  ;;  %v3212_v55 = vadd.f32 %v11170_v39, %v2826_v49  ;;  %v2828_v11 = vpop.f32.mrb[23].mxu1  ;;  %v3401_v39 = vadd.f32 %v3400_v35, %v15240_v40 }
 0x36c   :  { %v11288_v53 = vadd.f32 %v3212_v55, %v10982_v59  ;;  %v3402_v59 = vadd.f32 %v3401_v39, %v11133_v22 }
 0x36d   :  { %v2831_v27 = vpop.f32.mrb[24].mxu1 }
 0x36e   :  { %15239 = vst [vmem:[#allocation30_spill] sm:$0xff] %v11288_v53  ;;  %v3217_v8 = vadd.f32 %v11184_v2, %v2831_v27  ;;  %v2833_v15 = vpop.f32.mrb[25].mxu1  ;;  %v3403_v2 = vadd.f32 %v3402_v59, %v11138_v21 }
 0x370   :  { %v11294_v9 = vadd.f32 %v3217_v8, %v10994_v60  ;;  %v3404_v60 = vadd.f32 %v3403_v2, %v11143_v6  ;;  %v15243_v8 = vld [vmem:[#allocation23_spill] sm:$0xff] }
 0x371   :  { %v2836_v1 = vpop.f32.mrb[26].mxu1 }
 0x372   :  { %v3222_v43 = vadd.f32 %v11178_v62, %v2836_v1  ;;  %v2838_v58 = vpop.f32.mrb[27].mxu1  ;;  %v3405_v62 = vadd.f32 %v3404_v60, %v15243_v8  ;;  %v15244_v1 = vld [vmem:[#allocation25_spill] sm:$0xff] }
 0x374   :  { %v11300_v49 = vadd.f32 %v3222_v43, %v15241_v44  ;;  %v3406_v39 = vadd.f32 %v3405_v62, %v15244_v1  ;;  %v15245_v43 = vld [vmem:[#allocation46_spill] sm:$0xff] }
 0x375   :  { %v2841_v36 = vpop.f32.mrb[28].mxu1  ;;  %v15246_v44 = vld [vmem:[#allocation18_spill] sm:$0xff] }
 0x376   :  { %v3227_v55 = vadd.f32 %v11192_v51, %v2841_v36  ;;  %v2843_v11 = vpop.f32.mrb[29].mxu1  ;;  %v3407_v51 = vadd.f32 %v3406_v39, %v15246_v44 }
 0x377   :  { %v15247_v11 = vld [vmem:[#allocation43_spill] sm:$0xff] }
 0x378   :  { %v11306_v27 = vadd.f32 %v3227_v55, %v15242_v10  ;;  %v3408_v55 = vadd.f32 %v3407_v51, %v11174_v26 }
 0x379   :  { %v2846_v47 = vpop.f32.mrb[30].mxu1 }
 0x37a   :  { %v3232_v15 = vadd.f32 %v11186_v33, %v2846_v47  ;;  %v2848_v35 = vpop.f32.mrb[31].mxu1  ;;  %v3409_v33 = vadd.f32 %v3408_v55, %v11182_v31 }
 0x37b   :  { %v15248_v35 = vld [vmem:[#allocation49_spill] sm:$0xff] }
 0x37c   :  { %v11312_v58 = vadd.f32 %v3232_v15, %v15245_v43  ;;  %v3410_v15 = vadd.f32 %v3409_v33, %v11190_v17 }
 0x37d   :  { %v2851_v59 = vpop.f32.mrb[32].mxu1 }
 0x37e   :  { %v3237_v36 = vadd.f32 %v11200_v29, %v2851_v59  ;;  %v2853_v2 = vpop.f32.mrb[33].mxu1  ;;  %v3411_v29 = vadd.f32 %v3410_v15, %v11198_v42 }
 0x37f   :  { %v15249_v2 = vld [vmem:[#allocation53_spill] sm:$0xff] }
 0x380   :  { %v11318_v10 = vadd.f32 %v3237_v36, %v15247_v11  ;;  %v3412_v36 = vadd.f32 %v3411_v29, %v11206_v30 }
 0x381   :  { %v2856_v60 = vpop.f32.mrb[34].mxu1 }
 0x382   :  { %v3242_v47 = vadd.f32 %v11194_v24, %v2856_v60  ;;  %v2858_v62 = vpop.f32.mrb[35].mxu1  ;;  %v3413_v24 = vadd.f32 %v3412_v36, %v11215_v56 }
 0x383   :  { %v15251_v62 = vld [vmem:[#allocation51_spill] sm:$0xff] }
 0x384   :  { %v11324_v43 = vadd.f32 %v3242_v47, %v15248_v35  ;;  %v3414_v47 = vadd.f32 %v3413_v24, %v11224_v18 }
 0x385   :  { %v2861_v39 = vpop.f32.mrb[36].mxu1 }
 0x386   :  { %v3247_v59 = vadd.f32 %v11208_v63, %v2861_v39  ;;  %v2863_v51 = vpop.f32.mrb[37].mxu1  ;;  %v3415_v63 = vadd.f32 %v3414_v47, %v11233_v57 }
 0x387   :  { %v15252_v51 = vld [vmem:[#allocation55_spill] sm:$0xff] }
 0x388   :  { %v11330_v11 = vadd.f32 %v3247_v59, %v15249_v2  ;;  %v3416_v59 = vadd.f32 %v3415_v63, %v11242_v34 }
 0x389   :  { %v2866_v55 = vpop.f32.mrb[38].mxu1 }
 0x38a   :  { %15250 = vst [vmem:[#allocation33_spill] sm:$0xff] %v11330_v11  ;;  %v3252_v60 = vadd.f32 %v11202_v7, %v2866_v55  ;;  %v2868_v33 = vpop.f32.mrb[39].mxu1  ;;  %v3417_v7 = vadd.f32 %v3416_v59, %v11251_v41 }
 0x38b   :  { %v15253_v33 = vld [vmem:[#allocation42_spill] sm:$0xff] }
 0x38c   :  { %v11336_v35 = vadd.f32 %v3252_v60, %v15251_v62  ;;  %v3418_v60 = vadd.f32 %v3417_v7, %v11260_v52 }
 0x38d   :  { %v2871_v15 = vpop.f32.mrb[40].mxu1 }
 0x38e   :  { %v3257_v39 = vadd.f32 %v11217_v45, %v2871_v15  ;;  %v2873_v29 = vpop.f32.mrb[41].mxu1  ;;  %v3419_v45 = vadd.f32 %v3418_v60, %v11267_v28 }
 0x38f   :  { %v15254_v29 = vld [vmem:[#allocation45_spill] sm:$0xff] }
 0x390   :  { %v11342_v2 = vadd.f32 %v3257_v39, %v15252_v51  ;;  %v3420_v39 = vadd.f32 %v3419_v45, %v11272_v38 }
 0x391   :  { %v2876_v36 = vpop.f32.mrb[42].mxu1 }
 0x392   :  { %v3262_v55 = vadd.f32 %v11211_v48, %v2876_v36  ;;  %v2878_v24 = vpop.f32.mrb[43].mxu1  ;;  %v3421_v48 = vadd.f32 %v3420_v39, %v11277_v3 }
 0x393   :  { %v15256_v24 = vld [vmem:[#allocation57_spill] sm:$0xff] }
 0x394   :  { %v11348_v62 = vadd.f32 %v3262_v55, %v15253_v33  ;;  %v3422_v55 = vadd.f32 %v3421_v48, %v11282_v23 }
 0x395   :  { %v2881_v47 = vpop.f32.mrb[44].mxu1 }
 0x396   :  { %v3267_v15 = vadd.f32 %v11226_v32, %v2881_v47  ;;  %v2883_v63 = vpop.f32.mrb[45].mxu1  ;;  %v3423_v32 = vadd.f32 %v3422_v55, %v11288_v53 }
 0x397   :  { %v15258_v63 = vld [vmem:[#allocation61_spill] sm:$0xff] }
 0x398   :  { %v11354_v51 = vadd.f32 %v3267_v15, %v15254_v29  ;;  %v3424_v15 = vadd.f32 %v3423_v32, %v11294_v9 }
 0x399   :  { %v2886_v59 = vpop.f32.mrb[46].mxu1 }
 0x39a   :  { %15255 = vst [vmem:[#allocation29_spill] sm:$0xff] %v11354_v51  ;;  %v3272_v36 = vadd.f32 %v11220_v5, %v2886_v59  ;;  %v2888_v7 = vpop.f32.mrb[47].mxu1  ;;  %v3425_v5 = vadd.f32 %v3424_v15, %v11300_v49 }
 0x39b   :  { %v15260_v7 = vld [vmem:[#allocation59_spill] sm:$0xff] }
 0x39c   :  { %v11360_v33 = vadd.f32 %v3272_v36, %v15256_v24  ;;  %v3426_v36 = vadd.f32 %v3425_v5, %v11306_v27 }
 0x39d   :  { %v2891_v60 = vpop.f32.mrb[48].mxu1 }
 0x39e   :  { %15257 = vst [vmem:[#allocation31_spill] sm:$0xff] %v11360_v33  ;;  %v3277_v47 = vadd.f32 %v11235_v54, %v2891_v60  ;;  %v2893_v45 = vpop.f32.mrb[49].mxu1  ;;  %v3427_v54 = vadd.f32 %v3426_v36, %v11312_v58 }
 0x39f   :  { %v15262_v45 = vld [vmem:[#allocation48_spill] sm:$0xff] }
 0x3a0   :  { %v11366_v29 = vadd.f32 %v3277_v47, %v15258_v63  ;;  %v3428_v47 = vadd.f32 %v3427_v54, %v11318_v10 }
 0x3a1   :  { %v2896_v39 = vpop.f32.mrb[50].mxu1 }
 0x3a2   :  { %15259 = vst [vmem:[#allocation32_spill] sm:$0xff] %v11366_v29  ;;  %v3282_v59 = vadd.f32 %v11229_v14, %v2896_v39  ;;  %v2898_v48 = vpop.f32.mrb[51].mxu1  ;;  %v3429_v14 = vadd.f32 %v3428_v47, %v11324_v43 }
 0x3a3   :  { %v15264_v48 = vld [vmem:[#allocation44_spill] sm:$0xff] }
 0x3a4   :  { %v11372_v24 = vadd.f32 %v3282_v59, %v15260_v7  ;;  %v3430_v59 = vadd.f32 %v3429_v14, %v11330_v11 }
 0x3a5   :  { %v2901_v55 = vpop.f32.mrb[52].mxu1 }
 0x3a6   :  { %15261 = vst [vmem:[#allocation34_spill] sm:$0xff] %v11372_v24  ;;  %v3287_v60 = vadd.f32 %v11244_v20, %v2901_v55  ;;  %v2903_v32 = vpop.f32.mrb[53].mxu1  ;;  %v3431_v20 = vadd.f32 %v3430_v59, %v11336_v35 }
 0x3a7   :  { %v15266_v32 = vld [vmem:[#allocation52_spill] sm:$0xff] }
 0x3a8   :  { %v11378_v63 = vadd.f32 %v3287_v60, %v15262_v45  ;;  %v3432_v60 = vadd.f32 %v3431_v20, %v11342_v2 }
 0x3a9   :  { %v2906_v15 = vpop.f32.mrb[54].mxu1 }
 0x3aa   :  { %15263 = vst [vmem:[#allocation35_spill] sm:$0xff] %v11378_v63  ;;  %v3292_v39 = vadd.f32 %v11238_v37, %v2906_v15  ;;  %v2908_v5 = vpop.f32.mrb[55].mxu1  ;;  %v3433_v37 = vadd.f32 %v3432_v60, %v11348_v62  ;;  %v15268_v15 = vld [vmem:[#allocation21_spill] sm:$0xff] }
 0x3ac   :  { %v11384_v7 = vadd.f32 %v3292_v39, %v15264_v48  ;;  %v3434_v39 = vadd.f32 %v3433_v37, %v11354_v51  ;;  %v15269_v48 = vld [vmem:[#allocation47_spill] sm:$0xff] }
 0x3ad   :  { %v2911_v36 = vpop.f32.mrb[56].mxu1 }
 0x3ae   :  { %15265 = vst [vmem:[#allocation36_spill] sm:$0xff] %v11384_v7  ;;  %v3297_v55 = vadd.f32 %v11253_v4, %v2911_v36  ;;  %v2913_v54 = vpop.f32.mrb[57].mxu1  ;;  %v3435_v4 = vadd.f32 %v3434_v39, %v11360_v33 }
 0x3af   :  { %v15271_v54 = vld [vmem:[#allocation56_spill] sm:$0xff] }
 0x3b0   :  { %v11390_v45 = vadd.f32 %v3297_v55, %v15266_v32  ;;  %v3436_v55 = vadd.f32 %v3435_v4, %v11366_v29 }
 0x3b1   :  { %v2916_v47 = vpop.f32.mrb[58].mxu1 }
 0x3b2   :  { %15267 = vst [vmem:[#allocation37_spill] sm:$0xff] %v11390_v45  ;;  %v3302_v5 = vadd.f32 %v15268_v15, %v2916_v47  ;;  %v2918_v14 = vpop.f32.mrb[59].mxu1  ;;  %v3437_v47 = vadd.f32 %v3436_v55, %v11372_v24  ;;  %v15273_v15 = vld [vmem:[#allocation26_spill] sm:$0xff] }
 0x3b3   :  { %v15284_v24 = vld [vmem:[#allocation14_spill] sm:$0xff] }
 0x3b4   :  { %v11396_v11 = vadd.f32 %v3302_v5, %v15269_v48  ;;  %v3438_v5 = vadd.f32 %v3437_v47, %v11378_v63  ;;  %v15274_v48 = vld [vmem:[#allocation50_spill] sm:$0xff] }
 0x3b5   :  { %v2921_v59 = vpop.f32.mrb[60].mxu1 }
 0x3b6   :  { %15270 = vst [vmem:[#allocation39_spill] sm:$0xff] %v11396_v11  ;;  %v3307_v36 = vadd.f32 %v11262_v50, %v2921_v59  ;;  %v2923_v20 = vpop.f32.mrb[61].mxu1  ;;  %v3439_v39 = vadd.f32 %v3438_v5, %v11384_v7  ;;  %v15277_v5 = vld [vmem:[#allocation54_spill] sm:$0xff] }
 0x3b8   :  { %v11402_v32 = vadd.f32 %v3307_v36, %v15271_v54  ;;  %v3440_v50 = vadd.f32 %v3439_v39, %v11390_v45 }
 0x3b9   :  { %v2926_v60 = vpop.f32.mrb[62].mxu1 }
 0x3ba   :  { %15272 = vst [vmem:[#allocation38_spill] sm:$0xff] %v11402_v32  ;;  %v3312_v14 = vadd.f32 %v15273_v15, %v2926_v60  ;;  %v2928_v37 = vpop.f32.mrb[63].mxu1  ;;  %v3441_v59 = vadd.f32 %v3440_v50, %v11396_v11  ;;  %v15278_v50 = vld [vmem:[#allocation62_spill] sm:$0xff] }
 0x3bc   :  { %v11408_v51 = vadd.f32 %v3312_v14, %v15274_v48  ;;  %v3442_v4 = vadd.f32 %v3441_v59, %v11402_v32  ;;  %v15276_v14 = vld [vmem:[#allocation60_spill] sm:$0xff] }
 0x3be   :  { %15275 = vst [vmem:[#allocation40_spill] sm:$0xff] %v11408_v51  ;;  %v3443_v36 = vadd.f32 %v3442_v4, %v11408_v51  ;;  %v15279_v4 = vld [vmem:[#allocation58_spill] sm:$0xff] }
 0x3c0   :  { %v3444_v20 = vrot.slane %v3443_v36, 4 }
 0x3c2   :  { %v3445_v55 = vadd.f32 %v3444_v20, %v3443_v36  ;;  %v15280_v20 = vld [vmem:[#allocation63_spill] sm:$0xff] }
 0x3c4   :  { %v3446_v54 = vrot.slane %v3445_v55, 2 }
 0x3c6   :  { %v3447_v60 = vadd.f32 %v3446_v54, %v3445_v55 }
 0x3c8   :  { %v3448_v15 = vrot.slane %v3447_v60, 1 }
 0x3ca   :  { %v3449_v37 = vadd.f32 %v3448_v15, %v3447_v60  ;;  %v15281_v15 = vld [vmem:[#allocation64_spill] sm:$0xff] }
 0x3cc   :  { %v11415_v47 = vmul.f32 0.001953125, %v3449_v37 }
 0x3ce   :  { %v3452_v48 = vsub.f32 %v15276_v14, %v11415_v47  ;;  %v3453_v39 = vsub.f32 %v15277_v5, %v11415_v47  ;;  %v3454_v11 = vsub.f32 %v15278_v50, %v11415_v47  ;;  %v3455_v36 = vsub.f32 %v15279_v4, %v11415_v47  ;;  %v15282_v5 = vld [vmem:[#allocation13_spill] sm:$0xff] }
 0x3cf   :  { %v3456_v55 = vsub.f32 %v15280_v20, %v11415_v47  ;;  %v3457_v37 = vsub.f32 %v15281_v15, %v11415_v47  ;;  %v3458_v45 = vsub.f32 %v15282_v5, %v11415_v47  ;;  %v3460_v20 = vsub.f32 %v15284_v24, %v11415_v47 }
 0x3d0   :  { %v3516_v59 = vmul.f32 %v3452_v48, %v3452_v48  ;;  %v3517_v32 = vmul.f32 %v3453_v39, %v3453_v39  ;;  %v3518_v54 = vmul.f32 %v3454_v11, %v3454_v11  ;;  %v3519_v14 = vmul.f32 %v3455_v36, %v3455_v36  ;;  %v15283_v48 = vld [vmem:[#allocation17_spill] sm:$0xff] }
 0x3d1   :  { %v3520_v7 = vmul.f32 %v3456_v55, %v3456_v55  ;;  %v3459_v39 = vsub.f32 %v15283_v48, %v11415_v47  ;;  %v3521_v63 = vmul.f32 %v3457_v37, %v3457_v37  ;;  %v3522_v11 = vmul.f32 %v3458_v45, %v3458_v45 }
 0x3d2   :  { %v3580_v60 = vadd.f32 %v3517_v32, %v3516_v59  ;;  %v15285_v59 = vld [vmem:[#allocation20_spill] sm:$0xff]  ;;  %v3524_v55 = vmul.f32 %v3460_v20, %v3460_v20 }
 0x3d3   :  { %v3461_v15 = vsub.f32 %v15285_v59, %v11415_v47  ;;  %v3523_v36 = vmul.f32 %v3459_v39, %v3459_v39 }
 0x3d4   :  { %v3581_v51 = vadd.f32 %v3580_v60, %v3518_v54  ;;  %v15286_v60 = vld [vmem:[#allocation15_spill] sm:$0xff] }
 0x3d5   :  { %v3462_v5 = vsub.f32 %v15286_v60, %v11415_v47  ;;  %v3525_v37 = vmul.f32 %v3461_v15, %v3461_v15  ;;  %v4357_v60 = vld [vmem:[#allocation8 + $0x188] sm:$0xff]  ;;  %v3467_v15 = vsub.f32 %v11112_v0, %v11415_v47 }
 0x3d6   :  { %v3582_v50 = vadd.f32 %v3581_v51, %v3519_v14  ;;  %v15287_v14 = vld [vmem:[#allocation19_spill] sm:$0xff] }
 0x3d7   :  { %v3463_v48 = vsub.f32 %v15287_v14, %v11415_v47  ;;  %v3526_v45 = vmul.f32 %v3462_v5, %v3462_v5  ;;  %v3468_v5 = vsub.f32 %v11115_v61, %v11415_v47 }
 0x3d8   :  { %v3583_v4 = vadd.f32 %v3582_v50, %v3520_v7  ;;  %v15288_v50 = vld [vmem:[#allocation24_spill] sm:$0xff] }
 0x3d9   :  { %v3464_v24 = vsub.f32 %v15288_v50, %v11415_v47  ;;  %v3527_v39 = vmul.f32 %v3463_v48, %v3463_v48  ;;  %v15289_v48 = vmov 0.0|0.0  }
 0x3da   :  { %v3584_v32 = vadd.f32 %v3583_v4, %v3521_v63  ;;  %v3465_v4 = vsub.f32 %v11103_v16, %v11415_v47 }
 0x3db   :  { %v3528_v20 = vmul.f32 %v3464_v24, %v3464_v24  ;;  %v3469_v24 = vsub.f32 %v11118_v19, %v11415_v47 }
 0x3dc   :  { %v3585_v54 = vadd.f32 %v3584_v32, %v3522_v11  ;;  %v3466_v32 = vsub.f32 %v11109_v46, %v11415_v47 }
 0x3de   :  { %v3586_v51 = vadd.f32 %v3585_v54, %v3523_v36  ;;  %v4356_v54 = vld [vmem:[#allocation8 + $0x180] sm:$0xff] }
 0x3df   :  { %v9197_v50 = vpack.c.bf16 %v4357_v60, %v4356_v54  ;;  %v3532_v60 = vmul.f32 %v3468_v5, %v3468_v5  ;;  %v3533_v54 = vmul.f32 %v3469_v24, %v3469_v24  ;;  %v4362_v5 = vld [vmem:[#allocation8 + $0x1b0] sm:$0xff]  ;;  %v3474_v24 = vsub.f32 %v11133_v22, %v11415_v47 }
 0x3e0   :  { %v3587_v7 = vadd.f32 %v3586_v51, %v3524_v55  ;;  %v3529_v55 = vmul.f32 %v3465_v4, %v3465_v4  ;;  %v3470_v4 = vsub.f32 %v11121_v13, %v11415_v47 }
 0x3e1   :  { %9198 = vmatpush1.bf16.msra.mxu0 %v9197_v50  ;;  %v4361_v50 = vld [vmem:[#allocation8 + $0x1a8] sm:$0xff] }
 0x3e2   :  { %v3588_v63 = vadd.f32 %v3587_v7, %v3525_v37  ;;  %v3530_v37 = vmul.f32 %v3466_v32, %v3466_v32  ;;  %9199 = vmatprep.subr.bf16.mxu0 %v15289_v48  ;;  %v4360_v32 = vld [vmem:[#allocation8 + $0x1a0] sm:$0xff] }
 0x3e4   :  { %v3589_v11 = vadd.f32 %v3588_v63, %v3526_v45  ;;  %v4358_v45 = vld [vmem:[#allocation8 + $0x190] sm:$0xff]  ;;  %v4359_v63 = vld [vmem:[#allocation8 + $0x198] sm:$0xff] }
 0x3e5   :  { %v9200_v46 = vpack.c.bf16 %v4359_v63, %v4358_v45  ;;  %v3473_v45 = vsub.f32 %v15240_v40, %v11415_v47  ;;  %v4388_v40 = vld [vmem:[#allocation8 + $0x280] sm:$0xff] }
 0x3e6   :  { %v3590_v36 = vadd.f32 %v3589_v11, %v3527_v39  ;;  %v3531_v39 = vmul.f32 %v3467_v15, %v3467_v15  ;;  %v3472_v15 = vsub.f32 %v11127_v12, %v11415_v47 }
 0x3e7   :  { %9201 = vmatpush1.bf16.msra.mxu0 %v9200_v46  ;;  %v4363_v46 = vld [vmem:[#allocation8 + $0x1b8] sm:$0xff] }
 0x3e8   :  { %v3591_v51 = vadd.f32 %v3590_v36, %v3528_v20  ;;  %9202 = vmatprep.subr.bf16.mxu0 %v15289_v48  ;;  %v3471_v36 = vsub.f32 %v11124_v25, %v11415_v47 }
 0x3ea   :  { %v3592_v7 = vadd.f32 %v3591_v51, %v3529_v55  ;;  %v9203_v51 = vpack.c.bf16 %v4361_v50, %v4360_v32  ;;  %v3535_v63 = vmul.f32 %v3471_v36, %v3471_v36  ;;  %v4365_v32 = vld [vmem:[#allocation8 + $0x1c8] sm:$0xff]  ;;  %v3475_v50 = vsub.f32 %v11138_v21, %v11415_v47 }
 0x3eb   :  { %v4389_v36 = vld [vmem:[#allocation8 + $0x288] sm:$0xff] }
 0x3ec   :  { %v3593_v11 = vadd.f32 %v3592_v7, %v3530_v37  ;;  %v3534_v37 = vmul.f32 %v3470_v4, %v3470_v4  ;;  %9204 = vmatpush1.bf16.msra.mxu0 %v9203_v51  ;;  %v4364_v4 = vld [vmem:[#allocation8 + $0x1c0] sm:$0xff] }
 0x3ed   :  { %9205 = vmatprep.subr.bf16.mxu0 %v15289_v48  ;;  %v9209_v51 = vpack.c.bf16 %v4365_v32, %v4364_v4  ;;  %v4369_v32 = vld [vmem:[#allocation8 + $0x1e8] sm:$0xff] }
 0x3ee   :  { %v3594_v20 = vadd.f32 %v3593_v11, %v3531_v39  ;;  %v9206_v11 = vpack.c.bf16 %v4363_v46, %v4362_v5  ;;  %v4366_v46 = vld [vmem:[#allocation8 + $0x1d0] sm:$0xff] }
 0x3f0   :  { %v3595_v55 = vadd.f32 %v3594_v20, %v3532_v60  ;;  %v3536_v60 = vmul.f32 %v3472_v15, %v3472_v15  ;;  %9207 = vmatpush1.bf16.msra.mxu0 %v9206_v11  ;;  %v9244_v15 = vpack.c.bf16 %v4389_v36, %v4388_v40  ;;  %v3539_v11 = vmul.f32 %v3475_v50, %v3475_v50  ;;  %v4368_v40 = vld [vmem:[#allocation8 + $0x1e0] sm:$0xff] }
 0x3f1   :  { %9208 = vmatprep.subr.bf16.mxu0 %v15289_v48  ;;  %v9215_v50 = vpack.c.bf16 %v4369_v32, %v4368_v40  ;;  %v3480_v36 = vsub.f32 %v11174_v26, %v11415_v47  ;;  %v3483_v40 = vsub.f32 %v11198_v42, %v11415_v47 }
 0x3f2   :  { %v3596_v7 = vadd.f32 %v3595_v55, %v3533_v54  ;;  %v3537_v54 = vmul.f32 %v3473_v45, %v3473_v45  ;;  %9245 = vmatprep.subr.bf16.mxu1 %v9244_v15 }
 0x3f3   :  { %9247 = vmatpush3.bf16.msra.mxu1 %v9244_v15  ;;  %v4371_v15 = vld [vmem:[#allocation8 + $0x1f8] sm:$0xff] }
 0x3f4   :  { %v3597_v39 = vadd.f32 %v3596_v7, %v3534_v37  ;;  %v3476_v37 = vsub.f32 %v11143_v6, %v11415_v47  ;;  %v3538_v7 = vmul.f32 %v3474_v24, %v3474_v24  ;;  %9210 = vmatpush1.bf16.msra.mxu0 %v9209_v51 }
 0x3f5   :  { %9211 = vmatprep.subr.bf16.mxu0 %v15289_v48 }
 0x3f6   :  { %v3598_v20 = vadd.f32 %v3597_v39, %v3535_v63  ;;  %v4367_v63 = vld [vmem:[#allocation8 + $0x1d8] sm:$0xff]  ;;  %v3477_v39 = vsub.f32 %v15243_v8, %v11415_v47  ;;  %v3540_v4 = vmul.f32 %v3476_v37, %v3476_v37  ;;  %v4370_v37 = vld [vmem:[#allocation8 + $0x1f0] sm:$0xff] }
 0x3f8   :  { %v3599_v55 = vadd.f32 %v3598_v20, %v3536_v60  ;;  %v9212_v60 = vpack.c.bf16 %v4367_v63, %v4366_v46  ;;  %v3478_v20 = vsub.f32 %v15244_v1, %v11415_v47  ;;  %v3481_v46 = vsub.f32 %v11182_v31, %v11415_v47 }
 0x3fa   :  { %v3600_v5 = vadd.f32 %v3599_v55, %v3537_v54  ;;  %9213 = vmatpush1.bf16.msra.mxu0 %v9212_v60  ;;  %v3479_v54 = vsub.f32 %v15246_v44, %v11415_v47  ;;  %v3541_v55 = vmul.f32 %v3477_v39, %v3477_v39  ;;  %v3482_v39 = vsub.f32 %v11190_v17, %v11415_v47 }
 0x3fb   :  { %9214 = vmatprep.subr.bf16.mxu0 %v15289_v48  ;;  %v3544_v60 = vmul.f32 %v3480_v36, %v3480_v36  ;;  %v3545_v32 = vmul.f32 %v3481_v46, %v3481_v46  ;;  %v4391_v36 = vld [vmem:[#allocation8 + $0x298] sm:$0xff] }
 0x3fc   :  { %v3601_v45 = vadd.f32 %v3600_v5, %v3538_v7  ;;  %v3542_v7 = vmul.f32 %v3478_v20, %v3478_v20  ;;  %v3543_v63 = vmul.f32 %v3479_v54, %v3479_v54  ;;  %v4372_v20 = vld [vmem:[#allocation8 + $0x200] sm:$0xff]  ;;  %v3484_v54 = vsub.f32 %v11206_v30, %v11415_v47  ;;  %v4375_v46 = vld [vmem:[#allocation8 + $0x218] sm:$0xff] }
 0x3fe   :  { %v3602_v24 = vadd.f32 %v3601_v45, %v3539_v11  ;;  %9216 = vmatpush1.bf16.msra.mxu0 %v9215_v50  ;;  %v9218_v45 = vpack.c.bf16 %v4371_v15, %v4370_v37  ;;  %v3546_v50 = vmul.f32 %v3482_v39, %v3482_v39  ;;  %v4374_v37 = vld [vmem:[#allocation8 + $0x210] sm:$0xff]  ;;  %v3485_v15 = vsub.f32 %v11215_v56, %v11415_v47 }
 0x3ff   :  { %9217 = vmatprep.subr.bf16.mxu0 %v15289_v48 }
 0x400   :  { %v3603_v51 = vadd.f32 %v3602_v24, %v3540_v4  ;;  %v4373_v24 = vld [vmem:[#allocation8 + $0x208] sm:$0xff]  ;;  %v3549_v56 = vmul.f32 %v3485_v15, %v3485_v15  ;;  %v3489_v15 = vsub.f32 %v11251_v41, %v11415_v47 }
 0x402   :  { %v3604_v5 = vadd.f32 %v3603_v51, %v3541_v55  ;;  %9219 = vmatpush1.bf16.msra.mxu0 %v9218_v45  ;;  %v9221_v51 = vpack.c.bf16 %v4373_v24, %v4372_v20  ;;  %v3548_v20 = vmul.f32 %v3484_v54, %v3484_v54  ;;  %v4392_v24 = vld [vmem:[#allocation8 + $0x2a0] sm:$0xff]  ;;  %v3488_v54 = vsub.f32 %v11242_v34, %v11415_v47 }
 0x403   :  { %9220 = vmatprep.subr.bf16.mxu0 %v15289_v48 }
 0x404   :  { %v3605_v11 = vadd.f32 %v3604_v5, %v3542_v7  ;;  %v4390_v5 = vld [vmem:[#allocation8 + $0x290] sm:$0xff] }
 0x405   :  { %v9248_v45 = vpack.c.bf16 %v4391_v36, %v4390_v5 }
 0x406   :  { %v3606_v4 = vadd.f32 %v3605_v11, %v3543_v63  ;;  %9222 = vmatpush1.bf16.msra.mxu0 %v9221_v51  ;;  %v3547_v63 = vmul.f32 %v3483_v40, %v3483_v40  ;;  %v3487_v51 = vsub.f32 %v11233_v57, %v11415_v47 }
 0x407   :  { %9223 = vmatprep.subr.bf16.mxu0 %v15289_v48  ;;  %9249 = vmatprep.subr.bf16.mxu1 %v9248_v45 }
 0x408   :  { %v3607_v55 = vadd.f32 %v3606_v4, %v3544_v60  ;;  %v9224_v60 = vpack.c.bf16 %v4375_v46, %v4374_v37  ;;  %v3486_v4 = vsub.f32 %v11224_v18, %v11415_v47  ;;  %9251 = vmatpush3.bf16.msra.mxu1 %v9248_v45  ;;  %v4394_v45 = vld [vmem:[#allocation8 + $0x2b0] sm:$0xff]  ;;  %v3551_v46 = vmul.f32 %v3487_v51, %v3487_v51 }
 0x409   :  { %v3553_v51 = vmul.f32 %v3489_v15, %v3489_v15  ;;  %v4398_v15 = vld [vmem:[#allocation8 + $0x2d0] sm:$0xff] }
 0x40a   :  { %v3608_v7 = vadd.f32 %v3607_v55, %v3545_v32  ;;  %v4393_v32 = vld [vmem:[#allocation8 + $0x2a8] sm:$0xff]  ;;  %9225 = vmatpush1.bf16.msra.mxu0 %v9224_v60  ;;  %v4376_v55 = vld [vmem:[#allocation8 + $0x220] sm:$0xff]  ;;  %v3550_v36 = vmul.f32 %v3486_v4, %v3486_v4  ;;  %v3490_v4 = vsub.f32 %v11260_v52, %v11415_v47 }
 0x40b   :  { %9226 = vmatprep.subr.bf16.mxu0 %v15289_v48 }
 0x40c   :  { %v3609_v11 = vadd.f32 %v3608_v7, %v3546_v50  ;;  %v9252_v50 = vpack.c.bf16 %v4393_v32, %v4392_v24  ;;  %v4377_v7 = vld [vmem:[#allocation8 + $0x228] sm:$0xff] }
 0x40d   :  { %v9227_v5 = vpack.c.bf16 %v4377_v7, %v4376_v55  ;;  %v3491_v55 = vsub.f32 %v11267_v28, %v11415_v47  ;;  %v4396_v7 = vld [vmem:[#allocation8 + $0x2c0] sm:$0xff] }
 0x40e   :  { %v3610_v39 = vadd.f32 %v3609_v11, %v3547_v63  ;;  %9253 = vmatprep.subr.bf16.mxu1 %v9252_v50  ;;  %v4378_v63 = vld [vmem:[#allocation8 + $0x230] sm:$0xff]  ;;  %v4379_v11 = vld [vmem:[#allocation8 + $0x238] sm:$0xff] }
 0x40f   :  { %9255 = vmatpush3.bf16.msra.mxu1 %v9252_v50  ;;  %9228 = vmatpush1.bf16.msra.mxu0 %v9227_v5  ;;  %v4381_v50 = vld [vmem:[#allocation8 + $0x248] sm:$0xff] }
 0x410   :  { %v3611_v40 = vadd.f32 %v3610_v39, %v3548_v20  ;;  %9229 = vmatprep.subr.bf16.mxu0 %v15289_v48  ;;  %v9230_v20 = vpack.c.bf16 %v4379_v11, %v4378_v63  ;;  %v4395_v39 = vld [vmem:[#allocation8 + $0x2b8] sm:$0xff]  ;;  %v3554_v11 = vmul.f32 %v3490_v4, %v3490_v4  ;;  %v3494_v4 = vsub.f32 %v11282_v23, %v11415_v47  ;;  %v4148_v23 = vld [vmem:[#allocation8 + $0x108] sm:$0xff] }
 0x411   :  { %v9256_v24 = vpack.c.bf16 %v4395_v39, %v4394_v45  ;;  %v3555_v39 = vmul.f32 %v3491_v55, %v3491_v55  ;;  %v4400_v55 = vld [vmem:[#allocation8 + $0x2e0] sm:$0xff] }
 0x412   :  { %v3612_v37 = vadd.f32 %v3611_v40, %v3549_v56  ;;  %v3552_v56 = vmul.f32 %v3488_v54, %v3488_v54  ;;  %v4380_v40 = vld [vmem:[#allocation8 + $0x240] sm:$0xff]  ;;  %v3492_v54 = vsub.f32 %v11272_v38, %v11415_v47 }
 0x413   :  { %9231 = vmatpush1.bf16.msra.mxu0 %v9230_v20  ;;  %9257 = vmatprep.subr.bf16.mxu1 %v9256_v24  ;;  %v4383_v20 = vld [vmem:[#allocation8 + $0x258] sm:$0xff] }
 0x414   :  { %v3613_v60 = vadd.f32 %v3612_v37, %v3550_v36  ;;  %9259 = vmatpush3.bf16.msra.mxu1 %v9256_v24  ;;  %9232 = vmatprep.subr.bf16.mxu0 %v15289_v48  ;;  %v9233_v36 = vpack.c.bf16 %v4381_v50, %v4380_v40  ;;  %v4397_v37 = vld [vmem:[#allocation8 + $0x2c8] sm:$0xff]  ;;  %v3556_v50 = vmul.f32 %v3492_v54, %v3492_v54  ;;  %v4402_v54 = vld [vmem:[#allocation8 + $0x2f0] sm:$0xff] }
 0x415   :  { %v9260_v63 = vpack.c.bf16 %v4397_v37, %v4396_v7 }
 0x416   :  { %v3614_v32 = vadd.f32 %v3613_v60, %v3551_v46  ;;  %v3493_v46 = vsub.f32 %v11277_v3, %v11415_v47  ;;  %v4382_v60 = vld [vmem:[#allocation8 + $0x250] sm:$0xff] }
 0x417   :  { %9234 = vmatpush1.bf16.msra.mxu0 %v9233_v36  ;;  %9261 = vmatprep.subr.bf16.mxu1 %v9260_v63  ;;  %v4385_v36 = vld [vmem:[#allocation8 + $0x268] sm:$0xff] }
 0x418   :  { %v3615_v5 = vadd.f32 %v3614_v32, %v3552_v56  ;;  %9235 = vmatprep.subr.bf16.mxu0 %v15289_v48  ;;  %v9236_v56 = vpack.c.bf16 %v4383_v20, %v4382_v60  ;;  %9263 = vmatpush3.bf16.msra.mxu1 %v9260_v63  ;;  %v4399_v32 = vld [vmem:[#allocation8 + $0x2d8] sm:$0xff]  ;;  %v3557_v37 = vmul.f32 %v3493_v46, %v3493_v46  ;;  %v4386_v20 = vld [vmem:[#allocation8 + $0x270] sm:$0xff] }
 0x419   :  { %v9264_v40 = vpack.c.bf16 %v4399_v32, %v4398_v15  ;;  %v4387_v15 = vld [vmem:[#allocation8 + $0x278] sm:$0xff]  ;;  %v3497_v46 = vsub.f32 %v11300_v49, %v11415_v47 }
 0x41a   :  { %v3616_v45 = vadd.f32 %v3615_v5, %v3553_v51  ;;  %v3495_v51 = vsub.f32 %v11288_v53, %v11415_v47  ;;  %v4384_v5 = vld [vmem:[#allocation8 + $0x260] sm:$0xff]  ;;  %v4403_v32 = vld [vmem:[#allocation8 + $0x2f8] sm:$0xff] }
 0x41b   :  { %9237 = vmatpush1.bf16.msra.mxu0 %v9236_v56  ;;  %9265 = vmatprep.subr.bf16.mxu1 %v9264_v40  ;;  %v9239_v63 = vpack.c.bf16 %v4385_v36, %v4384_v5  ;;  %v4147_v53 = vld [vmem:[#allocation8 + $0x100] sm:$0xff] }
 0x41c   :  { %v3617_v24 = vadd.f32 %v3616_v45, %v3554_v11  ;;  %9238 = vmatprep.subr.bf16.mxu0 %v15289_v48  ;;  %9267 = vmatpush3.bf16.msra.mxu1 %v9264_v40  ;;  %v4401_v45 = vld [vmem:[#allocation8 + $0x2e8] sm:$0xff]  ;;  %v9272_v40 = vpack.c.bf16 %v4403_v32, %v4402_v54  ;;  %v11524_v36 = vpack.c.bf16 %v4148_v23, %v4147_v53  ;;  %v15291_v54 = vld [vmem:[#allocation33_spill] sm:$0xff] }
 0x41d   :  { %v9268_v60 = vpack.c.bf16 %v4401_v45, %v4400_v55  ;;  %v3500_v23 = vsub.f32 %v11318_v10, %v11415_v47  ;;  %v3503_v32 = vsub.f32 %v11336_v35, %v11415_v47 }
 0x41e   :  { %v3618_v7 = vadd.f32 %v3617_v24, %v3555_v39  ;;  %v3496_v39 = vsub.f32 %v11294_v9, %v11415_v47  ;;  %v3558_v24 = vmul.f32 %v3494_v4, %v3494_v4  ;;  %15290 = vst [vmem:[#allocation41_spill] sm:$0xff] %v11524_v36  ;;  %v3498_v4 = vsub.f32 %v11306_v27, %v11415_v47 }
 0x41f   :  { %9240 = vmatpush1.bf16.msra.mxu0 %v9239_v63  ;;  %9269 = vmatprep.subr.bf16.mxu1 %v9268_v60  ;;  %v3561_v63 = vmul.f32 %v3497_v46, %v3497_v46 }
 0x420   :  { %v3619_v11 = vadd.f32 %v3618_v7, %v3556_v50  ;;  %v9242_v50 = vpack.c.bf16 %v4387_v15, %v4386_v20  ;;  %v3559_v7 = vmul.f32 %v3495_v51, %v3495_v51  ;;  %9241 = vmatprep.subr.bf16.mxu0 %v15289_v48  ;;  %9271 = vmatpush3.bf16.msra.mxu1 %v9268_v60 }
 0x421   :  { %9273 = vmatprep.subr.bf16.mxu1 %v9272_v40  ;;  %v3560_v55 = vmul.f32 %v3496_v39, %v3496_v39  ;;  %v3562_v53 = vmul.f32 %v3498_v4, %v3498_v4  ;;  %v3501_v60 = vsub.f32 %v11324_v43, %v11415_v47  ;;  %v3502_v39 = vsub.f32 %v15291_v54, %v11415_v47 }
 0x422   :  { %v3620_v56 = vadd.f32 %v3619_v11, %v3557_v37  ;;  %v3499_v11 = vsub.f32 %v11312_v58, %v11415_v47  ;;  %v3505_v4 = vsub.f32 %v11348_v62, %v11415_v47 }
 0x423   :  { %9243 = vmatpush1.bf16.msra.mxu0 %v9242_v50  ;;  %v3565_v46 = vmul.f32 %v3501_v60, %v3501_v60 }
 0x424   :  { %v3621_v5 = vadd.f32 %v3620_v56, %v3558_v24  ;;  %9275 = vmatpush3.bf16.msra.mxu1 %v9272_v40  ;;  %9325 = vmatprep.subr.bf16.mxu0 %v11524_v36  ;;  %v3563_v20 = vmul.f32 %v3499_v11, %v3499_v11  ;;  %v3564_v24 = vmul.f32 %v3500_v23, %v3500_v23  ;;  %v15292_v11 = vld [vmem:[#allocation29_spill] sm:$0xff] }
 0x425   :  { %9276 = vmatprep.subr.bf16.mxu1 %v15289_v48  ;;  %v3504_v40 = vsub.f32 %v11342_v2, %v11415_v47 }
 0x426   :  { %v3622_v37 = vadd.f32 %v3621_v5, %v3559_v7  ;;  %v3566_v7 = vmul.f32 %v3502_v39, %v3502_v39 }
 0x428   :  { %v3623_v45 = vadd.f32 %v3622_v37, %v3560_v55  ;;  %v3567_v55 = vmul.f32 %v3503_v32, %v3503_v32 }
 0x42a   :  { %v3624_v51 = vadd.f32 %v3623_v45, %v3561_v63  ;;  %v3506_v63 = vsub.f32 %v15292_v11, %v11415_v47  ;;  %v3568_v45 = vmul.f32 %v3504_v40, %v3504_v40 }
 0x42c   :  { %v3625_v15 = vadd.f32 %v3624_v51, %v3562_v53  ;;  %v3507_v53 = vsub.f32 %v11360_v33, %v11415_v47  ;;  %v3569_v51 = vmul.f32 %v3505_v4, %v3505_v4 }
 0x42e   :  { %v3626_v56 = vadd.f32 %v3625_v15, %v3563_v20  ;;  %v3508_v20 = vsub.f32 %v11366_v29, %v11415_v47  ;;  %v3570_v15 = vmul.f32 %v3506_v63, %v3506_v63  ;;  %v3571_v32 = vmul.f32 %v3507_v53, %v3507_v53 }
 0x430   :  { %v3627_v50 = vadd.f32 %v3626_v56, %v3564_v24  ;;  %v15293_v24 = vld [vmem:[#allocation34_spill] sm:$0xff]  ;;  %v3572_v40 = vmul.f32 %v3508_v20, %v3508_v20 }
 0x431   :  { %v3509_v56 = vsub.f32 %v15293_v24, %v11415_v47 }
 0x432   :  { %v3628_v5 = vadd.f32 %v3627_v50, %v3565_v46  ;;  %v15294_v50 = vld [vmem:[#allocation35_spill] sm:$0xff] }
 0x433   :  { %v3573_v4 = vmul.f32 %v3509_v56, %v3509_v56 }
 0x434   :  { %v3629_v37 = vadd.f32 %v3628_v5, %v3566_v7  ;;  %v3510_v7 = vsub.f32 %v15294_v50, %v11415_v47 }
 0x436   :  { %v3630_v23 = vadd.f32 %v3629_v37, %v3567_v55  ;;  %v15295_v55 = vld [vmem:[#allocation36_spill] sm:$0xff]  ;;  %v3574_v63 = vmul.f32 %v3510_v7, %v3510_v7 }
 0x437   :  { %v3511_v37 = vsub.f32 %v15295_v55, %v11415_v47 }
 0x438   :  { %v3631_v60 = vadd.f32 %v3630_v23, %v3568_v45  ;;  %v15296_v23 = vld [vmem:[#allocation37_spill] sm:$0xff] }
 0x439   :  { %v3512_v48 = vsub.f32 %v15296_v23, %v11415_v47  ;;  %v3575_v53 = vmul.f32 %v3511_v37, %v3511_v37 }
 0x43a   :  { %v3632_v39 = vadd.f32 %v3631_v60, %v3569_v51  ;;  %v15297_v60 = vld [vmem:[#allocation39_spill] sm:$0xff] }
 0x43b   :  { %v3513_v36 = vsub.f32 %v15297_v60, %v11415_v47  ;;  %v3576_v20 = vmul.f32 %v3512_v48, %v3512_v48  ;;  %v3656_v48 = vlaneseq }
 0x43c   :  { %v3633_v46 = vadd.f32 %v3632_v39, %v3570_v15  ;;  %v15298_v39 = vld [vmem:[#allocation38_spill] sm:$0xff] }
 0x43d   :  { %v3514_v50 = vsub.f32 %v15298_v39, %v11415_v47  ;;  %v3577_v56 = vmul.f32 %v3513_v36, %v3513_v36  ;;  %v3379_v36 = vld [vmem:[%s14821_s2] sm:$0x1] }
 0x43e   :  { %v3634_v5 = vadd.f32 %v3633_v46, %v3571_v32  ;;  %v15299_v46 = vld [vmem:[#allocation40_spill] sm:$0xff] }
 0x43f   :  { %v3515_v55 = vsub.f32 %v15299_v46, %v11415_v47 }
 0x440   :  { %v3635_v45 = vadd.f32 %v3634_v5, %v3572_v40  ;;  %v3578_v5 = vmul.f32 %v3514_v50, %v3514_v50 }
 0x441   :  { %v3579_v23 = vmul.f32 %v3515_v55, %v3515_v55  ;;  %v4149_v55 = vld [vmem:[#allocation8 + $0x110] sm:$0xff] }
 0x442   :  { %v3636_v51 = vadd.f32 %v3635_v45, %v3573_v4 }
 0x444   :  { %v3637_v15 = vadd.f32 %v3636_v51, %v3574_v63 }
 0x446   :  { %v3638_v32 = vadd.f32 %v3637_v15, %v3575_v53  ;;  %v3657_v53 = vshrl.u32 %v3656_v48, 7  ;;  %v4151_v15 = vld [vmem:[#allocation8 + $0x120] sm:$0xff]  ;;  %v15307_v48 = vld [vmem:[#allocation60_spill] sm:$0xff] }
 0x448   :  { %v3639_v40 = vadd.f32 %v3638_v32, %v3576_v20  ;;  %v11567_v50 = vsub.s32 0, %v3657_v53  ;;  %v4152_v20 = vld [vmem:[#allocation8 + $0x128] sm:$0xff]  ;;  %v11569_v32 = vld [vmem:[#allocation8] sm:$0xff] }
 0x449   :  { %15301 = vst [vmem:[#allocation25_spill] sm:$0xff] %v11569_v32  ;;  %v15308_v53 = vld [vmem:[#allocation54_spill] sm:$0xff] }
 0x44a   :  { %v3640_v24 = vadd.f32 %v3639_v40, %v3577_v56  ;;  %15300 = vst [vmem:[#allocation23_spill] sm:$0xff] %v11567_v50  ;;  %v3380_v56 = vld [vmem:[%s14822_s3] sm:$0x1]  ;;  %v15322_v32 = vld [vmem:[#allocation30_spill] sm:$0xff] }
 0x44c   :  { %v3641_v7 = vadd.f32 %v3640_v24, %v3578_v5  ;;  %v4150_v24 = vld [vmem:[#allocation8 + $0x118] sm:$0xff] }
 0x44e   :  { %v3642_v4 = vadd.f32 %v3641_v7, %v3579_v23  ;;  %v11584_v7 = vpack.c.bf16 %v4150_v24, %v4149_v55  ;;  %v15309_v55 = vld [vmem:[#allocation62_spill] sm:$0xff] }
 0x450   :  { %v3643_v45 = vrot.slane %v3642_v4, 4  ;;  %15305 = vst [vmem:[#allocation49_spill] sm:$0xff] %v11584_v7  ;;  %v15329_v7 = vld [vmem:[#allocation32_spill] sm:$0xff] }
 0x452   :  { %v3644_v29 = vadd.f32 %v3643_v45, %v3642_v4  ;;  %v11586_v4 = vpack.c.bf16 %v4152_v20, %v4151_v15  ;;  %v15311_v20 = vld [vmem:[#allocation63_spill] sm:$0xff] }
 0x454   :  { %v3645_v60 = vrot.slane %v3644_v29, 2  ;;  %15306 = vst [vmem:[#allocation53_spill] sm:$0xff] %v11586_v4  ;;  %v15319_v4 = vld [vmem:[#allocation16_spill] sm:$0xff] }
 0x456   :  { %v3646_v37 = vadd.f32 %v3645_v60, %v3644_v29  ;;  %v11571_v60 = vld [vmem:[#allocation8 + $0x8] sm:$0xff] }
 0x457   :  { %15302 = vst [vmem:[#allocation46_spill] sm:$0xff] %v11571_v60  ;;  %v15327_v60 = vld [vmem:[#allocation31_spill] sm:$0xff] }
 0x458   :  { %v3647_v63 = vrot.slane %v3646_v37, 1 }
 0x45a   :  { %v3648_v51 = vadd.f32 %v3647_v63, %v3646_v37 }
 0x45c   :  { %v3649_v33 = vmul.f32 0.001953125, %v3648_v51 }
 0x45e   :  { %v3650_v39 = vadd.f32 1e-05, %v3649_v33  ;;  %v11573_v33 = vld [vmem:[#allocation8 + $0x10] sm:$0xff] }
 0x45f   :  { %15303 = vst [vmem:[#allocation18_spill] sm:$0xff] %v11573_v33 }
 0x460   :  { %9444 = vrsqrt.f32 %v3650_v39  ;;  %v11575_v39 = vld [vmem:[#allocation8 + $0x18] sm:$0xff] }
 0x461   :  { %15304 = vst [vmem:[#allocation43_spill] sm:$0xff] %v11575_v39 }
 0x46a   :  { %v9445_v23 = vpop.eup %9444 }
 0x46b   :  { %v3652_v29 = vmul.f32 %v9445_v23, %v3379_v36  ;;  %v15310_v23 = vld [vmem:[#allocation58_spill] sm:$0xff] }
 0x46d   :  { %v3653_v40 = vmul.f32 %v3652_v29, %v11415_v47  ;;  %v11582_v5 = vrot.slane %v3652_v29, %v11567_v50 }
 0x46f   :  { %v3654_v63 = vsub.f32 %v3380_v56, %v3653_v40  ;;  %v3724_v51 = vmul.f32 %v11582_v5, %v15299_v46  ;;  %v11596_v47 = vmul.f32 %v11582_v5, %v15307_v48  ;;  %v11600_v36 = vmul.f32 %v11582_v5, %v15308_v53  ;;  %v15312_v46 = vld [vmem:[#allocation64_spill] sm:$0xff]  ;;  %v15313_v48 = vld [vmem:[#allocation13_spill] sm:$0xff] }
 0x470   :  { %v11604_v24 = vmul.f32 %v11582_v5, %v15309_v55  ;;  %v11608_v15 = vmul.f32 %v11582_v5, %v15310_v23  ;;  %v11612_v29 = vmul.f32 %v11582_v5, %v15311_v20  ;;  %v11616_v56 = vmul.f32 %v11582_v5, %v15312_v46  ;;  %v15314_v55 = vld [vmem:[#allocation17_spill] sm:$0xff]  ;;  %v15315_v23 = vld [vmem:[#allocation14_spill] sm:$0xff]  ;;  %v15316_v46 = vld [vmem:[#allocation15_spill] sm:$0xff] }
 0x471   :  { %v11619_v40 = vrot.slane %v3654_v63, %v11567_v50  ;;  %v11623_v53 = vmul.f32 %v11582_v5, %v15313_v48  ;;  %v11627_v37 = vmul.f32 %v11582_v5, %v15314_v55  ;;  %v11631_v45 = vmul.f32 %v11582_v5, %v15315_v23  ;;  %v15317_v50 = vld [vmem:[#allocation24_spill] sm:$0xff] }
 0x472   :  { %v11635_v20 = vmul.f32 %v11582_v5, %v15285_v59  ;;  %v11639_v63 = vmul.f32 %v11582_v5, %v15316_v46  ;;  %v11643_v48 = vmul.f32 %v11582_v5, %v15287_v14  ;;  %v11647_v55 = vmul.f32 %v11582_v5, %v15317_v50  ;;  %v15318_v59 = vld [vmem:[#allocation22_spill] sm:$0xff] }
 0x473   :  { %v3794_v33 = vadd.f32 %v11619_v40, %v3724_v51  ;;  %v11652_v23 = vmul.f32 %v11582_v5, %v11103_v16  ;;  %v11656_v39 = vmul.f32 %v11582_v5, %v15318_v59  ;;  %v11660_v46 = vmul.f32 %v11582_v5, %v11112_v0 }
 0x474   :  { %v11664_v14 = vmul.f32 %v11582_v5, %v11115_v61  ;;  %v11668_v50 = vmul.f32 %v11582_v5, %v11118_v19  ;;  %v11672_v16 = vmul.f32 %v11582_v5, %v11121_v13  ;;  %v11676_v51 = vmul.f32 %v11582_v5, %v11124_v25 }
 0x475   :  { %v3858_v59 = vmax.f32 %v3794_v33, 0.0  ;;  %v11680_v0 = vmul.f32 %v11582_v5, %v11127_v12  ;;  %v11684_v61 = vmul.f32 %v11582_v5, %v15319_v4  ;;  %v11688_v19 = vmul.f32 %v11582_v5, %v11133_v22  ;;  %v15320_v4 = vld [vmem:[#allocation27_spill] sm:$0xff] }
 0x476   :  { %v11692_v13 = vmul.f32 %v11582_v5, %v11138_v21  ;;  %v11696_v25 = vmul.f32 %v11582_v5, %v11143_v6  ;;  %v11700_v12 = vmul.f32 %v11582_v5, %v15243_v8  ;;  %v11704_v33 = vmul.f32 %v11582_v5, %v15244_v1 }
 0x477   :  { %v11708_v22 = vmul.f32 %v11582_v5, %v15246_v44  ;;  %v11712_v21 = vmul.f32 %v11582_v5, %v11174_v26  ;;  %v11716_v6 = vmul.f32 %v11582_v5, %v11182_v31  ;;  %v11720_v8 = vmul.f32 %v11582_v5, %v11190_v17  ;;  %3922 = vst [vmem:[#allocation2 + $0x339] sm:$0xff] %v3858_v59 }
 0x478   :  { %v11724_v1 = vmul.f32 %v11582_v5, %v11198_v42  ;;  %v11728_v44 = vmul.f32 %v11582_v5, %v11206_v30  ;;  %v11732_v26 = vmul.f32 %v11582_v5, %v15320_v4  ;;  %v11736_v31 = vmul.f32 %v11582_v5, %v11224_v18  ;;  %v15321_v4 = vld [vmem:[#allocation28_spill] sm:$0xff] }
 0x479   :  { %v11740_v17 = vmul.f32 %v11582_v5, %v11233_v57  ;;  %v11744_v42 = vmul.f32 %v11582_v5, %v11242_v34  ;;  %v11748_v30 = vmul.f32 %v11582_v5, %v11251_v41  ;;  %v11752_v59 = vmul.f32 %v11582_v5, %v11260_v52 }
 0x47a   :  { %v11756_v18 = vmul.f32 %v11582_v5, %v11267_v28  ;;  %v11760_v57 = vmul.f32 %v11582_v5, %v11272_v38  ;;  %v11764_v34 = vmul.f32 %v11582_v5, %v11277_v3  ;;  %v11768_v41 = vmul.f32 %v11582_v5, %v15321_v4 }
 0x47b   :  { %v11772_v52 = vmul.f32 %v11582_v5, %v15322_v32  ;;  %v11776_v28 = vmul.f32 %v11582_v5, %v11294_v9  ;;  %v11780_v38 = vmul.f32 %v11582_v5, %v11300_v49  ;;  %v11784_v3 = vmul.f32 %v11582_v5, %v11306_v27 }
 0x47c   :  { %v11788_v4 = vmul.f32 %v11582_v5, %v11312_v58  ;;  %v11792_v32 = vmul.f32 %v11582_v5, %v11318_v10  ;;  %v11796_v9 = vmul.f32 %v11582_v5, %v11324_v43  ;;  %v11800_v49 = vmul.f32 %v11582_v5, %v15291_v54 }
 0x47d   :  { %v11804_v27 = vmul.f32 %v11582_v5, %v11336_v35  ;;  %v11808_v58 = vmul.f32 %v11582_v5, %v11342_v2  ;;  %v11812_v10 = vmul.f32 %v11582_v5, %v11348_v62  ;;  %v11816_v43 = vmul.f32 %v11582_v5, %v15292_v11 }
 0x47e   :  { %v11820_v54 = vmul.f32 %v11582_v5, %v15327_v60  ;;  %v11824_v35 = vmul.f32 %v11582_v5, %v15329_v7 }
 0x47f   :  { %15323 = vst [vmem:[#allocation51_spill] sm:$0xff] %v11804_v27  ;;  %15324 = vst [vmem:[#allocation55_spill] sm:$0xff] %v11808_v58  ;;  %v15331_v27 = vld [vmem:[#allocation34_spill] sm:$0xff]  ;;  %v15332_v58 = vld [vmem:[#allocation35_spill] sm:$0xff] }
 0x480   :  { %15325 = vst [vmem:[#allocation42_spill] sm:$0xff] %v11812_v10  ;;  %15326 = vst [vmem:[#allocation45_spill] sm:$0xff] %v11816_v43  ;;  %v11828_v2 = vmul.f32 %v11582_v5, %v15331_v27  ;;  %v11832_v62 = vmul.f32 %v11582_v5, %v15332_v58  ;;  %v15333_v10 = vld [vmem:[#allocation36_spill] sm:$0xff]  ;;  %v15334_v43 = vld [vmem:[#allocation37_spill] sm:$0xff]  ;;  %v11852_v58 = vadd.f32 %v11619_v40, %v11596_v47 }
 0x481   :  { %15328 = vst [vmem:[#allocation57_spill] sm:$0xff] %v11820_v54  ;;  %15330 = vst [vmem:[#allocation61_spill] sm:$0xff] %v11824_v35  ;;  %v11836_v11 = vmul.f32 %v11582_v5, %v15333_v10  ;;  %v11840_v60 = vmul.f32 %v11582_v5, %v15334_v43  ;;  %v15335_v54 = vld [vmem:[#allocation39_spill] sm:$0xff]  ;;  %v15336_v35 = vld [vmem:[#allocation38_spill] sm:$0xff]  ;;  %v11856_v10 = vadd.f32 %v11619_v40, %v11600_v36 }
 0x482   :  { %v11844_v7 = vmul.f32 %v11582_v5, %v15335_v54  ;;  %v11848_v27 = vmul.f32 %v11582_v5, %v15336_v35  ;;  %v11860_v43 = vadd.f32 %v11619_v40, %v11604_v24  ;;  %v11864_v54 = vadd.f32 %v11619_v40, %v11608_v15 }
 0x483   :  { %v11868_v5 = vadd.f32 %v11619_v40, %v11612_v29  ;;  %v11872_v47 = vadd.f32 %v11619_v40, %v11616_v56  ;;  %v11876_v36 = vadd.f32 %v11619_v40, %v11623_v53  ;;  %v11880_v24 = vadd.f32 %v11619_v40, %v11627_v37 }
 0x484   :  { %v11884_v15 = vadd.f32 %v11619_v40, %v11631_v45  ;;  %v11888_v29 = vadd.f32 %v11619_v40, %v11635_v20  ;;  %v11892_v56 = vadd.f32 %v11619_v40, %v11639_v63  ;;  %v11896_v53 = vadd.f32 %v11619_v40, %v11643_v48 }
 0x485   :  { %v11900_v37 = vadd.f32 %v11619_v40, %v11647_v55  ;;  %v11904_v45 = vadd.f32 %v11619_v40, %v11652_v23  ;;  %v11908_v20 = vadd.f32 %v11619_v40, %v11656_v39  ;;  %v11912_v63 = vadd.f32 %v11619_v40, %v11660_v46 }
 0x486   :  { %v11916_v48 = vadd.f32 %v11619_v40, %v11664_v14  ;;  %v11920_v55 = vadd.f32 %v11619_v40, %v11668_v50  ;;  %v11924_v23 = vadd.f32 %v11619_v40, %v11672_v16  ;;  %v11928_v39 = vadd.f32 %v11619_v40, %v11676_v51  ;;  %v15342_v35 = vld [vmem:[#allocation51_spill] sm:$0xff] }
 0x487   :  { %v11932_v46 = vadd.f32 %v11619_v40, %v11680_v0  ;;  %v11936_v14 = vadd.f32 %v11619_v40, %v11684_v61  ;;  %v11940_v50 = vadd.f32 %v11619_v40, %v11688_v19  ;;  %v11944_v16 = vadd.f32 %v11619_v40, %v11692_v13 }
 0x488   :  { %v11948_v51 = vadd.f32 %v11619_v40, %v11696_v25  ;;  %v11952_v0 = vadd.f32 %v11619_v40, %v11700_v12  ;;  %v11956_v61 = vadd.f32 %v11619_v40, %v11704_v33  ;;  %v11960_v19 = vadd.f32 %v11619_v40, %v11708_v22 }
 0x489   :  { %v11964_v13 = vadd.f32 %v11619_v40, %v11712_v21  ;;  %v11968_v25 = vadd.f32 %v11619_v40, %v11716_v6  ;;  %v11972_v12 = vadd.f32 %v11619_v40, %v11720_v8  ;;  %v11976_v33 = vadd.f32 %v11619_v40, %v11724_v1 }
 0x48a   :  { %v11980_v22 = vadd.f32 %v11619_v40, %v11728_v44  ;;  %v11984_v21 = vadd.f32 %v11619_v40, %v11732_v26  ;;  %v11988_v6 = vadd.f32 %v11619_v40, %v11736_v31  ;;  %v11992_v8 = vadd.f32 %v11619_v40, %v11740_v17 }
 0x48b   :  { %v11996_v1 = vadd.f32 %v11619_v40, %v11744_v42  ;;  %v12000_v44 = vadd.f32 %v11619_v40, %v11748_v30  ;;  %v12004_v26 = vadd.f32 %v11619_v40, %v11752_v59  ;;  %v12008_v31 = vadd.f32 %v11619_v40, %v11756_v18 }
 0x48c   :  { %v12012_v17 = vadd.f32 %v11619_v40, %v11760_v57  ;;  %v12016_v42 = vadd.f32 %v11619_v40, %v11764_v34  ;;  %v12020_v30 = vadd.f32 %v11619_v40, %v11768_v41  ;;  %v12024_v59 = vadd.f32 %v11619_v40, %v11772_v52 }
 0x48d   :  { %v12028_v18 = vadd.f32 %v11619_v40, %v11776_v28  ;;  %v12032_v57 = vadd.f32 %v11619_v40, %v11780_v38  ;;  %v12036_v34 = vadd.f32 %v11619_v40, %v11784_v3  ;;  %v12040_v41 = vadd.f32 %v11619_v40, %v11788_v4 }
 0x48e   :  { %v12044_v52 = vadd.f32 %v11619_v40, %v11792_v32  ;;  %v12048_v28 = vadd.f32 %v11619_v40, %v11796_v9  ;;  %v12052_v38 = vadd.f32 %v11619_v40, %v11800_v49  ;;  %v12056_v3 = vadd.f32 %v11619_v40, %v15342_v35 }
 0x48f   :  { %15337 = vst [vmem:[#allocation59_spill] sm:$0xff] %v12036_v34  ;;  %15338 = vst [vmem:[#allocation48_spill] sm:$0xff] %v12040_v41  ;;  %v15343_v34 = vld [vmem:[#allocation55_spill] sm:$0xff]  ;;  %v15344_v41 = vld [vmem:[#allocation42_spill] sm:$0xff] }
 0x490   :  { %15339 = vst [vmem:[#allocation44_spill] sm:$0xff] %v12044_v52  ;;  %15340 = vst [vmem:[#allocation52_spill] sm:$0xff] %v12048_v28  ;;  %v12060_v4 = vadd.f32 %v11619_v40, %v15343_v34  ;;  %v12064_v32 = vadd.f32 %v11619_v40, %v15344_v41  ;;  %v15345_v52 = vld [vmem:[#allocation45_spill] sm:$0xff]  ;;  %v12080_v34 = vadd.f32 %v11619_v40, %v11828_v2 }
 0x491   :  { %15341 = vst [vmem:[#allocation21_spill] sm:$0xff] %v12052_v38  ;;  %v12068_v9 = vadd.f32 %v11619_v40, %v15345_v52  ;;  %v15346_v28 = vld [vmem:[#allocation57_spill] sm:$0xff]  ;;  %v12084_v41 = vadd.f32 %v11619_v40, %v11832_v62  ;;  %v12088_v52 = vadd.f32 %v11619_v40, %v11836_v11  ;;  %v12100_v2 = vadd.f32 %v11619_v40, %v11848_v27 }
 0x492   :  { %v12072_v49 = vadd.f32 %v11619_v40, %v15346_v28  ;;  %v15347_v38 = vld [vmem:[#allocation61_spill] sm:$0xff]  ;;  %15348 = vst [vmem:[#allocation47_spill] sm:$0xff] %v12080_v34  ;;  %v12092_v28 = vadd.f32 %v11619_v40, %v11840_v60  ;;  %v3795_v34 = vmax.f32 %v11852_v58, 0.0  ;;  %v14922_v62 = vmax.f32 %v11856_v10, 0.0 }
 0x493   :  { %v12076_v35 = vadd.f32 %v11619_v40, %v15347_v38  ;;  %15349 = vst [vmem:[#allocation56_spill] sm:$0xff] %v12084_v41  ;;  %15350 = vst [vmem:[#allocation26_spill] sm:$0xff] %v12088_v52  ;;  %v12096_v38 = vadd.f32 %v11619_v40, %v11844_v7  ;;  %v14920_v41 = vmax.f32 %v11860_v43, 0.0  ;;  %v14921_v52 = vmax.f32 %v11868_v5, 0.0 }
 0x494   :  { %15351 = vst [vmem:[#allocation50_spill] sm:$0xff] %v12092_v28  ;;  %v14923_v60 = vmax.f32 %v11872_v47, 0.0  ;;  %v14924_v28 = vmax.f32 %v11876_v36, 0.0  ;;  %3859 = vst [vmem:[#allocation2 + $0x19] sm:$0xff] %v3795_v34  ;;  %4468 = vmatprep.mubr.f32.mxu0 %v3795_v34  ;;  %v14926_v40 = vmax.f32 %v11888_v29, 0.0  ;;  %v15353_v7 = vmax.f32 %v11864_v54, 0.0 }
 0x495   :  { %15352 = vst [vmem:[#allocation20_spill] sm:$0xff] %v12096_v38  ;;  %v14925_v38 = vmax.f32 %v11884_v15, 0.0  ;;  %3860 = vst [vmem:[#allocation2 + $0x21] sm:$0xff] %v14922_v62  ;;  %v14927_v34 = vmax.f32 %v11904_v45, 0.0  ;;  %v14928_v27 = vmax.f32 %v11908_v20, 0.0  ;;  %v14929_v58 = vmax.f32 %v11912_v63, 0.0 }
 0x496   :  { %3861 = vst [vmem:[#allocation2 + $0x31] sm:$0xff] %v14920_v41  ;;  %3862 = vst [vmem:[#allocation2 + $0x39] sm:$0xff] %v15353_v7  ;;  %v15354_v41 = vmax.f32 %v11880_v24, 0.0  ;;  %v14930_v7 = vmax.f32 %v11920_v55, 0.0  ;;  %v14933_v62 = vmax.f32 %v11944_v16, 0.0  ;;  %v3831_v11 = vmax.f32 %v11996_v1, 0.0 }
 0x497   :  { %3863 = vst [vmem:[#allocation2 + $0x49] sm:$0xff] %v14921_v52  ;;  %3864 = vst [vmem:[#allocation2 + $0x51] sm:$0xff] %v14923_v60  ;;  %v15355_v60 = vmax.f32 %v11892_v56, 0.0  ;;  %v14932_v52 = vmax.f32 %v11940_v50, 0.0  ;;  %v3835_v1 = vmax.f32 %v12012_v17, 0.0  ;;  %v3838_v17 = vmax.f32 %v12024_v59, 0.0 }
 0x498   :  { %3865 = vst [vmem:[#allocation2 + $0x61] sm:$0xff] %v14924_v28  ;;  %3866 = vst [vmem:[#allocation2 + $0x69] sm:$0xff] %v15354_v41  ;;  %v15356_v28 = vmax.f32 %v11896_v53, 0.0  ;;  %v15357_v41 = vmax.f32 %v11900_v37, 0.0 }
 0x499   :  { %3867 = vst [vmem:[#allocation2 + $0x79] sm:$0xff] %v14925_v38  ;;  %3868 = vst [vmem:[#allocation2 + $0x81] sm:$0xff] %v14926_v40  ;;  %v14931_v38 = vmax.f32 %v11936_v14, 0.0  ;;  %v14934_v40 = vmax.f32 %v11976_v33, 0.0 }
 0x49a   :  { %3869 = vst [vmem:[#allocation2 + $0x91] sm:$0xff] %v15355_v60  ;;  %3870 = vst [vmem:[#allocation2 + $0x99] sm:$0xff] %v15356_v28  ;;  %v15358_v28 = vmax.f32 %v11916_v48, 0.0  ;;  %v14937_v60 = vmax.f32 %v11952_v0, 0.0 }
 0x49b   :  { %3871 = vst [vmem:[#allocation2 + $0xa9] sm:$0xff] %v15357_v41  ;;  %3872 = vst [vmem:[#allocation2 + $0xb1] sm:$0xff] %v14927_v34  ;;  %v15359_v34 = vmax.f32 %v11924_v23, 0.0  ;;  %v14935_v41 = vmax.f32 %v11972_v12, 0.0 }
 0x49c   :  { %3873 = vst [vmem:[#allocation2 + $0xc1] sm:$0xff] %v14928_v27  ;;  %3874 = vst [vmem:[#allocation2 + $0xc9] sm:$0xff] %v14929_v58  ;;  %v15360_v27 = vmax.f32 %v11928_v39, 0.0  ;;  %v15361_v58 = vmax.f32 %v11932_v46, 0.0 }
 0x49d   :  { %3875 = vst [vmem:[#allocation2 + $0xd9] sm:$0xff] %v15358_v28  ;;  %3876 = vst [vmem:[#allocation2 + $0xe1] sm:$0xff] %v14930_v7  ;;  %v14936_v28 = vmax.f32 %v11968_v25, 0.0  ;;  %v3830_v7 = vmax.f32 %v11992_v8, 0.0  ;;  %v3834_v8 = vmax.f32 %v12008_v31, 0.0  ;;  %v3837_v31 = vmax.f32 %v12020_v30, 0.0 }
 0x49e   :  { %3877 = vst [vmem:[#allocation2 + $0xf1] sm:$0xff] %v15359_v34  ;;  %3878 = vst [vmem:[#allocation2 + $0xf9] sm:$0xff] %v15360_v27  ;;  %v15362_v27 = vmax.f32 %v11948_v51, 0.0  ;;  %v3829_v34 = vmax.f32 %v11988_v6, 0.0  ;;  %v3833_v6 = vmax.f32 %v12004_v26, 0.0  ;;  %v3836_v26 = vmax.f32 %v12016_v42, 0.0 }
 0x49f   :  { %3879 = vst [vmem:[#allocation2 + $0x109] sm:$0xff] %v15361_v58  ;;  %3880 = vst [vmem:[#allocation2 + $0x111] sm:$0xff] %v14931_v38  ;;  %v3828_v58 = vmax.f32 %v11984_v21, 0.0  ;;  %v15363_v38 = vmax.f32 %v11956_v61, 0.0  ;;  %v3832_v21 = vmax.f32 %v12000_v44, 0.0  ;;  %v4292_v44 = vld [vmem:[#allocation2 + $0x22] sm:$0xff] }
 0x4a0   :  { %3881 = vst [vmem:[#allocation2 + $0x121] sm:$0xff] %v14932_v52  ;;  %3882 = vst [vmem:[#allocation2 + $0x129] sm:$0xff] %v14933_v62  ;;  %v15364_v52 = vmax.f32 %v11960_v19, 0.0  ;;  %v15365_v62 = vmax.f32 %v11964_v13, 0.0  ;;  %v4293_v59 = vld [vmem:[#allocation2 + $0x32] sm:$0xff] }
 0x4a1   :  { %3883 = vst [vmem:[#allocation2 + $0x139] sm:$0xff] %v15362_v27  ;;  %3884 = vst [vmem:[#allocation2 + $0x141] sm:$0xff] %v14937_v60  ;;  %v12195_v27 = vld [vmem:[#allocation2 + $0x18] sm:$0xff] }
 0x4a2   :  { %3885 = vst [vmem:[#allocation2 + $0x151] sm:$0xff] %v15363_v38  ;;  %3886 = vst [vmem:[#allocation2 + $0x159] sm:$0xff] %v15364_v52  ;;  %v15367_v52 = vmax.f32 %v11980_v22, 0.0  ;;  %v4291_v38 = vld [vmem:[#allocation2 + $0x1a] sm:$0xff]  ;;  %4469 = vmatmul.mubr.f32.vlgmr.msra.gmra.mrb[0].mxu0 %v12195_v27 }
 0x4a3   :  { %3887 = vst [vmem:[#allocation2 + $0x169] sm:$0xff] %v15365_v62  ;;  %15366 = vst [vmem:[#allocation19_spill] sm:$0xff] %v12195_v27  ;;  %v3839_v62 = vmax.f32 %v12028_v18, 0.0  ;;  %8604 = vmatprep.mubr.f32.mxu1 %v4291_v38  ;;  %v15370_v60 = vld [vmem:[#allocation48_spill] sm:$0xff]  ;;  %v15372_v18 = vld [vmem:[#allocation41_spill] sm:$0xff] }
 0x4a4   :  { %3888 = vst [vmem:[#allocation2 + $0x171] sm:$0xff] %v14936_v28  ;;  %3889 = vst [vmem:[#allocation2 + $0x181] sm:$0xff] %v14935_v41  ;;  %v15369_v41 = vld [vmem:[#allocation59_spill] sm:$0xff]  ;;  %v3842_v42 = vmax.f32 %v15370_v60, 0.0  ;;  %v15371_v27 = vld [vmem:[#allocation44_spill] sm:$0xff]  ;;  %8605 = vmatmul.mubr.f32.vlgmr.msra.gmra.mrb[64].mxu1 %v4292_v44  ;;  %9327 = vmatpush3.bf16.msra.mxu0 %v15372_v18 }
 0x4a5   :  { %3890 = vst [vmem:[#allocation2 + $0x189] sm:$0xff] %v14934_v40  ;;  %3891 = vst [vmem:[#allocation2 + $0x1c9] sm:$0xff] %v15367_v52  ;;  %v15368_v40 = vmax.f32 %v11856_v10, 0.0  ;;  %v3840_v52 = vmax.f32 %v12032_v57, 0.0  ;;  %v3841_v28 = vmax.f32 %v15369_v41, 0.0  ;;  %v3843_v30 = vmax.f32 %v15371_v27, 0.0  ;;  %8607 = vmatprep.mubr.f32.mxu1 %v4293_v59 }
 0x4a6   :  { %3892 = vst [vmem:[#allocation2 + $0x1d1] sm:$0xff] %v3828_v58  ;;  %3893 = vst [vmem:[#allocation2 + $0x1e1] sm:$0xff] %v3829_v34  ;;  %v15374_v10 = vld [vmem:[#allocation21_spill] sm:$0xff]  ;;  %v3846_v57 = vmax.f32 %v12056_v3, 0.0  ;;  %v3847_v41 = vmax.f32 %v12060_v4, 0.0  ;;  %v3848_v27 = vmax.f32 %v12064_v32, 0.0 }
 0x4a7   :  { %3894 = vst [vmem:[#allocation2 + $0x1e9] sm:$0xff] %v3830_v7  ;;  %3895 = vst [vmem:[#allocation2 + $0x1f9] sm:$0xff] %v3831_v11  ;;  %4473 = vmatprep.mubr.f32.mxu0 %v15368_v40  ;;  %v15373_v11 = vld [vmem:[#allocation52_spill] sm:$0xff]  ;;  %v3845_v40 = vmax.f32 %v15374_v10, 0.0  ;;  %v12225_v60 = vld [vmem:[#allocation2 + $0x20] sm:$0xff]  ;;  %v3851_v3 = vmax.f32 %v12076_v35, 0.0 }
 0x4a8   :  { %3896 = vst [vmem:[#allocation2 + $0x201] sm:$0xff] %v3832_v21  ;;  %3897 = vst [vmem:[#allocation2 + $0x211] sm:$0xff] %v3833_v6  ;;  %v3844_v7 = vmax.f32 %v15373_v11, 0.0  ;;  %v15375_v58 = vld [vmem:[#allocation49_spill] sm:$0xff]  ;;  %v3849_v21 = vmax.f32 %v12068_v9, 0.0  ;;  %v3850_v6 = vmax.f32 %v12072_v49, 0.0  ;;  %4474 = vmatmul.mubr.f32.gmra.mrb[2].mxu0 %v12225_v60 }
 0x4a9   :  { %3898 = vst [vmem:[#allocation2 + $0x219] sm:$0xff] %v3834_v8  ;;  %3899 = vst [vmem:[#allocation2 + $0x229] sm:$0xff] %v3835_v1  ;;  %9329 = vmatprep.subr.bf16.mxu0 %v15375_v58  ;;  %v4119_v34 = vld [vmem:[#allocation8 + $0x20] sm:$0xff]  ;;  %v15376_v4 = vld [vmem:[#allocation46_spill] sm:$0xff]  ;;  %v3857_v11 = vmax.f32 %v12100_v2, 0.0 }
 0x4aa   :  { %3900 = vst [vmem:[#allocation2 + $0x231] sm:$0xff] %v3836_v26  ;;  %3901 = vst [vmem:[#allocation2 + $0x241] sm:$0xff] %v3837_v31  ;;  %v15377_v8 = vld [vmem:[#allocation25_spill] sm:$0xff]  ;;  %v4153_v38 = vld [vmem:[#allocation8 + $0x130] sm:$0xff]  ;;  %9331 = vmatpush3.bf16.msra.mxu0 %v15375_v58 }
 0x4ab   :  { %3902 = vst [vmem:[#allocation2 + $0x249] sm:$0xff] %v3838_v17  ;;  %3903 = vst [vmem:[#allocation2 + $0x259] sm:$0xff] %v3839_v62  ;;  %v15378_v1 = vpack.c.bf16 %v15376_v4, %v15377_v8  ;;  %v4154_v44 = vld [vmem:[#allocation8 + $0x138] sm:$0xff]  ;;  %v15379_v26 = vld [vmem:[#allocation47_spill] sm:$0xff] }
 0x4ac   :  { %3904 = vst [vmem:[#allocation2 + $0x261] sm:$0xff] %v3840_v52  ;;  %3905 = vst [vmem:[#allocation2 + $0x271] sm:$0xff] %v3841_v28  ;;  %v3852_v32 = vmax.f32 %v15379_v26, 0.0  ;;  %v15380_v31 = vld [vmem:[#allocation56_spill] sm:$0xff]  ;;  %v15381_v17 = vld [vmem:[#allocation26_spill] sm:$0xff]  ;;  %v15383_v52 = vmax.f32 %v11860_v43, 0.0 }
 0x4ad   :  { %3906 = vst [vmem:[#allocation2 + $0x279] sm:$0xff] %v3842_v42  ;;  %3907 = vst [vmem:[#allocation2 + $0x289] sm:$0xff] %v3843_v30  ;;  %9278 = vmatpush1.bf16.msra.mxu1 %v15378_v1  ;;  %v3853_v9 = vmax.f32 %v15380_v31, 0.0  ;;  %v3854_v49 = vmax.f32 %v15381_v17, 0.0  ;;  %v15382_v62 = vld [vmem:[#allocation50_spill] sm:$0xff]  ;;  %v4294_v28 = vld [vmem:[#allocation2 + $0x3a] sm:$0xff] }
 0x4ae   :  { %v3855_v35 = vmax.f32 %v15382_v62, 0.0  ;;  %3908 = vst [vmem:[#allocation2 + $0x291] sm:$0xff] %v3844_v7  ;;  %3909 = vst [vmem:[#allocation2 + $0x2a1] sm:$0xff] %v3845_v40  ;;  %4478 = vmatprep.mubr.f32.mxu0 %v15383_v52  ;;  %v15384_v42 = vmov 0.0|0.0   ;;  %v4120_v30 = vld [vmem:[#allocation8 + $0x28] sm:$0xff]  ;;  %v15385_v59 = vld [vmem:[#allocation20_spill] sm:$0xff]  ;;  %8608 = vmatmul.mubr.f32.gmra.mrb[66].mxu1 %v4294_v28  ;;  %v9336_v40 = vpack.c.bf16 %v4154_v44, %v4153_v38 }
 0x4af   :  { %3910 = vst [vmem:[#allocation2 + $0x2a9] sm:$0xff] %v3846_v57  ;;  %3911 = vst [vmem:[#allocation2 + $0x2b9] sm:$0xff] %v3847_v41  ;;  %9279 = vmatprep.subr.bf16.mxu1 %v15384_v42  ;;  %v3856_v18 = vmax.f32 %v15385_v59, 0.0  ;;  %v4295_v7 = vld [vmem:[#allocation2 + $0x4a] sm:$0xff]  ;;  %v15386_v10 = vld [vmem:[#allocation53_spill] sm:$0xff]  ;;  %v15392_v17 = vmax.f32 %v11872_v47, 0.0 }
 0x4b0   :  { %3912 = vst [vmem:[#allocation2 + $0x2c1] sm:$0xff] %v3848_v27  ;;  %3913 = vst [vmem:[#allocation2 + $0x2d1] sm:$0xff] %v3849_v21  ;;  %8610 = vmatprep.mubr.f32.mxu1 %v4295_v7  ;;  %v12246_v43 = vld [vmem:[#allocation2 + $0x30] sm:$0xff]  ;;  %9333 = vmatprep.subr.bf16.mxu0 %v15386_v10  ;;  %v15388_v57 = vld [vmem:[#allocation18_spill] sm:$0xff]  ;;  %v9283_v27 = vpack.c.bf16 %v4120_v30, %v4119_v34  ;;  %v15390_v21 = vmax.f32 %v11864_v54, 0.0  ;;  %v15391_v54 = vmax.f32 %v11868_v5, 0.0 }
 0x4b1   :  { %3914 = vst [vmem:[#allocation2 + $0x2d9] sm:$0xff] %v3850_v6  ;;  %3915 = vst [vmem:[#allocation2 + $0x2e9] sm:$0xff] %v3851_v3  ;;  %4479 = vmatmul.mubr.f32.gmra.mrb[4].mxu0 %v12246_v43  ;;  %v15387_v2 = vld [vmem:[#allocation43_spill] sm:$0xff]  ;;  %v4122_v3 = vld [vmem:[#allocation8 + $0x38] sm:$0xff]  ;;  %v15393_v30 = vmax.f32 %v11876_v36, 0.0 }
 0x4b2   :  { %3916 = vst [vmem:[#allocation2 + $0x2f1] sm:$0xff] %v3852_v32  ;;  %3917 = vst [vmem:[#allocation2 + $0x301] sm:$0xff] %v3853_v9  ;;  %v15389_v41 = vpack.c.bf16 %v15387_v2, %v15388_v57  ;;  %v4296_v58 = vld [vmem:[#allocation2 + $0x52] sm:$0xff]  ;;  %4483 = vmatprep.mubr.f32.mxu0 %v15390_v21  ;;  %v4297_v4 = vld [vmem:[#allocation2 + $0x62] sm:$0xff]  ;;  %9335 = vmatpush3.bf16.msra.mxu0 %v15386_v10  ;;  %v15395_v21 = vmax.f32 %v11884_v15, 0.0 }
 0x4b3   :  { %3918 = vst [vmem:[#allocation2 + $0x309] sm:$0xff] %v3854_v49  ;;  %3919 = vst [vmem:[#allocation2 + $0x319] sm:$0xff] %v3855_v35  ;;  %v4121_v6 = vld [vmem:[#allocation8 + $0x30] sm:$0xff]  ;;  %8611 = vmatmul.mubr.f32.gmra.mrb[68].mxu1 %v4296_v58  ;;  %v12257_v8 = vld [vmem:[#allocation2 + $0x38] sm:$0xff]  ;;  %9337 = vmatprep.subr.bf16.mxu0 %v9336_v40 }
 0x4b4   :  { %3920 = vst [vmem:[#allocation2 + $0x321] sm:$0xff] %v3856_v18  ;;  %3921 = vst [vmem:[#allocation2 + $0x331] sm:$0xff] %v3857_v11  ;;  %9281 = vmatpush1.bf16.msra.mxu1 %v15389_v41  ;;  %8613 = vmatprep.mubr.f32.mxu1 %v4297_v4  ;;  %v9286_v34 = vpack.c.bf16 %v4122_v3, %v4121_v6  ;;  %v4298_v1 = vld [vmem:[#allocation2 + $0x6a] sm:$0xff]  ;;  %v4123_v38 = vld [vmem:[#allocation8 + $0x40] sm:$0xff] }
 0x4b5   :  { %9282 = vmatprep.subr.bf16.mxu1 %v15384_v42  ;;  %4484 = vmatmul.mubr.f32.gmra.mrb[6].mxu0 %v12257_v8  ;;  %v4124_v44 = vld [vmem:[#allocation8 + $0x48] sm:$0xff]  ;;  %v4299_v26 = vld [vmem:[#allocation2 + $0x7a] sm:$0xff]  ;;  %v4125_v5 = vld [vmem:[#allocation8 + $0x50] sm:$0xff] }
 0x4b6   :  { %4488 = vmatprep.mubr.f32.mxu0 %v15391_v54  ;;  %9339 = vmatpush3.bf16.msra.mxu0 %v9336_v40  ;;  %v12263_v32 = vld [vmem:[#allocation2 + $0x48] sm:$0xff]  ;;  %v9289_v31 = vpack.c.bf16 %v4124_v44, %v4123_v38  ;;  %v4126_v49 = vld [vmem:[#allocation8 + $0x58] sm:$0xff]  ;;  %v12269_v35 = vld [vmem:[#allocation2 + $0x50] sm:$0xff]  ;;  %v15394_v40 = vmax.f32 %v11880_v24, 0.0  ;;  %v15396_v54 = vmax.f32 %v11888_v29, 0.0  ;;  %v15397_v29 = vmax.f32 %v11892_v56, 0.0 }
 0x4b7   :  { %8614 = vmatmul.mubr.f32.gmra.mrb[70].mxu1 %v4298_v1  ;;  %v4300_v9 = vld [vmem:[#allocation2 + $0x82] sm:$0xff]  ;;  %v4301_v62 = vld [vmem:[#allocation2 + $0x92] sm:$0xff]  ;;  %v9292_v28 = vpack.c.bf16 %v4126_v49, %v4125_v5  ;;  %v4302_v52 = vld [vmem:[#allocation2 + $0x9a] sm:$0xff] }
 0x4b8   :  { %9284 = vmatpush1.bf16.msra.mxu1 %v9283_v27  ;;  %8616 = vmatprep.mubr.f32.mxu1 %v4299_v26  ;;  %v4127_v47 = vld [vmem:[#allocation8 + $0x60] sm:$0xff]  ;;  %v4128_v59 = vld [vmem:[#allocation8 + $0x68] sm:$0xff]  ;;  %v4304_v10 = vld [vmem:[#allocation2 + $0xb2] sm:$0xff] }
 0x4b9   :  { %9285 = vmatprep.subr.bf16.mxu1 %v15384_v42  ;;  %4489 = vmatmul.mubr.f32.gmra.mrb[8].mxu0 %v12263_v32  ;;  %v4303_v18 = vld [vmem:[#allocation2 + $0xaa] sm:$0xff]  ;;  %v12275_v11 = vld [vmem:[#allocation2 + $0x60] sm:$0xff]  ;;  %v9295_v7 = vpack.c.bf16 %v4128_v59, %v4127_v47  ;;  %v4130_v2 = vld [vmem:[#allocation8 + $0x78] sm:$0xff] }
 0x4ba   :  { %4493 = vmatprep.mubr.f32.mxu0 %v15392_v17  ;;  %v4129_v36 = vld [vmem:[#allocation8 + $0x70] sm:$0xff]  ;;  %v4305_v57 = vld [vmem:[#allocation2 + $0xc2] sm:$0xff]  ;;  %v4307_v3 = vld [vmem:[#allocation2 + $0xda] sm:$0xff] }
 0x4bb   :  { %8617 = vmatmul.mubr.f32.gmra.mrb[72].mxu1 %v4300_v9  ;;  %v12281_v41 = vld [vmem:[#allocation2 + $0x68] sm:$0xff]  ;;  %v9298_v27 = vpack.c.bf16 %v4130_v2, %v4129_v36  ;;  %v4131_v24 = vld [vmem:[#allocation8 + $0x80] sm:$0xff]  ;;  %v12287_v4 = vld [vmem:[#allocation2 + $0x78] sm:$0xff] }
 0x4bc   :  { %9287 = vmatpush1.bf16.msra.mxu1 %v9286_v34  ;;  %8619 = vmatprep.mubr.f32.mxu1 %v4301_v62  ;;  %v4306_v58 = vld [vmem:[#allocation2 + $0xca] sm:$0xff]  ;;  %v4308_v1 = vld [vmem:[#allocation2 + $0xe2] sm:$0xff]  ;;  %v4134_v38 = vld [vmem:[#allocation8 + $0x98] sm:$0xff] }
 0x4bd   :  { %9288 = vmatprep.subr.bf16.mxu1 %v15384_v42  ;;  %4494 = vmatmul.mubr.f32.gmra.mrb[10].mxu0 %v12269_v35  ;;  %v4132_v6 = vld [vmem:[#allocation8 + $0x88] sm:$0xff]  ;;  %v4133_v15 = vld [vmem:[#allocation8 + $0x90] sm:$0xff]  ;;  %v4155_v26 = vld [vmem:[#allocation8 + $0x140] sm:$0xff] }
 0x4be   :  { %4498 = vmatprep.mubr.f32.mxu0 %v15393_v30  ;;  %v9301_v34 = vpack.c.bf16 %v4132_v6, %v4131_v24  ;;  %v4309_v44 = vld [vmem:[#allocation2 + $0xf2] sm:$0xff]  ;;  %v12293_v9 = vld [vmem:[#allocation2 + $0x80] sm:$0xff]  ;;  %v9304_v5 = vpack.c.bf16 %v4134_v38, %v4133_v15  ;;  %v4140_v24 = vld [vmem:[#allocation8 + $0xc8] sm:$0xff] }
 0x4bf   :  { %8620 = vmatmul.mubr.f32.gmra.mrb[74].mxu1 %v4302_v52  ;;  %v4310_v49 = vld [vmem:[#allocation2 + $0xfa] sm:$0xff]  ;;  %v4311_v52 = vld [vmem:[#allocation2 + $0x10a] sm:$0xff]  ;;  %v4312_v59 = vld [vmem:[#allocation2 + $0x112] sm:$0xff] }
 0x4c0   :  { %9290 = vmatpush1.bf16.msra.mxu1 %v9289_v31  ;;  %8622 = vmatprep.mubr.f32.mxu1 %v4303_v18  ;;  %v4156_v31 = vld [vmem:[#allocation8 + $0x148] sm:$0xff]  ;;  %v4135_v62 = vld [vmem:[#allocation8 + $0xa0] sm:$0xff]  ;;  %v12299_v30 = vld [vmem:[#allocation2 + $0x90] sm:$0xff]  ;;  %v15398_v18 = vmax.f32 %v11896_v53, 0.0  ;;  %v15399_v53 = vmax.f32 %v11900_v37, 0.0 }
 0x4c1   :  { %9291 = vmatprep.subr.bf16.mxu1 %v15384_v42  ;;  %4499 = vmatmul.mubr.f32.gmra.mrb[12].mxu0 %v12275_v11  ;;  %v9340_v17 = vpack.c.bf16 %v4156_v31, %v4155_v26  ;;  %v4137_v56 = vld [vmem:[#allocation8 + $0xb0] sm:$0xff]  ;;  %v12305_v36 = vld [vmem:[#allocation2 + $0x98] sm:$0xff] }
 0x4c2   :  { %4503 = vmatprep.mubr.f32.mxu0 %v15394_v40  ;;  %v4157_v40 = vld [vmem:[#allocation8 + $0x150] sm:$0xff]  ;;  %v4158_v2 = vld [vmem:[#allocation8 + $0x158] sm:$0xff] }
 0x4c3   :  { %8623 = vmatmul.mubr.f32.gmra.mrb[76].mxu1 %v4304_v10  ;;  %9341 = vmatprep.subr.bf16.mxu0 %v9340_v17  ;;  %v4313_v10 = vld [vmem:[#allocation2 + $0x122] sm:$0xff]  ;;  %v4315_v6 = vld [vmem:[#allocation2 + $0x13a] sm:$0xff]  ;;  %v4141_v37 = vld [vmem:[#allocation8 + $0xd0] sm:$0xff] }
 0x4c4   :  { %9293 = vmatpush1.bf16.msra.mxu1 %v9292_v28  ;;  %8625 = vmatprep.mubr.f32.mxu1 %v4305_v57  ;;  %v4136_v28 = vld [vmem:[#allocation8 + $0xa8] sm:$0xff]  ;;  %v4142_v15 = vld [vmem:[#allocation8 + $0xd8] sm:$0xff] }
 0x4c5   :  { %9294 = vmatprep.subr.bf16.mxu1 %v15384_v42  ;;  %4504 = vmatmul.mubr.f32.gmra.mrb[14].mxu0 %v12281_v41  ;;  %v9307_v47 = vpack.c.bf16 %v4136_v28, %v4135_v62  ;;  %v4317_v38 = vld [vmem:[#allocation2 + $0x152] sm:$0xff]  ;;  %v9316_v26 = vpack.c.bf16 %v4142_v15, %v4141_v37  ;;  %v4318_v31 = vld [vmem:[#allocation2 + $0x15a] sm:$0xff] }
 0x4c6   :  { %4508 = vmatprep.mubr.f32.mxu0 %v15395_v21  ;;  %9343 = vmatpush3.bf16.msra.mxu0 %v9340_v17  ;;  %v4139_v21 = vld [vmem:[#allocation8 + $0xc0] sm:$0xff]  ;;  %v15401_v17 = vmax.f32 %v11908_v20, 0.0  ;;  %v4320_v28 = vld [vmem:[#allocation2 + $0x172] sm:$0xff] }
 0x4c7   :  { %8626 = vmatmul.mubr.f32.gmra.mrb[78].mxu1 %v4306_v58  ;;  %v4314_v58 = vld [vmem:[#allocation2 + $0x12a] sm:$0xff]  ;;  %v4329_v37 = vld [vmem:[#allocation2 + $0x212] sm:$0xff] }
 0x4c8   :  { %9296 = vmatpush1.bf16.msra.mxu1 %v9295_v7  ;;  %8628 = vmatprep.mubr.f32.mxu1 %v4307_v3  ;;  %v4138_v7 = vld [vmem:[#allocation8 + $0xb8] sm:$0xff]  ;;  %v12311_v3 = vld [vmem:[#allocation2 + $0xa8] sm:$0xff]  ;;  %v4145_v20 = vld [vmem:[#allocation8 + $0xf0] sm:$0xff] }
 0x4c9   :  { %9297 = vmatprep.subr.bf16.mxu1 %v15384_v42  ;;  %4509 = vmatmul.mubr.f32.gmra.mrb[16].mxu0 %v12287_v4  ;;  %v9310_v57 = vpack.c.bf16 %v4138_v7, %v4137_v56  ;;  %v4322_v7 = vld [vmem:[#allocation2 + $0x18a] sm:$0xff]  ;;  %v12350_v15 = vld [vmem:[#allocation2 + $0xf8] sm:$0xff] }
 0x4ca   :  { %4513 = vmatprep.mubr.f32.mxu0 %v15396_v54  ;;  %v15400_v54 = vmax.f32 %v11904_v45, 0.0  ;;  %v4143_v45 = vld [vmem:[#allocation8 + $0xe0] sm:$0xff] }
 0x4cb   :  { %8629 = vmatmul.mubr.f32.gmra.mrb[80].mxu1 %v4308_v1  ;;  %v4316_v1 = vld [vmem:[#allocation2 + $0x142] sm:$0xff] }
 0x4cc   :  { %9299 = vmatpush1.bf16.msra.mxu1 %v9298_v27  ;;  %8631 = vmatprep.mubr.f32.mxu1 %v4309_v44  ;;  %v9344_v27 = vpack.c.bf16 %v4158_v2, %v4157_v40  ;;  %v12317_v44 = vld [vmem:[#allocation2 + $0xb0] sm:$0xff]  ;;  %v12335_v40 = vld [vmem:[#allocation2 + $0xd8] sm:$0xff] }
 0x4cd   :  { %9300 = vmatprep.subr.bf16.mxu1 %v15384_v42  ;;  %4514 = vmatmul.mubr.f32.gmra.mrb[18].mxu0 %v12293_v9  ;;  %v4324_v2 = vld [vmem:[#allocation2 + $0x1d2] sm:$0xff] }
 0x4ce   :  { %4518 = vmatprep.mubr.f32.mxu0 %v15397_v29  ;;  %9345 = vmatprep.subr.bf16.mxu0 %v9344_v27  ;;  %v12323_v29 = vld [vmem:[#allocation2 + $0xc0] sm:$0xff] }
 0x4cf   :  { %8632 = vmatmul.mubr.f32.gmra.mrb[82].mxu1 %v4310_v49  ;;  %9347 = vmatpush3.bf16.msra.mxu0 %v9344_v27  ;;  %v4319_v49 = vld [vmem:[#allocation2 + $0x16a] sm:$0xff]  ;;  %v4325_v27 = vld [vmem:[#allocation2 + $0x1e2] sm:$0xff] }
 0x4d0   :  { %9302 = vmatpush1.bf16.msra.mxu1 %v9301_v34  ;;  %8634 = vmatprep.mubr.f32.mxu1 %v4311_v52  ;;  %v9313_v34 = vpack.c.bf16 %v4140_v24, %v4139_v21  ;;  %v15402_v52 = vmax.f32 %v11912_v63, 0.0  ;;  %v4323_v63 = vld [vmem:[#allocation2 + $0x1ca] sm:$0xff] }
 0x4d1   :  { %9303 = vmatprep.subr.bf16.mxu1 %v15384_v42  ;;  %4519 = vmatmul.mubr.f32.gmra.mrb[20].mxu0 %v12299_v30  ;;  %v4326_v24 = vld [vmem:[#allocation2 + $0x1ea] sm:$0xff] }
 0x4d2   :  { %4523 = vmatprep.mubr.f32.mxu0 %v15398_v18  ;;  %v12329_v18 = vld [vmem:[#allocation2 + $0xc8] sm:$0xff] }
 0x4d3   :  { %8635 = vmatmul.mubr.f32.gmra.mrb[84].mxu1 %v4312_v59  ;;  %v4321_v59 = vld [vmem:[#allocation2 + $0x182] sm:$0xff] }
 0x4d4   :  { %9305 = vmatpush1.bf16.msra.mxu1 %v9304_v5  ;;  %8637 = vmatprep.mubr.f32.mxu1 %v4313_v10  ;;  %v4144_v5 = vld [vmem:[#allocation8 + $0xe8] sm:$0xff]  ;;  %v15403_v10 = vmax.f32 %v11916_v48, 0.0  ;;  %v12340_v48 = vld [vmem:[#allocation2 + $0xe0] sm:$0xff] }
 0x4d5   :  { %9306 = vmatprep.subr.bf16.mxu1 %v15384_v42  ;;  %4524 = vmatmul.mubr.f32.gmra.mrb[22].mxu0 %v12305_v36  ;;  %v9319_v62 = vpack.c.bf16 %v4144_v5, %v4143_v45  ;;  %v4333_v45 = vld [vmem:[#allocation2 + $0x242] sm:$0xff]  ;;  %v12360_v5 = vld [vmem:[#allocation2 + $0x110] sm:$0xff] }
 0x4d6   :  { %4528 = vmatprep.mubr.f32.mxu0 %v15399_v53  ;;  %v4160_v53 = vld [vmem:[#allocation8 + $0x168] sm:$0xff] }
 0x4d7   :  { %8638 = vmatmul.mubr.f32.gmra.mrb[86].mxu1 %v4314_v58  ;;  %v4159_v58 = vld [vmem:[#allocation8 + $0x160] sm:$0xff] }
 0x4d8   :  { %9308 = vmatpush1.bf16.msra.mxu1 %v9307_v47  ;;  %8640 = vmatprep.mubr.f32.mxu1 %v4315_v6  ;;  %v4146_v47 = vld [vmem:[#allocation8 + $0xf8] sm:$0xff]  ;;  %v9348_v21 = vpack.c.bf16 %v4160_v53, %v4159_v58  ;;  %v15405_v6 = vmax.f32 %v11924_v23, 0.0  ;;  %v4342_v58 = vld [vmem:[#allocation2 + $0x2aa] sm:$0xff]  ;;  %v15413_v53 = vmax.f32 %v11956_v61, 0.0 }
 0x4d9   :  { %9309 = vmatprep.subr.bf16.mxu1 %v15384_v42  ;;  %4529 = vmatmul.mubr.f32.gmra.mrb[24].mxu0 %v12311_v3  ;;  %v9322_v56 = vpack.c.bf16 %v4146_v47, %v4145_v20  ;;  %v4330_v23 = vld [vmem:[#allocation2 + $0x21a] sm:$0xff]  ;;  %v4337_v20 = vld [vmem:[#allocation2 + $0x272] sm:$0xff]  ;;  %v12370_v47 = vld [vmem:[#allocation2 + $0x128] sm:$0xff] }
 0x4da   :  { %4533 = vmatprep.mubr.f32.mxu0 %v15400_v54  ;;  %9349 = vmatprep.subr.bf16.mxu0 %v9348_v21  ;;  %v15406_v54 = vmax.f32 %v11928_v39, 0.0  ;;  %v4332_v39 = vld [vmem:[#allocation2 + $0x232] sm:$0xff] }
 0x4db   :  { %8641 = vmatmul.mubr.f32.gmra.mrb[88].mxu1 %v4316_v1  ;;  %9351 = vmatpush3.bf16.msra.mxu0 %v9348_v21  ;;  %v4328_v1 = vld [vmem:[#allocation2 + $0x202] sm:$0xff]  ;;  %v4343_v21 = vld [vmem:[#allocation2 + $0x2ba] sm:$0xff] }
 0x4dc   :  { %9311 = vmatpush1.bf16.msra.mxu1 %v9310_v57  ;;  %8643 = vmatprep.mubr.f32.mxu1 %v4317_v38  ;;  %v15404_v57 = vmax.f32 %v11920_v55, 0.0  ;;  %v12345_v55 = vld [vmem:[#allocation2 + $0xf0] sm:$0xff]  ;;  %v15407_v38 = vmax.f32 %v11932_v46, 0.0  ;;  %v12391_v61 = vld [vmem:[#allocation2 + $0x158] sm:$0xff] }
 0x4dd   :  { %9312 = vmatprep.subr.bf16.mxu1 %v15384_v42  ;;  %4534 = vmatmul.mubr.f32.gmra.mrb[26].mxu0 %v12317_v44  ;;  %v4334_v46 = vld [vmem:[#allocation2 + $0x24a] sm:$0xff] }
 0x4de   :  { %4538 = vmatprep.mubr.f32.mxu0 %v15401_v17  ;;  %v15408_v17 = vmax.f32 %v11936_v14, 0.0  ;;  %v4336_v14 = vld [vmem:[#allocation2 + $0x262] sm:$0xff] }
 0x4df   :  { %8644 = vmatmul.mubr.f32.gmra.mrb[90].mxu1 %v4318_v31  ;;  %v12355_v31 = vld [vmem:[#allocation2 + $0x108] sm:$0xff] }
 0x4e0   :  { %9314 = vmatpush1.bf16.msra.mxu1 %v9313_v34  ;;  %8646 = vmatprep.mubr.f32.mxu1 %v4319_v49  ;;  %v4327_v34 = vld [vmem:[#allocation2 + $0x1fa] sm:$0xff]  ;;  %v15409_v49 = vmax.f32 %v11940_v50, 0.0 }
 0x4e1   :  { %9315 = vmatprep.subr.bf16.mxu1 %v15384_v42  ;;  %4539 = vmatmul.mubr.f32.gmra.mrb[28].mxu0 %v12323_v29  ;;  %v4338_v50 = vld [vmem:[#allocation2 + $0x27a] sm:$0xff] }
 0x4e2   :  { %4543 = vmatprep.mubr.f32.mxu0 %v15402_v52  ;;  %v15410_v52 = vmax.f32 %v11944_v16, 0.0  ;;  %v4340_v16 = vld [vmem:[#allocation2 + $0x292] sm:$0xff] }
 0x4e3   :  { %8647 = vmatmul.mubr.f32.gmra.mrb[92].mxu1 %v4320_v28  ;;  %v12365_v28 = vld [vmem:[#allocation2 + $0x120] sm:$0xff] }
 0x4e4   :  { %9317 = vmatpush1.bf16.msra.mxu1 %v9316_v26  ;;  %8649 = vmatprep.mubr.f32.mxu1 %v4321_v59  ;;  %v4331_v26 = vld [vmem:[#allocation2 + $0x22a] sm:$0xff]  ;;  %v15411_v59 = vmax.f32 %v11948_v51, 0.0 }
 0x4e5   :  { %9318 = vmatprep.subr.bf16.mxu1 %v15384_v42  ;;  %4544 = vmatmul.mubr.f32.gmra.mrb[30].mxu0 %v12329_v18 }
 0x4e6   :  { %4548 = vmatprep.mubr.f32.mxu0 %v15403_v10  ;;  %v15412_v10 = vmax.f32 %v11952_v0, 0.0  ;;  %v12385_v0 = vld [vmem:[#allocation2 + $0x150] sm:$0xff] }
 0x4e7   :  { %8650 = vmatmul.mubr.f32.gmra.mrb[94].mxu1 %v4322_v7  ;;  %v12375_v7 = vld [vmem:[#allocation2 + $0x138] sm:$0xff] }
 0x4e8   :  { %9320 = vmatpush1.bf16.msra.mxu1 %v9319_v62  ;;  %8652 = vmatprep.mubr.f32.mxu1 %v4323_v63  ;;  %v4335_v62 = vld [vmem:[#allocation2 + $0x25a] sm:$0xff]  ;;  %v4341_v63 = vld [vmem:[#allocation2 + $0x2a2] sm:$0xff] }
 0x4e9   :  { %9321 = vmatprep.subr.bf16.mxu1 %v15384_v42  ;;  %4549 = vmatmul.mubr.f32.gmra.mrb[32].mxu0 %v12335_v40 }
 0x4ea   :  { %4553 = vmatprep.mubr.f32.mxu0 %v15404_v57  ;;  %v4162_v57 = vld [vmem:[#allocation8 + $0x178] sm:$0xff] }
 0x4eb   :  { %8653 = vmatmul.mubr.f32.gmra.mrb[96].mxu1 %v4324_v2  ;;  %v4161_v2 = vld [vmem:[#allocation8 + $0x170] sm:$0xff] }
 0x4ec   :  { %9323 = vmatpush1.bf16.msra.mxu1 %v9322_v56  ;;  %8655 = vmatprep.mubr.f32.mxu1 %v4325_v27  ;;  %v4339_v56 = vld [vmem:[#allocation2 + $0x28a] sm:$0xff]  ;;  %v12380_v27 = vld [vmem:[#allocation2 + $0x140] sm:$0xff]  ;;  %v9352_v51 = vpack.c.bf16 %v4162_v57, %v4161_v2 }
 0x4ed   :  { %4554 = vmatmul.mubr.f32.gmra.mrb[34].mxu0 %v12340_v48  ;;  %v12419_v2 = vld [vmem:[#allocation2 + $0x1e1] sm:$0xff] }
 0x4ee   :  { %4558 = vmatprep.mubr.f32.mxu0 %v15405_v6  ;;  %9353 = vmatprep.subr.bf16.mxu0 %v9352_v51  ;;  %v15414_v6 = vmax.f32 %v11960_v19, 0.0  ;;  %v4348_v19 = vld [vmem:[#allocation2 + $0x2f2] sm:$0xff]  ;;  %v12422_v57 = vld [vmem:[#allocation2 + $0x8] sm:$0xff] }
 0x4ef   :  { %8656 = vmatmul.mubr.f32.gmra.mrb[98].mxu1 %v4326_v24  ;;  %9355 = vmatpush3.bf16.msra.mxu0 %v9352_v51  ;;  %v4344_v24 = vld [vmem:[#allocation2 + $0x2c2] sm:$0xff]  ;;  %v3989_v51 = vld [vmem:[#allocation2 + $0x19] sm:$0xff] }
 0x4f0   :  { %8658 = vmatprep.mubr.f32.mxu1 %v4327_v34  ;;  %9356 = vmatprep.subr.bf16.mxu0 %v15384_v42  ;;  %v4345_v34 = vld [vmem:[#allocation2 + $0x2d2] sm:$0xff] }
 0x4f1   :  { %4559 = vmatmul.mubr.f32.gmra.mrb[36].mxu0 %v12345_v55 }
 0x4f2   :  { %4563 = vmatprep.mubr.f32.mxu0 %v15406_v54  ;;  %v15415_v54 = vmax.f32 %v11964_v13, 0.0  ;;  %v4350_v13 = vld [vmem:[#allocation2 + $0x30a] sm:$0xff] }
 0x4f3   :  { %8659 = vmatmul.mubr.f32.gmra.mrb[100].mxu1 %v4328_v1  ;;  %v4346_v1 = vld [vmem:[#allocation2 + $0x2da] sm:$0xff] }
 0x4f4   :  { %8661 = vmatprep.mubr.f32.mxu1 %v4329_v37  ;;  %v4347_v37 = vld [vmem:[#allocation2 + $0x2ea] sm:$0xff] }
 0x4f5   :  { %4564 = vmatmul.mubr.f32.gmra.mrb[38].mxu0 %v12350_v15 }
 0x4f6   :  { %4568 = vmatprep.mubr.f32.mxu0 %v15407_v38  ;;  %v15416_v38 = vmax.f32 %v11968_v25, 0.0  ;;  %v15418_v25 = vmax.f32 %v11976_v33, 0.0  ;;  %v12413_v33 = vld [vmem:[#allocation2 + $0x1d1] sm:$0xff] }
 0x4f7   :  { %8662 = vmatmul.mubr.f32.gmra.mrb[102].mxu1 %v4330_v23  ;;  %v12396_v23 = vld [vmem:[#allocation2 + $0x168] sm:$0xff] }
 0x4f8   :  { %8664 = vmatprep.mubr.f32.mxu1 %v4331_v26  ;;  %v4349_v26 = vld [vmem:[#allocation2 + $0x302] sm:$0xff] }
 0x4f9   :  { %4569 = vmatmul.mubr.f32.gmra.mrb[40].mxu0 %v12355_v31 }
 0x4fa   :  { %4573 = vmatprep.mubr.f32.mxu0 %v15408_v17  ;;  %v15417_v17 = vmax.f32 %v11972_v12, 0.0  ;;  %v6169_v12 = vld [vmem:[#allocation8 + $0x400] sm:$0xff] }
 0x4fb   :  { %8665 = vmatmul.mubr.f32.gmra.mrb[104].mxu1 %v4332_v39  ;;  %v12401_v39 = vld [vmem:[#allocation2 + $0x170] sm:$0xff] }
 0x4fc   :  { %8667 = vmatprep.mubr.f32.mxu1 %v4333_v45  ;;  %v4351_v45 = vld [vmem:[#allocation2 + $0x31a] sm:$0xff] }
 0x4fd   :  { %4574 = vmatmul.mubr.f32.gmra.mrb[42].mxu0 %v12360_v5 }
 0x4fe   :  { %4578 = vmatprep.mubr.f32.mxu0 %v15409_v49  ;;  %v4352_v49 = vld [vmem:[#allocation2 + $0x322] sm:$0xff] }
 0x4ff   :  { %8668 = vmatmul.mubr.f32.gmra.mrb[106].mxu1 %v4334_v46  ;;  %v4193_v46 = vld [vmem:[#allocation2 + $0x180] sm:$0xff] }
 0x500   :  { %8670 = vmatprep.mubr.f32.mxu1 %v4335_v62  ;;  %v4353_v62 = vld [vmem:[#allocation2 + $0x332] sm:$0xff] }
 0x501   :  { %4579 = vmatmul.mubr.f32.gmra.mrb[44].mxu0 %v12365_v28 }
 0x502   :  { %4583 = vmatprep.mubr.f32.mxu0 %v15410_v52  ;;  %v3987_v52 = vld [vmem:[#allocation2 + $0x1] sm:$0xff] }
 0x503   :  { %8671 = vmatmul.mubr.f32.gmra.mrb[108].mxu1 %v4336_v14  ;;  %v4194_v14 = vld [vmem:[#allocation2 + $0x188] sm:$0xff] }
 0x504   :  { %8673 = vmatprep.mubr.f32.mxu1 %v4337_v20  ;;  %v4354_v20 = vld [vmem:[#allocation2 + $0x33a] sm:$0xff] }
 0x505   :  { %4584 = vmatmul.mubr.f32.gmra.mrb[46].mxu0 %v12370_v47 }
 0x506   :  { %4588 = vmatprep.mubr.f32.mxu0 %v15411_v59  ;;  %v6170_v59 = vld [vmem:[#allocation8 + $0x408] sm:$0xff] }
 0x507   :  { %8674 = vmatmul.mubr.f32.gmra.mrb[110].mxu1 %v4338_v50  ;;  %v15419_v50 = vmax.f32 %v11980_v22, 0.0  ;;  %v12416_v22 = vld [vmem:[#allocation2 + $0x1d0] sm:$0xff] }
 0x508   :  { %8676 = vmatprep.mubr.f32.mxu1 %v4339_v56  ;;  %v12410_v56 = vld [vmem:[#allocation2 + $0x1c8] sm:$0xff] }
 0x509   :  { %4589 = vmatmul.mubr.f32.gmra.mrb[48].mxu0 %v12375_v7 }
 0x50a   :  { %4593 = vmatprep.mubr.f32.mxu0 %v15412_v10  ;;  %v9404_v10 = vpack.c.bf16 %v6170_v59, %v6169_v12  ;;  %v12481_v12 = vld [vmem:[#allocation2 + $0x240] sm:$0xff] }
 0x50b   :  { %8677 = vmatmul.mubr.f32.gmra.mrb[112].mxu1 %v4340_v16  ;;  %v3923_v16 = vld [vmem:[#allocation2] sm:$0xff] }
 0x50c   :  { %8679 = vmatprep.mubr.f32.mxu1 %v4341_v63  ;;  %v3988_v63 = vld [vmem:[#allocation2 + $0x9] sm:$0xff]  ;;  %9405 = vmatprep.subr.bf16.mxu1 %v9404_v10  ;;  %v3998_v59 = vld [vmem:[#allocation2 + $0x81] sm:$0xff] }
 0x50d   :  { %4594 = vmatmul.mubr.f32.gmra.mrb[50].mxu0 %v12380_v27 }
 0x50e   :  { %4598 = vmatprep.mubr.f32.mxu0 %v15413_v53  ;;  %v12428_v53 = vld [vmem:[#allocation2 + $0x1e9] sm:$0xff] }
 0x50f   :  { %8680 = vmatmul.mubr.f32.gmra.mrb[114].mxu1 %v4342_v58  ;;  %v12425_v58 = vld [vmem:[#allocation2 + $0x1e0] sm:$0xff] }
 0x510   :  { %8682 = vmatprep.mubr.f32.mxu1 %v4343_v21  ;;  %v15420_v21 = vld [vmem:[#allocation19_spill] sm:$0xff] }
 0x511   :  { %4599 = vmatmul.mubr.f32.gmra.mrb[52].mxu0 %v12385_v0 }
 0x512   :  { %4603 = vmatprep.mubr.f32.mxu0 %v15414_v6  ;;  %v12432_v6 = vld [vmem:[#allocation2 + $0x1e8] sm:$0xff] }
 0x513   :  { %8683 = vmatmul.mubr.f32.gmra.mrb[116].mxu1 %v4344_v24  ;;  %v3990_v24 = vld [vmem:[#allocation2 + $0x21] sm:$0xff] }
 0x514   :  { %8685 = vmatprep.mubr.f32.mxu1 %v4345_v34  ;;  %v12435_v34 = vld [vmem:[#allocation2 + $0x1f9] sm:$0xff] }
 0x515   :  { %4604 = vmatmul.mubr.f32.gmra.mrb[54].mxu0 %v12391_v61 }
 0x516   :  { %4608 = vmatprep.mubr.f32.mxu0 %v15415_v54  ;;  %v12439_v54 = vld [vmem:[#allocation2 + $0x1f8] sm:$0xff] }
 0x517   :  { %8686 = vmatmul.mubr.f32.gmra.mrb[118].mxu1 %v4346_v1  ;;  %v3991_v1 = vld [vmem:[#allocation2 + $0x31] sm:$0xff] }
 0x518   :  { %8688 = vmatprep.mubr.f32.mxu1 %v4347_v37  ;;  %v12442_v37 = vld [vmem:[#allocation2 + $0x201] sm:$0xff] }
 0x519   :  { %4609 = vmatmul.mubr.f32.gmra.mrb[56].mxu0 %v12396_v23 }
 0x51a   :  { %4613 = vmatprep.mubr.f32.mxu0 %v15416_v38  ;;  %v12446_v38 = vld [vmem:[#allocation2 + $0x200] sm:$0xff] }
 0x51b   :  { %8689 = vmatmul.mubr.f32.gmra.mrb[120].mxu1 %v4348_v19  ;;  %v3992_v19 = vld [vmem:[#allocation2 + $0x39] sm:$0xff] }
 0x51c   :  { %8691 = vmatprep.mubr.f32.mxu1 %v4349_v26  ;;  %v12449_v26 = vld [vmem:[#allocation2 + $0x211] sm:$0xff] }
 0x51d   :  { %4614 = vmatmul.mubr.f32.gmra.mrb[58].mxu0 %v12401_v39 }
 0x51e   :  { %4618 = vmatprep.mubr.f32.mxu0 %v15417_v17  ;;  %v12456_v17 = vld [vmem:[#allocation2 + $0x219] sm:$0xff] }
 0x51f   :  { %8692 = vmatmul.mubr.f32.gmra.mrb[122].mxu1 %v4350_v13  ;;  %v12453_v13 = vld [vmem:[#allocation2 + $0x210] sm:$0xff] }
 0x520   :  { %8694 = vmatprep.mubr.f32.mxu1 %v4351_v45  ;;  %v12460_v45 = vld [vmem:[#allocation2 + $0x218] sm:$0xff] }
 0x521   :  { %4619 = vmatmul.mubr.f32.gmra.mrb[60].mxu0 %v4193_v46  ;;  %v12463_v46 = vld [vmem:[#allocation2 + $0x229] sm:$0xff] }
 0x522   :  { %4623 = vmatprep.mubr.f32.mxu0 %v15418_v25  ;;  %v6171_v25 = vld [vmem:[#allocation8 + $0x410] sm:$0xff] }
 0x523   :  { %8695 = vmatmul.mubr.f32.gmra.mrb[124].mxu1 %v4352_v49  ;;  %v12467_v49 = vld [vmem:[#allocation2 + $0x228] sm:$0xff] }
 0x524   :  { %8697 = vmatprep.mubr.f32.mxu1 %v4353_v62  ;;  %v6172_v62 = vld [vmem:[#allocation8 + $0x418] sm:$0xff] }
 0x525   :  { %4624 = vmatmul.mubr.f32.gmra.mrb[62].mxu0 %v4194_v14  ;;  %v9408_v14 = vpack.c.bf16 %v6172_v62, %v6171_v25  ;;  %v6173_v25 = vld [vmem:[#allocation8 + $0x420] sm:$0xff]  ;;  %v6174_v62 = vld [vmem:[#allocation8 + $0x428] sm:$0xff] }
 0x526   :  { %4628 = vmatprep.mubr.f32.mxu0 %v15419_v50  ;;  %v3997_v50 = vld [vmem:[#allocation2 + $0x79] sm:$0xff] }
 0x527   :  { %8698 = vmatmul.mubr.f32.gmra.mrb[126].mxu1 %v4354_v20  ;;  %v12474_v20 = vld [vmem:[#allocation2 + $0x230] sm:$0xff] }
 0x528   :  { %5238 = vmatprep.mubr.f32.mxu1 %v3987_v52  ;;  %v3996_v52 = vld [vmem:[#allocation2 + $0x69] sm:$0xff] }
 0x529   :  { %4629 = vmatmul.mubr.f32.gmra.mrb[64].mxu0 %v12410_v56 }
 0x52a   :  { %4633 = vmatprep.mubr.f32.mxu0 %v12413_v33 }
 0x52b   :  { %5239 = vmatmul.mubr.f32.vlgmr.msra.gmra.mrb[128].mxu1 %v3923_v16  ;;  %v12488_v16 = vld [vmem:[#allocation2 + $0x248] sm:$0xff] }
 0x52c   :  { %5243 = vmatprep.mubr.f32.mxu1 %v3988_v63  ;;  %9407 = vmatpush3.bf16.msra.mxu1 %v9404_v10  ;;  %v12491_v10 = vld [vmem:[#allocation2 + $0x259] sm:$0xff] }
 0x52d   :  { %4634 = vmatmul.mubr.f32.gmra.mrb[66].mxu0 %v12416_v22  ;;  %9409 = vmatprep.subr.bf16.mxu1 %v9408_v14  ;;  %v12495_v63 = vld [vmem:[#allocation2 + $0x258] sm:$0xff] }
 0x52e   :  { %4638 = vmatprep.mubr.f32.mxu0 %v12419_v2 }
 0x52f   :  { %5244 = vmatmul.mubr.f32.gmra.mrb[130].mxu1 %v12422_v57 }
 0x530   :  { %5248 = vmatprep.mubr.f32.mxu1 %v3989_v51  ;;  %9411 = vmatpush3.bf16.msra.mxu1 %v9408_v14  ;;  %v12498_v51 = vld [vmem:[#allocation2 + $0x261] sm:$0xff]  ;;  %v9412_v14 = vpack.c.bf16 %v6174_v62, %v6173_v25 }
 0x531   :  { %4639 = vmatmul.mubr.f32.gmra.mrb[68].mxu0 %v12425_v58  ;;  %v12554_v25 = vld [vmem:[#allocation2 + $0x2c1] sm:$0xff] }
 0x532   :  { %4643 = vmatprep.mubr.f32.mxu0 %v12428_v53  ;;  %9413 = vmatprep.subr.bf16.mxu1 %v9412_v14  ;;  %15429 = vst [vmem:[#allocation64_spill] sm:$0xff] %v12554_v25 }
 0x533   :  { %5249 = vmatmul.mubr.f32.gmra.mrb[132].mxu1 %v15420_v21  ;;  %v12502_v21 = vld [vmem:[#allocation2 + $0x260] sm:$0xff] }
 0x534   :  { %5253 = vmatprep.mubr.f32.mxu1 %v3990_v24  ;;  %v12505_v24 = vld [vmem:[#allocation2 + $0x271] sm:$0xff]  ;;  %9415 = vmatpush3.bf16.msra.mxu1 %v9412_v14  ;;  %v12558_v14 = vld [vmem:[#allocation2 + $0x2c0] sm:$0xff] }
 0x535   :  { %4644 = vmatmul.mubr.f32.gmra.mrb[70].mxu0 %v12432_v6  ;;  %15430 = vst [vmem:[#allocation13_spill] sm:$0xff] %v12558_v14 }
 0x536   :  { %4648 = vmatprep.mubr.f32.mxu0 %v12435_v34 }
 0x537   :  { %5254 = vmatmul.mubr.f32.gmra.mrb[134].mxu1 %v12225_v60  ;;  %v3993_v60 = vld [vmem:[#allocation2 + $0x49] sm:$0xff] }
 0x538   :  { %5258 = vmatprep.mubr.f32.mxu1 %v3991_v1  ;;  %v12509_v1 = vld [vmem:[#allocation2 + $0x270] sm:$0xff] }
 0x539   :  { %4649 = vmatmul.mubr.f32.gmra.mrb[72].mxu0 %v12439_v54 }
 0x53a   :  { %4653 = vmatprep.mubr.f32.mxu0 %v12442_v37 }
 0x53b   :  { %5259 = vmatmul.mubr.f32.gmra.mrb[136].mxu1 %v12246_v43  ;;  %v3994_v43 = vld [vmem:[#allocation2 + $0x51] sm:$0xff] }
 0x53c   :  { %5263 = vmatprep.mubr.f32.mxu1 %v3992_v19  ;;  %v12512_v19 = vld [vmem:[#allocation2 + $0x279] sm:$0xff] }
 0x53d   :  { %4654 = vmatmul.mubr.f32.gmra.mrb[74].mxu0 %v12446_v38 }
 0x53e   :  { %4658 = vmatprep.mubr.f32.mxu0 %v12449_v26 }
 0x53f   :  { %5264 = vmatmul.mubr.f32.gmra.mrb[138].mxu1 %v12257_v8  ;;  %v3995_v8 = vld [vmem:[#allocation2 + $0x61] sm:$0xff] }
 0x540   :  { %5268 = vmatprep.mubr.f32.mxu1 %v3993_v60  ;;  %v12516_v60 = vld [vmem:[#allocation2 + $0x278] sm:$0xff] }
 0x541   :  { %4659 = vmatmul.mubr.f32.gmra.mrb[76].mxu0 %v12453_v13 }
 0x542   :  { %4663 = vmatprep.mubr.f32.mxu0 %v12456_v17 }
 0x543   :  { %5269 = vmatmul.mubr.f32.gmra.mrb[140].mxu1 %v12263_v32  ;;  %v12470_v32 = vld [vmem:[#allocation2 + $0x231] sm:$0xff] }
 0x544   :  { %5273 = vmatprep.mubr.f32.mxu1 %v3994_v43  ;;  %v12519_v43 = vld [vmem:[#allocation2 + $0x289] sm:$0xff] }
 0x545   :  { %4664 = vmatmul.mubr.f32.gmra.mrb[78].mxu0 %v12460_v45 }
 0x546   :  { %4668 = vmatprep.mubr.f32.mxu0 %v12463_v46 }
 0x547   :  { %5274 = vmatmul.mubr.f32.gmra.mrb[142].mxu1 %v12269_v35  ;;  %v12477_v35 = vld [vmem:[#allocation2 + $0x241] sm:$0xff] }
 0x548   :  { %5278 = vmatprep.mubr.f32.mxu1 %v3995_v8  ;;  %v12523_v8 = vld [vmem:[#allocation2 + $0x288] sm:$0xff] }
 0x549   :  { %4669 = vmatmul.mubr.f32.gmra.mrb[80].mxu0 %v12467_v49 }
 0x54a   :  { %4673 = vmatprep.mubr.f32.mxu0 %v12470_v32 }
 0x54b   :  { %5279 = vmatmul.mubr.f32.gmra.mrb[144].mxu1 %v12275_v11  ;;  %v12484_v11 = vld [vmem:[#allocation2 + $0x249] sm:$0xff] }
 0x54c   :  { %5283 = vmatprep.mubr.f32.mxu1 %v3996_v52  ;;  %v4004_v52 = vld [vmem:[#allocation2 + $0xc9] sm:$0xff] }
 0x54d   :  { %4674 = vmatmul.mubr.f32.gmra.mrb[82].mxu0 %v12474_v20 }
 0x54e   :  { %4678 = vmatprep.mubr.f32.mxu0 %v12477_v35 }
 0x54f   :  { %5284 = vmatmul.mubr.f32.gmra.mrb[146].mxu1 %v12281_v41  ;;  %v3999_v41 = vld [vmem:[#allocation2 + $0x91] sm:$0xff] }
 0x550   :  { %5288 = vmatprep.mubr.f32.mxu1 %v3997_v50  ;;  %v12530_v50 = vld [vmem:[#allocation2 + $0x290] sm:$0xff] }
 0x551   :  { %4679 = vmatmul.mubr.f32.gmra.mrb[84].mxu0 %v12481_v12  ;;  %15422 = vst [vmem:[#allocation29_spill] sm:$0xff] %v12530_v50 }
 0x552   :  { %4683 = vmatprep.mubr.f32.mxu0 %v12484_v11 }
 0x553   :  { %5289 = vmatmul.mubr.f32.gmra.mrb[148].mxu1 %v12287_v4  ;;  %v4000_v4 = vld [vmem:[#allocation2 + $0x99] sm:$0xff] }
 0x554   :  { %5293 = vmatprep.mubr.f32.mxu1 %v3998_v59  ;;  %v4005_v59 = vld [vmem:[#allocation2 + $0xd9] sm:$0xff] }
 0x555   :  { %4684 = vmatmul.mubr.f32.gmra.mrb[86].mxu0 %v12488_v16 }
 0x556   :  { %4688 = vmatprep.mubr.f32.mxu0 %v12491_v10 }
 0x557   :  { %5294 = vmatmul.mubr.f32.gmra.mrb[150].mxu1 %v12293_v9  ;;  %v4001_v9 = vld [vmem:[#allocation2 + $0xa9] sm:$0xff] }
 0x558   :  { %5298 = vmatprep.mubr.f32.mxu1 %v3999_v41  ;;  %v12537_v41 = vld [vmem:[#allocation2 + $0x2a0] sm:$0xff] }
 0x559   :  { %4689 = vmatmul.mubr.f32.gmra.mrb[88].mxu0 %v12495_v63  ;;  %15424 = vst [vmem:[#allocation60_spill] sm:$0xff] %v12537_v41 }
 0x55a   :  { %4693 = vmatprep.mubr.f32.mxu0 %v12498_v51 }
 0x55b   :  { %5299 = vmatmul.mubr.f32.gmra.mrb[152].mxu1 %v12299_v30  ;;  %v4002_v30 = vld [vmem:[#allocation2 + $0xb1] sm:$0xff] }
 0x55c   :  { %5303 = vmatprep.mubr.f32.mxu1 %v4000_v4  ;;  %v4006_v4 = vld [vmem:[#allocation2 + $0xe1] sm:$0xff] }
 0x55d   :  { %4694 = vmatmul.mubr.f32.gmra.mrb[90].mxu0 %v12502_v21 }
 0x55e   :  { %4698 = vmatprep.mubr.f32.mxu0 %v12505_v24 }
 0x55f   :  { %5304 = vmatmul.mubr.f32.gmra.mrb[154].mxu1 %v12305_v36  ;;  %v4003_v36 = vld [vmem:[#allocation2 + $0xc1] sm:$0xff] }
 0x560   :  { %5308 = vmatprep.mubr.f32.mxu1 %v4001_v9  ;;  %v12544_v9 = vld [vmem:[#allocation2 + $0x2a8] sm:$0xff] }
 0x561   :  { %4699 = vmatmul.mubr.f32.gmra.mrb[92].mxu0 %v12509_v1  ;;  %15426 = vst [vmem:[#allocation62_spill] sm:$0xff] %v12544_v9 }
 0x562   :  { %4703 = vmatprep.mubr.f32.mxu0 %v12512_v19 }
 0x563   :  { %5309 = vmatmul.mubr.f32.gmra.mrb[156].mxu1 %v12311_v3  ;;  %v12526_v3 = vld [vmem:[#allocation2 + $0x291] sm:$0xff] }
 0x564   :  { %5313 = vmatprep.mubr.f32.mxu1 %v4002_v30  ;;  %15421 = vst [vmem:[#allocation33_spill] sm:$0xff] %v12526_v3  ;;  %v12547_v30 = vld [vmem:[#allocation2 + $0x2b9] sm:$0xff] }
 0x565   :  { %4704 = vmatmul.mubr.f32.gmra.mrb[94].mxu0 %v12516_v60  ;;  %15427 = vst [vmem:[#allocation58_spill] sm:$0xff] %v12547_v30 }
 0x566   :  { %4708 = vmatprep.mubr.f32.mxu0 %v12519_v43 }
 0x567   :  { %5314 = vmatmul.mubr.f32.gmra.mrb[158].mxu1 %v12317_v44  ;;  %v12533_v44 = vld [vmem:[#allocation2 + $0x2a1] sm:$0xff] }
 0x568   :  { %5318 = vmatprep.mubr.f32.mxu1 %v4003_v36  ;;  %15423 = vst [vmem:[#allocation40_spill] sm:$0xff] %v12533_v44  ;;  %v12551_v36 = vld [vmem:[#allocation2 + $0x2b8] sm:$0xff] }
 0x569   :  { %4709 = vmatmul.mubr.f32.gmra.mrb[96].mxu0 %v12523_v8  ;;  %15428 = vst [vmem:[#allocation63_spill] sm:$0xff] %v12551_v36 }
 0x56a   :  { %4713 = vmatprep.mubr.f32.mxu0 %v12526_v3 }
 0x56b   :  { %5319 = vmatmul.mubr.f32.gmra.mrb[160].mxu1 %v12323_v29  ;;  %v12540_v29 = vld [vmem:[#allocation2 + $0x2a9] sm:$0xff] }
 0x56c   :  { %5323 = vmatprep.mubr.f32.mxu1 %v4004_v52  ;;  %15425 = vst [vmem:[#allocation54_spill] sm:$0xff] %v12540_v29 }
 0x56d   :  { %4714 = vmatmul.mubr.f32.gmra.mrb[98].mxu0 %v12530_v50 }
 0x56e   :  { %4718 = vmatprep.mubr.f32.mxu0 %v12533_v44  ;;  %v4052_v44 = vld [vmem:[#allocation2 + $0xa] sm:$0xff] }
 0x56f   :  { %5324 = vmatmul.mubr.f32.gmra.mrb[162].mxu1 %v12329_v18  ;;  %v4007_v18 = vld [vmem:[#allocation2 + $0xf1] sm:$0xff] }
 0x570   :  { %5328 = vmatprep.mubr.f32.mxu1 %v4005_v59 }
 0x571   :  { %4719 = vmatmul.mubr.f32.gmra.mrb[100].mxu0 %v12537_v41  ;;  %v4225_v41 = vld [vmem:[#allocation2 + $0x330] sm:$0xff] }
 0x572   :  { %4723 = vmatprep.mubr.f32.mxu0 %v12540_v29 }
 0x573   :  { %5329 = vmatmul.mubr.f32.gmra.mrb[164].mxu1 %v12335_v40  ;;  %v4008_v40 = vld [vmem:[#allocation2 + $0xf9] sm:$0xff] }
 0x574   :  { %5333 = vmatprep.mubr.f32.mxu1 %v4006_v4 }
 0x575   :  { %4724 = vmatmul.mubr.f32.gmra.mrb[102].mxu0 %v12544_v9  ;;  %v4470_v62 = vpop.f32.mrb[0].mxu0  ;;  %v12576_v9 = vld [vmem:[#allocation2 + $0x2e9] sm:$0xff] }
 0x576   :  { %4728 = vmatprep.mubr.f32.mxu0 %v12547_v30  ;;  %v4472_v52 = vpop.f32.mrb[1].mxu0  ;;  %15436 = vst [vmem:[#allocation16_spill] sm:$0xff] %v12576_v9 }
 0x577   :  { %5334 = vmatmul.mubr.f32.gmra.mrb[166].mxu1 %v12340_v48  ;;  %v12561_v48 = vld [vmem:[#allocation2 + $0x2d1] sm:$0xff]  ;;  %v8606_v59 = vpop.f32.mrb[64].mxu1  ;;  %v12570_v52 = vld [vmem:[#allocation2 + $0x2d9] sm:$0xff] }
 0x578   :  { %5338 = vmatprep.mubr.f32.mxu1 %v4007_v18  ;;  %15431 = vst [vmem:[#allocation17_spill] sm:$0xff] %v12561_v48  ;;  %v4855_v4 = vpop.f32.mrb[65].mxu1  ;;  %v4009_v18 = vld [vmem:[#allocation2 + $0x109] sm:$0xff]  ;;  %15434 = vst [vmem:[#allocation24_spill] sm:$0xff] %v12570_v52 }
 0x579   :  { %4729 = vmatmul.mubr.f32.gmra.mrb[104].mxu0 %v12551_v36 }
 0x57a   :  { %4733 = vmatprep.mubr.f32.mxu0 %v12554_v25  ;;  %v12565_v25 = vadd.f32 %v4855_v4, %v4470_v62  ;;  %v4218_v4 = vld [vmem:[#allocation2 + $0x2d8] sm:$0xff] }
 0x57b   :  { %5339 = vmatmul.mubr.f32.gmra.mrb[168].mxu1 %v12345_v55  ;;  %v4475_v55 = vpop.f32.mrb[2].mxu0 }
 0x57c   :  { %5343 = vmatprep.mubr.f32.mxu1 %v4008_v40  ;;  %15432 = vst [vmem:[#allocation14_spill] sm:$0xff] %v12565_v25  ;;  %v12567_v40 = vld [vmem:[#allocation2 + $0x2d0] sm:$0xff]  ;;  %v4477_v36 = vpop.f32.mrb[3].mxu0 }
 0x57d   :  { %4734 = vmatmul.mubr.f32.gmra.mrb[106].mxu0 %v12558_v14  ;;  %15433 = vst [vmem:[#allocation15_spill] sm:$0xff] %v12567_v40  ;;  %v12572_v14 = vadd.f32 %v8606_v59, %v4475_v55  ;;  %v4011_v55 = vld [vmem:[#allocation2 + $0x121] sm:$0xff] }
 0x57e   :  { %4738 = vmatprep.mubr.f32.mxu0 %v12561_v48 }
 0x57f   :  { %5344 = vmatmul.mubr.f32.gmra.mrb[170].mxu1 %v12350_v15  ;;  %15435 = vst [vmem:[#allocation22_spill] sm:$0xff] %v12572_v14  ;;  %v4010_v15 = vld [vmem:[#allocation2 + $0x111] sm:$0xff] }
 0x580   :  { %5348 = vmatprep.mubr.f32.mxu1 %v4009_v18  ;;  %v6175_v14 = vld [vmem:[#allocation8 + $0x430] sm:$0xff] }
 0x581   :  { %4739 = vmatmul.mubr.f32.gmra.mrb[108].mxu0 %v12567_v40  ;;  %v8609_v30 = vpop.f32.mrb[66].mxu1 }
 0x582   :  { %4743 = vmatprep.mubr.f32.mxu0 %v12570_v52  ;;  %v4865_v48 = vpop.f32.mrb[67].mxu1 }
 0x583   :  { %5349 = vmatmul.mubr.f32.gmra.mrb[172].mxu1 %v12355_v31  ;;  %v4219_v31 = vld [vmem:[#allocation2 + $0x2e8] sm:$0xff] }
 0x584   :  { %5353 = vmatprep.mubr.f32.mxu1 %v4010_v15  ;;  %v4480_v62 = vpop.f32.mrb[4].mxu0  ;;  %v6176_v15 = vld [vmem:[#allocation8 + $0x438] sm:$0xff] }
 0x585   :  { %v4482_v18 = vpop.f32.mrb[5].mxu0  ;;  %4744 = vmatmul.mubr.f32.gmra.mrb[110].mxu0 %v4218_v4  ;;  %v12578_v36 = vadd.f32 %v4865_v48, %v4480_v62  ;;  %v9416_v4 = vpack.c.bf16 %v6176_v15, %v6175_v14  ;;  %v4221_v15 = vld [vmem:[#allocation2 + $0x300] sm:$0xff] }
 0x586   :  { %v8612_v40 = vpop.f32.mrb[68].mxu1  ;;  %4748 = vmatprep.mubr.f32.mxu0 %v12576_v9  ;;  %v12582_v18 = vld [vmem:[#allocation2 + $0x2f1] sm:$0xff] }
 0x587   :  { %15437 = vst [vmem:[#allocation27_spill] sm:$0xff] %v12578_v36  ;;  %v4875_v59 = vpop.f32.mrb[69].mxu1  ;;  %5354 = vmatmul.mubr.f32.gmra.mrb[174].mxu1 %v12360_v5  ;;  %15438 = vst [vmem:[#allocation28_spill] sm:$0xff] %v12582_v18  ;;  %v4012_v5 = vld [vmem:[#allocation2 + $0x129] sm:$0xff]  ;;  %9417 = vmatprep.subr.bf16.mxu1 %v9416_v4 }
 0x588   :  { %5358 = vmatprep.mubr.f32.mxu1 %v4011_v55  ;;  %v4485_v52 = vpop.f32.mrb[6].mxu0  ;;  %v4220_v9 = vld [vmem:[#allocation2 + $0x2f0] sm:$0xff]  ;;  %9419 = vmatpush3.bf16.msra.mxu1 %v9416_v4 }
 0x589   :  { %v4487_v25 = vpop.f32.mrb[7].mxu0  ;;  %4749 = vmatmul.mubr.f32.gmra.mrb[112].mxu0 %v4219_v31  ;;  %v12584_v29 = vadd.f32 %v8609_v30, %v4485_v52  ;;  %v4013_v52 = vld [vmem:[#allocation2 + $0x139] sm:$0xff] }
 0x58a   :  { %v8615_v48 = vpop.f32.mrb[70].mxu1  ;;  %4753 = vmatprep.mubr.f32.mxu0 %v12582_v18  ;;  %v4285_v25 = vld [vmem:[#allocation2 + $0x301] sm:$0xff] }
 0x58b   :  { %15439 = vst [vmem:[#allocation30_spill] sm:$0xff] %v12584_v29  ;;  %v4885_v62 = vpop.f32.mrb[71].mxu1  ;;  %5359 = vmatmul.mubr.f32.gmra.mrb[176].mxu1 %v12365_v28 }
 0x58c   :  { %5363 = vmatprep.mubr.f32.mxu1 %v4012_v5  ;;  %v4490_v55 = vpop.f32.mrb[8].mxu0  ;;  %v4286_v5 = vld [vmem:[#allocation2 + $0x309] sm:$0xff] }
 0x58d   :  { %v4492_v36 = vpop.f32.mrb[9].mxu0  ;;  %4754 = vmatmul.mubr.f32.gmra.mrb[114].mxu0 %v4220_v9  ;;  %v12588_v31 = vadd.f32 %v4875_v59, %v4490_v55  ;;  %v4014_v59 = vld [vmem:[#allocation2 + $0x141] sm:$0xff] }
 0x58e   :  { %v12590_v14 = vpop.f32.mrb[72].mxu1  ;;  %4758 = vmatprep.mubr.f32.mxu0 %v4285_v25  ;;  %v4287_v25 = vld [vmem:[#allocation2 + $0x319] sm:$0xff] }
 0x58f   :  { %15440 = vst [vmem:[#allocation31_spill] sm:$0xff] %v12588_v31  ;;  %v4895_v30 = vpop.f32.mrb[73].mxu1  ;;  %5364 = vmatmul.mubr.f32.gmra.mrb[178].mxu1 %v12370_v47  ;;  %v4222_v47 = vld [vmem:[#allocation2 + $0x308] sm:$0xff] }
 0x590   :  { %5368 = vmatprep.mubr.f32.mxu1 %v4013_v52  ;;  %v4495_v28 = vpop.f32.mrb[10].mxu0 }
 0x591   :  { %v4497_v18 = vpop.f32.mrb[11].mxu0  ;;  %4759 = vmatmul.mubr.f32.gmra.mrb[116].mxu0 %v4221_v15  ;;  %v12593_v29 = vadd.f32 %v8612_v40, %v4495_v28  ;;  %v4015_v28 = vld [vmem:[#allocation2 + $0x151] sm:$0xff] }
 0x592   :  { %v12595_v36 = vpop.f32.mrb[74].mxu1  ;;  %4763 = vmatprep.mubr.f32.mxu0 %v4286_v5 }
 0x593   :  { %15441 = vst [vmem:[#allocation32_spill] sm:$0xff] %v12593_v29  ;;  %v12597_v9 = vpop.f32.mrb[75].mxu1  ;;  %5369 = vmatmul.mubr.f32.gmra.mrb[180].mxu1 %v12375_v7  ;;  %v4223_v7 = vld [vmem:[#allocation2 + $0x318] sm:$0xff] }
 0x594   :  { %5373 = vmatprep.mubr.f32.mxu1 %v4014_v59  ;;  %v4500_v4 = vpop.f32.mrb[12].mxu0  ;;  %v4288_v59 = vld [vmem:[#allocation2 + $0x321] sm:$0xff] }
 0x595   :  { %v4502_v55 = vpop.f32.mrb[13].mxu0  ;;  %4764 = vmatmul.mubr.f32.gmra.mrb[118].mxu0 %v4222_v47  ;;  %v12600_v52 = vadd.f32 %v4885_v62, %v4500_v4  ;;  %v4016_v4 = vld [vmem:[#allocation2 + $0x159] sm:$0xff] }
 0x596   :  { %v12602_v18 = vpop.f32.mrb[76].mxu1  ;;  %4768 = vmatprep.mubr.f32.mxu0 %v4287_v25  ;;  %v6177_v55 = vld [vmem:[#allocation8 + $0x440] sm:$0xff]  ;;  %v6178_v25 = vld [vmem:[#allocation8 + $0x448] sm:$0xff] }
 0x597   :  { %15442 = vst [vmem:[#allocation34_spill] sm:$0xff] %v12600_v52  ;;  %v12604_v40 = vpop.f32.mrb[77].mxu1  ;;  %5374 = vmatmul.mubr.f32.gmra.mrb[182].mxu1 %v12380_v27  ;;  %v9420_v52 = vpack.c.bf16 %v6178_v25, %v6177_v55 }
 0x598   :  { %5378 = vmatprep.mubr.f32.mxu1 %v4015_v28  ;;  %v4505_v15 = vpop.f32.mrb[14].mxu0  ;;  %v4224_v28 = vld [vmem:[#allocation2 + $0x320] sm:$0xff] }
 0x599   :  { %v4507_v5 = vpop.f32.mrb[15].mxu0  ;;  %4769 = vmatmul.mubr.f32.gmra.mrb[120].mxu0 %v4223_v7  ;;  %v12607_v29 = vadd.f32 %v8615_v48, %v4505_v15  ;;  %v4289_v7 = vld [vmem:[#allocation2 + $0x331] sm:$0xff]  ;;  %9421 = vmatprep.subr.bf16.mxu1 %v9420_v52 }
 0x59a   :  { %v12609_v47 = vpop.f32.mrb[78].mxu1  ;;  %4773 = vmatprep.mubr.f32.mxu0 %v4288_v59  ;;  %v6179_v59 = vld [vmem:[#allocation8 + $0x450] sm:$0xff]  ;;  %9423 = vmatpush3.bf16.msra.mxu1 %v9420_v52  ;;  %v6181_v52 = vld [vmem:[#allocation8 + $0x460] sm:$0xff] }
 0x59b   :  { %15443 = vst [vmem:[#allocation35_spill] sm:$0xff] %v12607_v29  ;;  %v12611_v62 = vpop.f32.mrb[79].mxu1  ;;  %5379 = vmatmul.mubr.f32.gmra.mrb[184].mxu1 %v12385_v0  ;;  %v4017_v0 = vld [vmem:[#allocation2 + $0x169] sm:$0xff]  ;;  %v6180_v29 = vld [vmem:[#allocation8 + $0x458] sm:$0xff] }
 0x59c   :  { %5383 = vmatprep.mubr.f32.mxu1 %v4016_v4  ;;  %v4510_v27 = vpop.f32.mrb[16].mxu0 }
 0x59d   :  { %v4512_v31 = vpop.f32.mrb[17].mxu0  ;;  %4774 = vmatmul.mubr.f32.gmra.mrb[122].mxu0 %v4224_v28  ;;  %v12614_v5 = vadd.f32 %v4895_v30, %v4510_v27  ;;  %v4290_v30 = vld [vmem:[#allocation2 + $0x339] sm:$0xff]  ;;  %v4018_v28 = vld [vmem:[#allocation2 + $0x171] sm:$0xff] }
 0x59e   :  { %v12616_v48 = vpop.f32.mrb[80].mxu1  ;;  %4778 = vmatprep.mubr.f32.mxu0 %v4289_v7  ;;  %v9424_v31 = vpack.c.bf16 %v6180_v29, %v6179_v59  ;;  %v4051_v7 = vld [vmem:[#allocation2 + $0x2] sm:$0xff]  ;;  %v4226_v59 = vld [vmem:[#allocation2 + $0x338] sm:$0xff] }
 0x59f   :  { %15444 = vst [vmem:[#allocation36_spill] sm:$0xff] %v12614_v5  ;;  %v12618_v15 = vpop.f32.mrb[81].mxu1  ;;  %5384 = vmatmul.mubr.f32.gmra.mrb[186].mxu1 %v12391_v61  ;;  %v6137_v61 = vld [vmem:[#allocation8 + $0x300] sm:$0xff]  ;;  %v6182_v29 = vld [vmem:[#allocation8 + $0x468] sm:$0xff] }
 0x5a0   :  { %5388 = vmatprep.mubr.f32.mxu1 %v4017_v0  ;;  %v4515_v4 = vpop.f32.mrb[18].mxu0  ;;  %9425 = vmatprep.subr.bf16.mxu1 %v9424_v31  ;;  %v6138_v0 = vld [vmem:[#allocation8 + $0x308] sm:$0xff] }
 0x5a1   :  { %v4517_v55 = vpop.f32.mrb[19].mxu0  ;;  %4779 = vmatmul.mubr.f32.gmra.mrb[124].mxu0 %v4225_v41  ;;  %v12622_v25 = vadd.f32 %v12590_v14, %v4515_v4  ;;  %9427 = vmatpush3.bf16.msra.mxu1 %v9424_v31  ;;  %v9428_v14 = vpack.c.bf16 %v6182_v29, %v6181_v52  ;;  %v9357_v50 = vpack.c.bf16 %v6138_v0, %v6137_v61  ;;  %v6183_v31 = vld [vmem:[#allocation8 + $0x470] sm:$0xff]  ;;  %v6184_v52 = vld [vmem:[#allocation8 + $0x478] sm:$0xff] }
 0x5a2   :  { %v12624_v27 = vpop.f32.mrb[82].mxu1  ;;  %4783 = vmatprep.mubr.f32.mxu0 %v4290_v30  ;;  %v4019_v55 = vld [vmem:[#allocation2 + $0x1b1] sm:$0xff] }
 0x5a3   :  { %15445 = vst [vmem:[#allocation37_spill] sm:$0xff] %v12622_v25  ;;  %v12626_v5 = vpop.f32.mrb[83].mxu1  ;;  %5389 = vmatmul.mubr.f32.gmra.mrb[188].mxu1 %v12396_v23  ;;  %v6139_v23 = vld [vmem:[#allocation8 + $0x310] sm:$0xff]  ;;  %9429 = vmatprep.subr.bf16.mxu1 %v9428_v14 }
 0x5a4   :  { %5393 = vmatprep.mubr.f32.mxu1 %v4018_v28  ;;  %v4520_v41 = vpop.f32.mrb[20].mxu0  ;;  %v6140_v28 = vld [vmem:[#allocation8 + $0x318] sm:$0xff] }
 0x5a5   :  { %v4522_v4 = vpop.f32.mrb[21].mxu0  ;;  %4784 = vmatmul.mubr.f32.gmra.mrb[126].mxu0 %v4226_v59  ;;  %v12630_v30 = vadd.f32 %v12597_v9, %v4520_v41  ;;  %v3955_v59 = vld [vmem:[#allocation2 + $0x1b0] sm:$0xff]  ;;  %9431 = vmatpush3.bf16.msra.mxu1 %v9428_v14  ;;  %v9432_v9 = vpack.c.bf16 %v6184_v52, %v6183_v31  ;;  %v6142_v14 = vld [vmem:[#allocation8 + $0x328] sm:$0xff] }
 0x5a6   :  { %v12632_v25 = vpop.f32.mrb[84].mxu1  ;;  %8732 = vmatprep.mubr.f32.mxu0 %v4051_v7  ;;  %v4053_v4 = vld [vmem:[#allocation2 + $0x1a] sm:$0xff] }
 0x5a7   :  { %15446 = vst [vmem:[#allocation39_spill] sm:$0xff] %v12630_v30  ;;  %v12634_v3 = vpop.f32.mrb[85].mxu1  ;;  %5394 = vmatmul.mubr.f32.gmra.mrb[190].mxu1 %v12401_v39  ;;  %v4020_v7 = vld [vmem:[#allocation2 + $0x1b9] sm:$0xff]  ;;  %v9360_v39 = vpack.c.bf16 %v6140_v28, %v6139_v23  ;;  %9433 = vmatprep.subr.bf16.mxu1 %v9432_v9 }
 0x5a8   :  { %v4525_v29 = vpop.f32.mrb[22].mxu0  ;;  %5398 = vmatprep.mubr.f32.mxu1 %v4019_v55  ;;  %v6141_v55 = vld [vmem:[#allocation8 + $0x320] sm:$0xff] }
 0x5a9   :  { %v4527_v41 = vpop.f32.mrb[23].mxu0  ;;  %8733 = vmatmul.mubr.f32.vlgmr.msra.gmra.mrb[128].mxu0 %v4052_v44  ;;  %v12638_v61 = vadd.f32 %v12595_v36, %v4525_v29  ;;  %v4054_v44 = vld [vmem:[#allocation2 + $0x22] sm:$0xff]  ;;  %v12645_v36 = vld [vmem:[#allocation2 + $0x32] sm:$0xff]  ;;  %9435 = vmatpush3.bf16.msra.mxu1 %v9432_v9  ;;  %v9363_v23 = vpack.c.bf16 %v6142_v14, %v6141_v55 }
 0x5aa   :  { %v12640_v0 = vpop.f32.mrb[86].mxu1  ;;  %8735 = vmatprep.mubr.f32.mxu0 %v4053_v4  ;;  %9358 = vmatpush1.bf16.msra.mxu0 %v9357_v50  ;;  %v6143_v41 = vld [vmem:[#allocation8 + $0x330] sm:$0xff]  ;;  %v6144_v4 = vld [vmem:[#allocation8 + $0x338] sm:$0xff] }
 0x5ab   :  { %v12642_v30 = vpop.f32.mrb[87].mxu1  ;;  %5399 = vmatmul.mubr.f32.gmra.mrb[192].mxu1 %v3955_v59  ;;  %9359 = vmatprep.subr.bf16.mxu0 %v15384_v42  ;;  %v4021_v59 = vld [vmem:[#allocation2 + $0x1c9] sm:$0xff] }
 0x5ac   :  { %v4530_v31 = vpop.f32.mrb[24].mxu0  ;;  %5403 = vmatprep.mubr.f32.mxu1 %v4020_v7  ;;  %v12657_v7 = vld [vmem:[#allocation2 + $0x3a] sm:$0xff] }
 0x5ad   :  { %v4532_v52 = vpop.f32.mrb[25].mxu0  ;;  %8736 = vmatmul.mubr.f32.gmra.mrb[130].mxu0 %v4054_v44  ;;  %v12648_v29 = vadd.f32 %v12604_v40, %v4530_v31  ;;  %v12660_v31 = vld [vmem:[#allocation2 + $0x4a] sm:$0xff]  ;;  %v6145_v44 = vld [vmem:[#allocation8 + $0x340] sm:$0xff] }
 0x5ae   :  { %v12650_v50 = vpop.f32.mrb[88].mxu1  ;;  %8738 = vmatprep.mubr.f32.mxu0 %v12645_v36  ;;  %9361 = vmatpush1.bf16.msra.mxu0 %v9360_v39  ;;  %v6146_v52 = vld [vmem:[#allocation8 + $0x348] sm:$0xff] }
 0x5af   :  { %v12653_v28 = vpop.f32.mrb[89].mxu1  ;;  %5404 = vmatmul.mubr.f32.gmra.mrb[194].mxu1 %v12422_v57  ;;  %9362 = vmatprep.subr.bf16.mxu0 %v15384_v42  ;;  %v9366_v57 = vpack.c.bf16 %v6144_v4, %v6143_v41 }
 0x5b0   :  { %5408 = vmatprep.mubr.f32.mxu1 %v4021_v59  ;;  %v4535_v9 = vpop.f32.mrb[26].mxu0 }
 0x5b1   :  { %v4537_v40 = vpop.f32.mrb[27].mxu0  ;;  %8739 = vmatmul.mubr.f32.gmra.mrb[132].mxu0 %v12657_v7  ;;  %v12663_v39 = vadd.f32 %v12602_v18, %v4535_v9  ;;  %v12676_v9 = vld [vmem:[#allocation2 + $0x62] sm:$0xff] }
 0x5b2   :  { %v12665_v55 = vpop.f32.mrb[90].mxu1  ;;  %8741 = vmatprep.mubr.f32.mxu0 %v12660_v31  ;;  %9364 = vmatpush1.bf16.msra.mxu0 %v9363_v23  ;;  %v12673_v40 = vld [vmem:[#allocation2 + $0x52] sm:$0xff] }
 0x5b3   :  { %15447 = vst [vmem:[#allocation38_spill] sm:$0xff] %v12663_v39  ;;  %v12668_v14 = vpop.f32.mrb[91].mxu1  ;;  %5409 = vmatmul.mubr.f32.gmra.mrb[196].mxu1 %v12410_v56  ;;  %9365 = vmatprep.subr.bf16.mxu0 %v15384_v42  ;;  %15448 = vst [vmem:[#allocation51_spill] sm:$0xff] %v12673_v40  ;;  %v9369_v56 = vpack.c.bf16 %v6146_v52, %v6145_v44 }
 0x5b4   :  { %5413 = vmatprep.mubr.f32.mxu1 %v12413_v33  ;;  %v4540_v59 = vpop.f32.mrb[28].mxu0  ;;  %v6147_v33 = vld [vmem:[#allocation8 + $0x350] sm:$0xff] }
 0x5b5   :  { %v4542_v18 = vpop.f32.mrb[29].mxu0  ;;  %8742 = vmatmul.mubr.f32.gmra.mrb[134].mxu0 %v12673_v40  ;;  %v12679_v23 = vadd.f32 %v12611_v62, %v4540_v59  ;;  %v12689_v40 = vld [vmem:[#allocation2 + $0x6a] sm:$0xff]  ;;  %v12692_v59 = vld [vmem:[#allocation2 + $0x7a] sm:$0xff] }
 0x5b6   :  { %v12681_v41 = vpop.f32.mrb[92].mxu1  ;;  %8744 = vmatprep.mubr.f32.mxu0 %v12676_v9  ;;  %9367 = vmatpush1.bf16.msra.mxu0 %v9366_v57  ;;  %v6148_v18 = vld [vmem:[#allocation8 + $0x358] sm:$0xff]  ;;  %15450 = vst [vmem:[#allocation42_spill] sm:$0xff] %v12689_v40 }
 0x5b7   :  { %15449 = vst [vmem:[#allocation55_spill] sm:$0xff] %v12679_v23  ;;  %v12684_v4 = vpop.f32.mrb[93].mxu1  ;;  %5414 = vmatmul.mubr.f32.gmra.mrb[198].mxu1 %v12416_v22  ;;  %9368 = vmatprep.subr.bf16.mxu0 %v15384_v42  ;;  %v9372_v22 = vpack.c.bf16 %v6148_v18, %v6147_v33 }
 0x5b8   :  { %5418 = vmatprep.mubr.f32.mxu1 %v12419_v2  ;;  %v4545_v39 = vpop.f32.mrb[30].mxu0  ;;  %v6149_v2 = vld [vmem:[#allocation8 + $0x360] sm:$0xff] }
 0x5b9   :  { %v4547_v62 = vpop.f32.mrb[31].mxu0  ;;  %8745 = vmatmul.mubr.f32.gmra.mrb[136].mxu0 %v12689_v40  ;;  %v12695_v57 = vadd.f32 %v12609_v47, %v4545_v39  ;;  %v12705_v40 = vld [vmem:[#allocation2 + $0x82] sm:$0xff]  ;;  %v12708_v39 = vld [vmem:[#allocation2 + $0x92] sm:$0xff] }
 0x5ba   :  { %v12697_v44 = vpop.f32.mrb[94].mxu1  ;;  %8747 = vmatprep.mubr.f32.mxu0 %v12692_v59  ;;  %9370 = vmatpush1.bf16.msra.mxu0 %v9369_v56  ;;  %v6150_v62 = vld [vmem:[#allocation8 + $0x368] sm:$0xff]  ;;  %15452 = vst [vmem:[#allocation57_spill] sm:$0xff] %v12705_v40 }
 0x5bb   :  { %15451 = vst [vmem:[#allocation45_spill] sm:$0xff] %v12695_v57  ;;  %v12700_v52 = vpop.f32.mrb[95].mxu1  ;;  %5419 = vmatmul.mubr.f32.gmra.mrb[200].mxu1 %v12425_v58  ;;  %9371 = vmatprep.subr.bf16.mxu0 %v15384_v42  ;;  %v9375_v58 = vpack.c.bf16 %v6150_v62, %v6149_v2 }
 0x5bc   :  { %5423 = vmatprep.mubr.f32.mxu1 %v12428_v53  ;;  %v4550_v23 = vpop.f32.mrb[32].mxu0  ;;  %v6151_v53 = vld [vmem:[#allocation8 + $0x370] sm:$0xff] }
 0x5bd   :  { %v4552_v47 = vpop.f32.mrb[33].mxu0  ;;  %8748 = vmatmul.mubr.f32.gmra.mrb[138].mxu0 %v12705_v40  ;;  %v12711_v56 = vadd.f32 %v12618_v15, %v4550_v23  ;;  %v12721_v40 = vld [vmem:[#allocation2 + $0x9a] sm:$0xff]  ;;  %v12724_v23 = vld [vmem:[#allocation2 + $0xaa] sm:$0xff] }
 0x5be   :  { %v12713_v33 = vpop.f32.mrb[96].mxu1  ;;  %8750 = vmatprep.mubr.f32.mxu0 %v12708_v39  ;;  %9373 = vmatpush1.bf16.msra.mxu0 %v9372_v22  ;;  %v6152_v47 = vld [vmem:[#allocation8 + $0x378] sm:$0xff]  ;;  %15454 = vst [vmem:[#allocation59_spill] sm:$0xff] %v12721_v40 }
 0x5bf   :  { %15453 = vst [vmem:[#allocation61_spill] sm:$0xff] %v12711_v56  ;;  %v12716_v18 = vpop.f32.mrb[97].mxu1  ;;  %5424 = vmatmul.mubr.f32.gmra.mrb[202].mxu1 %v12432_v6  ;;  %9374 = vmatprep.subr.bf16.mxu0 %v15384_v42  ;;  %v9378_v6 = vpack.c.bf16 %v6152_v47, %v6151_v53 }
 0x5c0   :  { %5428 = vmatprep.mubr.f32.mxu1 %v12435_v34  ;;  %v4555_v57 = vpop.f32.mrb[34].mxu0  ;;  %v6153_v34 = vld [vmem:[#allocation8 + $0x380] sm:$0xff] }
 0x5c1   :  { %v4557_v15 = vpop.f32.mrb[35].mxu0  ;;  %8751 = vmatmul.mubr.f32.gmra.mrb[140].mxu0 %v12721_v40  ;;  %v12727_v22 = vadd.f32 %v12616_v48, %v4555_v57  ;;  %v12737_v40 = vld [vmem:[#allocation2 + $0xb2] sm:$0xff]  ;;  %v12740_v57 = vld [vmem:[#allocation2 + $0xc2] sm:$0xff] }
 0x5c2   :  { %v12729_v2 = vpop.f32.mrb[98].mxu1  ;;  %8753 = vmatprep.mubr.f32.mxu0 %v12724_v23  ;;  %9376 = vmatpush1.bf16.msra.mxu0 %v9375_v58  ;;  %v6154_v15 = vld [vmem:[#allocation8 + $0x388] sm:$0xff]  ;;  %15456 = vst [vmem:[#allocation44_spill] sm:$0xff] %v12737_v40 }
 0x5c3   :  { %15455 = vst [vmem:[#allocation48_spill] sm:$0xff] %v12727_v22  ;;  %v12732_v62 = vpop.f32.mrb[99].mxu1  ;;  %5429 = vmatmul.mubr.f32.gmra.mrb[204].mxu1 %v12439_v54  ;;  %9377 = vmatprep.subr.bf16.mxu0 %v15384_v42  ;;  %v9381_v54 = vpack.c.bf16 %v6154_v15, %v6153_v34 }
 0x5c4   :  { %5433 = vmatprep.mubr.f32.mxu1 %v12442_v37  ;;  %v4560_v56 = vpop.f32.mrb[36].mxu0  ;;  %v6155_v37 = vld [vmem:[#allocation8 + $0x390] sm:$0xff] }
 0x5c5   :  { %v4562_v48 = vpop.f32.mrb[37].mxu0  ;;  %8754 = vmatmul.mubr.f32.gmra.mrb[142].mxu0 %v12737_v40  ;;  %v12743_v58 = vadd.f32 %v12626_v5, %v4560_v56  ;;  %v12753_v40 = vld [vmem:[#allocation2 + $0xca] sm:$0xff]  ;;  %v12756_v56 = vld [vmem:[#allocation2 + $0xda] sm:$0xff] }
 0x5c6   :  { %v12745_v53 = vpop.f32.mrb[100].mxu1  ;;  %8756 = vmatprep.mubr.f32.mxu0 %v12740_v57  ;;  %9379 = vmatpush1.bf16.msra.mxu0 %v9378_v6  ;;  %v6156_v48 = vld [vmem:[#allocation8 + $0x398] sm:$0xff]  ;;  %15458 = vst [vmem:[#allocation52_spill] sm:$0xff] %v12753_v40 }
 0x5c7   :  { %15457 = vst [vmem:[#allocation41_spill] sm:$0xff] %v12743_v58  ;;  %v12748_v47 = vpop.f32.mrb[101].mxu1  ;;  %5434 = vmatmul.mubr.f32.gmra.mrb[206].mxu1 %v12446_v38  ;;  %9380 = vmatprep.subr.bf16.mxu0 %v15384_v42  ;;  %v9384_v38 = vpack.c.bf16 %v6156_v48, %v6155_v37 }
 0x5c8   :  { %5438 = vmatprep.mubr.f32.mxu1 %v12449_v26  ;;  %v4565_v22 = vpop.f32.mrb[38].mxu0  ;;  %v6157_v26 = vld [vmem:[#allocation8 + $0x3a0] sm:$0xff] }
 0x5c9   :  { %v4567_v5 = vpop.f32.mrb[39].mxu0  ;;  %8757 = vmatmul.mubr.f32.gmra.mrb[144].mxu0 %v12753_v40  ;;  %v12759_v6 = vadd.f32 %v12624_v27, %v4565_v22  ;;  %v12769_v40 = vld [vmem:[#allocation2 + $0xe2] sm:$0xff]  ;;  %v12772_v22 = vld [vmem:[#allocation2 + $0xf2] sm:$0xff] }
 0x5ca   :  { %v12761_v34 = vpop.f32.mrb[102].mxu1  ;;  %8759 = vmatprep.mubr.f32.mxu0 %v12756_v56  ;;  %9382 = vmatpush1.bf16.msra.mxu0 %v9381_v54  ;;  %v6158_v5 = vld [vmem:[#allocation8 + $0x3a8] sm:$0xff]  ;;  %15460 = vst [vmem:[#allocation49_spill] sm:$0xff] %v12769_v40 }
 0x5cb   :  { %15459 = vst [vmem:[#allocation21_spill] sm:$0xff] %v12759_v6  ;;  %v12764_v15 = vpop.f32.mrb[103].mxu1  ;;  %5439 = vmatmul.mubr.f32.gmra.mrb[208].mxu1 %v12453_v13  ;;  %9383 = vmatprep.subr.bf16.mxu0 %v15384_v42  ;;  %v9387_v13 = vpack.c.bf16 %v6158_v5, %v6157_v26 }
 0x5cc   :  { %5443 = vmatprep.mubr.f32.mxu1 %v12456_v17  ;;  %v4570_v58 = vpop.f32.mrb[40].mxu0  ;;  %v6159_v17 = vld [vmem:[#allocation8 + $0x3b0] sm:$0xff] }
 0x5cd   :  { %v4572_v27 = vpop.f32.mrb[41].mxu0  ;;  %8760 = vmatmul.mubr.f32.gmra.mrb[146].mxu0 %v12769_v40  ;;  %v12775_v54 = vadd.f32 %v12634_v3, %v4570_v58  ;;  %v12785_v40 = vld [vmem:[#allocation2 + $0xfa] sm:$0xff]  ;;  %v12788_v58 = vld [vmem:[#allocation2 + $0x10a] sm:$0xff] }
 0x5ce   :  { %v12777_v37 = vpop.f32.mrb[104].mxu1  ;;  %8762 = vmatprep.mubr.f32.mxu0 %v12772_v22  ;;  %9385 = vmatpush1.bf16.msra.mxu0 %v9384_v38  ;;  %v6160_v27 = vld [vmem:[#allocation8 + $0x3b8] sm:$0xff]  ;;  %15462 = vst [vmem:[#allocation25_spill] sm:$0xff] %v12785_v40 }
 0x5cf   :  { %15461 = vst [vmem:[#allocation46_spill] sm:$0xff] %v12775_v54  ;;  %v12780_v48 = vpop.f32.mrb[105].mxu1  ;;  %5444 = vmatmul.mubr.f32.gmra.mrb[210].mxu1 %v12460_v45  ;;  %9386 = vmatprep.subr.bf16.mxu0 %v15384_v42  ;;  %v9390_v45 = vpack.c.bf16 %v6160_v27, %v6159_v17 }
 0x5d0   :  { %5448 = vmatprep.mubr.f32.mxu1 %v12463_v46  ;;  %v4575_v6 = vpop.f32.mrb[42].mxu0  ;;  %v6161_v46 = vld [vmem:[#allocation8 + $0x3c0] sm:$0xff] }
 0x5d1   :  { %v4577_v3 = vpop.f32.mrb[43].mxu0  ;;  %8763 = vmatmul.mubr.f32.gmra.mrb[148].mxu0 %v12785_v40  ;;  %v12791_v38 = vadd.f32 %v12632_v25, %v4575_v6  ;;  %v12801_v40 = vld [vmem:[#allocation2 + $0x112] sm:$0xff]  ;;  %v12804_v6 = vld [vmem:[#allocation2 + $0x122] sm:$0xff] }
 0x5d2   :  { %v12793_v26 = vpop.f32.mrb[106].mxu1  ;;  %8765 = vmatprep.mubr.f32.mxu0 %v12788_v58  ;;  %9388 = vmatpush1.bf16.msra.mxu0 %v9387_v13  ;;  %v6162_v3 = vld [vmem:[#allocation8 + $0x3c8] sm:$0xff]  ;;  %15464 = vst [vmem:[#allocation56_spill] sm:$0xff] %v12801_v40 }
 0x5d3   :  { %15463 = vst [vmem:[#allocation47_spill] sm:$0xff] %v12791_v38  ;;  %v12796_v5 = vpop.f32.mrb[107].mxu1  ;;  %5449 = vmatmul.mubr.f32.gmra.mrb[212].mxu1 %v12467_v49  ;;  %9389 = vmatprep.subr.bf16.mxu0 %v15384_v42  ;;  %v9393_v49 = vpack.c.bf16 %v6162_v3, %v6161_v46 }
 0x5d4   :  { %5453 = vmatprep.mubr.f32.mxu1 %v12470_v32  ;;  %v4580_v54 = vpop.f32.mrb[44].mxu0  ;;  %v6163_v32 = vld [vmem:[#allocation8 + $0x3d0] sm:$0xff] }
 0x5d5   :  { %v4582_v25 = vpop.f32.mrb[45].mxu0  ;;  %8766 = vmatmul.mubr.f32.gmra.mrb[150].mxu0 %v12801_v40  ;;  %v12807_v13 = vadd.f32 %v12642_v30, %v4580_v54  ;;  %v12817_v40 = vld [vmem:[#allocation2 + $0x12a] sm:$0xff]  ;;  %v12820_v54 = vld [vmem:[#allocation2 + $0x13a] sm:$0xff] }
 0x5d6   :  { %v12809_v17 = vpop.f32.mrb[108].mxu1  ;;  %8768 = vmatprep.mubr.f32.mxu0 %v12804_v6  ;;  %9391 = vmatpush1.bf16.msra.mxu0 %v9390_v45  ;;  %v6164_v25 = vld [vmem:[#allocation8 + $0x3d8] sm:$0xff]  ;;  %15466 = vst [vmem:[#allocation50_spill] sm:$0xff] %v12817_v40 }
 0x5d7   :  { %15465 = vst [vmem:[#allocation26_spill] sm:$0xff] %v12807_v13  ;;  %v12812_v27 = vpop.f32.mrb[109].mxu1  ;;  %5454 = vmatmul.mubr.f32.gmra.mrb[214].mxu1 %v12474_v20  ;;  %9392 = vmatprep.subr.bf16.mxu0 %v15384_v42  ;;  %v9396_v20 = vpack.c.bf16 %v6164_v25, %v6163_v32 }
 0x5d8   :  { %5458 = vmatprep.mubr.f32.mxu1 %v12477_v35  ;;  %v4585_v38 = vpop.f32.mrb[46].mxu0  ;;  %v6165_v35 = vld [vmem:[#allocation8 + $0x3e0] sm:$0xff] }
 0x5d9   :  { %v4587_v30 = vpop.f32.mrb[47].mxu0  ;;  %8769 = vmatmul.mubr.f32.gmra.mrb[152].mxu0 %v12817_v40  ;;  %v12823_v45 = vadd.f32 %v12640_v0, %v4585_v38  ;;  %v12833_v40 = vld [vmem:[#allocation2 + $0x142] sm:$0xff]  ;;  %v12836_v38 = vld [vmem:[#allocation2 + $0x152] sm:$0xff] }
 0x5da   :  { %v12825_v46 = vpop.f32.mrb[110].mxu1  ;;  %8771 = vmatprep.mubr.f32.mxu0 %v12820_v54  ;;  %9394 = vmatpush1.bf16.msra.mxu0 %v9393_v49  ;;  %v6166_v30 = vld [vmem:[#allocation8 + $0x3e8] sm:$0xff]  ;;  %15468 = vst [vmem:[#allocation53_spill] sm:$0xff] %v12833_v40 }
 0x5db   :  { %15467 = vst [vmem:[#allocation20_spill] sm:$0xff] %v12823_v45  ;;  %v12828_v3 = vpop.f32.mrb[111].mxu1  ;;  %5459 = vmatmul.mubr.f32.gmra.mrb[216].mxu1 %v12481_v12  ;;  %9395 = vmatprep.subr.bf16.mxu0 %v15384_v42  ;;  %v9399_v12 = vpack.c.bf16 %v6166_v30, %v6165_v35 }
 0x5dc   :  { %5463 = vmatprep.mubr.f32.mxu1 %v12484_v11  ;;  %v4590_v13 = vpop.f32.mrb[48].mxu0  ;;  %v6167_v11 = vld [vmem:[#allocation8 + $0x3f0] sm:$0xff] }
 0x5dd   :  { %v4592_v0 = vpop.f32.mrb[49].mxu0  ;;  %8772 = vmatmul.mubr.f32.gmra.mrb[154].mxu0 %v12833_v40  ;;  %v12839_v49 = vadd.f32 %v12653_v28, %v4590_v13  ;;  %v12849_v40 = vld [vmem:[#allocation2 + $0x15a] sm:$0xff]  ;;  %v12852_v13 = vld [vmem:[#allocation2 + $0x16a] sm:$0xff] }
 0x5de   :  { %v12841_v32 = vpop.f32.mrb[112].mxu1  ;;  %8774 = vmatprep.mubr.f32.mxu0 %v12836_v38  ;;  %9397 = vmatpush1.bf16.msra.mxu0 %v9396_v20  ;;  %v6168_v0 = vld [vmem:[#allocation8 + $0x3f8] sm:$0xff] }
 0x5df   :  { %15469 = vst [vmem:[#allocation43_spill] sm:$0xff] %v12839_v49  ;;  %v12844_v25 = vpop.f32.mrb[113].mxu1  ;;  %5464 = vmatmul.mubr.f32.gmra.mrb[218].mxu1 %v12488_v16  ;;  %9398 = vmatprep.subr.bf16.mxu0 %v15384_v42  ;;  %v9402_v16 = vpack.c.bf16 %v6168_v0, %v6167_v11  ;;  %v12865_v49 = vld [vmem:[#allocation2 + $0x172] sm:$0xff]  ;;  %v4084_v11 = vld [vmem:[#allocation2 + $0x1ba] sm:$0xff]  ;;  %v4085_v0 = vld [vmem:[#allocation2 + $0x1ca] sm:$0xff] }
 0x5e0   :  { %5468 = vmatprep.mubr.f32.mxu1 %v12491_v10  ;;  %v4595_v45 = vpop.f32.mrb[50].mxu0  ;;  %v4083_v10 = vld [vmem:[#allocation2 + $0x1b2] sm:$0xff] }
 0x5e1   :  { %v4597_v28 = vpop.f32.mrb[51].mxu0  ;;  %8775 = vmatmul.mubr.f32.gmra.mrb[156].mxu0 %v12849_v40  ;;  %v12855_v20 = vadd.f32 %v12650_v50, %v4595_v45 }
 0x5e2   :  { %v12857_v35 = vpop.f32.mrb[114].mxu1  ;;  %8777 = vmatprep.mubr.f32.mxu0 %v12852_v13  ;;  %9400 = vmatpush1.bf16.msra.mxu0 %v9399_v12 }
 0x5e3   :  { %v12860_v30 = vpop.f32.mrb[115].mxu1  ;;  %5469 = vmatmul.mubr.f32.gmra.mrb[220].mxu1 %v12495_v63  ;;  %9401 = vmatprep.subr.bf16.mxu0 %v15384_v42 }
 0x5e4   :  { %5473 = vmatprep.mubr.f32.mxu1 %v12498_v51  ;;  %v4600_v28 = vpop.f32.mrb[52].mxu0 }
 0x5e5   :  { %v4602_v50 = vpop.f32.mrb[53].mxu0  ;;  %8778 = vmatmul.mubr.f32.gmra.mrb[158].mxu0 %v12865_v49  ;;  %v12869_v45 = vadd.f32 %v12668_v14, %v4600_v28 }
 0x5e6   :  { %v12871_v12 = vpop.f32.mrb[116].mxu1  ;;  %8780 = vmatprep.mubr.f32.mxu0 %v4083_v10  ;;  %9403 = vmatpush1.bf16.msra.mxu0 %v9402_v16 }
 0x5e7   :  { %v12873_v63 = vpop.f32.mrb[117].mxu1  ;;  %5474 = vmatmul.mubr.f32.gmra.mrb[222].mxu1 %v12502_v21  ;;  %v4086_v21 = vld [vmem:[#allocation2 + $0x1d2] sm:$0xff] }
 0x5e8   :  { %5478 = vmatprep.mubr.f32.mxu1 %v12505_v24  ;;  %v4605_v42 = vpop.f32.mrb[54].mxu0  ;;  %v12886_v24 = vld [vmem:[#allocation2 + $0x1e2] sm:$0xff] }
 0x5e9   :  { %v4607_v51 = vpop.f32.mrb[55].mxu0  ;;  %8781 = vmatmul.mubr.f32.gmra.mrb[160].mxu0 %v4084_v11  ;;  %v12878_v50 = vadd.f32 %v12665_v55, %v4605_v42 }
 0x5ea   :  { %v12880_v14 = vpop.f32.mrb[118].mxu1  ;;  %8783 = vmatprep.mubr.f32.mxu0 %v4085_v0  ;;  %v12901_v0 = vld [vmem:[#allocation2 + $0x1fa] sm:$0xff] }
 0x5eb   :  { %v12882_v28 = vpop.f32.mrb[119].mxu1  ;;  %5479 = vmatmul.mubr.f32.gmra.mrb[224].mxu1 %v12509_v1  ;;  %15472 = vst [vmem:[#allocation65_spill] sm:$0xff] %v12901_v0 }
 0x5ec   :  { %5483 = vmatprep.mubr.f32.mxu1 %v12512_v19  ;;  %v4610_v16 = vpop.f32.mrb[56].mxu0  ;;  %v12898_v19 = vld [vmem:[#allocation2 + $0x1ea] sm:$0xff] }
 0x5ed   :  { %v4612_v10 = vpop.f32.mrb[57].mxu0  ;;  %8784 = vmatmul.mubr.f32.gmra.mrb[162].mxu0 %v4086_v21  ;;  %v12889_v11 = vadd.f32 %v12684_v4, %v4610_v16  ;;  %15471 = vst [vmem:[#allocation19_spill] sm:$0xff] %v12898_v19 }
 0x5ee   :  { %v12891_v55 = vpop.f32.mrb[120].mxu1  ;;  %8786 = vmatprep.mubr.f32.mxu0 %v12886_v24  ;;  %v12913_v10 = vld [vmem:[#allocation2 + $0x202] sm:$0xff] }
 0x5ef   :  { %15470 = vst [vmem:[#allocation18_spill] sm:$0xff] %v12889_v11  ;;  %v12894_v42 = vpop.f32.mrb[121].mxu1  ;;  %5484 = vmatmul.mubr.f32.gmra.mrb[226].mxu1 %v12516_v60  ;;  %v15474_v60 = vld [vmem:[#allocation33_spill] sm:$0xff]  ;;  %v12916_v11 = vld [vmem:[#allocation2 + $0x212] sm:$0xff] }
 0x5f0   :  { %5488 = vmatprep.mubr.f32.mxu1 %v12519_v43  ;;  %v4615_v1 = vpop.f32.mrb[58].mxu0  ;;  %15475 = vst [vmem:[#allocation33_spill] sm:$0xff] %v12913_v10  ;;  %15476 = vst [vmem:[#allocation67_spill] sm:$0xff] %v12916_v11 }
 0x5f1   :  { %v4617_v51 = vpop.f32.mrb[59].mxu0  ;;  %8787 = vmatmul.mubr.f32.gmra.mrb[164].mxu0 %v12898_v19  ;;  %v12904_v4 = vadd.f32 %v12681_v41, %v4615_v1  ;;  %v12928_v19 = vld [vmem:[#allocation2 + $0x21a] sm:$0xff] }
 0x5f2   :  { %v12906_v16 = vpop.f32.mrb[122].mxu1  ;;  %8789 = vmatprep.mubr.f32.mxu0 %v12901_v0 }
 0x5f3   :  { %15473 = vst [vmem:[#allocation66_spill] sm:$0xff] %v12904_v4  ;;  %v12909_v21 = vpop.f32.mrb[123].mxu1  ;;  %5489 = vmatmul.mubr.f32.gmra.mrb[228].mxu1 %v12523_v8  ;;  %v15480_v8 = vld [vmem:[#allocation29_spill] sm:$0xff] }
 0x5f4   :  { %5493 = vmatprep.mubr.f32.mxu1 %v15474_v60  ;;  %v4620_v43 = vpop.f32.mrb[60].mxu0  ;;  %v15481_v60 = vld [vmem:[#allocation40_spill] sm:$0xff]  ;;  %15482 = vst [vmem:[#allocation29_spill] sm:$0xff] %v12928_v19 }
 0x5f5   :  { %v4622_v51 = vpop.f32.mrb[61].mxu0  ;;  %8790 = vmatmul.mubr.f32.gmra.mrb[166].mxu0 %v12913_v10  ;;  %v12919_v41 = vadd.f32 %v12700_v52, %v4620_v43  ;;  %v12931_v10 = vld [vmem:[#allocation2 + $0x22a] sm:$0xff] }
 0x5f6   :  { %v12921_v1 = vpop.f32.mrb[124].mxu1  ;;  %8792 = vmatprep.mubr.f32.mxu0 %v12916_v11  ;;  %15483 = vst [vmem:[#allocation40_spill] sm:$0xff] %v12931_v10  ;;  %v12943_v11 = vld [vmem:[#allocation2 + $0x232] sm:$0xff] }
 0x5f7   :  { %15477 = vst [vmem:[#allocation68_spill] sm:$0xff] %v12919_v41  ;;  %15478 = vst [vmem:[#allocation69_spill] sm:$0xff] %v12921_v1  ;;  %v12924_v4 = vpop.f32.mrb[125].mxu1  ;;  %5494 = vmatmul.mubr.f32.gmra.mrb[230].mxu1 %v15480_v8  ;;  %v15487_v8 = vld [vmem:[#allocation60_spill] sm:$0xff] }
 0x5f8   :  { %15479 = vst [vmem:[#allocation70_spill] sm:$0xff] %v12924_v4  ;;  %5498 = vmatprep.mubr.f32.mxu1 %v15481_v60  ;;  %v4625_v0 = vpop.f32.mrb[62].mxu0  ;;  %v15488_v60 = vld [vmem:[#allocation54_spill] sm:$0xff] }
 0x5f9   :  { %v4627_v51 = vpop.f32.mrb[63].mxu0  ;;  %8793 = vmatmul.mubr.f32.gmra.mrb[168].mxu0 %v12928_v19  ;;  %v12934_v52 = vadd.f32 %v12697_v44, %v4625_v0  ;;  %v12949_v44 = vld [vmem:[#allocation2 + $0x242] sm:$0xff]  ;;  %v12957_v4 = vld [vmem:[#allocation2 + $0x24a] sm:$0xff] }
 0x5fa   :  { %v12936_v43 = vpop.f32.mrb[126].mxu1  ;;  %8795 = vmatprep.mubr.f32.mxu0 %v12931_v10  ;;  %15490 = vst [vmem:[#allocation54_spill] sm:$0xff] %v12949_v44 }
 0x5fb   :  { %15484 = vst [vmem:[#allocation71_spill] sm:$0xff] %v12934_v52  ;;  %15485 = vst [vmem:[#allocation72_spill] sm:$0xff] %v12936_v43  ;;  %v12939_v41 = vpop.f32.mrb[127].mxu1  ;;  %5499 = vmatmul.mubr.f32.gmra.mrb[232].mxu1 %v15487_v8  ;;  %v15491_v52 = vld [vmem:[#allocation14_spill] sm:$0xff] }
 0x5fc   :  { %15486 = vst [vmem:[#allocation73_spill] sm:$0xff] %v12939_v41  ;;  %5503 = vmatprep.mubr.f32.mxu1 %v15488_v60  ;;  %v4630_v1 = vpop.f32.mrb[64].mxu0  ;;  %v15493_v8 = vld [vmem:[#allocation62_spill] sm:$0xff] }
 0x5fd   :  { %v12946_v51 = vadd.f32 %v12716_v18, %v4630_v1  ;;  %v4632_v19 = vpop.f32.mrb[65].mxu0  ;;  %8796 = vmatmul.mubr.f32.gmra.mrb[170].mxu0 %v12943_v11  ;;  %v15494_v41 = vld [vmem:[#allocation58_spill] sm:$0xff]  ;;  %v12963_v1 = vld [vmem:[#allocation2 + $0x25a] sm:$0xff] }
 0x5fe   :  { %v5240_v0 = vpop.f32.mrb[128].mxu1  ;;  %8798 = vmatprep.mubr.f32.mxu0 %v12949_v44  ;;  %15496 = vst [vmem:[#allocation58_spill] sm:$0xff] %v12963_v1  ;;  %v12971_v44 = vld [vmem:[#allocation2 + $0x262] sm:$0xff] }
 0x5ff   :  { %15489 = vst [vmem:[#allocation60_spill] sm:$0xff] %v12946_v51  ;;  %v12953_v43 = vadd.f32 %v5240_v0, %v15491_v52  ;;  %5504 = vmatmul.mubr.f32.gmra.mrb[234].mxu1 %v15493_v8  ;;  %v5242_v60 = vpop.f32.mrb[129].mxu1  ;;  %v15497_v52 = vld [vmem:[#allocation22_spill] sm:$0xff]  ;;  %v15499_v8 = vld [vmem:[#allocation63_spill] sm:$0xff] }
 0x600   :  { %5508 = vmatprep.mubr.f32.mxu1 %v15494_v41  ;;  %v4635_v10 = vpop.f32.mrb[66].mxu0  ;;  %v15500_v60 = vld [vmem:[#allocation64_spill] sm:$0xff] }
 0x601   :  { %15492 = vst [vmem:[#allocation14_spill] sm:$0xff] %v12953_v43  ;;  %v12960_v18 = vadd.f32 %v12713_v33, %v4635_v10  ;;  %v4637_v19 = vpop.f32.mrb[67].mxu0  ;;  %8799 = vmatmul.mubr.f32.gmra.mrb[172].mxu0 %v12957_v4 }
 0x602   :  { %v5245_v51 = vpop.f32.mrb[130].mxu1  ;;  %8801 = vmatprep.mubr.f32.mxu0 %v12963_v1  ;;  %v12977_v19 = vld [vmem:[#allocation2 + $0x272] sm:$0xff]  ;;  %v12985_v1 = vld [vmem:[#allocation2 + $0x27a] sm:$0xff] }
 0x603   :  { %15495 = vst [vmem:[#allocation62_spill] sm:$0xff] %v12960_v18  ;;  %v12967_v0 = vadd.f32 %v5245_v51, %v15497_v52  ;;  %5509 = vmatmul.mubr.f32.gmra.mrb[236].mxu1 %v15499_v8  ;;  %v5247_v41 = vpop.f32.mrb[131].mxu1  ;;  %15502 = vst [vmem:[#allocation64_spill] sm:$0xff] %v12977_v19  ;;  %v15503_v51 = vld [vmem:[#allocation27_spill] sm:$0xff] }
 0x604   :  { %5513 = vmatprep.mubr.f32.mxu1 %v15500_v60  ;;  %v4640_v43 = vpop.f32.mrb[68].mxu0  ;;  %v15505_v41 = vld [vmem:[#allocation13_spill] sm:$0xff] }
 0x605   :  { %15498 = vst [vmem:[#allocation22_spill] sm:$0xff] %v12967_v0  ;;  %v12974_v33 = vadd.f32 %v12732_v62, %v4640_v43  ;;  %v4642_v10 = vpop.f32.mrb[69].mxu0  ;;  %8802 = vmatmul.mubr.f32.gmra.mrb[174].mxu0 %v12971_v44  ;;  %v15506_v60 = vld [vmem:[#allocation17_spill] sm:$0xff]  ;;  %15507 = vst [vmem:[#allocation13_spill] sm:$0xff] %v12985_v1 }
 0x606   :  { %v5250_v18 = vpop.f32.mrb[132].mxu1  ;;  %8804 = vmatprep.mubr.f32.mxu0 %v12977_v19  ;;  %v12991_v10 = vld [vmem:[#allocation2 + $0x28a] sm:$0xff]  ;;  %v12999_v19 = vld [vmem:[#allocation2 + $0x292] sm:$0xff] }
 0x607   :  { %15501 = vst [vmem:[#allocation63_spill] sm:$0xff] %v12974_v33  ;;  %v12981_v52 = vadd.f32 %v5250_v18, %v15503_v51  ;;  %v5252_v8 = vpop.f32.mrb[133].mxu1  ;;  %5514 = vmatmul.mubr.f32.gmra.mrb[238].mxu1 %v15505_v41  ;;  %15509 = vst [vmem:[#allocation74_spill] sm:$0xff] %v12991_v10  ;;  %v15510_v18 = vld [vmem:[#allocation30_spill] sm:$0xff]  ;;  %v15511_v41 = vld [vmem:[#allocation15_spill] sm:$0xff] }
 0x608   :  { %5518 = vmatprep.mubr.f32.mxu1 %v15506_v60  ;;  %v4645_v0 = vpop.f32.mrb[70].mxu0  ;;  %v15512_v60 = vld [vmem:[#allocation24_spill] sm:$0xff]  ;;  %15513 = vst [vmem:[#allocation30_spill] sm:$0xff] %v12999_v19 }
 0x609   :  { %15504 = vst [vmem:[#allocation27_spill] sm:$0xff] %v12981_v52  ;;  %v12988_v62 = vadd.f32 %v12729_v2, %v4645_v0  ;;  %v4647_v43 = vpop.f32.mrb[71].mxu0  ;;  %8805 = vmatmul.mubr.f32.gmra.mrb[176].mxu0 %v12985_v1  ;;  %v13012_v1 = vld [vmem:[#allocation2 + $0x2aa] sm:$0xff] }
 0x60a   :  { %v5255_v33 = vpop.f32.mrb[134].mxu1  ;;  %8807 = vmatprep.mubr.f32.mxu0 %v12991_v10  ;;  %v13005_v43 = vld [vmem:[#allocation2 + $0x2a2] sm:$0xff]  ;;  %v3980_v10 = vld [vmem:[#allocation2 + $0x2d8] sm:$0xff] }
 0x60b   :  { %15508 = vst [vmem:[#allocation17_spill] sm:$0xff] %v12988_v62  ;;  %v12995_v51 = vadd.f32 %v5255_v33, %v15510_v18  ;;  %v5257_v8 = vpop.f32.mrb[135].mxu1  ;;  %5519 = vmatmul.mubr.f32.gmra.mrb[240].mxu1 %v15511_v41  ;;  %15515 = vst [vmem:[#allocation24_spill] sm:$0xff] %v13005_v43  ;;  %v15516_v33 = vld [vmem:[#allocation31_spill] sm:$0xff]  ;;  %v15517_v41 = vld [vmem:[#allocation16_spill] sm:$0xff] }
 0x60c   :  { %5523 = vmatprep.mubr.f32.mxu1 %v15512_v60  ;;  %v4650_v52 = vpop.f32.mrb[72].mxu0  ;;  %15518 = vst [vmem:[#allocation31_spill] sm:$0xff] %v13012_v1 }
 0x60d   :  { %v13002_v2 = vadd.f32 %v12748_v47, %v4650_v52  ;;  %v4652_v0 = vpop.f32.mrb[73].mxu0  ;;  %8808 = vmatmul.mubr.f32.gmra.mrb[178].mxu0 %v12999_v19  ;;  %v13025_v19 = vld [vmem:[#allocation2 + $0x2c2] sm:$0xff] }
 0x60e   :  { %v5260_v62 = vpop.f32.mrb[136].mxu1  ;;  %8810 = vmatprep.mubr.f32.mxu0 %v13005_v43  ;;  %v13018_v0 = vld [vmem:[#allocation2 + $0x2ba] sm:$0xff]  ;;  %v3981_v43 = vld [vmem:[#allocation2 + $0x2e8] sm:$0xff] }
 0x60f   :  { %15514 = vst [vmem:[#allocation15_spill] sm:$0xff] %v13002_v2  ;;  %v13009_v18 = vadd.f32 %v5260_v62, %v15516_v33  ;;  %v5262_v8 = vpop.f32.mrb[137].mxu1  ;;  %5524 = vmatmul.mubr.f32.gmra.mrb[242].mxu1 %v3980_v10  ;;  %15520 = vst [vmem:[#allocation75_spill] sm:$0xff] %v13018_v0  ;;  %v15521_v62 = vld [vmem:[#allocation32_spill] sm:$0xff] }
 0x610   :  { %5528 = vmatprep.mubr.f32.mxu1 %v15517_v41  ;;  %v4655_v60 = vpop.f32.mrb[74].mxu0  ;;  %v15522_v8 = vld [vmem:[#allocation28_spill] sm:$0xff]  ;;  %15523 = vst [vmem:[#allocation32_spill] sm:$0xff] %v13025_v19 }
 0x611   :  { %v13015_v47 = vadd.f32 %v12745_v53, %v4655_v60  ;;  %v4657_v52 = vpop.f32.mrb[75].mxu0  ;;  %8811 = vmatmul.mubr.f32.gmra.mrb[180].mxu0 %v13012_v1  ;;  %v13037_v1 = vld [vmem:[#allocation2 + $0x2da] sm:$0xff] }
 0x612   :  { %v5265_v2 = vpop.f32.mrb[138].mxu1  ;;  %8813 = vmatprep.mubr.f32.mxu0 %v13018_v0  ;;  %v13031_v52 = vld [vmem:[#allocation2 + $0x2d2] sm:$0xff] }
 0x613   :  { %15519 = vst [vmem:[#allocation16_spill] sm:$0xff] %v13015_v47  ;;  %v13022_v33 = vadd.f32 %v5265_v2, %v15521_v62  ;;  %v5267_v10 = vpop.f32.mrb[139].mxu1  ;;  %5529 = vmatmul.mubr.f32.gmra.mrb[244].mxu1 %v3981_v43  ;;  %15525 = vst [vmem:[#allocation76_spill] sm:$0xff] %v13031_v52  ;;  %v3982_v0 = vld [vmem:[#allocation2 + $0x2f0] sm:$0xff]  ;;  %v15526_v2 = vld [vmem:[#allocation34_spill] sm:$0xff] }
 0x614   :  { %5533 = vmatprep.mubr.f32.mxu1 %v15522_v8  ;;  %v4660_v41 = vpop.f32.mrb[76].mxu0  ;;  %v4047_v10 = vld [vmem:[#allocation2 + $0x301] sm:$0xff]  ;;  %15527 = vst [vmem:[#allocation34_spill] sm:$0xff] %v13037_v1 }
 0x615   :  { %v13028_v53 = vadd.f32 %v12764_v15, %v4660_v41  ;;  %v4662_v60 = vpop.f32.mrb[77].mxu0  ;;  %8814 = vmatmul.mubr.f32.gmra.mrb[182].mxu0 %v13025_v19  ;;  %v13049_v19 = vld [vmem:[#allocation2 + $0x2f2] sm:$0xff] }
 0x616   :  { %v5270_v47 = vpop.f32.mrb[140].mxu1  ;;  %8816 = vmatprep.mubr.f32.mxu0 %v13031_v52  ;;  %v13043_v60 = vld [vmem:[#allocation2 + $0x2ea] sm:$0xff]  ;;  %v3983_v52 = vld [vmem:[#allocation2 + $0x300] sm:$0xff] }
 0x617   :  { %15524 = vst [vmem:[#allocation28_spill] sm:$0xff] %v13028_v53  ;;  %v13035_v62 = vadd.f32 %v5270_v47, %v15526_v2  ;;  %v5272_v43 = vpop.f32.mrb[141].mxu1  ;;  %5534 = vmatmul.mubr.f32.gmra.mrb[246].mxu1 %v3982_v0  ;;  %15529 = vst [vmem:[#allocation78_spill] sm:$0xff] %v13043_v60  ;;  %v15530_v47 = vld [vmem:[#allocation35_spill] sm:$0xff] }
 0x618   :  { %5538 = vmatprep.mubr.f32.mxu1 %v4047_v10  ;;  %v4665_v8 = vpop.f32.mrb[78].mxu0  ;;  %v4048_v43 = vld [vmem:[#allocation2 + $0x309] sm:$0xff]  ;;  %15531 = vst [vmem:[#allocation35_spill] sm:$0xff] %v13049_v19 }
 0x619   :  { %v13040_v15 = vadd.f32 %v12761_v34, %v4665_v8  ;;  %v4667_v41 = vpop.f32.mrb[79].mxu0  ;;  %8817 = vmatmul.mubr.f32.gmra.mrb[184].mxu0 %v13037_v1  ;;  %v13061_v1 = vld [vmem:[#allocation2 + $0x30a] sm:$0xff] }
 0x61a   :  { %v5275_v53 = vpop.f32.mrb[142].mxu1  ;;  %8819 = vmatprep.mubr.f32.mxu0 %v13043_v60  ;;  %v13055_v41 = vld [vmem:[#allocation2 + $0x302] sm:$0xff] }
 0x61b   :  { %15528 = vst [vmem:[#allocation77_spill] sm:$0xff] %v13040_v15  ;;  %v13047_v2 = vadd.f32 %v5275_v53, %v15530_v47  ;;  %v5277_v0 = vpop.f32.mrb[143].mxu1  ;;  %5539 = vmatmul.mubr.f32.gmra.mrb[248].mxu1 %v3983_v52  ;;  %15533 = vst [vmem:[#allocation80_spill] sm:$0xff] %v13055_v41  ;;  %v3984_v60 = vld [vmem:[#allocation2 + $0x308] sm:$0xff]  ;;  %v15534_v53 = vld [vmem:[#allocation36_spill] sm:$0xff] }
 0x61c   :  { %5543 = vmatprep.mubr.f32.mxu1 %v4048_v43  ;;  %v4670_v10 = vpop.f32.mrb[80].mxu0  ;;  %v4049_v0 = vld [vmem:[#allocation2 + $0x319] sm:$0xff]  ;;  %15535 = vst [vmem:[#allocation36_spill] sm:$0xff] %v13061_v1 }
 0x61d   :  { %v13052_v34 = vadd.f32 %v12780_v48, %v4670_v10  ;;  %v4672_v8 = vpop.f32.mrb[81].mxu0  ;;  %8820 = vmatmul.mubr.f32.gmra.mrb[186].mxu0 %v13049_v19  ;;  %v13073_v19 = vld [vmem:[#allocation2 + $0x322] sm:$0xff] }
 0x61e   :  { %v5280_v15 = vpop.f32.mrb[144].mxu1  ;;  %8822 = vmatprep.mubr.f32.mxu0 %v13055_v41  ;;  %v13067_v8 = vld [vmem:[#allocation2 + $0x31a] sm:$0xff] }
 0x61f   :  { %15532 = vst [vmem:[#allocation79_spill] sm:$0xff] %v13052_v34  ;;  %v13059_v47 = vadd.f32 %v5280_v15, %v15534_v53  ;;  %v5282_v52 = vpop.f32.mrb[145].mxu1  ;;  %5544 = vmatmul.mubr.f32.gmra.mrb[250].mxu1 %v3984_v60  ;;  %15537 = vst [vmem:[#allocation82_spill] sm:$0xff] %v13067_v8  ;;  %v3985_v41 = vld [vmem:[#allocation2 + $0x318] sm:$0xff]  ;;  %v15538_v15 = vld [vmem:[#allocation37_spill] sm:$0xff] }
 0x620   :  { %5548 = vmatprep.mubr.f32.mxu1 %v4049_v0  ;;  %v4675_v43 = vpop.f32.mrb[82].mxu0  ;;  %v4050_v52 = vld [vmem:[#allocation2 + $0x321] sm:$0xff] }
 0x621   :  { %v13064_v48 = vadd.f32 %v12777_v37, %v4675_v43  ;;  %v4677_v10 = vpop.f32.mrb[83].mxu0  ;;  %8823 = vmatmul.mubr.f32.gmra.mrb[188].mxu0 %v13061_v1  ;;  %v3986_v1 = vld [vmem:[#allocation2 + $0x320] sm:$0xff] }
 0x622   :  { %v5285_v34 = vpop.f32.mrb[146].mxu1  ;;  %8825 = vmatprep.mubr.f32.mxu0 %v13067_v8  ;;  %v6008_v10 = vld [vmem:[#allocation2 + $0x31] sm:$0xff] }
 0x623   :  { %15536 = vst [vmem:[#allocation81_spill] sm:$0xff] %v13064_v48  ;;  %v13071_v53 = vadd.f32 %v5285_v34, %v15538_v15  ;;  %v5287_v60 = vpop.f32.mrb[147].mxu1  ;;  %5549 = vmatmul.mubr.f32.gmra.mrb[252].mxu1 %v3985_v41  ;;  %v15540_v8 = vld [vmem:[#allocation39_spill] sm:$0xff] }
 0x624   :  { %5553 = vmatprep.mubr.f32.mxu1 %v4050_v52  ;;  %v4680_v0 = vpop.f32.mrb[84].mxu0  ;;  %v5944_v60 = vld [vmem:[#allocation2 + $0x30] sm:$0xff] }
 0x625   :  { %v13076_v37 = vadd.f32 %v12796_v5, %v4680_v0  ;;  %v4682_v43 = vpop.f32.mrb[85].mxu0  ;;  %8826 = vmatmul.mubr.f32.gmra.mrb[190].mxu0 %v13073_v19  ;;  %v6009_v0 = vld [vmem:[#allocation2 + $0x39] sm:$0xff] }
 0x626   :  { %v5290_v48 = vpop.f32.mrb[148].mxu1  ;;  %6249 = vmatprep.mubr.f32.mxu0 %v6008_v10 }
 0x627   :  { %15539 = vst [vmem:[#allocation37_spill] sm:$0xff] %v13076_v37  ;;  %v13080_v34 = vadd.f32 %v5290_v48, %v15540_v8  ;;  %v5292_v15 = vpop.f32.mrb[149].mxu1  ;;  %5554 = vmatmul.mubr.f32.gmra.mrb[254].mxu1 %v3986_v1  ;;  %v6010_v8 = vld [vmem:[#allocation2 + $0x49] sm:$0xff] }
 0x628   :  { %8860 = vmatprep.mubr.f32.mxu1 %v12645_v36  ;;  %v4685_v41 = vpop.f32.mrb[86].mxu0  ;;  %v5945_v36 = vld [vmem:[#allocation2 + $0x38] sm:$0xff] }
 0x629   :  { %v13084_v52 = vadd.f32 %v12793_v26, %v4685_v41  ;;  %v4687_v5 = vpop.f32.mrb[87].mxu0  ;;  %6250 = vmatmul.mubr.f32.vlgmr.msra.gmra.mrb[192].mxu0 %v5944_v60  ;;  %v15541_v60 = vld [vmem:[#allocation51_spill] sm:$0xff] }
 0x62a   :  { %v5295_v43 = vpop.f32.mrb[150].mxu1  ;;  %6254 = vmatprep.mubr.f32.mxu0 %v6009_v0  ;;  %v6011_v0 = vld [vmem:[#allocation2 + $0x51] sm:$0xff] }
 0x62b   :  { %v13087_v37 = vadd.f32 %v5295_v43, %v12638_v61  ;;  %v5297_v10 = vpop.f32.mrb[151].mxu1  ;;  %8861 = vmatmul.mubr.f32.vlgmr.msra.gmra.mrb[0].mxu1 %v12657_v7 }
 0x62c   :  { %8863 = vmatprep.mubr.f32.mxu1 %v12660_v31  ;;  %v4690_v1 = vpop.f32.mrb[88].mxu0  ;;  %v5946_v31 = vld [vmem:[#allocation2 + $0x48] sm:$0xff] }
 0x62d   :  { %v13092_v48 = vadd.f32 %v12812_v27, %v4690_v1  ;;  %v4692_v26 = vpop.f32.mrb[89].mxu0  ;;  %6255 = vmatmul.mubr.f32.gmra.mrb[194].mxu0 %v5945_v36  ;;  %v15542_v10 = vld [vmem:[#allocation38_spill] sm:$0xff] }
 0x62e   :  { %v5300_v15 = vpop.f32.mrb[152].mxu1  ;;  %6259 = vmatprep.mubr.f32.mxu0 %v6010_v8  ;;  %v15543_v36 = vld [vmem:[#allocation42_spill] sm:$0xff] }
 0x62f   :  { %v13095_v41 = vadd.f32 %v5300_v15, %v12648_v29  ;;  %v5302_v61 = vpop.f32.mrb[153].mxu1  ;;  %8864 = vmatmul.mubr.f32.gmra.mrb[2].mxu1 %v15541_v60  ;;  %v6012_v15 = vld [vmem:[#allocation2 + $0x61] sm:$0xff]  ;;  %v15544_v60 = vld [vmem:[#allocation55_spill] sm:$0xff] }
 0x630   :  { %8866 = vmatprep.mubr.f32.mxu1 %v12676_v9  ;;  %v4695_v7 = vpop.f32.mrb[90].mxu0  ;;  %v5947_v9 = vld [vmem:[#allocation2 + $0x50] sm:$0xff] }
 0x631   :  { %v13100_v5 = vadd.f32 %v12809_v17, %v4695_v7  ;;  %v4697_v27 = vpop.f32.mrb[91].mxu0  ;;  %6260 = vmatmul.mubr.f32.gmra.mrb[196].mxu0 %v5946_v31 }
 0x632   :  { %v5305_v43 = vpop.f32.mrb[154].mxu1  ;;  %6264 = vmatprep.mubr.f32.mxu0 %v6011_v0  ;;  %v15545_v27 = vld [vmem:[#allocation57_spill] sm:$0xff] }
 0x633   :  { %v13103_v1 = vadd.f32 %v5305_v43, %v15542_v10  ;;  %v5307_v29 = vpop.f32.mrb[155].mxu1  ;;  %8867 = vmatmul.mubr.f32.gmra.mrb[4].mxu1 %v15543_v36  ;;  %v6013_v10 = vld [vmem:[#allocation2 + $0x69] sm:$0xff]  ;;  %v15546_v36 = vld [vmem:[#allocation45_spill] sm:$0xff] }
 0x634   :  { %8869 = vmatprep.mubr.f32.mxu1 %v12692_v59  ;;  %v4700_v26 = vpop.f32.mrb[92].mxu0  ;;  %v5948_v59 = vld [vmem:[#allocation2 + $0x60] sm:$0xff] }
 0x635   :  { %v13108_v8 = vadd.f32 %v12828_v3, %v4700_v26  ;;  %v4702_v17 = vpop.f32.mrb[93].mxu0  ;;  %6265 = vmatmul.mubr.f32.gmra.mrb[198].mxu0 %v5947_v9 }
 0x636   :  { %v5310_v61 = vpop.f32.mrb[156].mxu1  ;;  %6269 = vmatprep.mubr.f32.mxu0 %v6012_v15  ;;  %v15547_v17 = vld [vmem:[#allocation59_spill] sm:$0xff] }
 0x637   :  { %v13111_v7 = vadd.f32 %v5310_v61, %v15544_v60  ;;  %v5312_v31 = vpop.f32.mrb[157].mxu1  ;;  %8870 = vmatmul.mubr.f32.gmra.mrb[6].mxu1 %v15545_v27  ;;  %v6014_v60 = vld [vmem:[#allocation2 + $0x79] sm:$0xff] }
 0x638   :  { %8872 = vmatprep.mubr.f32.mxu1 %v12708_v39  ;;  %v4705_v0 = vpop.f32.mrb[94].mxu0  ;;  %v5949_v39 = vld [vmem:[#allocation2 + $0x68] sm:$0xff]  ;;  %v15548_v27 = vld [vmem:[#allocation61_spill] sm:$0xff] }
 0x639   :  { %v13116_v43 = vadd.f32 %v12825_v46, %v4705_v0  ;;  %v4707_v3 = vpop.f32.mrb[95].mxu0  ;;  %6270 = vmatmul.mubr.f32.gmra.mrb[200].mxu0 %v5948_v59 }
 0x63a   :  { %v5315_v29 = vpop.f32.mrb[158].mxu1  ;;  %6274 = vmatprep.mubr.f32.mxu0 %v6013_v10  ;;  %v15549_v3 = vld [vmem:[#allocation44_spill] sm:$0xff] }
 0x63b   :  { %v13119_v26 = vadd.f32 %v5315_v29, %v15546_v36  ;;  %v5317_v9 = vpop.f32.mrb[159].mxu1  ;;  %8873 = vmatmul.mubr.f32.gmra.mrb[8].mxu1 %v15547_v17  ;;  %v6015_v36 = vld [vmem:[#allocation2 + $0x81] sm:$0xff]  ;;  %v15550_v17 = vld [vmem:[#allocation48_spill] sm:$0xff] }
 0x63c   :  { %8875 = vmatprep.mubr.f32.mxu1 %v12724_v23  ;;  %v4710_v15 = vpop.f32.mrb[96].mxu0  ;;  %v5950_v23 = vld [vmem:[#allocation2 + $0x78] sm:$0xff] }
 0x63d   :  { %v13124_v61 = vadd.f32 %v12844_v25, %v4710_v15  ;;  %v4712_v46 = vpop.f32.mrb[97].mxu0  ;;  %6275 = vmatmul.mubr.f32.gmra.mrb[202].mxu0 %v5949_v39 }
 0x63e   :  { %v5320_v31 = vpop.f32.mrb[160].mxu1  ;;  %6279 = vmatprep.mubr.f32.mxu0 %v6014_v60  ;;  %v15551_v46 = vld [vmem:[#allocation52_spill] sm:$0xff] }
 0x63f   :  { %v13127_v0 = vadd.f32 %v5320_v31, %v15548_v27  ;;  %v5322_v59 = vpop.f32.mrb[161].mxu1  ;;  %8876 = vmatmul.mubr.f32.gmra.mrb[10].mxu1 %v15549_v3  ;;  %v6016_v27 = vld [vmem:[#allocation2 + $0x91] sm:$0xff]  ;;  %v15552_v3 = vld [vmem:[#allocation41_spill] sm:$0xff] }
 0x640   :  { %8878 = vmatprep.mubr.f32.mxu1 %v12740_v57  ;;  %v4715_v10 = vpop.f32.mrb[98].mxu0  ;;  %v5951_v57 = vld [vmem:[#allocation2 + $0x80] sm:$0xff] }
 0x641   :  { %v13132_v29 = vadd.f32 %v12841_v32, %v4715_v10  ;;  %v4717_v25 = vpop.f32.mrb[99].mxu0  ;;  %6280 = vmatmul.mubr.f32.gmra.mrb[204].mxu0 %v5950_v23 }
 0x642   :  { %v5325_v9 = vpop.f32.mrb[162].mxu1  ;;  %6284 = vmatprep.mubr.f32.mxu0 %v6015_v36  ;;  %v15553_v25 = vld [vmem:[#allocation49_spill] sm:$0xff] }
 0x643   :  { %v13135_v15 = vadd.f32 %v5325_v9, %v15550_v17  ;;  %v5327_v39 = vpop.f32.mrb[163].mxu1  ;;  %8879 = vmatmul.mubr.f32.gmra.mrb[12].mxu1 %v15551_v46  ;;  %v6017_v17 = vld [vmem:[#allocation2 + $0x99] sm:$0xff] }
 0x644   :  { %8881 = vmatprep.mubr.f32.mxu1 %v12756_v56  ;;  %v4720_v60 = vpop.f32.mrb[100].mxu0  ;;  %v5952_v56 = vld [vmem:[#allocation2 + $0x90] sm:$0xff]  ;;  %v15554_v46 = vld [vmem:[#allocation21_spill] sm:$0xff] }
 0x645   :  { %v13140_v31 = vadd.f32 %v12860_v30, %v4720_v60  ;;  %v4722_v32 = vpop.f32.mrb[101].mxu0  ;;  %6285 = vmatmul.mubr.f32.gmra.mrb[206].mxu0 %v5951_v57 }
 0x646   :  { %v5330_v59 = vpop.f32.mrb[164].mxu1  ;;  %6289 = vmatprep.mubr.f32.mxu0 %v6016_v27  ;;  %v15555_v32 = vld [vmem:[#allocation25_spill] sm:$0xff] }
 0x647   :  { %v13143_v10 = vadd.f32 %v5330_v59, %v15552_v3  ;;  %v5332_v23 = vpop.f32.mrb[165].mxu1  ;;  %8882 = vmatmul.mubr.f32.gmra.mrb[14].mxu1 %v15553_v25  ;;  %v6018_v3 = vld [vmem:[#allocation2 + $0xa9] sm:$0xff] }
 0x648   :  { %8884 = vmatprep.mubr.f32.mxu1 %v12772_v22  ;;  %v4725_v36 = vpop.f32.mrb[102].mxu0  ;;  %v5953_v22 = vld [vmem:[#allocation2 + $0x98] sm:$0xff]  ;;  %v15556_v25 = vld [vmem:[#allocation46_spill] sm:$0xff] }
 0x649   :  { %v13148_v9 = vadd.f32 %v12857_v35, %v4725_v36  ;;  %v4727_v30 = vpop.f32.mrb[103].mxu0  ;;  %6290 = vmatmul.mubr.f32.gmra.mrb[208].mxu0 %v5952_v56 }
 0x64a   :  { %v5335_v39 = vpop.f32.mrb[166].mxu1  ;;  %6294 = vmatprep.mubr.f32.mxu0 %v6017_v17  ;;  %v15557_v30 = vld [vmem:[#allocation56_spill] sm:$0xff] }
 0x64b   :  { %v13151_v60 = vadd.f32 %v5335_v39, %v15554_v46  ;;  %v5337_v57 = vpop.f32.mrb[167].mxu1  ;;  %8885 = vmatmul.mubr.f32.gmra.mrb[16].mxu1 %v15555_v32  ;;  %v6019_v46 = vld [vmem:[#allocation2 + $0xb1] sm:$0xff] }
 0x64c   :  { %8887 = vmatprep.mubr.f32.mxu1 %v12788_v58  ;;  %v4730_v27 = vpop.f32.mrb[104].mxu0  ;;  %v5954_v58 = vld [vmem:[#allocation2 + $0xa8] sm:$0xff]  ;;  %v15558_v32 = vld [vmem:[#allocation47_spill] sm:$0xff] }
 0x64d   :  { %v13156_v59 = vadd.f32 %v12873_v63, %v4730_v27  ;;  %v4732_v35 = vpop.f32.mrb[105].mxu0  ;;  %6295 = vmatmul.mubr.f32.gmra.mrb[210].mxu0 %v5953_v22 }
 0x64e   :  { %v5340_v23 = vpop.f32.mrb[168].mxu1  ;;  %6299 = vmatprep.mubr.f32.mxu0 %v6018_v3  ;;  %v15559_v35 = vld [vmem:[#allocation50_spill] sm:$0xff] }
 0x64f   :  { %v13159_v36 = vadd.f32 %v5340_v23, %v15556_v25  ;;  %v5342_v56 = vpop.f32.mrb[169].mxu1  ;;  %8888 = vmatmul.mubr.f32.gmra.mrb[18].mxu1 %v15557_v30  ;;  %v6020_v25 = vld [vmem:[#allocation2 + $0xc1] sm:$0xff] }
 0x650   :  { %8890 = vmatprep.mubr.f32.mxu1 %v12804_v6  ;;  %v4735_v17 = vpop.f32.mrb[106].mxu0  ;;  %v5955_v6 = vld [vmem:[#allocation2 + $0xb0] sm:$0xff]  ;;  %v15560_v30 = vld [vmem:[#allocation26_spill] sm:$0xff] }
 0x651   :  { %v13164_v39 = vadd.f32 %v12871_v12, %v4735_v17  ;;  %v4737_v63 = vpop.f32.mrb[107].mxu0  ;;  %6300 = vmatmul.mubr.f32.gmra.mrb[212].mxu0 %v5954_v58 }
 0x652   :  { %v5345_v57 = vpop.f32.mrb[170].mxu1  ;;  %6304 = vmatprep.mubr.f32.mxu0 %v6019_v46  ;;  %v15561_v63 = vld [vmem:[#allocation53_spill] sm:$0xff] }
 0x653   :  { %v13167_v27 = vadd.f32 %v5345_v57, %v15558_v32  ;;  %v5347_v22 = vpop.f32.mrb[171].mxu1  ;;  %8891 = vmatmul.mubr.f32.gmra.mrb[20].mxu1 %v15559_v35  ;;  %v6021_v32 = vld [vmem:[#allocation2 + $0xc9] sm:$0xff]  ;;  %v15562_v35 = vld [vmem:[#allocation20_spill] sm:$0xff] }
 0x654   :  { %8893 = vmatprep.mubr.f32.mxu1 %v12820_v54  ;;  %v4740_v3 = vpop.f32.mrb[108].mxu0  ;;  %v5956_v54 = vld [vmem:[#allocation2 + $0xc0] sm:$0xff] }
 0x655   :  { %v13172_v23 = vadd.f32 %v12882_v28, %v4740_v3  ;;  %v4742_v12 = vpop.f32.mrb[109].mxu0  ;;  %6305 = vmatmul.mubr.f32.gmra.mrb[214].mxu0 %v5955_v6 }
 0x656   :  { %v5350_v56 = vpop.f32.mrb[172].mxu1  ;;  %6309 = vmatprep.mubr.f32.mxu0 %v6020_v25 }
 0x657   :  { %v13175_v17 = vadd.f32 %v5350_v56, %v15560_v30  ;;  %v5352_v58 = vpop.f32.mrb[173].mxu1  ;;  %8894 = vmatmul.mubr.f32.gmra.mrb[22].mxu1 %v15561_v63  ;;  %v6022_v56 = vld [vmem:[#allocation2 + $0xd9] sm:$0xff] }
 0x658   :  { %8896 = vmatprep.mubr.f32.mxu1 %v12836_v38  ;;  %v4745_v46 = vpop.f32.mrb[110].mxu0  ;;  %v5957_v38 = vld [vmem:[#allocation2 + $0xc8] sm:$0xff]  ;;  %v15563_v58 = vld [vmem:[#allocation43_spill] sm:$0xff] }
 0x659   :  { %v13180_v57 = vadd.f32 %v12880_v14, %v4745_v46  ;;  %v4747_v28 = vpop.f32.mrb[111].mxu0  ;;  %6310 = vmatmul.mubr.f32.gmra.mrb[216].mxu0 %v5956_v54  ;;  %v6100_v54 = vld [vmem:[#allocation2 + $0x182] sm:$0xff] }
 0x65a   :  { %v5355_v22 = vpop.f32.mrb[174].mxu1  ;;  %6314 = vmatprep.mubr.f32.mxu0 %v6021_v32  ;;  %v6023_v32 = vld [vmem:[#allocation2 + $0xe1] sm:$0xff] }
 0x65b   :  { %v13183_v3 = vadd.f32 %v5355_v22, %v15562_v35  ;;  %v5357_v6 = vpop.f32.mrb[175].mxu1  ;;  %8897 = vmatmul.mubr.f32.gmra.mrb[24].mxu1 %v12849_v40  ;;  %v6102_v22 = vld [vmem:[#allocation2 + $0x19a] sm:$0xff] }
 0x65c   :  { %8899 = vmatprep.mubr.f32.mxu1 %v12852_v13  ;;  %v4750_v12 = vpop.f32.mrb[112].mxu0  ;;  %v5958_v13 = vld [vmem:[#allocation2 + $0xd8] sm:$0xff]  ;;  %v6101_v6 = vld [vmem:[#allocation2 + $0x18a] sm:$0xff] }
 0x65d   :  { %v13188_v25 = vadd.f32 %v12894_v42, %v4750_v12  ;;  %v4752_v14 = vpop.f32.mrb[113].mxu0  ;;  %6315 = vmatmul.mubr.f32.gmra.mrb[218].mxu0 %v5957_v38 }
 0x65e   :  { %v5360_v30 = vpop.f32.mrb[176].mxu1  ;;  %6319 = vmatprep.mubr.f32.mxu0 %v6022_v56  ;;  %v5959_v14 = vld [vmem:[#allocation2 + $0xe0] sm:$0xff] }
 0x65f   :  { %v13191_v63 = vadd.f32 %v5360_v30, %v15563_v58  ;;  %v5362_v46 = vpop.f32.mrb[177].mxu1  ;;  %8900 = vmatmul.mubr.f32.gmra.mrb[26].mxu1 %v12865_v49  ;;  %v6103_v56 = vld [vmem:[#allocation2 + $0x1a2] sm:$0xff]  ;;  %v6024_v58 = vld [vmem:[#allocation2 + $0xf1] sm:$0xff] }
 0x660   :  { %8902 = vmatprep.mubr.f32.mxu1 %v6100_v54  ;;  %v4755_v40 = vpop.f32.mrb[114].mxu0 }
 0x661   :  { %v13195_v28 = vadd.f32 %v12891_v55, %v4755_v40  ;;  %v4757_v42 = vpop.f32.mrb[115].mxu0  ;;  %6320 = vmatmul.mubr.f32.gmra.mrb[220].mxu0 %v5958_v13  ;;  %v5960_v13 = vld [vmem:[#allocation2 + $0xf0] sm:$0xff] }
 0x662   :  { %v5365_v35 = vpop.f32.mrb[178].mxu1  ;;  %6324 = vmatprep.mubr.f32.mxu0 %v6023_v32 }
 0x663   :  { %v13198_v12 = vadd.f32 %v5365_v35, %v12855_v20  ;;  %v5367_v38 = vpop.f32.mrb[179].mxu1  ;;  %8903 = vmatmul.mubr.f32.gmra.mrb[28].mxu1 %v6101_v6 }
 0x664   :  { %v4760_v49 = vpop.f32.mrb[116].mxu0  ;;  %8905 = vmatprep.mubr.f32.mxu1 %v6102_v22  ;;  %v15565_v38 = vld [vmem:[#allocation65_spill] sm:$0xff] }
 0x665   :  { %v13201_v30 = vadd.f32 %v12909_v21, %v4760_v49  ;;  %v4762_v55 = vpop.f32.mrb[117].mxu0  ;;  %6325 = vmatmul.mubr.f32.gmra.mrb[222].mxu0 %v5959_v14  ;;  %v6025_v21 = vld [vmem:[#allocation2 + $0xf9] sm:$0xff]  ;;  %v15566_v14 = vld [vmem:[#allocation70_spill] sm:$0xff] }
 0x666   :  { %v5370_v46 = vpop.f32.mrb[180].mxu1  ;;  %6329 = vmatprep.mubr.f32.mxu0 %v6024_v58  ;;  %v6026_v55 = vld [vmem:[#allocation2 + $0x109] sm:$0xff] }
 0x667   :  { %v13204_v54 = vadd.f32 %v5370_v46, %v12869_v45  ;;  %v5372_v40 = vpop.f32.mrb[181].mxu1  ;;  %8906 = vmatmul.mubr.f32.gmra.mrb[30].mxu1 %v6103_v56  ;;  %v15564_v45 = vld [vmem:[#allocation19_spill] sm:$0xff]  ;;  %v15567_v46 = vld [vmem:[#allocation18_spill] sm:$0xff] }
 0x668   :  { %8908 = vmatprep.mubr.f32.mxu1 %v12886_v24  ;;  %v4765_v20 = vpop.f32.mrb[118].mxu0  ;;  %v5961_v24 = vld [vmem:[#allocation2 + $0xf8] sm:$0xff] }
 0x669   :  { %v13208_v42 = vadd.f32 %v12906_v16, %v4765_v20  ;;  %v4767_v32 = vpop.f32.mrb[119].mxu0  ;;  %6330 = vmatmul.mubr.f32.gmra.mrb[224].mxu0 %v5960_v13  ;;  %v15568_v20 = vld [vmem:[#allocation33_spill] sm:$0xff]  ;;  %v15569_v13 = vld [vmem:[#allocation67_spill] sm:$0xff] }
 0x66a   :  { %v5375_v22 = vpop.f32.mrb[182].mxu1  ;;  %6334 = vmatprep.mubr.f32.mxu0 %v6025_v21  ;;  %v5962_v21 = vld [vmem:[#allocation2 + $0x108] sm:$0xff] }
 0x66b   :  { %v13211_v35 = vadd.f32 %v5375_v22, %v12878_v50  ;;  %v5377_v6 = vpop.f32.mrb[183].mxu1  ;;  %8909 = vmatmul.mubr.f32.gmra.mrb[32].mxu1 %v15564_v45  ;;  %v15570_v22 = vld [vmem:[#allocation69_spill] sm:$0xff] }
 0x66c   :  { %8911 = vmatprep.mubr.f32.mxu1 %v15565_v38  ;;  %v4770_v49 = vpop.f32.mrb[120].mxu0  ;;  %v6027_v38 = vld [vmem:[#allocation2 + $0x111] sm:$0xff] }
 0x66d   :  { %v13216_v56 = vadd.f32 %v15566_v14, %v4770_v49  ;;  %v4772_v16 = vpop.f32.mrb[121].mxu0  ;;  %6335 = vmatmul.mubr.f32.gmra.mrb[226].mxu0 %v5961_v24  ;;  %v15572_v24 = vld [vmem:[#allocation66_spill] sm:$0xff] }
 0x66e   :  { %v5380_v58 = vpop.f32.mrb[184].mxu1  ;;  %6339 = vmatprep.mubr.f32.mxu0 %v6026_v55  ;;  %v15573_v55 = vld [vmem:[#allocation29_spill] sm:$0xff] }
 0x66f   :  { %v13219_v40 = vadd.f32 %v5380_v58, %v15567_v46  ;;  %v5382_v50 = vpop.f32.mrb[185].mxu1  ;;  %8912 = vmatmul.mubr.f32.gmra.mrb[34].mxu1 %v15568_v20  ;;  %v15574_v58 = vld [vmem:[#allocation40_spill] sm:$0xff]  ;;  %v15575_v20 = vld [vmem:[#allocation73_spill] sm:$0xff] }
 0x670   :  { %8914 = vmatprep.mubr.f32.mxu1 %v15569_v13  ;;  %v4775_v32 = vpop.f32.mrb[122].mxu0  ;;  %v5963_v50 = vld [vmem:[#allocation2 + $0x110] sm:$0xff] }
 0x671   :  { %v13224_v6 = vadd.f32 %v15570_v22, %v4775_v32  ;;  %v4777_v45 = vpop.f32.mrb[123].mxu0  ;;  %6340 = vmatmul.mubr.f32.gmra.mrb[228].mxu0 %v5962_v21  ;;  %v6028_v22 = vld [vmem:[#allocation2 + $0x121] sm:$0xff] }
 0x672   :  { %v5385_v49 = vpop.f32.mrb[186].mxu1  ;;  %6344 = vmatprep.mubr.f32.mxu0 %v6027_v38  ;;  %v15577_v45 = vld [vmem:[#allocation68_spill] sm:$0xff] }
 0x673   :  { %15571 = vst [vmem:[#allocation39_spill] sm:$0xff] %v13224_v6  ;;  %v13227_v14 = vadd.f32 %v5385_v49, %v15572_v24  ;;  %v5387_v16 = vpop.f32.mrb[187].mxu1  ;;  %8915 = vmatmul.mubr.f32.gmra.mrb[36].mxu1 %v15573_v55  ;;  %v15578_v24 = vld [vmem:[#allocation54_spill] sm:$0xff]  ;;  %v5964_v55 = vld [vmem:[#allocation2 + $0x120] sm:$0xff] }
 0x674   :  { %8917 = vmatprep.mubr.f32.mxu1 %v15574_v58  ;;  %v4780_v46 = vpop.f32.mrb[124].mxu0  ;;  %v15579_v58 = vld [vmem:[#allocation72_spill] sm:$0xff] }
 0x675   :  { %v13232_v13 = vadd.f32 %v15575_v20, %v4780_v46  ;;  %v4782_v32 = vpop.f32.mrb[125].mxu0  ;;  %6345 = vmatmul.mubr.f32.gmra.mrb[230].mxu0 %v5963_v50  ;;  %v6029_v20 = vld [vmem:[#allocation2 + $0x129] sm:$0xff] }
 0x676   :  { %v5390_v21 = vpop.f32.mrb[188].mxu1  ;;  %6349 = vmatprep.mubr.f32.mxu0 %v6028_v22  ;;  %v15581_v32 = vld [vmem:[#allocation71_spill] sm:$0xff] }
 0x677   :  { %15576 = vst [vmem:[#allocation51_spill] sm:$0xff] %v13232_v13  ;;  %v13235_v38 = vadd.f32 %v5390_v21, %v15577_v45  ;;  %v5392_v49 = vpop.f32.mrb[189].mxu1  ;;  %8918 = vmatmul.mubr.f32.gmra.mrb[38].mxu1 %v12943_v11  ;;  %v15582_v45 = vld [vmem:[#allocation58_spill] sm:$0xff] }
 0x678   :  { %8920 = vmatprep.mubr.f32.mxu1 %v15578_v24  ;;  %v4785_v16 = vpop.f32.mrb[126].mxu0  ;;  %v5965_v49 = vld [vmem:[#allocation2 + $0x128] sm:$0xff] }
 0x679   :  { %v13240_v6 = vadd.f32 %v15579_v58, %v4785_v16  ;;  %v4787_v46 = vpop.f32.mrb[127].mxu0  ;;  %6350 = vmatmul.mubr.f32.gmra.mrb[232].mxu0 %v5964_v55  ;;  %v15583_v24 = vld [vmem:[#allocation22_spill] sm:$0xff]  ;;  %v6030_v58 = vld [vmem:[#allocation2 + $0x139] sm:$0xff] }
 0x67a   :  { %v5395_v50 = vpop.f32.mrb[190].mxu1  ;;  %6354 = vmatprep.mubr.f32.mxu0 %v6029_v20  ;;  %v15585_v46 = vld [vmem:[#allocation14_spill] sm:$0xff]  ;;  %v15587_v20 = vld [vmem:[#allocation60_spill] sm:$0xff] }
 0x67b   :  { %15580 = vst [vmem:[#allocation38_spill] sm:$0xff] %v13240_v6  ;;  %v13243_v22 = vadd.f32 %v5395_v50, %v15581_v32  ;;  %v5397_v21 = vpop.f32.mrb[191].mxu1  ;;  %8921 = vmatmul.mubr.f32.gmra.mrb[40].mxu1 %v12957_v4  ;;  %v15588_v32 = vld [vmem:[#allocation64_spill] sm:$0xff] }
 0x67c   :  { %8923 = vmatprep.mubr.f32.mxu1 %v15582_v45  ;;  %v8734_v11 = vpop.f32.mrb[128].mxu0  ;;  %v5966_v45 = vld [vmem:[#allocation2 + $0x138] sm:$0xff] }
 0x67d   :  { %v13248_v13 = vadd.f32 %v8734_v11, %v15583_v24  ;;  %v5625_v16 = vpop.f32.mrb[129].mxu0  ;;  %6355 = vmatmul.mubr.f32.gmra.mrb[234].mxu0 %v5965_v49  ;;  %v6031_v24 = vld [vmem:[#allocation2 + $0x141] sm:$0xff] }
 0x67e   :  { %v5400_v55 = vpop.f32.mrb[192].mxu1  ;;  %v13251_v6 = vadd.f32 %v5625_v16, %v15585_v46  ;;  %6359 = vmatprep.mubr.f32.mxu0 %v6030_v58  ;;  %v15590_v16 = vld [vmem:[#allocation27_spill] sm:$0xff]  ;;  %v15591_v58 = vld [vmem:[#allocation62_spill] sm:$0xff] }
 0x67f   :  { %15584 = vst [vmem:[#allocation42_spill] sm:$0xff] %v13248_v13  ;;  %v13254_v50 = vadd.f32 %v5400_v55, %v15587_v20  ;;  %8924 = vmatmul.mubr.f32.gmra.mrb[42].mxu1 %v12971_v44  ;;  %v5402_v4 = vpop.f32.mrb[193].mxu1  ;;  %v15592_v44 = vld [vmem:[#allocation13_spill] sm:$0xff] }
 0x680   :  { %15586 = vst [vmem:[#allocation55_spill] sm:$0xff] %v13251_v6  ;;  %8926 = vmatprep.mubr.f32.mxu1 %v15588_v32  ;;  %v8737_v21 = vpop.f32.mrb[130].mxu0  ;;  %v15593_v4 = vld [vmem:[#allocation74_spill] sm:$0xff]  ;;  %v5967_v6 = vld [vmem:[#allocation2 + $0x140] sm:$0xff] }
 0x681   :  { %v13259_v11 = vadd.f32 %v8737_v21, %v12995_v51  ;;  %v5635_v49 = vpop.f32.mrb[131].mxu0  ;;  %6360 = vmatmul.mubr.f32.gmra.mrb[236].mxu0 %v5966_v45  ;;  %v6032_v45 = vld [vmem:[#allocation2 + $0x151] sm:$0xff] }
 0x682   :  { %v5405_v13 = vpop.f32.mrb[194].mxu1  ;;  %v13262_v46 = vadd.f32 %v5635_v49, %v15590_v16  ;;  %6364 = vmatprep.mubr.f32.mxu0 %v6031_v24 }
 0x683   :  { %15589 = vst [vmem:[#allocation57_spill] sm:$0xff] %v13259_v11  ;;  %v13265_v55 = vadd.f32 %v5405_v13, %v15591_v58  ;;  %8927 = vmatmul.mubr.f32.gmra.mrb[44].mxu1 %v15592_v44  ;;  %v5407_v20 = vpop.f32.mrb[195].mxu1  ;;  %v15595_v13 = vld [vmem:[#allocation63_spill] sm:$0xff]  ;;  %v15596_v58 = vld [vmem:[#allocation30_spill] sm:$0xff]  ;;  %v15597_v44 = vld [vmem:[#allocation24_spill] sm:$0xff] }
 0x684   :  { %8929 = vmatprep.mubr.f32.mxu1 %v15593_v4  ;;  %v8740_v32 = vpop.f32.mrb[132].mxu0  ;;  %v5968_v4 = vld [vmem:[#allocation2 + $0x150] sm:$0xff] }
 0x685   :  { %v13270_v51 = vadd.f32 %v8740_v32, %v13022_v33  ;;  %v5645_v21 = vpop.f32.mrb[133].mxu0  ;;  %6365 = vmatmul.mubr.f32.gmra.mrb[238].mxu0 %v5967_v6  ;;  %v6033_v32 = vld [vmem:[#allocation2 + $0x159] sm:$0xff] }
 0x686   :  { %v5410_v11 = vpop.f32.mrb[196].mxu1  ;;  %v13273_v49 = vadd.f32 %v5645_v21, %v13009_v18  ;;  %6369 = vmatprep.mubr.f32.mxu0 %v6032_v45 }
 0x687   :  { %15594 = vst [vmem:[#allocation45_spill] sm:$0xff] %v13270_v51  ;;  %v13276_v24 = vadd.f32 %v5410_v11, %v15595_v13  ;;  %v5412_v16 = vpop.f32.mrb[197].mxu1  ;;  %8930 = vmatmul.mubr.f32.gmra.mrb[46].mxu1 %v15596_v58  ;;  %v15599_v11 = vld [vmem:[#allocation17_spill] sm:$0xff]  ;;  %v15600_v13 = vld [vmem:[#allocation31_spill] sm:$0xff] }
 0x688   :  { %8932 = vmatprep.mubr.f32.mxu1 %v15597_v44  ;;  %v8743_v20 = vpop.f32.mrb[134].mxu0  ;;  %v15601_v16 = vld [vmem:[#allocation75_spill] sm:$0xff]  ;;  %v5969_v44 = vld [vmem:[#allocation2 + $0x158] sm:$0xff] }
 0x689   :  { %v13281_v33 = vadd.f32 %v8743_v20, %v13047_v2  ;;  %v5655_v6 = vpop.f32.mrb[135].mxu0  ;;  %6370 = vmatmul.mubr.f32.gmra.mrb[240].mxu0 %v5968_v4  ;;  %v6034_v4 = vld [vmem:[#allocation2 + $0x169] sm:$0xff] }
 0x68a   :  { %v5415_v51 = vpop.f32.mrb[198].mxu1  ;;  %v13284_v18 = vadd.f32 %v5655_v6, %v13035_v62  ;;  %6374 = vmatprep.mubr.f32.mxu0 %v6033_v32 }
 0x68b   :  { %15598 = vst [vmem:[#allocation59_spill] sm:$0xff] %v13281_v33  ;;  %v13287_v21 = vadd.f32 %v5415_v51, %v15599_v11  ;;  %v5417_v45 = vpop.f32.mrb[199].mxu1  ;;  %8933 = vmatmul.mubr.f32.gmra.mrb[48].mxu1 %v15600_v13  ;;  %v15603_v51 = vld [vmem:[#allocation15_spill] sm:$0xff]  ;;  %v15604_v11 = vld [vmem:[#allocation32_spill] sm:$0xff] }
 0x68c   :  { %8935 = vmatprep.mubr.f32.mxu1 %v15601_v16  ;;  %v8746_v58 = vpop.f32.mrb[136].mxu0  ;;  %v15605_v45 = vld [vmem:[#allocation76_spill] sm:$0xff]  ;;  %v5970_v16 = vld [vmem:[#allocation2 + $0x168] sm:$0xff] }
 0x68d   :  { %v13292_v2 = vadd.f32 %v8746_v58, %v13071_v53  ;;  %v5665_v20 = vpop.f32.mrb[137].mxu0  ;;  %6375 = vmatmul.mubr.f32.gmra.mrb[242].mxu0 %v5969_v44  ;;  %v6035_v44 = vld [vmem:[#allocation2 + $0x171] sm:$0xff] }
 0x68e   :  { %v5420_v33 = vpop.f32.mrb[200].mxu1  ;;  %v13295_v62 = vadd.f32 %v5665_v20, %v13059_v47  ;;  %6379 = vmatprep.mubr.f32.mxu0 %v6034_v4 }
 0x68f   :  { %15602 = vst [vmem:[#allocation61_spill] sm:$0xff] %v13292_v2  ;;  %v13298_v6 = vadd.f32 %v5420_v33, %v15603_v51  ;;  %v5422_v32 = vpop.f32.mrb[201].mxu1  ;;  %8936 = vmatmul.mubr.f32.gmra.mrb[50].mxu1 %v15604_v11  ;;  %v15607_v33 = vld [vmem:[#allocation16_spill] sm:$0xff]  ;;  %v15608_v51 = vld [vmem:[#allocation34_spill] sm:$0xff] }
 0x690   :  { %8938 = vmatprep.mubr.f32.mxu1 %v15605_v45  ;;  %v8749_v13 = vpop.f32.mrb[138].mxu0  ;;  %v15609_v32 = vld [vmem:[#allocation78_spill] sm:$0xff]  ;;  %v5971_v45 = vld [vmem:[#allocation2 + $0x170] sm:$0xff] }
 0x691   :  { %v13303_v53 = vadd.f32 %v8749_v13, %v13087_v37  ;;  %v5675_v58 = vpop.f32.mrb[139].mxu0  ;;  %6380 = vmatmul.mubr.f32.gmra.mrb[244].mxu0 %v5970_v16  ;;  %v6036_v16 = vld [vmem:[#allocation2 + $0x181] sm:$0xff] }
 0x692   :  { %v5425_v2 = vpop.f32.mrb[202].mxu1  ;;  %v13306_v47 = vadd.f32 %v5675_v58, %v13080_v34  ;;  %6384 = vmatprep.mubr.f32.mxu0 %v6035_v44 }
 0x693   :  { %15606 = vst [vmem:[#allocation44_spill] sm:$0xff] %v13303_v53  ;;  %v13309_v20 = vadd.f32 %v5425_v2, %v15607_v33  ;;  %v5427_v4 = vpop.f32.mrb[203].mxu1  ;;  %8939 = vmatmul.mubr.f32.gmra.mrb[52].mxu1 %v15608_v51  ;;  %v15611_v2 = vld [vmem:[#allocation28_spill] sm:$0xff]  ;;  %v15612_v33 = vld [vmem:[#allocation35_spill] sm:$0xff] }
 0x694   :  { %8941 = vmatprep.mubr.f32.mxu1 %v15609_v32  ;;  %v8752_v11 = vpop.f32.mrb[140].mxu0  ;;  %v15613_v4 = vld [vmem:[#allocation80_spill] sm:$0xff]  ;;  %v5972_v32 = vld [vmem:[#allocation2 + $0x180] sm:$0xff] }
 0x695   :  { %v13314_v37 = vadd.f32 %v8752_v11, %v13103_v1  ;;  %v5685_v13 = vpop.f32.mrb[141].mxu0  ;;  %6385 = vmatmul.mubr.f32.gmra.mrb[246].mxu0 %v5971_v45  ;;  %v6037_v45 = vld [vmem:[#allocation2 + $0x189] sm:$0xff] }
 0x696   :  { %v5430_v53 = vpop.f32.mrb[204].mxu1  ;;  %v13317_v34 = vadd.f32 %v5685_v13, %v13095_v41  ;;  %6389 = vmatprep.mubr.f32.mxu0 %v6036_v16 }
 0x697   :  { %15610 = vst [vmem:[#allocation48_spill] sm:$0xff] %v13314_v37  ;;  %v13320_v58 = vadd.f32 %v5430_v53, %v15611_v2  ;;  %v5432_v44 = vpop.f32.mrb[205].mxu1  ;;  %8942 = vmatmul.mubr.f32.gmra.mrb[54].mxu1 %v15612_v33  ;;  %v15615_v53 = vld [vmem:[#allocation77_spill] sm:$0xff]  ;;  %v15616_v2 = vld [vmem:[#allocation36_spill] sm:$0xff]  ;;  %v15617_v33 = vld [vmem:[#allocation82_spill] sm:$0xff] }
 0x698   :  { %8944 = vmatprep.mubr.f32.mxu1 %v15613_v4  ;;  %v8755_v51 = vpop.f32.mrb[142].mxu0  ;;  %v6038_v44 = vld [vmem:[#allocation2 + $0x199] sm:$0xff] }
 0x699   :  { %v13325_v1 = vadd.f32 %v8755_v51, %v13119_v26  ;;  %v5695_v11 = vpop.f32.mrb[143].mxu0  ;;  %6390 = vmatmul.mubr.f32.gmra.mrb[248].mxu0 %v5972_v32  ;;  %v5973_v26 = vld [vmem:[#allocation2 + $0x188] sm:$0xff] }
 0x69a   :  { %v5435_v37 = vpop.f32.mrb[206].mxu1  ;;  %v13328_v41 = vadd.f32 %v5695_v11, %v13111_v7  ;;  %6394 = vmatprep.mubr.f32.mxu0 %v6037_v45  ;;  %v15618_v11 = vld [vmem:[#allocation79_spill] sm:$0xff] }
 0x69b   :  { %15614 = vst [vmem:[#allocation52_spill] sm:$0xff] %v13325_v1  ;;  %v13331_v13 = vadd.f32 %v5435_v37, %v15615_v53  ;;  %v5437_v16 = vpop.f32.mrb[207].mxu1  ;;  %8945 = vmatmul.mubr.f32.gmra.mrb[56].mxu1 %v15616_v2  ;;  %v5974_v37 = vld [vmem:[#allocation2 + $0x198] sm:$0xff]  ;;  %v6039_v2 = vld [vmem:[#allocation2 + $0x1a1] sm:$0xff] }
 0x69c   :  { %8947 = vmatprep.mubr.f32.mxu1 %v15617_v33  ;;  %v8758_v4 = vpop.f32.mrb[144].mxu0  ;;  %v6132_v16 = vld [vmem:[#allocation2 + $0x332] sm:$0xff] }
 0x69d   :  { %v13336_v51 = vadd.f32 %v8758_v4, %v13135_v15  ;;  %v5705_v32 = vpop.f32.mrb[145].mxu0  ;;  %6395 = vmatmul.mubr.f32.gmra.mrb[250].mxu0 %v5973_v26  ;;  %v6134_v26 = vld [vmem:[#allocation2 + $0x34a] sm:$0xff] }
 0x69e   :  { %v5440_v1 = vpop.f32.mrb[208].mxu1  ;;  %v13339_v7 = vadd.f32 %v5705_v32, %v13127_v0  ;;  %6399 = vmatprep.mubr.f32.mxu0 %v6038_v44  ;;  %v6133_v32 = vld [vmem:[#allocation2 + $0x33a] sm:$0xff] }
 0x69f   :  { %v13342_v45 = vadd.f32 %v5440_v1, %v15618_v11  ;;  %v5442_v53 = vpop.f32.mrb[209].mxu1  ;;  %8948 = vmatmul.mubr.f32.gmra.mrb[58].mxu1 %v13073_v19  ;;  %v15621_v1 = vld [vmem:[#allocation81_spill] sm:$0xff] }
 0x6a0   :  { %8950 = vmatprep.mubr.f32.mxu1 %v6132_v16  ;;  %v8761_v33 = vpop.f32.mrb[146].mxu0 }
 0x6a1   :  { %v13346_v15 = vadd.f32 %v8761_v33, %v13151_v60  ;;  %v5715_v4 = vpop.f32.mrb[147].mxu0  ;;  %6400 = vmatmul.mubr.f32.gmra.mrb[252].mxu0 %v5974_v37  ;;  %v13357_v33 = vld [vmem:[#allocation2 + $0x8] sm:$0xff] }
 0x6a2   :  { %v5445_v0 = vpop.f32.mrb[210].mxu1  ;;  %v13349_v44 = vadd.f32 %v5715_v4, %v13143_v10  ;;  %6404 = vmatprep.mubr.f32.mxu0 %v6039_v2  ;;  %v6040_v37 = vld [vmem:[#allocation2 + $0x1e1] sm:$0xff]  ;;  %v6135_v10 = vld [vmem:[#allocation2 + $0x352] sm:$0xff] }
 0x6a3   :  { %15619 = vst [vmem:[#allocation41_spill] sm:$0xff] %v13346_v15  ;;  %v13352_v11 = vadd.f32 %v5445_v0, %v15621_v1  ;;  %v5447_v19 = vpop.f32.mrb[211].mxu1  ;;  %8951 = vmatmul.mubr.f32.gmra.mrb[60].mxu1 %v6133_v32  ;;  %v15623_v0 = vld [vmem:[#allocation37_spill] sm:$0xff] }
 0x6a4   :  { %15620 = vst [vmem:[#allocation49_spill] sm:$0xff] %v13349_v44  ;;  %v8764_v53 = vpop.f32.mrb[148].mxu0  ;;  %8953 = vmatprep.mubr.f32.mxu1 %v6134_v26 }
 0x6a5   :  { %v13355_v16 = vadd.f32 %v8764_v53, %v13167_v27  ;;  %v5725_v60 = vpop.f32.mrb[149].mxu0  ;;  %6405 = vmatmul.mubr.f32.gmra.mrb[254].mxu0 %v13357_v33  ;;  %v5976_v27 = vld [vmem:[#allocation2 + $0x1e0] sm:$0xff] }
 0x6a6   :  { %v5450_v4 = vpop.f32.mrb[212].mxu1  ;;  %v13361_v2 = vadd.f32 %v5725_v60, %v13159_v36  ;;  %6409 = vmatprep.mubr.f32.mxu0 %v6040_v37 }
 0x6a7   :  { %15622 = vst [vmem:[#allocation21_spill] sm:$0xff] %v13355_v16  ;;  %v13364_v1 = vadd.f32 %v5450_v4, %v15623_v0  ;;  %v5452_v32 = vpop.f32.mrb[213].mxu1  ;;  %8954 = vmatmul.mubr.f32.gmra.mrb[62].mxu1 %v6135_v10  ;;  %v6041_v16 = vld [vmem:[#allocation2 + $0x1e9] sm:$0xff] }
 0x6a8   :  { %v8767_v26 = vpop.f32.mrb[150].mxu0  ;;  %v5977_v4 = vld [vmem:[#allocation2 + $0x1e8] sm:$0xff] }
 0x6a9   :  { %v13367_v19 = vadd.f32 %v8767_v26, %v13183_v3  ;;  %v5735_v53 = vpop.f32.mrb[151].mxu0  ;;  %6410 = vmatmul.mubr.f32.gmra.mrb[0].mxu0 %v5976_v27  ;;  %v6042_v3 = vld [vmem:[#allocation2 + $0x1f9] sm:$0xff] }
 0x6aa   :  { %v5455_v15 = vpop.f32.mrb[214].mxu1  ;;  %v13370_v44 = vadd.f32 %v5735_v53, %v13175_v17  ;;  %6414 = vmatprep.mubr.f32.mxu0 %v6041_v16 }
 0x6ab   :  { %v13373_v36 = vadd.f32 %v5455_v15, %v13084_v52  ;;  %v5457_v60 = vpop.f32.mrb[215].mxu1  ;;  %v5978_v15 = vld [vmem:[#allocation2 + $0x1f8] sm:$0xff] }
 0x6ac   :  { %v8770_v37 = vpop.f32.mrb[152].mxu0 }
 0x6ad   :  { %v13376_v10 = vadd.f32 %v8770_v37, %v13198_v12  ;;  %v5745_v0 = vpop.f32.mrb[153].mxu0  ;;  %6415 = vmatmul.mubr.f32.gmra.mrb[2].mxu0 %v5977_v4  ;;  %v6043_v12 = vld [vmem:[#allocation2 + $0x201] sm:$0xff] }
 0x6ae   :  { %v5460_v32 = vpop.f32.mrb[216].mxu1  ;;  %v13379_v26 = vadd.f32 %v5745_v0, %v13191_v63  ;;  %6419 = vmatprep.mubr.f32.mxu0 %v6042_v3  ;;  %v5979_v0 = vld [vmem:[#allocation2 + $0x200] sm:$0xff] }
 0x6af   :  { %v13382_v17 = vadd.f32 %v5460_v32, %v13092_v48  ;;  %v5462_v16 = vpop.f32.mrb[217].mxu1 }
 0x6b0   :  { %v8773_v52 = vpop.f32.mrb[154].mxu0 }
 0x6b1   :  { %v13385_v27 = vadd.f32 %v8773_v52, %v13211_v35  ;;  %v5755_v53 = vpop.f32.mrb[155].mxu0  ;;  %6420 = vmatmul.mubr.f32.gmra.mrb[4].mxu0 %v5978_v15  ;;  %v6044_v35 = vld [vmem:[#allocation2 + $0x211] sm:$0xff] }
 0x6b2   :  { %v5465_v60 = vpop.f32.mrb[218].mxu1  ;;  %v13388_v37 = vadd.f32 %v5755_v53, %v13204_v54  ;;  %6424 = vmatprep.mubr.f32.mxu0 %v6043_v12  ;;  %v5980_v53 = vld [vmem:[#allocation2 + $0x210] sm:$0xff] }
 0x6b3   :  { %v13391_v63 = vadd.f32 %v5465_v60, %v13100_v5  ;;  %v5467_v4 = vpop.f32.mrb[219].mxu1 }
 0x6b4   :  { %v8776_v48 = vpop.f32.mrb[156].mxu0 }
 0x6b5   :  { %v13394_v3 = vadd.f32 %v8776_v48, %v13227_v14  ;;  %v5765_v32 = vpop.f32.mrb[157].mxu0  ;;  %6425 = vmatmul.mubr.f32.gmra.mrb[6].mxu0 %v5979_v0  ;;  %v6045_v14 = vld [vmem:[#allocation2 + $0x219] sm:$0xff] }
 0x6b6   :  { %v5470_v16 = vpop.f32.mrb[220].mxu1  ;;  %v13397_v52 = vadd.f32 %v5765_v32, %v13219_v40  ;;  %6429 = vmatprep.mubr.f32.mxu0 %v6044_v35  ;;  %v5981_v32 = vld [vmem:[#allocation2 + $0x218] sm:$0xff] }
 0x6b7   :  { %v13400_v54 = vadd.f32 %v5470_v16, %v13108_v8  ;;  %v5472_v15 = vpop.f32.mrb[221].mxu1 }
 0x6b8   :  { %v8779_v5 = vpop.f32.mrb[158].mxu0 }
 0x6b9   :  { %v13403_v12 = vadd.f32 %v8779_v5, %v13243_v22  ;;  %v5775_v60 = vpop.f32.mrb[159].mxu0  ;;  %6430 = vmatmul.mubr.f32.gmra.mrb[8].mxu0 %v5980_v53  ;;  %v6046_v22 = vld [vmem:[#allocation2 + $0x229] sm:$0xff] }
 0x6ba   :  { %v5475_v4 = vpop.f32.mrb[222].mxu1  ;;  %v13406_v48 = vadd.f32 %v5775_v60, %v13235_v38  ;;  %6434 = vmatprep.mubr.f32.mxu0 %v6045_v14  ;;  %v5982_v60 = vld [vmem:[#allocation2 + $0x228] sm:$0xff] }
 0x6bb   :  { %v13409_v40 = vadd.f32 %v5475_v4, %v13116_v43  ;;  %v5477_v0 = vpop.f32.mrb[223].mxu1 }
 0x6bc   :  { %v8782_v8 = vpop.f32.mrb[160].mxu0 }
 0x6bd   :  { %v13412_v35 = vadd.f32 %v8782_v8, %v13265_v55  ;;  %v5785_v16 = vpop.f32.mrb[161].mxu0  ;;  %6435 = vmatmul.mubr.f32.gmra.mrb[10].mxu0 %v5981_v32  ;;  %v6047_v55 = vld [vmem:[#allocation2 + $0x231] sm:$0xff] }
 0x6be   :  { %v5480_v15 = vpop.f32.mrb[224].mxu1  ;;  %v13415_v5 = vadd.f32 %v5785_v16, %v13254_v50  ;;  %6439 = vmatprep.mubr.f32.mxu0 %v6046_v22  ;;  %v5983_v16 = vld [vmem:[#allocation2 + $0x230] sm:$0xff] }
 0x6bf   :  { %v13418_v38 = vadd.f32 %v5480_v15, %v13124_v61  ;;  %v5482_v53 = vpop.f32.mrb[225].mxu1 }
 0x6c0   :  { %v8785_v43 = vpop.f32.mrb[162].mxu0 }
 0x6c1   :  { %v13421_v14 = vadd.f32 %v8785_v43, %v13287_v21  ;;  %v5795_v4 = vpop.f32.mrb[163].mxu0  ;;  %6440 = vmatmul.mubr.f32.gmra.mrb[12].mxu0 %v5982_v60  ;;  %v6048_v21 = vld [vmem:[#allocation2 + $0x241] sm:$0xff] }
 0x6c2   :  { %v5485_v0 = vpop.f32.mrb[226].mxu1  ;;  %v13424_v8 = vadd.f32 %v5795_v4, %v13276_v24  ;;  %6444 = vmatprep.mubr.f32.mxu0 %v6047_v55  ;;  %v5984_v4 = vld [vmem:[#allocation2 + $0x240] sm:$0xff] }
 0x6c3   :  { %v13427_v50 = vadd.f32 %v5485_v0, %v13132_v29  ;;  %v5487_v32 = vpop.f32.mrb[227].mxu1 }
 0x6c4   :  { %v8788_v61 = vpop.f32.mrb[164].mxu0 }
 0x6c5   :  { %v13430_v22 = vadd.f32 %v8788_v61, %v13309_v20  ;;  %v5805_v15 = vpop.f32.mrb[165].mxu0  ;;  %6445 = vmatmul.mubr.f32.gmra.mrb[14].mxu0 %v5983_v16  ;;  %v6049_v20 = vld [vmem:[#allocation2 + $0x249] sm:$0xff] }
 0x6c6   :  { %v5490_v53 = vpop.f32.mrb[228].mxu1  ;;  %v13433_v43 = vadd.f32 %v5805_v15, %v13298_v6  ;;  %6449 = vmatprep.mubr.f32.mxu0 %v6048_v21 }
 0x6c7   :  { %v13436_v24 = vadd.f32 %v5490_v53, %v13140_v31  ;;  %v5492_v60 = vpop.f32.mrb[229].mxu1  ;;  %v5985_v31 = vld [vmem:[#allocation2 + $0x248] sm:$0xff] }
 0x6c8   :  { %v8791_v29 = vpop.f32.mrb[166].mxu0 }
 0x6c9   :  { %v13439_v55 = vadd.f32 %v8791_v29, %v13331_v13  ;;  %v5815_v0 = vpop.f32.mrb[167].mxu0  ;;  %6450 = vmatmul.mubr.f32.gmra.mrb[16].mxu0 %v5984_v4  ;;  %v6050_v13 = vld [vmem:[#allocation2 + $0x259] sm:$0xff] }
 0x6ca   :  { %v5495_v32 = vpop.f32.mrb[230].mxu1  ;;  %v13442_v61 = vadd.f32 %v5815_v0, %v13320_v58  ;;  %6454 = vmatprep.mubr.f32.mxu0 %v6049_v20 }
 0x6cb   :  { %v5496_v6 = vadd.f32 %v5495_v32, %v13148_v9  ;;  %v5497_v16 = vpop.f32.mrb[231].mxu1  ;;  %v5986_v9 = vld [vmem:[#allocation2 + $0x258] sm:$0xff] }
 0x6cc   :  { %v8794_v15 = vpop.f32.mrb[168].mxu0 }
 0x6cd   :  { %v13446_v21 = vadd.f32 %v8794_v15, %v13352_v11  ;;  %v5825_v53 = vpop.f32.mrb[169].mxu0  ;;  %6455 = vmatmul.mubr.f32.gmra.mrb[18].mxu0 %v5985_v31  ;;  %v6051_v11 = vld [vmem:[#allocation2 + $0x261] sm:$0xff] }
 0x6ce   :  { %v5500_v60 = vpop.f32.mrb[232].mxu1  ;;  %v13449_v29 = vadd.f32 %v5825_v53, %v13342_v45  ;;  %6459 = vmatprep.mubr.f32.mxu0 %v6050_v13 }
 0x6cf   :  { %15624 = vst [vmem:[#allocation25_spill] sm:$0xff] %v13446_v21  ;;  %v13452_v58 = vadd.f32 %v5500_v60, %v13156_v59  ;;  %v5502_v4 = vpop.f32.mrb[233].mxu1  ;;  %v5987_v59 = vld [vmem:[#allocation2 + $0x260] sm:$0xff]  ;;  %v15668_v21 = vld [vmem:[#allocation52_spill] sm:$0xff] }
 0x6d0   :  { %15625 = vst [vmem:[#allocation46_spill] sm:$0xff] %v13449_v29  ;;  %v8797_v0 = vpop.f32.mrb[170].mxu0  ;;  %v15672_v29 = vld [vmem:[#allocation49_spill] sm:$0xff] }
 0x6d1   :  { %v13455_v20 = vadd.f32 %v8797_v0, %v13373_v36  ;;  %v5835_v32 = vpop.f32.mrb[171].mxu0  ;;  %6460 = vmatmul.mubr.f32.gmra.mrb[20].mxu0 %v5986_v9  ;;  %v6052_v36 = vld [vmem:[#allocation2 + $0x271] sm:$0xff] }
 0x6d2   :  { %v5505_v16 = vpop.f32.mrb[234].mxu1  ;;  %v13458_v15 = vadd.f32 %v5835_v32, %v13364_v1  ;;  %6464 = vmatprep.mubr.f32.mxu0 %v6051_v11  ;;  %v5988_v11 = vld [vmem:[#allocation2 + $0x270] sm:$0xff] }
 0x6d3   :  { %15626 = vst [vmem:[#allocation56_spill] sm:$0xff] %v13455_v20  ;;  %v5506_v45 = vadd.f32 %v5505_v16, %v13164_v39  ;;  %v5507_v31 = vpop.f32.mrb[235].mxu1 }
 0x6d4   :  { %15627 = vst [vmem:[#allocation47_spill] sm:$0xff] %v13458_v15  ;;  %v8800_v53 = vpop.f32.mrb[172].mxu0 }
 0x6d5   :  { %v13462_v13 = vadd.f32 %v8800_v53, %v13391_v63  ;;  %v5845_v60 = vpop.f32.mrb[173].mxu0  ;;  %6465 = vmatmul.mubr.f32.gmra.mrb[22].mxu0 %v5987_v59  ;;  %v6053_v63 = vld [vmem:[#allocation2 + $0x279] sm:$0xff] }
 0x6d6   :  { %v5510_v4 = vpop.f32.mrb[236].mxu1  ;;  %v13465_v0 = vadd.f32 %v5845_v60, %v13382_v17  ;;  %6469 = vmatprep.mubr.f32.mxu0 %v6052_v36  ;;  %v5989_v36 = vld [vmem:[#allocation2 + $0x278] sm:$0xff] }
 0x6d7   :  { %15628 = vst [vmem:[#allocation50_spill] sm:$0xff] %v13462_v13  ;;  %v5511_v1 = vadd.f32 %v5510_v4, %v13172_v23  ;;  %v5512_v9 = vpop.f32.mrb[237].mxu1 }
 0x6d8   :  { %15629 = vst [vmem:[#allocation26_spill] sm:$0xff] %v13465_v0  ;;  %v8803_v32 = vpop.f32.mrb[174].mxu0 }
 0x6d9   :  { %v13469_v39 = vadd.f32 %v8803_v32, %v13409_v40  ;;  %v5855_v16 = vpop.f32.mrb[175].mxu0  ;;  %6470 = vmatmul.mubr.f32.gmra.mrb[24].mxu0 %v5988_v11  ;;  %v6054_v40 = vld [vmem:[#allocation2 + $0x289] sm:$0xff] }
 0x6da   :  { %v5515_v31 = vpop.f32.mrb[238].mxu1  ;;  %v13472_v53 = vadd.f32 %v5855_v16, %v13400_v54  ;;  %6474 = vmatprep.mubr.f32.mxu0 %v6053_v63  ;;  %v5990_v63 = vld [vmem:[#allocation2 + $0x288] sm:$0xff] }
 0x6db   :  { %15630 = vst [vmem:[#allocation53_spill] sm:$0xff] %v13469_v39  ;;  %v5516_v17 = vadd.f32 %v5515_v31, %v13180_v57  ;;  %v5517_v59 = vpop.f32.mrb[239].mxu1 }
 0x6dc   :  { %15631 = vst [vmem:[#allocation20_spill] sm:$0xff] %v13472_v53  ;;  %v8806_v60 = vpop.f32.mrb[176].mxu0  ;;  %v6055_v59 = vld [vmem:[#allocation2 + $0x291] sm:$0xff] }
 0x6dd   :  { %v13476_v23 = vadd.f32 %v8806_v60, %v13427_v50  ;;  %v5865_v4 = vpop.f32.mrb[177].mxu0  ;;  %6475 = vmatmul.mubr.f32.gmra.mrb[26].mxu0 %v5989_v36 }
 0x6de   :  { %v5520_v9 = vpop.f32.mrb[240].mxu1  ;;  %v13479_v32 = vadd.f32 %v5865_v4, %v13418_v38  ;;  %6479 = vmatprep.mubr.f32.mxu0 %v6054_v40  ;;  %v5991_v40 = vld [vmem:[#allocation2 + $0x290] sm:$0xff] }
 0x6df   :  { %15632 = vst [vmem:[#allocation43_spill] sm:$0xff] %v13476_v23  ;;  %v5521_v54 = vadd.f32 %v5520_v9, %v13188_v25  ;;  %v5522_v11 = vpop.f32.mrb[241].mxu1  ;;  %v6056_v9 = vld [vmem:[#allocation2 + $0x2a1] sm:$0xff] }
 0x6e0   :  { %15633 = vst [vmem:[#allocation19_spill] sm:$0xff] %v13479_v32  ;;  %v8809_v16 = vpop.f32.mrb[178].mxu0 }
 0x6e1   :  { %v13482_v57 = vadd.f32 %v8809_v16, %v5496_v6  ;;  %v5875_v31 = vpop.f32.mrb[179].mxu0  ;;  %6480 = vmatmul.mubr.f32.gmra.mrb[28].mxu0 %v5990_v63 }
 0x6e2   :  { %v5525_v50 = vpop.f32.mrb[242].mxu1  ;;  %v13485_v60 = vadd.f32 %v5875_v31, %v13436_v24  ;;  %6484 = vmatprep.mubr.f32.mxu0 %v6055_v59  ;;  %v5992_v31 = vld [vmem:[#allocation2 + $0x2a0] sm:$0xff] }
 0x6e3   :  { %15634 = vst [vmem:[#allocation65_spill] sm:$0xff] %v13482_v57  ;;  %v5526_v36 = vadd.f32 %v5525_v50, %v13195_v28  ;;  %v5527_v38 = vpop.f32.mrb[243].mxu1  ;;  %v6057_v50 = vld [vmem:[#allocation2 + $0x2a9] sm:$0xff] }
 0x6e4   :  { %15635 = vst [vmem:[#allocation70_spill] sm:$0xff] %v13485_v60  ;;  %v8812_v4 = vpop.f32.mrb[180].mxu0  ;;  %v15658_v57 = vld [vmem:[#allocation59_spill] sm:$0xff] }
 0x6e5   :  { %v13488_v23 = vadd.f32 %v8812_v4, %v5506_v45  ;;  %v5885_v25 = vpop.f32.mrb[181].mxu0  ;;  %6485 = vmatmul.mubr.f32.gmra.mrb[30].mxu0 %v5991_v40 }
 0x6e6   :  { %v5530_v6 = vpop.f32.mrb[244].mxu1  ;;  %v13491_v11 = vadd.f32 %v5885_v25, %v13452_v58  ;;  %6489 = vmatprep.mubr.f32.mxu0 %v6056_v9  ;;  %v5993_v25 = vld [vmem:[#allocation2 + $0x2a8] sm:$0xff] }
 0x6e7   :  { %15636 = vst [vmem:[#allocation18_spill] sm:$0xff] %v13488_v23  ;;  %v5531_v16 = vadd.f32 %v5530_v6, %v13201_v30  ;;  %v5532_v24 = vpop.f32.mrb[245].mxu1  ;;  %v6058_v6 = vld [vmem:[#allocation2 + $0x2b9] sm:$0xff] }
 0x6e8   :  { %15637 = vst [vmem:[#allocation33_spill] sm:$0xff] %v13491_v11  ;;  %v8815_v63 = vpop.f32.mrb[182].mxu0 }
 0x6e9   :  { %v13494_v59 = vadd.f32 %v8815_v63, %v5516_v17  ;;  %v5895_v28 = vpop.f32.mrb[183].mxu0  ;;  %6490 = vmatmul.mubr.f32.gmra.mrb[32].mxu0 %v5992_v31 }
 0x6ea   :  { %v5535_v45 = vpop.f32.mrb[246].mxu1  ;;  %v13496_v38 = vadd.f32 %v5895_v28, %v5511_v1  ;;  %6494 = vmatprep.mubr.f32.mxu0 %v6057_v50  ;;  %v5994_v28 = vld [vmem:[#allocation2 + $0x2b8] sm:$0xff] }
 0x6eb   :  { %15638 = vst [vmem:[#allocation67_spill] sm:$0xff] %v13494_v59  ;;  %v5536_v4 = vadd.f32 %v5535_v45, %v13208_v42  ;;  %v5537_v40 = vpop.f32.mrb[247].mxu1  ;;  %v6059_v45 = vld [vmem:[#allocation2 + $0x2c1] sm:$0xff] }
 0x6ec   :  { %15639 = vst [vmem:[#allocation69_spill] sm:$0xff] %v13496_v38  ;;  %v8818_v58 = vpop.f32.mrb[184].mxu0  ;;  %v15657_v38 = vld [vmem:[#allocation45_spill] sm:$0xff] }
 0x6ed   :  { %v13499_v9 = vadd.f32 %v8818_v58, %v5526_v36  ;;  %v5905_v30 = vpop.f32.mrb[185].mxu0  ;;  %6495 = vmatmul.mubr.f32.gmra.mrb[34].mxu0 %v5993_v25  ;;  %v15644_v58 = vld [vmem:[#allocation39_spill] sm:$0xff] }
 0x6ee   :  { %v5540_v24 = vpop.f32.mrb[248].mxu1  ;;  %v13501_v17 = vadd.f32 %v5905_v30, %v5521_v54  ;;  %6499 = vmatprep.mubr.f32.mxu0 %v6058_v6  ;;  %v5995_v30 = vld [vmem:[#allocation2 + $0x2c0] sm:$0xff] }
 0x6ef   :  { %15640 = vst [vmem:[#allocation66_spill] sm:$0xff] %v13499_v9  ;;  %v5541_v63 = vadd.f32 %v5540_v24, %v13216_v56  ;;  %v5542_v31 = vpop.f32.mrb[249].mxu1  ;;  %v6060_v24 = vld [vmem:[#allocation2 + $0x2d1] sm:$0xff] }
 0x6f0   :  { %15641 = vst [vmem:[#allocation29_spill] sm:$0xff] %v13501_v17  ;;  %v8821_v1 = vpop.f32.mrb[186].mxu0 }
 0x6f1   :  { %v13504_v50 = vadd.f32 %v8821_v1, %v5536_v4  ;;  %v5915_v42 = vpop.f32.mrb[187].mxu0  ;;  %6500 = vmatmul.mubr.f32.gmra.mrb[36].mxu0 %v5994_v28  ;;  %v15647_v1 = vld [vmem:[#allocation51_spill] sm:$0xff] }
 0x6f2   :  { %v5545_v40 = vpop.f32.mrb[250].mxu1  ;;  %v13506_v36 = vadd.f32 %v5915_v42, %v5531_v16  ;;  %6504 = vmatprep.mubr.f32.mxu0 %v6059_v45  ;;  %v5996_v42 = vld [vmem:[#allocation2 + $0x2d0] sm:$0xff] }
 0x6f3   :  { %15642 = vst [vmem:[#allocation40_spill] sm:$0xff] %v13504_v50  ;;  %v5546_v25 = vadd.f32 %v5545_v40, %v15644_v58  ;;  %v5547_v9 = vpop.f32.mrb[251].mxu1  ;;  %v6061_v40 = vld [vmem:[#allocation2 + $0x2d9] sm:$0xff] }
 0x6f4   :  { %15643 = vst [vmem:[#allocation73_spill] sm:$0xff] %v13506_v36  ;;  %v8824_v54 = vpop.f32.mrb[188].mxu0  ;;  %v5997_v36 = vld [vmem:[#allocation2 + $0x2d8] sm:$0xff] }
 0x6f5   :  { %v13509_v6 = vadd.f32 %v8824_v54, %v5546_v25  ;;  %v5925_v56 = vpop.f32.mrb[189].mxu0  ;;  %6505 = vmatmul.mubr.f32.gmra.mrb[38].mxu0 %v5995_v30  ;;  %v15649_v25 = vld [vmem:[#allocation38_spill] sm:$0xff] }
 0x6f6   :  { %v5550_v31 = vpop.f32.mrb[252].mxu1  ;;  %v13511_v4 = vadd.f32 %v5925_v56, %v5541_v63  ;;  %6509 = vmatprep.mubr.f32.mxu0 %v6060_v24  ;;  %v6062_v24 = vld [vmem:[#allocation2 + $0x2e9] sm:$0xff] }
 0x6f7   :  { %15645 = vst [vmem:[#allocation68_spill] sm:$0xff] %v13509_v6  ;;  %v5551_v28 = vadd.f32 %v5550_v31, %v15647_v1  ;;  %v5552_v50 = vpop.f32.mrb[253].mxu1 }
 0x6f8   :  { %15646 = vst [vmem:[#allocation54_spill] sm:$0xff] %v13511_v4  ;;  %v8827_v16 = vpop.f32.mrb[190].mxu0  ;;  %v5998_v4 = vld [vmem:[#allocation2 + $0x2e8] sm:$0xff] }
 0x6f9   :  { %v5935_v45 = vpop.f32.mrb[191].mxu0  ;;  %6510 = vmatmul.mubr.f32.gmra.mrb[40].mxu0 %v5996_v42 }
 0x6fa   :  { %v5555_v9 = vpop.f32.mrb[254].mxu1  ;;  %v13514_v58 = vadd.f32 %v5935_v45, %v5551_v28  ;;  %6514 = vmatprep.mubr.f32.mxu0 %v6061_v40  ;;  %v6063_v45 = vld [vmem:[#allocation2 + $0x2f1] sm:$0xff] }
 0x6fb   :  { %v5556_v54 = vadd.f32 %v5555_v9, %v15649_v25  ;;  %v5557_v30 = vpop.f32.mrb[255].mxu1  ;;  %v15651_v40 = vld [vmem:[#allocation55_spill] sm:$0xff] }
 0x6fc   :  { %15648 = vst [vmem:[#allocation72_spill] sm:$0xff] %v13514_v58  ;;  %v6251_v6 = vpop.f32.mrb[192].mxu0 }
 0x6fd   :  { %v13517_v63 = vadd.f32 %v8827_v16, %v5556_v54  ;;  %v6253_v56 = vpop.f32.mrb[193].mxu0  ;;  %6515 = vmatmul.mubr.f32.gmra.mrb[42].mxu0 %v5997_v36  ;;  %v15652_v16 = vld [vmem:[#allocation42_spill] sm:$0xff] }
 0x6fe   :  { %v8862_v50 = vpop.f32.mrb[0].mxu1  ;;  %6519 = vmatprep.mubr.f32.mxu0 %v6062_v24  ;;  %v5999_v56 = vld [vmem:[#allocation2 + $0x2f0] sm:$0xff] }
 0x6ff   :  { %15650 = vst [vmem:[#allocation71_spill] sm:$0xff] %v13517_v63  ;;  %v6636_v31 = vpop.f32.mrb[1].mxu1 }
 0x700   :  { %v6637_v1 = vadd.f32 %v6636_v31, %v6251_v6  ;;  %v6256_v42 = vpop.f32.mrb[194].mxu0  ;;  %v6064_v6 = vld [vmem:[#allocation2 + $0x301] sm:$0xff] }
 0x701   :  { %v6642_v17 = vadd.f32 %v8862_v50, %v6256_v42  ;;  %v6258_v28 = vpop.f32.mrb[195].mxu0  ;;  %6520 = vmatmul.mubr.f32.gmra.mrb[44].mxu0 %v5998_v4  ;;  %v6000_v42 = vld [vmem:[#allocation2 + $0x300] sm:$0xff] }
 0x702   :  { %v13520_v9 = vadd.f32 %v6637_v1, %v15651_v40  ;;  %v8865_v25 = vpop.f32.mrb[2].mxu1  ;;  %6524 = vmatprep.mubr.f32.mxu0 %v6063_v45 }
 0x703   :  { %v13523_v54 = vadd.f32 %v6642_v17, %v15652_v16  ;;  %v6646_v36 = vpop.f32.mrb[3].mxu1  ;;  %v6065_v17 = vld [vmem:[#allocation2 + $0x309] sm:$0xff]  ;;  %v15654_v16 = vld [vmem:[#allocation57_spill] sm:$0xff] }
 0x704   :  { %v6261_v30 = vpop.f32.mrb[196].mxu0 }
 0x705   :  { %v6647_v24 = vadd.f32 %v6646_v36, %v6261_v30  ;;  %v6263_v63 = vpop.f32.mrb[197].mxu0  ;;  %6525 = vmatmul.mubr.f32.gmra.mrb[46].mxu0 %v5999_v56  ;;  %v6001_v30 = vld [vmem:[#allocation2 + $0x308] sm:$0xff] }
 0x706   :  { %v8868_v31 = vpop.f32.mrb[4].mxu1  ;;  %6529 = vmatprep.mubr.f32.mxu0 %v6064_v6 }
 0x707   :  { %v13526_v4 = vadd.f32 %v6647_v24, %v13262_v46  ;;  %v6656_v50 = vpop.f32.mrb[5].mxu1  ;;  %v6066_v46 = vld [vmem:[#allocation2 + $0x319] sm:$0xff] }
 0x708   :  { %v6266_v1 = vpop.f32.mrb[198].mxu0 }
 0x709   :  { %15653 = vst [vmem:[#allocation58_spill] sm:$0xff] %v13526_v4  ;;  %v6652_v28 = vadd.f32 %v8865_v25, %v6266_v1  ;;  %v6268_v45 = vpop.f32.mrb[199].mxu0  ;;  %6530 = vmatmul.mubr.f32.gmra.mrb[48].mxu0 %v6000_v42  ;;  %v6002_v42 = vld [vmem:[#allocation2 + $0x318] sm:$0xff] }
 0x70a   :  { %v8871_v40 = vpop.f32.mrb[6].mxu1  ;;  %6534 = vmatprep.mubr.f32.mxu0 %v6065_v17 }
 0x70b   :  { %v13529_v58 = vadd.f32 %v6652_v28, %v15654_v16  ;;  %v6666_v63 = vpop.f32.mrb[7].mxu1  ;;  %v6067_v28 = vld [vmem:[#allocation2 + $0x321] sm:$0xff] }
 0x70c   :  { %v6271_v36 = vpop.f32.mrb[200].mxu0 }
 0x70d   :  { %15655 = vst [vmem:[#allocation22_spill] sm:$0xff] %v13529_v58  ;;  %v6657_v56 = vadd.f32 %v6656_v50, %v6271_v36  ;;  %v6273_v6 = vpop.f32.mrb[201].mxu0  ;;  %6535 = vmatmul.mubr.f32.gmra.mrb[50].mxu0 %v6001_v30  ;;  %v6003_v30 = vld [vmem:[#allocation2 + $0x320] sm:$0xff] }
 0x70e   :  { %v8874_v24 = vpop.f32.mrb[8].mxu1  ;;  %6539 = vmatprep.mubr.f32.mxu0 %v6066_v46 }
 0x70f   :  { %v13532_v59 = vadd.f32 %v6657_v56, %v13273_v49  ;;  %v6676_v25 = vpop.f32.mrb[9].mxu1  ;;  %v6068_v49 = vld [vmem:[#allocation2 + $0x331] sm:$0xff] }
 0x710   :  { %v6276_v1 = vpop.f32.mrb[202].mxu0 }
 0x711   :  { %15656 = vst [vmem:[#allocation14_spill] sm:$0xff] %v13532_v59  ;;  %v6662_v45 = vadd.f32 %v8868_v31, %v6276_v1  ;;  %v6278_v17 = vpop.f32.mrb[203].mxu0  ;;  %6540 = vmatmul.mubr.f32.gmra.mrb[52].mxu0 %v6002_v42  ;;  %v6004_v42 = vld [vmem:[#allocation2 + $0x330] sm:$0xff] }
 0x712   :  { %v8877_v16 = vpop.f32.mrb[10].mxu1  ;;  %6544 = vmatprep.mubr.f32.mxu0 %v6067_v28 }
 0x713   :  { %v13535_v23 = vadd.f32 %v6662_v45, %v15657_v38  ;;  %v6686_v50 = vpop.f32.mrb[11].mxu1  ;;  %v6069_v38 = vld [vmem:[#allocation2 + $0x339] sm:$0xff] }
 0x714   :  { %v6281_v36 = vpop.f32.mrb[204].mxu0 }
 0x715   :  { %v6667_v6 = vadd.f32 %v6666_v63, %v6281_v36  ;;  %v6283_v46 = vpop.f32.mrb[205].mxu0  ;;  %6545 = vmatmul.mubr.f32.gmra.mrb[54].mxu0 %v6003_v30  ;;  %v6070_v36 = vld [vmem:[#allocation2 + $0x349] sm:$0xff] }
 0x716   :  { %v8880_v56 = vpop.f32.mrb[12].mxu1  ;;  %6549 = vmatprep.mubr.f32.mxu0 %v6068_v49  ;;  %v6005_v46 = vld [vmem:[#allocation2 + $0x338] sm:$0xff] }
 0x717   :  { %v13538_v11 = vadd.f32 %v6667_v6, %v13284_v18  ;;  %v6696_v31 = vpop.f32.mrb[13].mxu1  ;;  %v6006_v6 = vld [vmem:[#allocation2 + $0x348] sm:$0xff] }
 0x718   :  { %v6286_v1 = vpop.f32.mrb[206].mxu0 }
 0x719   :  { %v6672_v17 = vadd.f32 %v8871_v40, %v6286_v1  ;;  %v6288_v28 = vpop.f32.mrb[207].mxu0  ;;  %6550 = vmatmul.mubr.f32.gmra.mrb[56].mxu0 %v6004_v42  ;;  %v6071_v42 = vld [vmem:[#allocation2 + $0x351] sm:$0xff] }
 0x71a   :  { %v8883_v45 = vpop.f32.mrb[14].mxu1  ;;  %6554 = vmatprep.mubr.f32.mxu0 %v6069_v38 }
 0x71b   :  { %v13541_v60 = vadd.f32 %v6672_v17, %v15658_v57  ;;  %v6706_v63 = vpop.f32.mrb[15].mxu1  ;;  %v15659_v17 = vld [vmem:[#allocation61_spill] sm:$0xff] }
 0x71c   :  { %v6291_v30 = vpop.f32.mrb[208].mxu0 }
 0x71d   :  { %v6677_v49 = vadd.f32 %v6676_v25, %v6291_v30  ;;  %v6293_v32 = vpop.f32.mrb[209].mxu0  ;;  %6555 = vmatmul.mubr.f32.gmra.mrb[58].mxu0 %v6005_v46 }
 0x71e   :  { %v8886_v18 = vpop.f32.mrb[16].mxu1  ;;  %6559 = vmatprep.mubr.f32.mxu0 %v6070_v36 }
 0x71f   :  { %v13544_v40 = vadd.f32 %v6677_v49, %v13295_v62  ;;  %v6716_v1 = vpop.f32.mrb[17].mxu1 }
 0x720   :  { %v6296_v28 = vpop.f32.mrb[210].mxu0 }
 0x721   :  { %v6682_v38 = vadd.f32 %v8874_v24, %v6296_v28  ;;  %v6298_v39 = vpop.f32.mrb[211].mxu0  ;;  %6560 = vmatmul.mubr.f32.gmra.mrb[60].mxu0 %v6006_v6 }
 0x722   :  { %v8889_v57 = vpop.f32.mrb[18].mxu1  ;;  %6564 = vmatprep.mubr.f32.mxu0 %v6071_v42  ;;  %v15662_v42 = vld [vmem:[#allocation44_spill] sm:$0xff] }
 0x723   :  { %v13547_v53 = vadd.f32 %v6682_v38, %v15659_v17  ;;  %v6726_v25 = vpop.f32.mrb[19].mxu1 }
 0x724   :  { %v6301_v32 = vpop.f32.mrb[212].mxu0 }
 0x725   :  { %15660 = vst [vmem:[#allocation60_spill] sm:$0xff] %v13547_v53  ;;  %v6687_v30 = vadd.f32 %v6686_v50, %v6301_v32  ;;  %v6303_v46 = vpop.f32.mrb[213].mxu0  ;;  %6565 = vmatmul.mubr.f32.gmra.mrb[62].mxu0 %v13357_v33 }
 0x726   :  { %v13550_v36 = vpop.f32.mrb[20].mxu1 }
 0x727   :  { %v13553_v62 = vadd.f32 %v6687_v30, %v13306_v47  ;;  %v6736_v49 = vpop.f32.mrb[21].mxu1 }
 0x728   :  { %v6306_v24 = vpop.f32.mrb[214].mxu0 }
 0x729   :  { %15661 = vst [vmem:[#allocation64_spill] sm:$0xff] %v13553_v62  ;;  %v6692_v39 = vadd.f32 %v8877_v16, %v6306_v24  ;;  %v6308_v6 = vpop.f32.mrb[215].mxu0 }
 0x72a   :  { %v13555_v28 = vpop.f32.mrb[22].mxu1  ;;  %v15665_v6 = vld [vmem:[#allocation48_spill] sm:$0xff] }
 0x72b   :  { %v13558_v38 = vadd.f32 %v6692_v39, %v15662_v42  ;;  %v6746_v17 = vpop.f32.mrb[23].mxu1 }
 0x72c   :  { %v6311_v13 = vpop.f32.mrb[216].mxu0 }
 0x72d   :  { %15663 = vst [vmem:[#allocation27_spill] sm:$0xff] %v13558_v38  ;;  %v6697_v50 = vadd.f32 %v6696_v31, %v6311_v13  ;;  %v6313_v32 = vpop.f32.mrb[217].mxu0 }
 0x72e   :  { %v13560_v46 = vpop.f32.mrb[24].mxu1 }
 0x72f   :  { %v13563_v33 = vadd.f32 %v6697_v50, %v13317_v34  ;;  %v13565_v47 = vpop.f32.mrb[25].mxu1 }
 0x730   :  { %v6316_v30 = vpop.f32.mrb[218].mxu0 }
 0x731   :  { %15664 = vst [vmem:[#allocation62_spill] sm:$0xff] %v13563_v33  ;;  %v6702_v0 = vadd.f32 %v8880_v56, %v6316_v30  ;;  %v6318_v16 = vpop.f32.mrb[219].mxu0  ;;  %v15674_v33 = vld [vmem:[#allocation41_spill] sm:$0xff] }
 0x732   :  { %v13567_v24 = vpop.f32.mrb[26].mxu1 }
 0x733   :  { %v13570_v20 = vadd.f32 %v6702_v0, %v15665_v6  ;;  %v13572_v39 = vpop.f32.mrb[27].mxu1 }
 0x734   :  { %v6321_v42 = vpop.f32.mrb[220].mxu0 }
 0x735   :  { %15666 = vst [vmem:[#allocation13_spill] sm:$0xff] %v13570_v20  ;;  %v6707_v13 = vadd.f32 %v6706_v63, %v6321_v42  ;;  %v6323_v31 = vpop.f32.mrb[221].mxu0 }
 0x736   :  { %v13574_v32 = vpop.f32.mrb[28].mxu1 }
 0x737   :  { %v13577_v34 = vadd.f32 %v6707_v13, %v13328_v41  ;;  %v13579_v50 = vpop.f32.mrb[29].mxu1 }
 0x738   :  { %v6326_v15 = vpop.f32.mrb[222].mxu0 }
 0x739   :  { %15667 = vst [vmem:[#allocation74_spill] sm:$0xff] %v13577_v34  ;;  %v6712_v56 = vadd.f32 %v8883_v45, %v6326_v15  ;;  %v6328_v30 = vpop.f32.mrb[223].mxu0 }
 0x73a   :  { %v13581_v16 = vpop.f32.mrb[30].mxu1 }
 0x73b   :  { %v13584_v0 = vadd.f32 %v6712_v56, %v15668_v21  ;;  %v13586_v6 = vpop.f32.mrb[31].mxu1 }
 0x73c   :  { %v6331_v20 = vpop.f32.mrb[224].mxu0 }
 0x73d   :  { %15669 = vst [vmem:[#allocation63_spill] sm:$0xff] %v13584_v0  ;;  %v6717_v63 = vadd.f32 %v6716_v1, %v6331_v20  ;;  %v6333_v42 = vpop.f32.mrb[225].mxu0 }
 0x73e   :  { %v13588_v31 = vpop.f32.mrb[32].mxu1 }
 0x73f   :  { %v13591_v41 = vadd.f32 %v6717_v63, %v13339_v7  ;;  %v13593_v13 = vpop.f32.mrb[33].mxu1 }
 0x740   :  { %v6336_v34 = vpop.f32.mrb[226].mxu0 }
 0x741   :  { %15670 = vst [vmem:[#allocation30_spill] sm:$0xff] %v13591_v41  ;;  %v6722_v15 = vadd.f32 %v8886_v18, %v6336_v34  ;;  %v6338_v45 = vpop.f32.mrb[227].mxu0 }
 0x742   :  { %v13595_v30 = vpop.f32.mrb[34].mxu1 }
 0x743   :  { %v13598_v21 = vadd.f32 %v6722_v15, %v13336_v51  ;;  %v13600_v56 = vpop.f32.mrb[35].mxu1 }
 0x744   :  { %v6341_v0 = vpop.f32.mrb[228].mxu0 }
 0x745   :  { %15671 = vst [vmem:[#allocation24_spill] sm:$0xff] %v13598_v21  ;;  %v6727_v20 = vadd.f32 %v6726_v25, %v6341_v0  ;;  %v6343_v1 = vpop.f32.mrb[229].mxu0 }
 0x746   :  { %v13602_v42 = vpop.f32.mrb[36].mxu1 }
 0x747   :  { %v13605_v7 = vadd.f32 %v6727_v20, %v15672_v29  ;;  %v13607_v63 = vpop.f32.mrb[37].mxu1 }
 0x748   :  { %v6346_v41 = vpop.f32.mrb[230].mxu0 }
 0x749   :  { %15673 = vst [vmem:[#allocation17_spill] sm:$0xff] %v13605_v7  ;;  %v6732_v18 = vadd.f32 %v8889_v57, %v6346_v41  ;;  %v6348_v34 = vpop.f32.mrb[231].mxu0 }
 0x74a   :  { %v13609_v45 = vpop.f32.mrb[38].mxu1 }
 0x74b   :  { %v13612_v51 = vadd.f32 %v6732_v18, %v15674_v33  ;;  %v13614_v15 = vpop.f32.mrb[39].mxu1  ;;  %v15678_v33 = vld [vmem:[#allocation21_spill] sm:$0xff] }
 0x74c   :  { %v6351_v21 = vpop.f32.mrb[232].mxu0 }
 0x74d   :  { %15675 = vst [vmem:[#allocation31_spill] sm:$0xff] %v13612_v51  ;;  %v6737_v25 = vadd.f32 %v6736_v49, %v6351_v21  ;;  %v6353_v0 = vpop.f32.mrb[233].mxu0 }
 0x74e   :  { %v13616_v1 = vpop.f32.mrb[40].mxu1 }
 0x74f   :  { %15676 = vst [vmem:[#allocation75_spill] sm:$0xff] %v13616_v1  ;;  %v13619_v29 = vadd.f32 %v6737_v25, %v13361_v2  ;;  %v13621_v20 = vpop.f32.mrb[41].mxu1 }
 0x750   :  { %v6356_v7 = vpop.f32.mrb[234].mxu0 }
 0x751   :  { %15677 = vst [vmem:[#allocation15_spill] sm:$0xff] %v13619_v29  ;;  %v6742_v57 = vadd.f32 %v13550_v36, %v6356_v7  ;;  %v6358_v41 = vpop.f32.mrb[235].mxu0 }
 0x752   :  { %v13624_v34 = vpop.f32.mrb[42].mxu1 }
 0x753   :  { %v13627_v18 = vadd.f32 %v6742_v57, %v15678_v33  ;;  %v13629_v51 = vpop.f32.mrb[43].mxu1 }
 0x754   :  { %v6361_v49 = vpop.f32.mrb[236].mxu0 }
 0x755   :  { %v6747_v21 = vadd.f32 %v6746_v17, %v6361_v49  ;;  %v6363_v0 = vpop.f32.mrb[237].mxu0 }
 0x756   :  { %v13631_v1 = vpop.f32.mrb[44].mxu1 }
 0x757   :  { %15679 = vst [vmem:[#allocation32_spill] sm:$0xff] %v13631_v1  ;;  %v13634_v2 = vadd.f32 %v6747_v21, %v13370_v44  ;;  %v13636_v25 = vpop.f32.mrb[45].mxu1 }
 0x758   :  { %v6366_v29 = vpop.f32.mrb[238].mxu0 }
 0x759   :  { %15680 = vst [vmem:[#allocation76_spill] sm:$0xff] %v13634_v2  ;;  %v6752_v36 = vadd.f32 %v13555_v28, %v6366_v29  ;;  %v6368_v7 = vpop.f32.mrb[239].mxu0 }
 0x75a   :  { %v13639_v41 = vpop.f32.mrb[46].mxu1 }
 0x75b   :  { %15681 = vst [vmem:[#allocation16_spill] sm:$0xff] %v13639_v41  ;;  %v13642_v57 = vadd.f32 %v6752_v36, %v13367_v19  ;;  %v13644_v33 = vpop.f32.mrb[47].mxu1 }
 0x75c   :  { %v6371_v17 = vpop.f32.mrb[240].mxu0 }
 0x75d   :  { %v6757_v49 = vadd.f32 %v13565_v47, %v6371_v17  ;;  %v6373_v0 = vpop.f32.mrb[241].mxu0 }
 0x75e   :  { %v13647_v1 = vpop.f32.mrb[48].mxu1 }
 0x75f   :  { %15682 = vst [vmem:[#allocation34_spill] sm:$0xff] %v13647_v1  ;;  %v13650_v44 = vadd.f32 %v6757_v49, %v13379_v26  ;;  %v13652_v21 = vpop.f32.mrb[49].mxu1 }
 0x760   :  { %v6376_v28 = vpop.f32.mrb[242].mxu0 }
 0x761   :  { %v6762_v29 = vadd.f32 %v13560_v46, %v6376_v28  ;;  %v6378_v7 = vpop.f32.mrb[243].mxu0 }
 0x762   :  { %v13655_v41 = vpop.f32.mrb[50].mxu1 }
 0x763   :  { %15683 = vst [vmem:[#allocation78_spill] sm:$0xff] %v13655_v41  ;;  %v13658_v19 = vadd.f32 %v6762_v29, %v13376_v10  ;;  %v13660_v36 = vpop.f32.mrb[51].mxu1 }
 0x764   :  { %v6381_v47 = vpop.f32.mrb[244].mxu0 }
 0x765   :  { %v6767_v17 = vadd.f32 %v13572_v39, %v6381_v47  ;;  %v6383_v0 = vpop.f32.mrb[245].mxu0 }
 0x766   :  { %v13663_v1 = vpop.f32.mrb[52].mxu1 }
 0x767   :  { %15684 = vst [vmem:[#allocation28_spill] sm:$0xff] %v13663_v1  ;;  %v13666_v26 = vadd.f32 %v6767_v17, %v13388_v37  ;;  %v13668_v49 = vpop.f32.mrb[53].mxu1 }
 0x768   :  { %v6386_v46 = vpop.f32.mrb[246].mxu0 }
 0x769   :  { %15685 = vst [vmem:[#allocation35_spill] sm:$0xff] %v13666_v26  ;;  %v6772_v28 = vadd.f32 %v13567_v24, %v6386_v46  ;;  %v6388_v7 = vpop.f32.mrb[247].mxu0 }
 0x76a   :  { %v13671_v41 = vpop.f32.mrb[54].mxu1 }
 0x76b   :  { %15686 = vst [vmem:[#allocation80_spill] sm:$0xff] %v13671_v41  ;;  %v13674_v10 = vadd.f32 %v6772_v28, %v13385_v27  ;;  %v13676_v29 = vpop.f32.mrb[55].mxu1 }
 0x76c   :  { %v6391_v39 = vpop.f32.mrb[248].mxu0 }
 0x76d   :  { %v6777_v47 = vadd.f32 %v13579_v50, %v6391_v39  ;;  %v6393_v0 = vpop.f32.mrb[249].mxu0 }
 0x76e   :  { %v13679_v1 = vpop.f32.mrb[56].mxu1 }
 0x76f   :  { %15687 = vst [vmem:[#allocation77_spill] sm:$0xff] %v13679_v1  ;;  %v13682_v37 = vadd.f32 %v6777_v47, %v13397_v52  ;;  %v13684_v17 = vpop.f32.mrb[57].mxu1 }
 0x770   :  { %v6396_v24 = vpop.f32.mrb[250].mxu0 }
 0x771   :  { %v6782_v46 = vadd.f32 %v13574_v32, %v6396_v24  ;;  %v6398_v7 = vpop.f32.mrb[251].mxu0 }
 0x772   :  { %v13687_v41 = vpop.f32.mrb[58].mxu1 }
 0x773   :  { %15688 = vst [vmem:[#allocation36_spill] sm:$0xff] %v13687_v41  ;;  %v13690_v27 = vadd.f32 %v6782_v46, %v13394_v3  ;;  %v13692_v28 = vpop.f32.mrb[59].mxu1 }
 0x774   :  { %v6401_v50 = vpop.f32.mrb[252].mxu0 }
 0x775   :  { %v6787_v39 = vadd.f32 %v13586_v6, %v6401_v50  ;;  %v6403_v0 = vpop.f32.mrb[253].mxu0 }
 0x776   :  { %v13695_v1 = vpop.f32.mrb[60].mxu1 }
 0x777   :  { %15689 = vst [vmem:[#allocation82_spill] sm:$0xff] %v13695_v1  ;;  %v13698_v52 = vadd.f32 %v6787_v39, %v13406_v48  ;;  %v13700_v47 = vpop.f32.mrb[61].mxu1 }
 0x778   :  { %15691 = vst [vmem:[#allocation81_spill] sm:$0xff] %v13700_v47  ;;  %v6406_v32 = vpop.f32.mrb[254].mxu0 }
 0x779   :  { %15690 = vst [vmem:[#allocation79_spill] sm:$0xff] %v13698_v52  ;;  %v6792_v24 = vadd.f32 %v13581_v16, %v6406_v32  ;;  %v6408_v7 = vpop.f32.mrb[255].mxu0 }
 0x77a   :  { %v13703_v41 = vpop.f32.mrb[62].mxu1 }
 0x77b   :  { %15692 = vst [vmem:[#allocation37_spill] sm:$0xff] %v13703_v41  ;;  %v13706_v3 = vadd.f32 %v6792_v24, %v13403_v12  ;;  %v13708_v46 = vpop.f32.mrb[63].mxu1 }
 0x77c   :  { %v6411_v6 = vpop.f32.mrb[0].mxu0 }
 0x77d   :  { %v6797_v50 = vadd.f32 %v13593_v13, %v6411_v6  ;;  %v6413_v0 = vpop.f32.mrb[1].mxu0  ;;  %v7021_v13 = vadd.f32 %v13523_v54, %v13520_v9 }
 0x77f   :  { %v13712_v48 = vadd.f32 %v6797_v50, %v13415_v5 }
 0x780   :  { %v6416_v39 = vpop.f32.mrb[2].mxu0 }
 0x781   :  { %v6802_v1 = vadd.f32 %v13588_v31, %v6416_v39  ;;  %v6418_v47 = vpop.f32.mrb[3].mxu0  ;;  %v7022_v31 = vadd.f32 %v7021_v13, %v13526_v4 }
 0x783   :  { %v13716_v16 = vadd.f32 %v6802_v1, %v13412_v35  ;;  %v7023_v1 = vadd.f32 %v7022_v31, %v13529_v58 }
 0x784   :  { %v6421_v32 = vpop.f32.mrb[4].mxu0 }
 0x785   :  { %v6807_v12 = vadd.f32 %v13600_v56, %v6421_v32  ;;  %v6423_v24 = vpop.f32.mrb[5].mxu0 }
 0x787   :  { %v13720_v7 = vadd.f32 %v6807_v12, %v13424_v8  ;;  %v7024_v8 = vadd.f32 %v7023_v1, %v13532_v59 }
 0x788   :  { %v6426_v41 = vpop.f32.mrb[6].mxu0 }
 0x789   :  { %15693 = vst [vmem:[#allocation39_spill] sm:$0xff] %v13720_v7  ;;  %v6812_v5 = vadd.f32 %v13595_v30, %v6426_v41  ;;  %v6428_v6 = vpop.f32.mrb[7].mxu0  ;;  %v7025_v30 = vadd.f32 %v7024_v8, %v13535_v23 }
 0x78b   :  { %v13727_v47 = vadd.f32 %v6812_v5, %v13421_v14  ;;  %v7026_v14 = vadd.f32 %v7025_v30, %v13538_v11  ;;  %v15695_v30 = vld [vmem:[#allocation62_spill] sm:$0xff] }
 0x78c   :  { %v6431_v35 = vpop.f32.mrb[8].mxu0 }
 0x78d   :  { %v6817_v56 = vadd.f32 %v13607_v63, %v6431_v35  ;;  %v6433_v50 = vpop.f32.mrb[9].mxu0  ;;  %v7027_v63 = vadd.f32 %v7026_v14, %v13541_v60 }
 0x78f   :  { %v13733_v0 = vadd.f32 %v6817_v56, %v13433_v43  ;;  %v7028_v43 = vadd.f32 %v7027_v63, %v13544_v40  ;;  %v15698_v63 = vld [vmem:[#allocation75_spill] sm:$0xff] }
 0x790   :  { %v6436_v39 = vpop.f32.mrb[10].mxu0 }
 0x791   :  { %v6822_v41 = vadd.f32 %v13602_v42, %v6436_v39  ;;  %v6438_v32 = vpop.f32.mrb[11].mxu0  ;;  %v7029_v42 = vadd.f32 %v7028_v43, %v13547_v53  ;;  %v15699_v43 = vld [vmem:[#allocation74_spill] sm:$0xff] }
 0x793   :  { %v13739_v12 = vadd.f32 %v6822_v41, %v13430_v22  ;;  %v7030_v22 = vadd.f32 %v7029_v42, %v13553_v62  ;;  %v15696_v41 = vld [vmem:[#allocation46_spill] sm:$0xff] }
 0x794   :  { %v6441_v24 = vpop.f32.mrb[12].mxu0 }
 0x795   :  { %v6827_v13 = vadd.f32 %v13614_v15, %v6441_v24  ;;  %v6443_v5 = vpop.f32.mrb[13].mxu0  ;;  %v7031_v15 = vadd.f32 %v7030_v22, %v13558_v38  ;;  %v15697_v24 = vld [vmem:[#allocation13_spill] sm:$0xff] }
 0x797   :  { %v13745_v6 = vadd.f32 %v6827_v13, %v13442_v61  ;;  %v7032_v61 = vadd.f32 %v7031_v15, %v15695_v30  ;;  %v15702_v15 = vld [vmem:[#allocation30_spill] sm:$0xff] }
 0x798   :  { %v6446_v31 = vpop.f32.mrb[14].mxu0 }
 0x799   :  { %15694 = vst [vmem:[#allocation51_spill] sm:$0xff] %v13745_v6  ;;  %v6832_v35 = vadd.f32 %v13609_v45, %v6446_v31  ;;  %v6448_v1 = vpop.f32.mrb[15].mxu0  ;;  %v7033_v45 = vadd.f32 %v7032_v61, %v15697_v24  ;;  %v15700_v31 = vld [vmem:[#allocation25_spill] sm:$0xff]  ;;  %v15705_v24 = vld [vmem:[#allocation24_spill] sm:$0xff] }
 0x79a   :  { %v15701_v1 = vld [vmem:[#allocation63_spill] sm:$0xff] }
 0x79b   :  { %v13751_v56 = vadd.f32 %v6832_v35, %v13439_v55  ;;  %v7034_v55 = vadd.f32 %v7033_v45, %v15699_v43 }
 0x79c   :  { %v6451_v50 = vpop.f32.mrb[16].mxu0 }
 0x79d   :  { %v6837_v8 = vadd.f32 %v13621_v20, %v6451_v50  ;;  %v6453_v39 = vpop.f32.mrb[17].mxu0  ;;  %v7035_v20 = vadd.f32 %v7034_v55, %v15701_v1  ;;  %v15708_v1 = vld [vmem:[#allocation31_spill] sm:$0xff] }
 0x79e   :  { %v15703_v39 = vld [vmem:[#allocation47_spill] sm:$0xff] }
 0x79f   :  { %v13757_v32 = vadd.f32 %v6837_v8, %v15696_v41  ;;  %v7036_v8 = vadd.f32 %v7035_v20, %v15702_v15 }
 0x7a0   :  { %v6456_v14 = vpop.f32.mrb[18].mxu0 }
 0x7a1   :  { %v6842_v13 = vadd.f32 %v15698_v63, %v6456_v14  ;;  %v6458_v5 = vpop.f32.mrb[19].mxu0  ;;  %v7037_v14 = vadd.f32 %v7036_v8, %v15705_v24 }
 0x7a2   :  { %v15706_v5 = vld [vmem:[#allocation17_spill] sm:$0xff] }
 0x7a3   :  { %v13763_v42 = vadd.f32 %v6842_v13, %v15700_v31  ;;  %v7038_v13 = vadd.f32 %v7037_v14, %v15706_v5  ;;  %v15707_v31 = vld [vmem:[#allocation56_spill] sm:$0xff] }
 0x7a4   :  { %v6461_v35 = vpop.f32.mrb[20].mxu0 }
 0x7a5   :  { %v6847_v22 = vadd.f32 %v13629_v51, %v6461_v35  ;;  %v6463_v50 = vpop.f32.mrb[21].mxu0  ;;  %v7039_v51 = vadd.f32 %v7038_v13, %v15708_v1 }
 0x7a6   :  { %v15709_v50 = vld [vmem:[#allocation15_spill] sm:$0xff] }
 0x7a7   :  { %v13769_v41 = vadd.f32 %v6847_v22, %v15703_v39  ;;  %v7040_v22 = vadd.f32 %v7039_v51, %v15709_v50  ;;  %v15710_v39 = vld [vmem:[#allocation26_spill] sm:$0xff] }
 0x7a8   :  { %v6466_v61 = vpop.f32.mrb[22].mxu0 }
 0x7a9   :  { %15704 = vst [vmem:[#allocation38_spill] sm:$0xff] %v13769_v41  ;;  %v6852_v63 = vadd.f32 %v13624_v34, %v6466_v61  ;;  %v6468_v45 = vpop.f32.mrb[23].mxu0  ;;  %v7041_v34 = vadd.f32 %v7040_v22, %v13627_v18  ;;  %v15712_v61 = vld [vmem:[#allocation32_spill] sm:$0xff] }
 0x7ab   :  { %v13775_v43 = vadd.f32 %v6852_v63, %v15707_v31  ;;  %v7042_v63 = vadd.f32 %v7041_v34, %v13634_v2  ;;  %v15713_v31 = vld [vmem:[#allocation50_spill] sm:$0xff] }
 0x7ac   :  { %v6471_v55 = vpop.f32.mrb[24].mxu0 }
 0x7ad   :  { %v6857_v35 = vadd.f32 %v13636_v25, %v6471_v55  ;;  %v6473_v20 = vpop.f32.mrb[25].mxu0  ;;  %v7043_v25 = vadd.f32 %v7042_v63, %v13642_v57 }
 0x7ae   :  { %v15714_v20 = vld [vmem:[#allocation20_spill] sm:$0xff] }
 0x7af   :  { %v13781_v15 = vadd.f32 %v6857_v35, %v15710_v39  ;;  %v7044_v35 = vadd.f32 %v7043_v25, %v13650_v44 }
 0x7b0   :  { %v6476_v8 = vpop.f32.mrb[26].mxu0 }
 0x7b1   :  { %15711 = vst [vmem:[#allocation55_spill] sm:$0xff] %v13781_v15  ;;  %v6862_v45 = vadd.f32 %v15712_v61, %v6476_v8  ;;  %v6478_v14 = vpop.f32.mrb[27].mxu0  ;;  %v7045_v8 = vadd.f32 %v7044_v35, %v13658_v19  ;;  %v15716_v61 = vld [vmem:[#allocation16_spill] sm:$0xff] }
 0x7b3   :  { %v13787_v5 = vadd.f32 %v6862_v45, %v15713_v31  ;;  %v7046_v45 = vadd.f32 %v7045_v8, %v13666_v26  ;;  %v15717_v31 = vld [vmem:[#allocation53_spill] sm:$0xff] }
 0x7b4   :  { %v6481_v13 = vpop.f32.mrb[28].mxu0 }
 0x7b5   :  { %v6867_v55 = vadd.f32 %v13644_v33, %v6481_v13  ;;  %v6483_v51 = vpop.f32.mrb[29].mxu0  ;;  %v7047_v33 = vadd.f32 %v7046_v45, %v13674_v10 }
 0x7b6   :  { %v15718_v51 = vld [vmem:[#allocation19_spill] sm:$0xff] }
 0x7b7   :  { %v13793_v39 = vadd.f32 %v6867_v55, %v15714_v20  ;;  %v7048_v55 = vadd.f32 %v7047_v33, %v13682_v37 }
 0x7b8   :  { %v6486_v22 = vpop.f32.mrb[30].mxu0 }
 0x7b9   :  { %15715 = vst [vmem:[#allocation42_spill] sm:$0xff] %v13793_v39  ;;  %v6872_v14 = vadd.f32 %v15716_v61, %v6486_v22  ;;  %v6488_v34 = vpop.f32.mrb[31].mxu0  ;;  %v7049_v22 = vadd.f32 %v7048_v55, %v13690_v27  ;;  %v15720_v61 = vld [vmem:[#allocation34_spill] sm:$0xff] }
 0x7bb   :  { %v13799_v2 = vadd.f32 %v6872_v14, %v15717_v31  ;;  %v7050_v14 = vadd.f32 %v7049_v22, %v13698_v52  ;;  %v15721_v31 = vld [vmem:[#allocation43_spill] sm:$0xff] }
 0x7bc   :  { %v6491_v63 = vpop.f32.mrb[32].mxu0 }
 0x7bd   :  { %v6877_v13 = vadd.f32 %v13652_v21, %v6491_v63  ;;  %v6493_v25 = vpop.f32.mrb[33].mxu0  ;;  %v7051_v21 = vadd.f32 %v7050_v14, %v13706_v3 }
 0x7be   :  { %v15722_v25 = vld [vmem:[#allocation70_spill] sm:$0xff] }
 0x7bf   :  { %v13805_v20 = vadd.f32 %v6877_v13, %v15718_v51  ;;  %v7052_v13 = vadd.f32 %v7051_v21, %v13712_v48 }
 0x7c0   :  { %v6496_v35 = vpop.f32.mrb[34].mxu0 }
 0x7c1   :  { %15719 = vst [vmem:[#allocation57_spill] sm:$0xff] %v13805_v20  ;;  %v6882_v34 = vadd.f32 %v15720_v61, %v6496_v35  ;;  %v6498_v8 = vpop.f32.mrb[35].mxu0  ;;  %v7053_v35 = vadd.f32 %v7052_v13, %v13716_v16  ;;  %v15724_v61 = vld [vmem:[#allocation78_spill] sm:$0xff] }
 0x7c3   :  { %v13811_v26 = vadd.f32 %v6882_v34, %v15721_v31  ;;  %v7054_v34 = vadd.f32 %v7053_v35, %v13720_v7  ;;  %v15725_v31 = vld [vmem:[#allocation65_spill] sm:$0xff] }
 0x7c4   :  { %v6501_v45 = vpop.f32.mrb[36].mxu0 }
 0x7c5   :  { %v6887_v63 = vadd.f32 %v13660_v36, %v6501_v45  ;;  %v6503_v33 = vpop.f32.mrb[37].mxu0  ;;  %v7055_v36 = vadd.f32 %v7054_v34, %v13727_v47 }
 0x7c6   :  { %v15726_v33 = vld [vmem:[#allocation33_spill] sm:$0xff] }
 0x7c7   :  { %v13817_v51 = vadd.f32 %v6887_v63, %v15722_v25  ;;  %v7056_v63 = vadd.f32 %v7055_v36, %v13733_v0 }
 0x7c8   :  { %v6506_v55 = vpop.f32.mrb[38].mxu0 }
 0x7c9   :  { %15723 = vst [vmem:[#allocation45_spill] sm:$0xff] %v13817_v51  ;;  %v6892_v8 = vadd.f32 %v15724_v61, %v6506_v55  ;;  %v6508_v22 = vpop.f32.mrb[39].mxu0  ;;  %v7057_v55 = vadd.f32 %v7056_v63, %v13739_v12  ;;  %v15727_v61 = vld [vmem:[#allocation28_spill] sm:$0xff] }
 0x7cb   :  { %v13823_v52 = vadd.f32 %v6892_v8, %v15725_v31  ;;  %v7058_v8 = vadd.f32 %v7057_v55, %v13745_v6  ;;  %v15728_v31 = vld [vmem:[#allocation18_spill] sm:$0xff] }
 0x7cc   :  { %v6511_v14 = vpop.f32.mrb[40].mxu0 }
 0x7cd   :  { %v6897_v45 = vadd.f32 %v13668_v49, %v6511_v14  ;;  %v6513_v21 = vpop.f32.mrb[41].mxu0  ;;  %v7059_v49 = vadd.f32 %v7058_v8, %v13751_v56 }
 0x7ce   :  { %v15729_v21 = vld [vmem:[#allocation69_spill] sm:$0xff] }
 0x7cf   :  { %v13829_v25 = vadd.f32 %v6897_v45, %v15726_v33  ;;  %v7060_v45 = vadd.f32 %v7059_v49, %v13757_v32 }
 0x7d0   :  { %v6516_v13 = vpop.f32.mrb[42].mxu0 }
 0x7d1   :  { %v6902_v22 = vadd.f32 %v15727_v61, %v6516_v13  ;;  %v6518_v35 = vpop.f32.mrb[43].mxu0  ;;  %v7061_v13 = vadd.f32 %v7060_v45, %v13763_v42  ;;  %v15731_v61 = vld [vmem:[#allocation80_spill] sm:$0xff] }
 0x7d3   :  { %v13835_v7 = vadd.f32 %v6902_v22, %v15728_v31  ;;  %v7062_v22 = vadd.f32 %v7061_v13, %v13769_v41  ;;  %v15732_v31 = vld [vmem:[#allocation67_spill] sm:$0xff] }
 0x7d4   :  { %v6521_v34 = vpop.f32.mrb[44].mxu0 }
 0x7d5   :  { %v6907_v14 = vadd.f32 %v13676_v29, %v6521_v34  ;;  %v6523_v36 = vpop.f32.mrb[45].mxu0  ;;  %v7063_v29 = vadd.f32 %v7062_v22, %v13775_v43 }
 0x7d6   :  { %v15733_v36 = vld [vmem:[#allocation29_spill] sm:$0xff] }
 0x7d7   :  { %v13841_v33 = vadd.f32 %v6907_v14, %v15729_v21  ;;  %v7064_v14 = vadd.f32 %v7063_v29, %v13781_v15 }
 0x7d8   :  { %v6526_v63 = vpop.f32.mrb[46].mxu0 }
 0x7d9   :  { %15730 = vst [vmem:[#allocation59_spill] sm:$0xff] %v13841_v33  ;;  %v6912_v35 = vadd.f32 %v15731_v61, %v6526_v63  ;;  %v6528_v55 = vpop.f32.mrb[47].mxu0  ;;  %v7065_v63 = vadd.f32 %v7064_v14, %v13787_v5  ;;  %v15734_v61 = vld [vmem:[#allocation77_spill] sm:$0xff] }
 0x7db   :  { %v13847_v6 = vadd.f32 %v6912_v35, %v15732_v31  ;;  %v7066_v35 = vadd.f32 %v7065_v63, %v13793_v39  ;;  %v15735_v31 = vld [vmem:[#allocation66_spill] sm:$0xff] }
 0x7dc   :  { %v6531_v8 = vpop.f32.mrb[48].mxu0 }
 0x7dd   :  { %v6917_v34 = vadd.f32 %v13684_v17, %v6531_v8  ;;  %v6533_v49 = vpop.f32.mrb[49].mxu0  ;;  %v7067_v17 = vadd.f32 %v7066_v35, %v13799_v2 }
 0x7de   :  { %v15737_v49 = vld [vmem:[#allocation73_spill] sm:$0xff] }
 0x7df   :  { %v13853_v21 = vadd.f32 %v6917_v34, %v15733_v36  ;;  %v7068_v34 = vadd.f32 %v7067_v17, %v13805_v20 }
 0x7e0   :  { %v6536_v45 = vpop.f32.mrb[50].mxu0 }
 0x7e1   :  { %v6922_v55 = vadd.f32 %v15734_v61, %v6536_v45  ;;  %v6538_v13 = vpop.f32.mrb[51].mxu0  ;;  %v7069_v45 = vadd.f32 %v7068_v34, %v13811_v26  ;;  %v15739_v61 = vld [vmem:[#allocation36_spill] sm:$0xff] }
 0x7e3   :  { %v13859_v41 = vadd.f32 %v6922_v55, %v15735_v31  ;;  %v7070_v55 = vadd.f32 %v7069_v45, %v13817_v51  ;;  %v15740_v31 = vld [vmem:[#allocation40_spill] sm:$0xff] }
 0x7e4   :  { %v6541_v22 = vpop.f32.mrb[52].mxu0 }
 0x7e5   :  { %15736 = vst [vmem:[#allocation61_spill] sm:$0xff] %v13859_v41  ;;  %v6927_v8 = vadd.f32 %v13692_v28, %v6541_v22  ;;  %v6543_v29 = vpop.f32.mrb[53].mxu0  ;;  %v7071_v28 = vadd.f32 %v7070_v55, %v13823_v52  ;;  %v15742_v22 = vld [vmem:[#allocation81_spill] sm:$0xff] }
 0x7e7   :  { %v13865_v36 = vadd.f32 %v6927_v8, %v15737_v49  ;;  %v7072_v8 = vadd.f32 %v7071_v28, %v13829_v25  ;;  %v15743_v49 = vld [vmem:[#allocation54_spill] sm:$0xff] }
 0x7e8   :  { %v6546_v14 = vpop.f32.mrb[54].mxu0 }
 0x7e9   :  { %15738 = vst [vmem:[#allocation44_spill] sm:$0xff] %v13865_v36  ;;  %v6932_v13 = vadd.f32 %v15739_v61, %v6546_v14  ;;  %v6548_v63 = vpop.f32.mrb[55].mxu0  ;;  %v7073_v14 = vadd.f32 %v7072_v8, %v13835_v7  ;;  %v15745_v61 = vld [vmem:[#allocation82_spill] sm:$0xff] }
 0x7eb   :  { %v13871_v39 = vadd.f32 %v6932_v13, %v15740_v31  ;;  %v7074_v13 = vadd.f32 %v7073_v14, %v13841_v33  ;;  %v15746_v31 = vld [vmem:[#allocation68_spill] sm:$0xff] }
 0x7ec   :  { %v6551_v35 = vpop.f32.mrb[56].mxu0 }
 0x7ed   :  { %15741 = vst [vmem:[#allocation48_spill] sm:$0xff] %v13871_v39  ;;  %v6937_v29 = vadd.f32 %v15742_v22, %v6551_v35  ;;  %v6553_v17 = vpop.f32.mrb[57].mxu0  ;;  %v7075_v35 = vadd.f32 %v7074_v13, %v13847_v6 }
 0x7ee   :  { %v15748_v17 = vld [vmem:[#allocation72_spill] sm:$0xff] }
 0x7ef   :  { %v13877_v20 = vadd.f32 %v6937_v29, %v15743_v49  ;;  %v7076_v29 = vadd.f32 %v7075_v35, %v13853_v21 }
 0x7f0   :  { %v6556_v34 = vpop.f32.mrb[58].mxu0 }
 0x7f1   :  { %15744 = vst [vmem:[#allocation52_spill] sm:$0xff] %v13877_v20  ;;  %v6942_v63 = vadd.f32 %v15745_v61, %v6556_v34  ;;  %v6558_v45 = vpop.f32.mrb[59].mxu0  ;;  %v7077_v34 = vadd.f32 %v7076_v29, %v13859_v41  ;;  %v15750_v61 = vld [vmem:[#allocation37_spill] sm:$0xff] }
 0x7f3   :  { %v13883_v51 = vadd.f32 %v6942_v63, %v15746_v31  ;;  %v7078_v63 = vadd.f32 %v7077_v34, %v13865_v36  ;;  %v15751_v31 = vld [vmem:[#allocation71_spill] sm:$0xff] }
 0x7f4   :  { %v6561_v55 = vpop.f32.mrb[60].mxu0 }
 0x7f5   :  { %15747 = vst [vmem:[#allocation49_spill] sm:$0xff] %v13883_v51  ;;  %v6947_v22 = vadd.f32 %v13708_v46, %v6561_v55  ;;  %v6563_v28 = vpop.f32.mrb[61].mxu0  ;;  %v7079_v13 = vadd.f32 %v7078_v63, %v13871_v39 }
 0x7f7   :  { %v13889_v49 = vadd.f32 %v6947_v22, %v15748_v17  ;;  %v7080_v46 = vadd.f32 %v7079_v13, %v13877_v20 }
 0x7f8   :  { %v6566_v8 = vpop.f32.mrb[62].mxu0 }
 0x7f9   :  { %15749 = vst [vmem:[#allocation41_spill] sm:$0xff] %v13889_v49  ;;  %v6952_v45 = vadd.f32 %v15750_v61, %v6566_v8  ;;  %v6568_v14 = vpop.f32.mrb[63].mxu0  ;;  %v7081_v55 = vadd.f32 %v7080_v46, %v13883_v51 }
 0x7fb   :  { %v13895_v33 = vadd.f32 %v6952_v45, %v15751_v31  ;;  %v7082_v35 = vadd.f32 %v7081_v55, %v13889_v49 }
 0x7fd   :  { %v7083_v22 = vadd.f32 %v7082_v35, %v13895_v33 }
 0x7ff   :  { %v7084_v28 = vrot.slane %v7083_v22, 4 }
 0x801   :  { %v7085_v29 = vadd.f32 %v7084_v28, %v7083_v22 }
 0x803   :  { %v7086_v17 = vrot.slane %v7085_v29, 2 }
 0x805   :  { %v7087_v8 = vadd.f32 %v7086_v17, %v7085_v29 }
 0x807   :  { %v7088_v61 = vrot.slane %v7087_v8, 1 }
 0x809   :  { %v7089_v14 = vadd.f32 %v7088_v61, %v7087_v8 }
 0x80b   :  { %v13902_v34 = vmul.f32 0.001953125, %v7089_v14 }
 0x80d   :  { %v7091_v45 = vsub.f32 %v13520_v9, %v13902_v34  ;;  %v7092_v63 = vsub.f32 %v13523_v54, %v13902_v34  ;;  %v7093_v31 = vsub.f32 %v13526_v4, %v13902_v34  ;;  %v7094_v55 = vsub.f32 %v13529_v58, %v13902_v34 }
 0x80e   :  { %v7095_v35 = vsub.f32 %v13532_v59, %v13902_v34  ;;  %v7096_v29 = vsub.f32 %v13535_v23, %v13902_v34  ;;  %v7097_v61 = vsub.f32 %v13538_v11, %v13902_v34  ;;  %v7099_v59 = vsub.f32 %v13544_v40, %v13902_v34 }
 0x80f   :  { %v7155_v13 = vmul.f32 %v7091_v45, %v7091_v45  ;;  %v7156_v46 = vmul.f32 %v7092_v63, %v7092_v63  ;;  %v7157_v22 = vmul.f32 %v7093_v31, %v7093_v31  ;;  %v7158_v17 = vmul.f32 %v7094_v55, %v7094_v55 }
 0x810   :  { %v7159_v14 = vmul.f32 %v7095_v35, %v7095_v35  ;;  %v7098_v45 = vsub.f32 %v13541_v60, %v13902_v34  ;;  %v7160_v63 = vmul.f32 %v7096_v29, %v7096_v29  ;;  %v7161_v31 = vmul.f32 %v7097_v61, %v7097_v61 }
 0x811   :  { %v7219_v28 = vadd.f32 %v7156_v46, %v7155_v13  ;;  %v7100_v46 = vsub.f32 %v13547_v53, %v13902_v34  ;;  %v7163_v35 = vmul.f32 %v7099_v59, %v7099_v59 }
 0x812   :  { %v7162_v55 = vmul.f32 %v7098_v45, %v7098_v45 }
 0x813   :  { %v7220_v8 = vadd.f32 %v7219_v28, %v7157_v22  ;;  %v7101_v28 = vsub.f32 %v13553_v62, %v13902_v34  ;;  %v7164_v29 = vmul.f32 %v7100_v46, %v7100_v46 }
 0x815   :  { %v7221_v4 = vadd.f32 %v7220_v8, %v7158_v17  ;;  %v7102_v8 = vsub.f32 %v13558_v38, %v13902_v34  ;;  %v7165_v61 = vmul.f32 %v7101_v28, %v7101_v28 }
 0x817   :  { %v7222_v58 = vadd.f32 %v7221_v4, %v7159_v14  ;;  %v7103_v14 = vsub.f32 %v15695_v30, %v13902_v34  ;;  %v7166_v45 = vmul.f32 %v7102_v8, %v7102_v8 }
 0x819   :  { %v7223_v13 = vadd.f32 %v7222_v58, %v7160_v63  ;;  %v15752_v63 = vld [vmem:[#allocation13_spill] sm:$0xff]  ;;  %v7167_v59 = vmul.f32 %v7103_v14, %v7103_v14 }
 0x81a   :  { %v7104_v53 = vsub.f32 %v15752_v63, %v13902_v34 }
 0x81b   :  { %v7224_v22 = vadd.f32 %v7223_v13, %v7161_v31  ;;  %v15753_v13 = vld [vmem:[#allocation74_spill] sm:$0xff] }
 0x81c   :  { %v7105_v62 = vsub.f32 %v15753_v13, %v13902_v34  ;;  %v7168_v46 = vmul.f32 %v7104_v53, %v7104_v53 }
 0x81d   :  { %v7225_v17 = vadd.f32 %v7224_v22, %v7162_v55  ;;  %v15754_v22 = vld [vmem:[#allocation63_spill] sm:$0xff] }
 0x81e   :  { %v7106_v38 = vsub.f32 %v15754_v22, %v13902_v34  ;;  %v7169_v28 = vmul.f32 %v7105_v62, %v7105_v62 }
 0x81f   :  { %v7226_v4 = vadd.f32 %v7225_v17, %v7163_v35  ;;  %v15755_v17 = vld [vmem:[#allocation30_spill] sm:$0xff] }
 0x820   :  { %v7107_v30 = vsub.f32 %v15755_v17, %v13902_v34  ;;  %v7170_v8 = vmul.f32 %v7106_v38, %v7106_v38 }
 0x821   :  { %v7227_v58 = vadd.f32 %v7226_v4, %v7164_v29  ;;  %v7108_v4 = vsub.f32 %v15705_v24, %v13902_v34 }
 0x822   :  { %v7171_v14 = vmul.f32 %v7107_v30, %v7107_v30 }
 0x823   :  { %v7228_v31 = vadd.f32 %v7227_v58, %v7165_v61  ;;  %v15756_v58 = vld [vmem:[#allocation17_spill] sm:$0xff]  ;;  %v7172_v53 = vmul.f32 %v7108_v4, %v7108_v4 }
 0x824   :  { %v7109_v13 = vsub.f32 %v15756_v58, %v13902_v34 }
 0x825   :  { %v7229_v55 = vadd.f32 %v7228_v31, %v7166_v45  ;;  %v7110_v31 = vsub.f32 %v15708_v1, %v13902_v34 }
 0x826   :  { %v7173_v62 = vmul.f32 %v7109_v13, %v7109_v13 }
 0x827   :  { %v7230_v35 = vadd.f32 %v7229_v55, %v7167_v59  ;;  %v7111_v55 = vsub.f32 %v15709_v50, %v13902_v34  ;;  %v7174_v38 = vmul.f32 %v7110_v31, %v7110_v31 }
 0x829   :  { %v7231_v29 = vadd.f32 %v7230_v35, %v7168_v46  ;;  %v7112_v35 = vsub.f32 %v13627_v18, %v13902_v34  ;;  %v7175_v30 = vmul.f32 %v7111_v55, %v7111_v55 }
 0x82b   :  { %v7232_v61 = vadd.f32 %v7231_v29, %v7169_v28  ;;  %v15757_v29 = vld [vmem:[#allocation76_spill] sm:$0xff]  ;;  %v7176_v4 = vmul.f32 %v7112_v35, %v7112_v35 }
 0x82c   :  { %v7113_v58 = vsub.f32 %v15757_v29, %v13902_v34 }
 0x82d   :  { %v7233_v45 = vadd.f32 %v7232_v61, %v7170_v8  ;;  %v7114_v61 = vsub.f32 %v13642_v57, %v13902_v34 }
 0x82e   :  { %v7177_v13 = vmul.f32 %v7113_v58, %v7113_v58 }
 0x82f   :  { %v7234_v59 = vadd.f32 %v7233_v45, %v7171_v14  ;;  %v7115_v45 = vsub.f32 %v13650_v44, %v13902_v34  ;;  %v7178_v31 = vmul.f32 %v7114_v61, %v7114_v61 }
 0x831   :  { %v7235_v46 = vadd.f32 %v7234_v59, %v7172_v53  ;;  %v7116_v59 = vsub.f32 %v13658_v19, %v13902_v34  ;;  %v7179_v55 = vmul.f32 %v7115_v45, %v7115_v45 }
 0x833   :  { %v7236_v28 = vadd.f32 %v7235_v46, %v7173_v62  ;;  %v15758_v46 = vld [vmem:[#allocation35_spill] sm:$0xff]  ;;  %v7180_v35 = vmul.f32 %v7116_v59, %v7116_v59 }
 0x834   :  { %v7117_v29 = vsub.f32 %v15758_v46, %v13902_v34 }
 0x835   :  { %v7237_v8 = vadd.f32 %v7236_v28, %v7174_v38  ;;  %v7118_v28 = vsub.f32 %v13674_v10, %v13902_v34 }
 0x836   :  { %v7181_v58 = vmul.f32 %v7117_v29, %v7117_v29 }
 0x837   :  { %v7238_v14 = vadd.f32 %v7237_v8, %v7175_v30  ;;  %v7119_v8 = vsub.f32 %v13682_v37, %v13902_v34  ;;  %v7182_v61 = vmul.f32 %v7118_v28, %v7118_v28 }
 0x839   :  { %v7239_v53 = vadd.f32 %v7238_v14, %v7176_v4  ;;  %v7120_v14 = vsub.f32 %v13690_v27, %v13902_v34  ;;  %v7183_v45 = vmul.f32 %v7119_v8, %v7119_v8 }
 0x83b   :  { %v7240_v62 = vadd.f32 %v7239_v53, %v7177_v13  ;;  %v15759_v53 = vld [vmem:[#allocation79_spill] sm:$0xff]  ;;  %v7184_v59 = vmul.f32 %v7120_v14, %v7120_v14 }
 0x83c   :  { %v7121_v46 = vsub.f32 %v15759_v53, %v13902_v34 }
 0x83d   :  { %v7241_v38 = vadd.f32 %v7240_v62, %v7178_v31  ;;  %v7122_v62 = vsub.f32 %v13706_v3, %v13902_v34 }
 0x83e   :  { %v7185_v29 = vmul.f32 %v7121_v46, %v7121_v46 }
 0x83f   :  { %v7242_v30 = vadd.f32 %v7241_v38, %v7179_v55  ;;  %v7123_v38 = vsub.f32 %v13712_v48, %v13902_v34  ;;  %v7186_v28 = vmul.f32 %v7122_v62, %v7122_v62 }
 0x841   :  { %v7243_v4 = vadd.f32 %v7242_v30, %v7180_v35  ;;  %v7124_v30 = vsub.f32 %v13716_v16, %v13902_v34  ;;  %v7187_v8 = vmul.f32 %v7123_v38, %v7123_v38 }
 0x843   :  { %v7244_v13 = vadd.f32 %v7243_v4, %v7181_v58  ;;  %v15760_v4 = vld [vmem:[#allocation39_spill] sm:$0xff]  ;;  %v7188_v14 = vmul.f32 %v7124_v30, %v7124_v30 }
 0x844   :  { %v7125_v53 = vsub.f32 %v15760_v4, %v13902_v34 }
 0x845   :  { %v7245_v31 = vadd.f32 %v7244_v13, %v7182_v61  ;;  %v7126_v13 = vsub.f32 %v13727_v47, %v13902_v34 }
 0x846   :  { %v7189_v46 = vmul.f32 %v7125_v53, %v7125_v53 }
 0x847   :  { %v7246_v55 = vadd.f32 %v7245_v31, %v7183_v45  ;;  %v7127_v31 = vsub.f32 %v13733_v0, %v13902_v34  ;;  %v7190_v62 = vmul.f32 %v7126_v13, %v7126_v13 }
 0x849   :  { %v7247_v35 = vadd.f32 %v7246_v55, %v7184_v59  ;;  %v7128_v55 = vsub.f32 %v13739_v12, %v13902_v34  ;;  %v7191_v38 = vmul.f32 %v7127_v31, %v7127_v31 }
 0x84b   :  { %v7248_v58 = vadd.f32 %v7247_v35, %v7185_v29  ;;  %v15761_v35 = vld [vmem:[#allocation51_spill] sm:$0xff]  ;;  %v7192_v30 = vmul.f32 %v7128_v55, %v7128_v55 }
 0x84c   :  { %v7129_v4 = vsub.f32 %v15761_v35, %v13902_v34 }
 0x84d   :  { %v7249_v61 = vadd.f32 %v7248_v58, %v7186_v28  ;;  %v7130_v58 = vsub.f32 %v13751_v56, %v13902_v34 }
 0x84e   :  { %v7193_v53 = vmul.f32 %v7129_v4, %v7129_v4 }
 0x84f   :  { %v7250_v45 = vadd.f32 %v7249_v61, %v7187_v8  ;;  %v7131_v61 = vsub.f32 %v13757_v32, %v13902_v34  ;;  %v7194_v13 = vmul.f32 %v7130_v58, %v7130_v58 }
 0x851   :  { %v7251_v59 = vadd.f32 %v7250_v45, %v7188_v14  ;;  %v7132_v45 = vsub.f32 %v13763_v42, %v13902_v34  ;;  %v7195_v31 = vmul.f32 %v7131_v61, %v7131_v61 }
 0x853   :  { %v7252_v29 = vadd.f32 %v7251_v59, %v7189_v46  ;;  %v15762_v59 = vld [vmem:[#allocation38_spill] sm:$0xff]  ;;  %v7196_v55 = vmul.f32 %v7132_v45, %v7132_v45 }
 0x854   :  { %v7133_v35 = vsub.f32 %v15762_v59, %v13902_v34 }
 0x855   :  { %v7253_v28 = vadd.f32 %v7252_v29, %v7190_v62  ;;  %v7134_v29 = vsub.f32 %v13775_v43, %v13902_v34 }
 0x856   :  { %v7197_v4 = vmul.f32 %v7133_v35, %v7133_v35 }
 0x857   :  { %v7254_v8 = vadd.f32 %v7253_v28, %v7191_v38  ;;  %v7135_v28 = vsub.f32 %v13781_v15, %v13902_v34  ;;  %v7198_v58 = vmul.f32 %v7134_v29, %v7134_v29 }
 0x859   :  { %v7255_v14 = vadd.f32 %v7254_v8, %v7192_v30  ;;  %v7136_v8 = vsub.f32 %v13787_v5, %v13902_v34  ;;  %v7199_v61 = vmul.f32 %v7135_v28, %v7135_v28 }
 0x85b   :  { %v7256_v46 = vadd.f32 %v7255_v14, %v7193_v53  ;;  %v15763_v14 = vld [vmem:[#allocation42_spill] sm:$0xff]  ;;  %v7200_v45 = vmul.f32 %v7136_v8, %v7136_v8 }
 0x85c   :  { %v7137_v59 = vsub.f32 %v15763_v14, %v13902_v34 }
 0x85d   :  { %v7257_v62 = vadd.f32 %v7256_v46, %v7194_v13  ;;  %v7138_v46 = vsub.f32 %v13799_v2, %v13902_v34 }
 0x85e   :  { %v7201_v35 = vmul.f32 %v7137_v59, %v7137_v59 }
 0x85f   :  { %v7258_v38 = vadd.f32 %v7257_v62, %v7195_v31  ;;  %v15764_v62 = vld [vmem:[#allocation57_spill] sm:$0xff]  ;;  %v7202_v29 = vmul.f32 %v7138_v46, %v7138_v46 }
 0x860   :  { %v7139_v15 = vsub.f32 %v15764_v62, %v13902_v34 }
 0x861   :  { %v7259_v30 = vadd.f32 %v7258_v38, %v7196_v55  ;;  %v7140_v38 = vsub.f32 %v13811_v26, %v13902_v34 }
 0x862   :  { %v7203_v28 = vmul.f32 %v7139_v15, %v7139_v15 }
 0x863   :  { %v7260_v53 = vadd.f32 %v7259_v30, %v7197_v4  ;;  %v15765_v30 = vld [vmem:[#allocation45_spill] sm:$0xff]  ;;  %v7204_v8 = vmul.f32 %v7140_v38, %v7140_v38 }
 0x864   :  { %v7141_v14 = vsub.f32 %v15765_v30, %v13902_v34 }
 0x865   :  { %v7261_v13 = vadd.f32 %v7260_v53, %v7198_v58  ;;  %v7142_v53 = vsub.f32 %v13823_v52, %v13902_v34 }
 0x866   :  { %v7205_v59 = vmul.f32 %v7141_v14, %v7141_v14 }
 0x867   :  { %v7262_v31 = vadd.f32 %v7261_v13, %v7199_v61  ;;  %v7143_v13 = vsub.f32 %v13829_v25, %v13902_v34  ;;  %v7206_v46 = vmul.f32 %v7142_v53, %v7142_v53 }
 0x869   :  { %v7263_v55 = vadd.f32 %v7262_v31, %v7200_v45  ;;  %v7144_v31 = vsub.f32 %v13835_v7, %v13902_v34  ;;  %v7207_v15 = vmul.f32 %v7143_v13, %v7143_v13 }
 0x86b   :  { %v7264_v4 = vadd.f32 %v7263_v55, %v7201_v35  ;;  %v15766_v55 = vld [vmem:[#allocation59_spill] sm:$0xff]  ;;  %v7208_v38 = vmul.f32 %v7144_v31, %v7144_v31 }
 0x86c   :  { %v7145_v30 = vsub.f32 %v15766_v55, %v13902_v34 }
 0x86d   :  { %v7265_v58 = vadd.f32 %v7264_v4, %v7202_v29  ;;  %v7146_v4 = vsub.f32 %v13847_v6, %v13902_v34 }
 0x86e   :  { %v7209_v14 = vmul.f32 %v7145_v30, %v7145_v30 }
 0x86f   :  { %v7266_v61 = vadd.f32 %v7265_v58, %v7203_v28  ;;  %v7147_v58 = vsub.f32 %v13853_v21, %v13902_v34  ;;  %v7210_v53 = vmul.f32 %v7146_v4, %v7146_v4 }
 0x871   :  { %v7267_v45 = vadd.f32 %v7266_v61, %v7204_v8  ;;  %v7148_v61 = vsub.f32 %v13859_v41, %v13902_v34  ;;  %v7211_v13 = vmul.f32 %v7147_v58, %v7147_v58 }
 0x873   :  { %v7268_v35 = vadd.f32 %v7267_v45, %v7205_v59  ;;  %v7149_v45 = vsub.f32 %v13865_v36, %v13902_v34  ;;  %v7212_v31 = vmul.f32 %v7148_v61, %v7148_v61 }
 0x875   :  { %v7269_v29 = vadd.f32 %v7268_v35, %v7206_v46  ;;  %v7150_v35 = vsub.f32 %v13871_v39, %v13902_v34  ;;  %v7213_v30 = vmul.f32 %v7149_v45, %v7149_v45 }
 0x877   :  { %v7270_v28 = vadd.f32 %v7269_v29, %v7207_v15  ;;  %v7151_v29 = vsub.f32 %v13877_v20, %v13902_v34  ;;  %v7214_v4 = vmul.f32 %v7150_v35, %v7150_v35 }
 0x879   :  { %v7271_v8 = vadd.f32 %v7270_v28, %v7208_v38  ;;  %v7152_v28 = vsub.f32 %v13883_v51, %v13902_v34  ;;  %v7215_v58 = vmul.f32 %v7151_v29, %v7151_v29  ;;  %v7019_v29 = vld [vmem:[%s14824_s5] sm:$0x1]  ;;  %s9571_s5 = smov [#allocation9]  }
 0x87b   :  { %v7272_v59 = vadd.f32 %v7271_v8, %v7209_v14  ;;  %v7153_v8 = vsub.f32 %v13889_v49, %v13902_v34  ;;  %v7216_v61 = vmul.f32 %v7152_v28, %v7152_v28 }
 0x87d   :  { %v7273_v46 = vadd.f32 %v7272_v59, %v7210_v53  ;;  %v7154_v59 = vsub.f32 %v13895_v33, %v13902_v34 }
 0x87f   :  { %v7274_v15 = vadd.f32 %v7273_v46, %v7211_v13  ;;  %v7217_v46 = vmul.f32 %v7153_v8, %v7153_v8  ;;  %v7218_v20 = vmul.f32 %v7154_v59, %v7154_v59 }
 0x881   :  { %v7275_v38 = vadd.f32 %v7274_v15, %v7212_v31 }
 0x883   :  { %v7276_v14 = vadd.f32 %v7275_v38, %v7213_v30 }
 0x885   :  { %v7277_v53 = vadd.f32 %v7276_v14, %v7214_v4  ;;  %v15767_v14 = vld [vmem:[#allocation23_spill] sm:$0xff] }
 0x887   :  { %v7278_v13 = vadd.f32 %v7277_v53, %v7215_v58  ;;  %v15768_v58 = vld [vmem:[#allocation58_spill] sm:$0xff] }
 0x889   :  { %v7279_v39 = vadd.f32 %v7278_v13, %v7216_v61  ;;  %v15770_v61 = vld [vmem:[#allocation14_spill] sm:$0xff] }
 0x88b   :  { %v7280_v45 = vadd.f32 %v7279_v39, %v7217_v46  ;;  %v7020_v39 = vld [vmem:[%s14825_s6] sm:$0x1]  ;;  %s7695_s6 = sshll.u32 %s9571_s5, 4  ;;  %s7696_s6 = int_to_ptr.vmem [resolvable:$true] %s7695_s6 }
 0x88c   :  { %s9536_s21 = scalar_lea.vmem %s7696_s6, 8192  ;;  %p9541_p11 = scmp.lt.s32.totalorder %s7696_s6, %s7696_s6 }
 0x88d   :  { %v7281_v31 = vadd.f32 %v7280_v45, %v7218_v20  ;;  %p9537_p10 = scmp.ne.s32.totalorder %s7696_s6, %s9536_s21  ;;  %p9542_p12 = scmp.lt.s32.totalorder %s9536_s21, %s9536_s21 }
 0x88f   :  { %v7282_v15 = vrot.slane %v7281_v31, 4  ;;  %p9543_p13 = por %p9542_p12, %p9541_p11 }
 0x891   :  { %v7283_v36 = vadd.f32 %v7282_v15, %v7281_v31  ;;  %v7497_v31 = vld [vmem:[#allocation3 + $0x1f8] sm:$0xff]  ;;  %p9544_p0 = pnand %p9543_p13, %p9537_p10 }
 0x892   :  { %v15771_v15 = vld [vmem:[#allocation60_spill] sm:$0xff] }
 0x893   :  { %v7284_v51 = vrot.slane %v7283_v36, 2 }
 0x895   :  { %v7285_v35 = vadd.f32 %v7284_v51, %v7283_v36 }
 0x897   :  { %v7286_v30 = vrot.slane %v7285_v35, 1 }
 0x899   :  { %v7287_v38 = vadd.f32 %v7286_v30, %v7285_v35  ;;  %v15772_v35 = vld [vmem:[#allocation64_spill] sm:$0xff] }
 0x89b   :  { %v7288_v41 = vmul.f32 0.001953125, %v7287_v38  ;;  %v15773_v38 = vld [vmem:[#allocation27_spill] sm:$0xff] }
 0x89d   :  { %v7289_v49 = vadd.f32 1e-05, %v7288_v41 }
 0x89f   :  { %9446 = vrsqrt.f32 %v7289_v49 }
 0x8a9   :  { %v9447_v28 = vpop.eup %9446 }
 0x8aa   :  { %v7291_v4 = vmul.f32 %v9447_v28, %v7019_v29  ;;  %v15774_v29 = vld [vmem:[#allocation62_spill] sm:$0xff] }
 0x8ac   :  { %v7292_v20 = vmul.f32 %v7291_v4, %v13902_v34  ;;  %v14040_v8 = vrot.slane %v7291_v4, %v15767_v14  ;;  %v15769_v34 = vld [vmem:[#allocation22_spill] sm:$0xff] }
 0x8ad   :  { %v15775_v4 = vld [vmem:[#allocation74_spill] sm:$0xff] }
 0x8ae   :  { %v7293_v51 = vsub.f32 %v7020_v39, %v7292_v20  ;;  %v7363_v41 = vmul.f32 %v14040_v8, %v13895_v33  ;;  %v14046_v36 = vmul.f32 %v14040_v8, %v13520_v9  ;;  %v14050_v49 = vmul.f32 %v14040_v8, %v13523_v54 }
 0x8af   :  { %v14054_v53 = vmul.f32 %v14040_v8, %v15768_v58  ;;  %v14058_v59 = vmul.f32 %v14040_v8, %v15769_v34  ;;  %v14062_v13 = vmul.f32 %v14040_v8, %v15770_v61  ;;  %v14066_v9 = vmul.f32 %v14040_v8, %v13535_v23  ;;  %v15777_v61 = vld [vmem:[#allocation76_spill] sm:$0xff] }
 0x8b0   :  { %v14069_v33 = vrot.slane %v7293_v51, %v15767_v14  ;;  %v14073_v54 = vmul.f32 %v14040_v8, %v13538_v11  ;;  %v14077_v46 = vmul.f32 %v14040_v8, %v13541_v60  ;;  %v14081_v45 = vmul.f32 %v14040_v8, %v13544_v40 }
 0x8b1   :  { %v14085_v23 = vmul.f32 %v14040_v8, %v15771_v15  ;;  %v14089_v30 = vmul.f32 %v14040_v8, %v15772_v35  ;;  %v14093_v11 = vmul.f32 %v14040_v8, %v15773_v38  ;;  %v14097_v60 = vmul.f32 %v14040_v8, %v15774_v29  ;;  %v15779_v29 = vld [vmem:[#allocation79_spill] sm:$0xff] }
 0x8b2   :  { %v7433_v40 = vadd.f32 %v14069_v33, %v7363_v41  ;;  %v14102_v28 = vmul.f32 %v14040_v8, %v15752_v63  ;;  %v14106_v39 = vmul.f32 %v14040_v8, %v15775_v4  ;;  %v14110_v20 = vmul.f32 %v14040_v8, %v15754_v22  ;;  %v15776_v41 = vld [vmem:[#allocation17_spill] sm:$0xff]  ;;  %v15780_v4 = vld [vmem:[#allocation39_spill] sm:$0xff] }
 0x8b3   :  { %v14114_v14 = vmul.f32 %v14040_v8, %v15755_v17  ;;  %v14118_v51 = vmul.f32 %v14040_v8, %v15705_v24  ;;  %v14122_v63 = vmul.f32 %v14040_v8, %v15776_v41  ;;  %v14126_v58 = vmul.f32 %v14040_v8, %v15708_v1 }
 0x8b4   :  { %v7561_v34 = vadd.f32 %v7497_v31, %v7433_v40  ;;  %v14130_v22 = vmul.f32 %v14040_v8, %v15709_v50  ;;  %v14134_v17 = vmul.f32 %v14040_v8, %v13627_v18  ;;  %v14138_v24 = vmul.f32 %v14040_v8, %v15777_v61  ;;  %v15778_v31 = vld [vmem:[#allocation35_spill] sm:$0xff] }
 0x8b5   :  { %v14142_v15 = vmul.f32 %v14040_v8, %v13642_v57  ;;  %v14146_v1 = vmul.f32 %v14040_v8, %v13650_v44  ;;  %v14150_v50 = vmul.f32 %v14040_v8, %v13658_v19  ;;  %v14154_v18 = vmul.f32 %v14040_v8, %v15778_v31  ;;  %v15782_v31 = vld [vmem:[#allocation38_spill] sm:$0xff] }
 0x8b6   :  { %v7625_v35 = vmax.f32 %v7561_v34, 0.0  ;;  %v14158_v38 = vmul.f32 %v14040_v8, %v13674_v10  ;;  %v14162_v57 = vmul.f32 %v14040_v8, %v13682_v37  ;;  %v14166_v44 = vmul.f32 %v14040_v8, %v13690_v27  ;;  %v15781_v34 = vld [vmem:[#allocation51_spill] sm:$0xff] }
 0x8b7   :  { %v14170_v19 = vmul.f32 %v14040_v8, %v15779_v29  ;;  %v14174_v40 = vmul.f32 %v14040_v8, %v13706_v3  ;;  %v14178_v10 = vmul.f32 %v14040_v8, %v13712_v48  ;;  %v14182_v37 = vmul.f32 %v14040_v8, %v13716_v16  ;;  %v15783_v29 = vld [vmem:[#allocation55_spill] sm:$0xff] }
 0x8b8   :  { %7689 = vst [vmem:[#allocation9 + $0x1f8] sm:$0xff] %v7625_v35  ;;  %v14186_v27 = vmul.f32 %v14040_v8, %v15780_v4  ;;  %v14190_v41 = vmul.f32 %v14040_v8, %v13727_v47  ;;  %v14194_v3 = vmul.f32 %v14040_v8, %v13733_v0  ;;  %v14198_v48 = vmul.f32 %v14040_v8, %v13739_v12  ;;  %v15784_v4 = vld [vmem:[#allocation42_spill] sm:$0xff] }
 0x8b9   :  { %v14202_v16 = vmul.f32 %v14040_v8, %v15781_v34  ;;  %v14206_v61 = vmul.f32 %v14040_v8, %v13751_v56  ;;  %v14210_v47 = vmul.f32 %v14040_v8, %v13757_v32  ;;  %v14214_v0 = vmul.f32 %v14040_v8, %v13763_v42 }
 0x8ba   :  { %v14218_v12 = vmul.f32 %v14040_v8, %v15782_v31  ;;  %v14222_v35 = vmul.f32 %v14040_v8, %v13775_v43  ;;  %v14226_v56 = vmul.f32 %v14040_v8, %v15783_v29  ;;  %v14230_v32 = vmul.f32 %v14040_v8, %v13787_v5  ;;  %v15785_v29 = vld [vmem:[#allocation45_spill] sm:$0xff] }
 0x8bb   :  { %v14234_v42 = vmul.f32 %v14040_v8, %v15784_v4  ;;  %v14238_v34 = vmul.f32 %v14040_v8, %v13799_v2  ;;  %v14242_v43 = vmul.f32 %v14040_v8, %v15764_v62  ;;  %v14246_v31 = vmul.f32 %v14040_v8, %v13811_v26 }
 0x8bc   :  { %v14250_v5 = vmul.f32 %v14040_v8, %v15785_v29  ;;  %v14254_v4 = vmul.f32 %v14040_v8, %v13823_v52  ;;  %v14258_v2 = vmul.f32 %v14040_v8, %v13829_v25  ;;  %v14262_v62 = vmul.f32 %v14040_v8, %v13835_v7 }
 0x8bd   :  { %v14266_v26 = vmul.f32 %v14040_v8, %v15766_v55  ;;  %v14270_v29 = vmul.f32 %v14040_v8, %v13847_v6  ;;  %v14274_v52 = vmul.f32 %v14040_v8, %v13853_v21 }
 0x8be   :  { %15786 = vst [vmem:[#allocation21_spill] sm:$0xff] %v14254_v4  ;;  %15787 = vst [vmem:[#allocation46_spill] sm:$0xff] %v14258_v2  ;;  %v15792_v4 = vld [vmem:[#allocation61_spill] sm:$0xff]  ;;  %v15793_v2 = vld [vmem:[#allocation44_spill] sm:$0xff] }
 0x8bf   :  { %15788 = vst [vmem:[#allocation75_spill] sm:$0xff] %v14262_v62  ;;  %15789 = vst [vmem:[#allocation25_spill] sm:$0xff] %v14266_v26  ;;  %v14278_v25 = vmul.f32 %v14040_v8, %v15792_v4  ;;  %v14282_v7 = vmul.f32 %v14040_v8, %v15793_v2  ;;  %v15794_v62 = vld [vmem:[#allocation48_spill] sm:$0xff]  ;;  %v14302_v2 = vadd.f32 %v14069_v33, %v14046_v36 }
 0x8c0   :  { %15790 = vst [vmem:[#allocation47_spill] sm:$0xff] %v14270_v29  ;;  %15791 = vst [vmem:[#allocation24_spill] sm:$0xff] %v14274_v52  ;;  %v14286_v55 = vmul.f32 %v14040_v8, %v15794_v62  ;;  %v15795_v26 = vld [vmem:[#allocation52_spill] sm:$0xff]  ;;  %v15796_v29 = vld [vmem:[#allocation49_spill] sm:$0xff]  ;;  %v14306_v62 = vadd.f32 %v14069_v33, %v14050_v49  ;;  %v14322_v36 = vadd.f32 %v14069_v33, %v14066_v9 }
 0x8c1   :  { %v14290_v6 = vmul.f32 %v14040_v8, %v15795_v26  ;;  %v14294_v21 = vmul.f32 %v14040_v8, %v15796_v29  ;;  %v15797_v52 = vld [vmem:[#allocation41_spill] sm:$0xff]  ;;  %v14310_v26 = vadd.f32 %v14069_v33, %v14054_v53  ;;  %v14314_v29 = vadd.f32 %v14069_v33, %v14058_v59 }
 0x8c2   :  { %v14298_v4 = vmul.f32 %v14040_v8, %v15797_v52  ;;  %v14318_v8 = vadd.f32 %v14069_v33, %v14062_v13  ;;  %v14326_v49 = vadd.f32 %v14069_v33, %v14073_v54  ;;  %v14330_v53 = vadd.f32 %v14069_v33, %v14077_v46  ;;  %v7434_v52 = vld [vmem:[#allocation3] sm:$0xff] }
 0x8c3   :  { %v14334_v59 = vadd.f32 %v14069_v33, %v14081_v45  ;;  %v14338_v13 = vadd.f32 %v14069_v33, %v14085_v23  ;;  %v14342_v9 = vadd.f32 %v14069_v33, %v14089_v30  ;;  %v14346_v54 = vadd.f32 %v14069_v33, %v14093_v11 }
 0x8c4   :  { %v14350_v46 = vadd.f32 %v14069_v33, %v14097_v60  ;;  %v14354_v45 = vadd.f32 %v14069_v33, %v14102_v28  ;;  %v14358_v23 = vadd.f32 %v14069_v33, %v14106_v39  ;;  %v14362_v30 = vadd.f32 %v14069_v33, %v14110_v20 }
 0x8c5   :  { %v14366_v11 = vadd.f32 %v14069_v33, %v14114_v14  ;;  %v14370_v60 = vadd.f32 %v14069_v33, %v14118_v51  ;;  %v14374_v28 = vadd.f32 %v14069_v33, %v14122_v63  ;;  %v14378_v39 = vadd.f32 %v14069_v33, %v14126_v58 }
 0x8c6   :  { %v14382_v20 = vadd.f32 %v14069_v33, %v14130_v22  ;;  %v14386_v14 = vadd.f32 %v14069_v33, %v14134_v17  ;;  %v14390_v51 = vadd.f32 %v14069_v33, %v14138_v24  ;;  %v14394_v63 = vadd.f32 %v14069_v33, %v14142_v15 }
 0x8c7   :  { %v14398_v58 = vadd.f32 %v14069_v33, %v14146_v1  ;;  %v14402_v22 = vadd.f32 %v14069_v33, %v14150_v50  ;;  %v14406_v17 = vadd.f32 %v14069_v33, %v14154_v18  ;;  %v14410_v24 = vadd.f32 %v14069_v33, %v14158_v38 }
 0x8c8   :  { %v14414_v15 = vadd.f32 %v14069_v33, %v14162_v57  ;;  %v14418_v1 = vadd.f32 %v14069_v33, %v14166_v44  ;;  %v14422_v50 = vadd.f32 %v14069_v33, %v14170_v19  ;;  %v14426_v18 = vadd.f32 %v14069_v33, %v14174_v40 }
 0x8c9   :  { %v14430_v38 = vadd.f32 %v14069_v33, %v14178_v10  ;;  %v14434_v57 = vadd.f32 %v14069_v33, %v14182_v37  ;;  %v14438_v44 = vadd.f32 %v14069_v33, %v14186_v27  ;;  %v14442_v19 = vadd.f32 %v14069_v33, %v14190_v41 }
 0x8ca   :  { %15798 = vst [vmem:[#allocation56_spill] sm:$0xff] %v14422_v50  ;;  %15799 = vst [vmem:[#allocation31_spill] sm:$0xff] %v14426_v18  ;;  %v14446_v40 = vadd.f32 %v14069_v33, %v14194_v3  ;;  %v14450_v10 = vadd.f32 %v14069_v33, %v14198_v48  ;;  %v14454_v37 = vadd.f32 %v14069_v33, %v14202_v16  ;;  %v7436_v16 = vld [vmem:[#allocation3 + $0x10] sm:$0xff]  ;;  %v7453_v18 = vld [vmem:[#allocation3 + $0x98] sm:$0xff] }
 0x8cb   :  { %15800 = vst [vmem:[#allocation15_spill] sm:$0xff] %v14430_v38  ;;  %15801 = vst [vmem:[#allocation26_spill] sm:$0xff] %v14434_v57  ;;  %v14458_v27 = vadd.f32 %v14069_v33, %v14206_v61  ;;  %v14462_v41 = vadd.f32 %v14069_v33, %v14210_v47  ;;  %v14466_v3 = vadd.f32 %v14069_v33, %v14214_v0  ;;  %v7449_v57 = vld [vmem:[#allocation3 + $0x78] sm:$0xff]  ;;  %v15827_v38 = vld [vmem:[#allocation47_spill] sm:$0xff] }
 0x8cc   :  { %15802 = vst [vmem:[#allocation32_spill] sm:$0xff] %v14438_v44  ;;  %15803 = vst [vmem:[#allocation50_spill] sm:$0xff] %v14442_v19  ;;  %v14470_v48 = vadd.f32 %v14069_v33, %v14218_v12  ;;  %v14474_v61 = vadd.f32 %v14069_v33, %v14222_v35  ;;  %v14478_v47 = vadd.f32 %v14069_v33, %v14226_v56  ;;  %v7447_v19 = vld [vmem:[#allocation3 + $0x68] sm:$0xff]  ;;  %v7448_v44 = vld [vmem:[#allocation3 + $0x70] sm:$0xff] }
 0x8cd   :  { %15804 = vst [vmem:[#allocation20_spill] sm:$0xff] %v14446_v40  ;;  %15805 = vst [vmem:[#allocation16_spill] sm:$0xff] %v14450_v10  ;;  %v7435_v10 = vld [vmem:[#allocation3 + $0x8] sm:$0xff]  ;;  %v14482_v0 = vadd.f32 %v14069_v33, %v14230_v32  ;;  %v14486_v12 = vadd.f32 %v14069_v33, %v14234_v42  ;;  %v14490_v35 = vadd.f32 %v14069_v33, %v14238_v34  ;;  %v15819_v40 = vld [vmem:[#allocation21_spill] sm:$0xff] }
 0x8ce   :  { %15806 = vst [vmem:[#allocation53_spill] sm:$0xff] %v14454_v37  ;;  %15807 = vst [vmem:[#allocation19_spill] sm:$0xff] %v14458_v27  ;;  %v7437_v37 = vld [vmem:[#allocation3 + $0x18] sm:$0xff]  ;;  %v14494_v56 = vadd.f32 %v14069_v33, %v14242_v43  ;;  %v14498_v32 = vadd.f32 %v14069_v33, %v14246_v31  ;;  %v14502_v42 = vadd.f32 %v14069_v33, %v14250_v5 }
 0x8cf   :  { %15808 = vst [vmem:[#allocation34_spill] sm:$0xff] %v14462_v41  ;;  %15809 = vst [vmem:[#allocation43_spill] sm:$0xff] %v14466_v3  ;;  %v7439_v3 = vld [vmem:[#allocation3 + $0x28] sm:$0xff]  ;;  %v7440_v41 = vld [vmem:[#allocation3 + $0x30] sm:$0xff]  ;;  %v14506_v34 = vadd.f32 %v14069_v33, %v15819_v40  ;;  %v14522_v40 = vadd.f32 %v14069_v33, %v15827_v38  ;;  %v14538_v38 = vadd.f32 %v14069_v33, %v14286_v55 }
 0x8d0   :  { %15810 = vst [vmem:[#allocation70_spill] sm:$0xff] %v14470_v48  ;;  %15811 = vst [vmem:[#allocation78_spill] sm:$0xff] %v14474_v61  ;;  %v7438_v48 = vld [vmem:[#allocation3 + $0x20] sm:$0xff]  ;;  %v7441_v27 = vld [vmem:[#allocation3 + $0x38] sm:$0xff]  ;;  %v14553_v50 = vadd.f32 %v7434_v52, %v14302_v2  ;;  %v14556_v55 = vadd.f32 %v7435_v10, %v14306_v62  ;;  %v14571_v2 = vadd.f32 %v7440_v41, %v14326_v49 }
 0x8d1   :  { %15812 = vst [vmem:[#allocation65_spill] sm:$0xff] %v14478_v47  ;;  %15813 = vst [vmem:[#allocation33_spill] sm:$0xff] %v14482_v0  ;;  %v7443_v0 = vld [vmem:[#allocation3 + $0x48] sm:$0xff]  ;;  %v7444_v47 = vld [vmem:[#allocation3 + $0x50] sm:$0xff]  ;;  %v14574_v62 = vadd.f32 %v7441_v27, %v14330_v53 }
 0x8d2   :  { %15814 = vst [vmem:[#allocation28_spill] sm:$0xff] %v14486_v12  ;;  %15815 = vst [vmem:[#allocation18_spill] sm:$0xff] %v14490_v35  ;;  %v7442_v12 = vld [vmem:[#allocation3 + $0x40] sm:$0xff]  ;;  %v7445_v61 = vld [vmem:[#allocation3 + $0x58] sm:$0xff] }
 0x8d3   :  { %15816 = vst [vmem:[#allocation69_spill] sm:$0xff] %v14494_v56  ;;  %15817 = vst [vmem:[#allocation80_spill] sm:$0xff] %v14498_v32  ;;  %v15821_v35 = vld [vmem:[#allocation46_spill] sm:$0xff]  ;;  %v15823_v56 = vld [vmem:[#allocation75_spill] sm:$0xff]  ;;  %v14577_v52 = vadd.f32 %v7442_v12, %v14334_v59  ;;  %v14595_v59 = vadd.f32 %v7448_v44, %v14358_v23 }
 0x8d4   :  { %15818 = vst [vmem:[#allocation67_spill] sm:$0xff] %v14502_v42  ;;  %15820 = vst [vmem:[#allocation29_spill] sm:$0xff] %v14506_v34  ;;  %v14510_v43 = vadd.f32 %v14069_v33, %v15821_v35  ;;  %v14514_v31 = vadd.f32 %v14069_v33, %v15823_v56  ;;  %v15825_v32 = vld [vmem:[#allocation25_spill] sm:$0xff]  ;;  %v15829_v34 = vld [vmem:[#allocation24_spill] sm:$0xff]  ;;  %v14530_v56 = vadd.f32 %v14069_v33, %v14278_v25 }
 0x8d5   :  { %v14518_v5 = vadd.f32 %v14069_v33, %v15825_v32  ;;  %v7446_v42 = vld [vmem:[#allocation3 + $0x60] sm:$0xff]  ;;  %15828 = vst [vmem:[#allocation36_spill] sm:$0xff] %v14522_v40  ;;  %v14526_v35 = vadd.f32 %v14069_v33, %v15829_v34  ;;  %v14534_v32 = vadd.f32 %v14069_v33, %v14282_v7  ;;  %15833 = vst [vmem:[#allocation82_spill] sm:$0xff] %v14538_v38  ;;  %v7457_v40 = vld [vmem:[#allocation3 + $0xb8] sm:$0xff] }
 0x8d6   :  { %15822 = vst [vmem:[#allocation77_spill] sm:$0xff] %v14510_v43  ;;  %15824 = vst [vmem:[#allocation66_spill] sm:$0xff] %v14514_v31  ;;  %v7451_v31 = vld [vmem:[#allocation3 + $0x88] sm:$0xff]  ;;  %v7452_v43 = vld [vmem:[#allocation3 + $0x90] sm:$0xff]  ;;  %v14542_v34 = vadd.f32 %v14069_v33, %v14290_v6  ;;  %v14546_v25 = vadd.f32 %v14069_v33, %v14294_v21  ;;  %v14550_v7 = vadd.f32 %v14069_v33, %v14298_v4 }
 0x8d7   :  { %15826 = vst [vmem:[#allocation73_spill] sm:$0xff] %v14518_v5  ;;  %15830 = vst [vmem:[#allocation40_spill] sm:$0xff] %v14526_v35  ;;  %v7450_v5 = vld [vmem:[#allocation3 + $0x80] sm:$0xff]  ;;  %v7456_v35 = vld [vmem:[#allocation3 + $0xb0] sm:$0xff]  ;;  %v14559_v6 = vadd.f32 %v7436_v16, %v14310_v26  ;;  %v14562_v21 = vadd.f32 %v7437_v37, %v14314_v29  ;;  %v14568_v38 = vadd.f32 %v7439_v3, %v14322_v36 }
 0x8d8   :  { %15831 = vst [vmem:[#allocation81_spill] sm:$0xff] %v14530_v56  ;;  %15832 = vst [vmem:[#allocation54_spill] sm:$0xff] %v14534_v32  ;;  %v7454_v32 = vld [vmem:[#allocation3 + $0xa0] sm:$0xff]  ;;  %v7455_v56 = vld [vmem:[#allocation3 + $0xa8] sm:$0xff]  ;;  %v14580_v16 = vadd.f32 %v7443_v0, %v14338_v13  ;;  %v14586_v36 = vadd.f32 %v7445_v61, %v14346_v54  ;;  %v14589_v3 = vadd.f32 %v7446_v42, %v14350_v46 }
 0x8d9   :  { %15834 = vst [vmem:[#allocation68_spill] sm:$0xff] %v14542_v34  ;;  %15835 = vst [vmem:[#allocation72_spill] sm:$0xff] %v14546_v25  ;;  %v7458_v25 = vld [vmem:[#allocation3 + $0xc0] sm:$0xff]  ;;  %v7459_v34 = vld [vmem:[#allocation3 + $0xc8] sm:$0xff]  ;;  %v14598_v13 = vadd.f32 %v7449_v57, %v14362_v30  ;;  %v14601_v61 = vadd.f32 %v7450_v5, %v14366_v11  ;;  %v14604_v0 = vadd.f32 %v7451_v31, %v14370_v60 }
 0x8da   :  { %15836 = vst [vmem:[#allocation37_spill] sm:$0xff] %v14550_v7  ;;  %v7460_v33 = vld [vmem:[#allocation3 + $0xd0] sm:$0xff]  ;;  %v7461_v4 = vld [vmem:[#allocation3 + $0xd8] sm:$0xff]  ;;  %v14565_v7 = vadd.f32 %v7438_v48, %v14318_v8  ;;  %v7462_v26 = vld [vmem:[#allocation3 + $0xe0] sm:$0xff]  ;;  %v14583_v8 = vadd.f32 %v7444_v47, %v14342_v9  ;;  %v14592_v48 = vadd.f32 %v7447_v19, %v14354_v45  ;;  %v14607_v46 = vadd.f32 %v7452_v43, %v14374_v28 }
 0x8db   :  { %v7463_v10 = vld [vmem:[#allocation3 + $0xe8] sm:$0xff]  ;;  %v7464_v29 = vld [vmem:[#allocation3 + $0xf0] sm:$0xff]  ;;  %v7465_v37 = vld [vmem:[#allocation3 + $0xf8] sm:$0xff]  ;;  %v14610_v45 = vadd.f32 %v7453_v18, %v14378_v39  ;;  %v14613_v30 = vadd.f32 %v7454_v32, %v14382_v20  ;;  %v14616_v57 = vadd.f32 %v7455_v56, %v14386_v14  ;;  %v14619_v11 = vadd.f32 %v7456_v35, %v14390_v51 }
 0x8dc   :  { %v7466_v49 = vld [vmem:[#allocation3 + $0x100] sm:$0xff]  ;;  %v7467_v41 = vld [vmem:[#allocation3 + $0x108] sm:$0xff]  ;;  %v7468_v53 = vld [vmem:[#allocation3 + $0x110] sm:$0xff]  ;;  %v14622_v60 = vadd.f32 %v7457_v40, %v14394_v63  ;;  %v14625_v39 = vadd.f32 %v7458_v25, %v14398_v58  ;;  %v14628_v18 = vadd.f32 %v7459_v34, %v14402_v22  ;;  %v14631_v20 = vadd.f32 %v7460_v33, %v14406_v17 }
 0x8dd   :  { %v7469_v27 = vld [vmem:[#allocation3 + $0x118] sm:$0xff]  ;;  %v7470_v9 = vld [vmem:[#allocation3 + $0x120] sm:$0xff]  ;;  %v7471_v47 = vld [vmem:[#allocation3 + $0x128] sm:$0xff]  ;;  %v14634_v14 = vadd.f32 %v7461_v4, %v14410_v24  ;;  %v14637_v63 = vadd.f32 %v7462_v26, %v14414_v15  ;;  %v14640_v5 = vadd.f32 %v7463_v10, %v14418_v1 }
 0x8de   :  { %v7472_v54 = vld [vmem:[#allocation3 + $0x130] sm:$0xff]  ;;  %v7473_v23 = vld [vmem:[#allocation3 + $0x138] sm:$0xff]  ;;  %v7474_v44 = vld [vmem:[#allocation3 + $0x140] sm:$0xff] }
 0x8df   :  { %v7475_v19 = vld [vmem:[#allocation3 + $0x148] sm:$0xff]  ;;  %v7476_v28 = vld [vmem:[#allocation3 + $0x150] sm:$0xff]  ;;  %v7477_v12 = vld [vmem:[#allocation3 + $0x158] sm:$0xff] }
 0x8e0   :  { %v7478_v42 = vld [vmem:[#allocation3 + $0x160] sm:$0xff]  ;;  %v7479_v51 = vld [vmem:[#allocation3 + $0x168] sm:$0xff]  ;;  %v7480_v43 = vld [vmem:[#allocation3 + $0x170] sm:$0xff] }
 0x8e1   :  { %v7481_v31 = vld [vmem:[#allocation3 + $0x178] sm:$0xff]  ;;  %v15839_v22 = vld [vmem:[#allocation31_spill] sm:$0xff]  ;;  %v7482_v17 = vld [vmem:[#allocation3 + $0x180] sm:$0xff] }
 0x8e2   :  { %v15837_v58 = vld [vmem:[#allocation56_spill] sm:$0xff]  ;;  %v14646_v35 = vadd.f32 %v7465_v37, %v15839_v22  ;;  %v7483_v56 = vld [vmem:[#allocation3 + $0x188] sm:$0xff]  ;;  %v7484_v32 = vld [vmem:[#allocation3 + $0x190] sm:$0xff] }
 0x8e3   :  { %v14643_v40 = vadd.f32 %v7464_v29, %v15837_v58  ;;  %v15841_v24 = vld [vmem:[#allocation15_spill] sm:$0xff]  ;;  %v15842_v25 = vld [vmem:[#allocation26_spill] sm:$0xff]  ;;  %v15844_v15 = vld [vmem:[#allocation32_spill] sm:$0xff] }
 0x8e4   :  { %15840 = vst [vmem:[#allocation13_spill] sm:$0xff] %v14646_v35  ;;  %v14649_v34 = vadd.f32 %v7466_v49, %v15841_v24  ;;  %v14652_v33 = vadd.f32 %v7467_v41, %v15842_v25  ;;  %v14655_v4 = vadd.f32 %v7468_v53, %v15844_v15  ;;  %v15846_v1 = vld [vmem:[#allocation50_spill] sm:$0xff]  ;;  %v7485_v10 = vld [vmem:[#allocation3 + $0x198] sm:$0xff]  ;;  %v7486_v29 = vld [vmem:[#allocation3 + $0x1a0] sm:$0xff] }
 0x8e5   :  { %15838 = vst [vmem:[#allocation71_spill] sm:$0xff] %v14643_v40  ;;  %v14658_v26 = vadd.f32 %v7469_v27, %v15846_v1  ;;  %v7487_v58 = vld [vmem:[#allocation3 + $0x1a8] sm:$0xff]  ;;  %v15848_v37 = vld [vmem:[#allocation20_spill] sm:$0xff]  ;;  %v15851_v49 = vld [vmem:[#allocation53_spill] sm:$0xff] }
 0x8e6   :  { %15843 = vst [vmem:[#allocation63_spill] sm:$0xff] %v14652_v33  ;;  %15845 = vst [vmem:[#allocation30_spill] sm:$0xff] %v14655_v4  ;;  %v14661_v22 = vadd.f32 %v7470_v9, %v15848_v37  ;;  %v15849_v35 = vld [vmem:[#allocation16_spill] sm:$0xff]  ;;  %v14667_v24 = vadd.f32 %v7472_v54, %v15851_v49  ;;  %v15853_v41 = vld [vmem:[#allocation19_spill] sm:$0xff] }
 0x8e7   :  { %15847 = vst [vmem:[#allocation57_spill] sm:$0xff] %v14658_v26  ;;  %v14664_v40 = vadd.f32 %v7471_v47, %v15849_v35  ;;  %v14670_v25 = vadd.f32 %v7473_v23, %v15853_v41  ;;  %v7488_v53 = vld [vmem:[#allocation3 + $0x1b0] sm:$0xff]  ;;  %v7489_v15 = vld [vmem:[#allocation3 + $0x1b8] sm:$0xff]  ;;  %v7490_v4 = vld [vmem:[#allocation3 + $0x1c0] sm:$0xff] }
 0x8e8   :  { %15852 = vst [vmem:[#allocation23_spill] sm:$0xff] %v14667_v24  ;;  %v15855_v27 = vld [vmem:[#allocation34_spill] sm:$0xff]  ;;  %v15856_v26 = vld [vmem:[#allocation43_spill] sm:$0xff]  ;;  %v7493_v24 = vld [vmem:[#allocation3 + $0x1d8] sm:$0xff] }
 0x8e9   :  { %15850 = vst [vmem:[#allocation59_spill] sm:$0xff] %v14664_v40  ;;  %15854 = vst [vmem:[#allocation58_spill] sm:$0xff] %v14670_v25  ;;  %v14673_v1 = vadd.f32 %v7474_v44, %v15855_v27  ;;  %v14676_v33 = vadd.f32 %v7475_v19, %v15856_v26  ;;  %v15858_v9 = vld [vmem:[#allocation70_spill] sm:$0xff]  ;;  %v7492_v49 = vld [vmem:[#allocation3 + $0x1d0] sm:$0xff] }
 0x8ea   :  { %v14679_v37 = vadd.f32 %v7476_v28, %v15858_v9  ;;  %v15860_v47 = vld [vmem:[#allocation78_spill] sm:$0xff]  ;;  %v15862_v23 = vld [vmem:[#allocation65_spill] sm:$0xff]  ;;  %v15864_v44 = vld [vmem:[#allocation28_spill] sm:$0xff] }
 0x8eb   :  { %15857 = vst [vmem:[#allocation22_spill] sm:$0xff] %v14676_v33  ;;  %v14682_v35 = vadd.f32 %v7477_v12, %v15860_v47  ;;  %v7491_v54 = vld [vmem:[#allocation3 + $0x1c8] sm:$0xff]  ;;  %v14685_v41 = vadd.f32 %v7478_v42, %v15862_v23  ;;  %v15863_v25 = vld [vmem:[#allocation33_spill] sm:$0xff]  ;;  %v14691_v27 = vadd.f32 %v7480_v43, %v15864_v44  ;;  %v15870_v42 = vld [vmem:[#allocation67_spill] sm:$0xff] }
 0x8ec   :  { %15859 = vst [vmem:[#allocation14_spill] sm:$0xff] %v14679_v37  ;;  %v14688_v40 = vadd.f32 %v7479_v51, %v15863_v25  ;;  %v15866_v19 = vld [vmem:[#allocation18_spill] sm:$0xff]  ;;  %v7494_v28 = vld [vmem:[#allocation3 + $0x1e0] sm:$0xff]  ;;  %v7496_v37 = vld [vmem:[#allocation3 + $0x1f0] sm:$0xff]  ;;  %v14703_v23 = vadd.f32 %v7484_v32, %v15870_v42 }
 0x8ed   :  { %15861 = vst [vmem:[#allocation60_spill] sm:$0xff] %v14682_v35  ;;  %15865 = vst [vmem:[#allocation64_spill] sm:$0xff] %v14691_v27  ;;  %v14694_v26 = vadd.f32 %v7481_v31, %v15866_v19  ;;  %v7495_v9 = vld [vmem:[#allocation3 + $0x1e8] sm:$0xff]  ;;  %v15868_v12 = vld [vmem:[#allocation69_spill] sm:$0xff] }
 0x8ee   :  { %v14697_v47 = vadd.f32 %v7482_v17, %v15868_v12  ;;  %v15869_v35 = vld [vmem:[#allocation80_spill] sm:$0xff]  ;;  %v15871_v51 = vld [vmem:[#allocation29_spill] sm:$0xff]  ;;  %v15873_v31 = vld [vmem:[#allocation66_spill] sm:$0xff] }
 0x8ef   :  { %15867 = vst [vmem:[#allocation27_spill] sm:$0xff] %v14694_v26  ;;  %v14700_v33 = vadd.f32 %v7483_v56, %v15869_v35  ;;  %v14706_v25 = vadd.f32 %v7485_v10, %v15871_v51  ;;  %v15872_v43 = vld [vmem:[#allocation77_spill] sm:$0xff]  ;;  %v14712_v19 = vadd.f32 %v7487_v58, %v15873_v31  ;;  %v15875_v17 = vld [vmem:[#allocation36_spill] sm:$0xff]  ;;  %v15878_v10 = vld [vmem:[#allocation54_spill] sm:$0xff] }
 0x8f0   :  { %v14709_v44 = vadd.f32 %v7486_v29, %v15872_v43  ;;  %v15874_v26 = vld [vmem:[#allocation73_spill] sm:$0xff]  ;;  %v14718_v12 = vadd.f32 %v7489_v15, %v15875_v17  ;;  %v15876_v56 = vld [vmem:[#allocation40_spill] sm:$0xff]  ;;  %v14727_v51 = vadd.f32 %v7492_v49, %v15878_v10  ;;  %v15879_v29 = vld [vmem:[#allocation82_spill] sm:$0xff]  ;;  %v7565_v49 = vmax.f32 %v14562_v21, 0.0 }
 0x8f1   :  { %v14715_v27 = vadd.f32 %v7488_v53, %v15874_v26  ;;  %v14721_v35 = vadd.f32 %v7490_v4, %v15876_v56  ;;  %v15877_v32 = vld [vmem:[#allocation81_spill] sm:$0xff]  ;;  %v14730_v43 = vadd.f32 %v7493_v24, %v15879_v29  ;;  %v15880_v58 = vld [vmem:[#allocation68_spill] sm:$0xff]  ;;  %v7562_v4 = vmax.f32 %v14553_v50, 0.0 }
 0x8f2   :  { %v14724_v42 = vadd.f32 %v7491_v54, %v15877_v32  ;;  %v14733_v31 = vadd.f32 %v7494_v28, %v15880_v58  ;;  %v15881_v53 = vld [vmem:[#allocation72_spill] sm:$0xff]  ;;  %v15882_v15 = vld [vmem:[#allocation37_spill] sm:$0xff]  ;;  %v7563_v54 = vmax.f32 %v14556_v55, 0.0  ;;  %v7564_v56 = vmax.f32 %v14559_v6, 0.0  ;;  %7629 = vst [vmem:[#allocation9 + $0x18] sm:$0xff] %v7565_v49 }
 0x8f3   :  { %v14736_v26 = vadd.f32 %v7495_v9, %v15881_v53  ;;  %v14739_v17 = vadd.f32 %v7496_v37, %v15882_v15  ;;  %v7566_v24 = vmax.f32 %v14565_v7, 0.0  ;;  %v7567_v32 = vmax.f32 %v14568_v38, 0.0  ;;  %7626 = vst [vmem:[#allocation9] sm:$0xff] %v7562_v4  ;;  %v15887_v29 = vld [vmem:[#allocation57_spill] sm:$0xff]  ;;  %v15889_v4 = vld [vmem:[#allocation23_spill] sm:$0xff] }
 0x8f4   :  { %v7568_v28 = vmax.f32 %v14571_v2, 0.0  ;;  %v7569_v9 = vmax.f32 %v14574_v62, 0.0  ;;  %v7570_v10 = vmax.f32 %v14577_v52, 0.0  ;;  %v7571_v37 = vmax.f32 %v14580_v16, 0.0  ;;  %7627 = vst [vmem:[#allocation9 + $0x8] sm:$0xff] %v7563_v54  ;;  %7628 = vst [vmem:[#allocation9 + $0x10] sm:$0xff] %v7564_v56 }
 0x8f5   :  { %v7572_v50 = vmax.f32 %v14583_v8, 0.0  ;;  %v7573_v55 = vmax.f32 %v14586_v36, 0.0  ;;  %v7574_v6 = vmax.f32 %v14589_v3, 0.0  ;;  %7630 = vst [vmem:[#allocation9 + $0x20] sm:$0xff] %v7566_v24  ;;  %v7575_v38 = vmax.f32 %v14592_v48, 0.0  ;;  %7631 = vst [vmem:[#allocation9 + $0x28] sm:$0xff] %v7567_v32 }
 0x8f6   :  { %v7576_v7 = vmax.f32 %v14595_v59, 0.0  ;;  %v7577_v21 = vmax.f32 %v14598_v13, 0.0  ;;  %v7578_v2 = vmax.f32 %v14601_v61, 0.0  ;;  %7632 = vst [vmem:[#allocation9 + $0x30] sm:$0xff] %v7568_v28  ;;  %7633 = vst [vmem:[#allocation9 + $0x38] sm:$0xff] %v7569_v9  ;;  %v7579_v62 = vmax.f32 %v14604_v0, 0.0 }
 0x8f7   :  { %7634 = vst [vmem:[#allocation9 + $0x40] sm:$0xff] %v7570_v10  ;;  %v7580_v52 = vmax.f32 %v14607_v46, 0.0  ;;  %v7581_v16 = vmax.f32 %v14610_v45, 0.0  ;;  %v7582_v8 = vmax.f32 %v14613_v30, 0.0  ;;  %7635 = vst [vmem:[#allocation9 + $0x48] sm:$0xff] %v7571_v37  ;;  %v7583_v36 = vmax.f32 %v14616_v57, 0.0 }
 0x8f8   :  { %7636 = vst [vmem:[#allocation9 + $0x50] sm:$0xff] %v7572_v50  ;;  %7637 = vst [vmem:[#allocation9 + $0x58] sm:$0xff] %v7573_v55  ;;  %v7584_v3 = vmax.f32 %v14619_v11, 0.0  ;;  %v7585_v48 = vmax.f32 %v14622_v60, 0.0  ;;  %v7586_v59 = vmax.f32 %v14625_v39, 0.0  ;;  %v7587_v13 = vmax.f32 %v14628_v18, 0.0 }
 0x8f9   :  { %7638 = vst [vmem:[#allocation9 + $0x60] sm:$0xff] %v7574_v6  ;;  %7639 = vst [vmem:[#allocation9 + $0x68] sm:$0xff] %v7575_v38  ;;  %v7588_v61 = vmax.f32 %v14631_v20, 0.0  ;;  %v7589_v0 = vmax.f32 %v14634_v14, 0.0  ;;  %v7590_v46 = vmax.f32 %v14637_v63, 0.0  ;;  %v7591_v45 = vmax.f32 %v14640_v5, 0.0 }
 0x8fa   :  { %7640 = vst [vmem:[#allocation9 + $0x70] sm:$0xff] %v7576_v7  ;;  %7641 = vst [vmem:[#allocation9 + $0x78] sm:$0xff] %v7577_v21  ;;  %v15883_v30 = vld [vmem:[#allocation71_spill] sm:$0xff]  ;;  %v15884_v11 = vld [vmem:[#allocation13_spill] sm:$0xff]  ;;  %v7594_v39 = vmax.f32 %v14649_v34, 0.0  ;;  %v7597_v58 = vmax.f32 %v15887_v29, 0.0 }
 0x8fb   :  { %7642 = vst [vmem:[#allocation9 + $0x80] sm:$0xff] %v7578_v2  ;;  %7643 = vst [vmem:[#allocation9 + $0x88] sm:$0xff] %v7579_v62  ;;  %v7592_v57 = vmax.f32 %v15883_v30, 0.0  ;;  %v7593_v60 = vmax.f32 %v15884_v11, 0.0  ;;  %v15885_v18 = vld [vmem:[#allocation63_spill] sm:$0xff]  ;;  %v15886_v14 = vld [vmem:[#allocation30_spill] sm:$0xff] }
 0x8fc   :  { %7644 = vst [vmem:[#allocation9 + $0x90] sm:$0xff] %v7580_v52  ;;  %7645 = vst [vmem:[#allocation9 + $0x98] sm:$0xff] %v7581_v16  ;;  %v7595_v20 = vmax.f32 %v15885_v18, 0.0  ;;  %v7596_v63 = vmax.f32 %v15886_v14, 0.0  ;;  %v7598_v53 = vmax.f32 %v14661_v22, 0.0  ;;  %v15888_v5 = vld [vmem:[#allocation59_spill] sm:$0xff] }
 0x8fd   :  { %7646 = vst [vmem:[#allocation9 + $0xa0] sm:$0xff] %v7582_v8  ;;  %7647 = vst [vmem:[#allocation9 + $0xa8] sm:$0xff] %v7583_v36  ;;  %v7599_v15 = vmax.f32 %v15888_v5, 0.0  ;;  %v7600_v34 = vmax.f32 %v15889_v4, 0.0  ;;  %v15890_v54 = vld [vmem:[#allocation58_spill] sm:$0xff]  ;;  %v7602_v49 = vmax.f32 %v14673_v1, 0.0 }
 0x8fe   :  { %7648 = vst [vmem:[#allocation9 + $0xb0] sm:$0xff] %v7584_v3  ;;  %7649 = vst [vmem:[#allocation9 + $0xb8] sm:$0xff] %v7585_v48  ;;  %v7601_v56 = vmax.f32 %v15890_v54, 0.0  ;;  %v15891_v24 = vld [vmem:[#allocation22_spill] sm:$0xff]  ;;  %v15893_v9 = vld [vmem:[#allocation60_spill] sm:$0xff]  ;;  %v7606_v37 = vmax.f32 %v14685_v41, 0.0 }
 0x8ff   :  { %7650 = vst [vmem:[#allocation9 + $0xc0] sm:$0xff] %v7586_v59  ;;  %7651 = vst [vmem:[#allocation9 + $0xc8] sm:$0xff] %v7587_v13  ;;  %v7603_v32 = vmax.f32 %v15891_v24, 0.0  ;;  %v15892_v28 = vld [vmem:[#allocation14_spill] sm:$0xff]  ;;  %v7605_v10 = vmax.f32 %v15893_v9, 0.0  ;;  %v7607_v50 = vmax.f32 %v14688_v40, 0.0 }
 0x900   :  { %7652 = vst [vmem:[#allocation9 + $0xd0] sm:$0xff] %v7588_v61  ;;  %7653 = vst [vmem:[#allocation9 + $0xd8] sm:$0xff] %v7589_v0  ;;  %v7604_v22 = vmax.f32 %v15892_v28, 0.0  ;;  %v15894_v55 = vld [vmem:[#allocation64_spill] sm:$0xff]  ;;  %v15895_v6 = vld [vmem:[#allocation27_spill] sm:$0xff]  ;;  %v7610_v7 = vmax.f32 %v14697_v47, 0.0 }
 0x901   :  { %7654 = vst [vmem:[#allocation9 + $0xe0] sm:$0xff] %v7590_v46  ;;  %7655 = vst [vmem:[#allocation9 + $0xe8] sm:$0xff] %v7591_v45  ;;  %v7608_v1 = vmax.f32 %v15894_v55, 0.0  ;;  %v7609_v38 = vmax.f32 %v15895_v6, 0.0  ;;  %v7611_v21 = vmax.f32 %v14700_v33, 0.0  ;;  %v7612_v41 = vmax.f32 %v14703_v23, 0.0 }
 0x902   :  { %7656 = vst [vmem:[#allocation9 + $0xf0] sm:$0xff] %v7592_v57  ;;  %7657 = vst [vmem:[#allocation9 + $0xf8] sm:$0xff] %v7593_v60  ;;  %v7613_v2 = vmax.f32 %v14706_v25, 0.0  ;;  %v7614_v62 = vmax.f32 %v14709_v44, 0.0  ;;  %v7615_v40 = vmax.f32 %v14712_v19, 0.0  ;;  %v7616_v47 = vmax.f32 %v14715_v27, 0.0 }
 0x903   :  { %7658 = vst [vmem:[#allocation9 + $0x100] sm:$0xff] %v7594_v39  ;;  %7659 = vst [vmem:[#allocation9 + $0x108] sm:$0xff] %v7595_v20  ;;  %v7617_v52 = vmax.f32 %v14718_v12, 0.0  ;;  %v7618_v33 = vmax.f32 %v14721_v35, 0.0  ;;  %v7619_v23 = vmax.f32 %v14724_v42, 0.0  ;;  %v7620_v25 = vmax.f32 %v14727_v51, 0.0 }
 0x904   :  { %7660 = vst [vmem:[#allocation9 + $0x110] sm:$0xff] %v7596_v63  ;;  %7661 = vst [vmem:[#allocation9 + $0x118] sm:$0xff] %v7597_v58  ;;  %v7621_v44 = vmax.f32 %v14730_v43, 0.0  ;;  %v7622_v16 = vmax.f32 %v14733_v31, 0.0  ;;  %v7623_v27 = vmax.f32 %v14736_v26, 0.0  ;;  %v7624_v19 = vmax.f32 %v14739_v17, 0.0 }
 0x905   :  { %7662 = vst [vmem:[#allocation9 + $0x120] sm:$0xff] %v7598_v53  ;;  %7663 = vst [vmem:[#allocation9 + $0x128] sm:$0xff] %v7599_v15 }
 0x906   :  { %7664 = vst [vmem:[#allocation9 + $0x130] sm:$0xff] %v7600_v34  ;;  %7665 = vst [vmem:[#allocation9 + $0x138] sm:$0xff] %v7601_v56 }
 0x907   :  { %7666 = vst [vmem:[#allocation9 + $0x140] sm:$0xff] %v7602_v49  ;;  %7667 = vst [vmem:[#allocation9 + $0x148] sm:$0xff] %v7603_v32 }
 0x908   :  { %7668 = vst [vmem:[#allocation9 + $0x150] sm:$0xff] %v7604_v22  ;;  %7669 = vst [vmem:[#allocation9 + $0x158] sm:$0xff] %v7605_v10 }
 0x909   :  { %7670 = vst [vmem:[#allocation9 + $0x160] sm:$0xff] %v7606_v37  ;;  %7671 = vst [vmem:[#allocation9 + $0x168] sm:$0xff] %v7607_v50 }
 0x90a   :  { %7672 = vst [vmem:[#allocation9 + $0x170] sm:$0xff] %v7608_v1  ;;  %7673 = vst [vmem:[#allocation9 + $0x178] sm:$0xff] %v7609_v38 }
 0x90b   :  { %7674 = vst [vmem:[#allocation9 + $0x180] sm:$0xff] %v7610_v7  ;;  %7675 = vst [vmem:[#allocation9 + $0x188] sm:$0xff] %v7611_v21 }
 0x90c   :  { %7676 = vst [vmem:[#allocation9 + $0x190] sm:$0xff] %v7612_v41  ;;  %7677 = vst [vmem:[#allocation9 + $0x198] sm:$0xff] %v7613_v2 }
 0x90d   :  { %7678 = vst [vmem:[#allocation9 + $0x1a0] sm:$0xff] %v7614_v62  ;;  %7679 = vst [vmem:[#allocation9 + $0x1a8] sm:$0xff] %v7615_v40 }
 0x90e   :  { %7680 = vst [vmem:[#allocation9 + $0x1b0] sm:$0xff] %v7616_v47  ;;  %7681 = vst [vmem:[#allocation9 + $0x1b8] sm:$0xff] %v7617_v52 }
 0x90f   :  { %7682 = vst [vmem:[#allocation9 + $0x1c0] sm:$0xff] %v7618_v33  ;;  %7683 = vst [vmem:[#allocation9 + $0x1c8] sm:$0xff] %v7619_v23 }
 0x910   :  { %7684 = vst [vmem:[#allocation9 + $0x1d0] sm:$0xff] %v7620_v25  ;;  %7685 = vst [vmem:[#allocation9 + $0x1d8] sm:$0xff] %v7621_v44 }
 0x911   :  { %7686 = vst [vmem:[#allocation9 + $0x1e0] sm:$0xff] %v7622_v16  ;;  %7687 = vst [vmem:[#allocation9 + $0x1e8] sm:$0xff] %v7623_v27 }
 0x912   :  { %7688 = vst [vmem:[#allocation9 + $0x1f0] sm:$0xff] %v7624_v19 }
 0x913   :  { %9547 = shalt.err (!%p9544_p0)
}
 0x914   :  { %s9548_s24 = scalar_lea.hbm %s14826_s7, 8192 }
 0x915   :  { %p9549_p1 = scmp.ne.s32.totalorder %s14826_s7, %s9548_s24  ;;  %p9552_p2 = scmp.lt.u32.totalorder %s9548_s24, %s14826_s7 }
 0x917   :  { %p9554_p3 = pnand %p9552_p2, %p9549_p1 }
 0x919   :  { %9557 = shalt.err (!%p9554_p3)
}
 0x91a   :  { %7701 = dma.vmem_to_hbm [thread:$0]  %s7696_s6, 8192, %s14826_s7, [#allocation5], %s9566_s13, %s9566_s13, %s9567_s14  }
 0x91b   :  { %9562 = dma.done.wait [#allocation5], 8192  }
 0x91c   :  { %9563 = vsyncadd [#allocation5], 4294959104 }
 0x91d   :  { %7705 = vsyncpa [#allocation4], 1 }
 0x91e   :  { %7706 = vsyncpa [#allocation7], 1 }
 0x91f   :  { %7707 = vsyncpa [#allocation5], 1 }

</bundles_post_ra>
